<compile_context>
chip_gen: v7x
topology: tpu7x:2x2x1
jax: 0.10.0
libtpu: 0.0.40
codegen_flags: <defaults>
</compile_context>

<pallas_src>
import jax
import jax.numpy as jnp
from jax.experimental import pallas as pl
from jax.experimental.pallas import tpu as pltpu


# ----------------------------- small helpers --------------------------------

def _round_up(x, m):
    return (x + m - 1) // m * m


def _cdiv(a, b):
    return (a + b - 1) // b


def _tpu_vmem_bytes():
    """Per-core VMEM capacity (v5e/v6e: 128 MiB, v7x: 64 MiB)."""
    try:
        return int(pltpu.get_tpu_info().vmem_capacity_bytes)
    except Exception:
        pass
    try:
        kind = jax.devices()[0].device_kind.lower()
    except Exception:
        kind = ""
    return 64 * 1024 * 1024 if "v7" in kind else 128 * 1024 * 1024


def _has_bf16_vpu():
    """True on chips whose VPU has native bf16 (v6e/v7x); False on v5e/older."""
    try:
        kind = jax.devices()[0].device_kind.lower()
    except Exception:
        return True
    return not any(t in kind for t in ("v2", "v3", "v4", "v5 lite", "v5e", "v5lite"))


# --------------------------------- kernel -----------------------------------

def _pos2weight_kernel(x_ref, w1_ref, b1_ref, w2_ref, b2_ref, o_ref):
    # x_ref:  (TN, 3)      layer-1 dtype (bf16 on v6e/v7x, f32 on v5e)
    # w1_ref: (3, 256)     layer-1 dtype     b1_ref: (1, 256)  layer-1 dtype
    # w2_ref: (256, TD)    bf16              b2_ref: (1, TD)   f32
    # o_ref:  (TN, TD)     out dtype (default bf16)
    x = x_ref[...]
    w1 = w1_ref[...]

    # Layer 1: Linear(3, 256) as three VPU broadcast multiply-adds (K=3 would be
    # a degenerate MXU pass), then ReLU.  Runs in bf16 where the VPU has bf16
    # (v6e/v7x), which also makes the pre-MXU cast below a no-op.
    h = b1_ref[...] + x[:, 0:1] * w1[0:1, :]
    h = h + x[:, 1:2] * w1[1:2, :]
    h = h + x[:, 2:3] * w1[2:3, :]
    h = jnp.maximum(h, 0.0)
    h = h.astype(jnp.bfloat16)          # no-op when layer-1 already ran in bf16

    # Layer 2: Linear(256, dout) on the MXU, bf16 inputs / f32 accumulation.
    o = jnp.dot(h, w2_ref[...], preferred_element_type=jnp.float32)
    o = o + b2_ref[...]

    o_ref[...] = o.astype(o_ref.dtype)


# ------------------------------ param prep ----------------------------------

def prepare_pos2weight_params(w1, b1, w2, b2, *, l1_bf16=None,
                              out_dtype=jnp.bfloat16, pad_output=False):
    """One-time weight preparation (hoist out of the forward/hot path).

    Weights stored as (in_features, out_features).
      l1_bf16:    run layer-1 in bf16 (default: auto -- True on chips with a
                  bf16 VPU (v6e/v7x), False on v5e and older).
      out_dtype:  kernel output dtype. bf16 (default) halves the HBM writeback
                  that dominates this op; use jnp.float32 to match PyTorch.
      pad_output: if True and dout % 128 != 0, pad w2/b2 so the kernel writes a
                  lane-dense (N, round_up(dout,128)) buffer (caller slices /
                  reshapes inside its own downstream fusion).  If False, the
                  kernel writes exactly dout columns (masked stores) so no
                  post-call slice pass is needed.
    """
    hidden = w1.shape[1]
    dout = w2.shape[1]
    assert w1.shape[0] == 3 and w2.shape[0] == hidden

    if l1_bf16 is None:
        l1_bf16 = _has_bf16_vpu()
    l1_dtype = jnp.bfloat16 if l1_bf16 else jnp.float32

    dcols = dout
    if pad_output and dout % 128 != 0:
        dcols = _round_up(dout, 128)
        w2 = jnp.pad(w2, ((0, 0), (0, dcols - dout)))
        b2 = jnp.pad(b2, ((0, dcols - dout),))

    return dict(
        w1=jnp.asarray(w1, l1_dtype),
        b1=jnp.asarray(b1, l1_dtype).reshape(1, hidden),
        w2=jnp.asarray(w2, jnp.bfloat16),              # MXU-native, f32 acc
        b2=jnp.asarray(b2, jnp.float32).reshape(1, dcols),
        x_dtype=l1_dtype,
        out_dtype=jnp.dtype(out_dtype),
        hidden=hidden,
        dout=dout,
        dcols=dcols,
    )


# -------------------------------- forward -----------------------------------

def pos2weight_forward(x, params, *, tile_n=8192):
    """x: (N, 3) -> (N, dout), or (N, round_up(dout,128)) if prepared with
    pad_output=True (caller slices/reshapes inside its own fusion)."""
    N, din = x.shape
    assert din == 3
    w1, b1, w2, b2 = params["w1"], params["b1"], params["w2"], params["b2"]
    hidden = params["hidden"]
    dcols = params["dcols"]
    out_dtype = params["out_dtype"]

    x = x.astype(params["x_dtype"])

    # Output-column tiling: for huge dout keep the resident w2 block modest via
    # a 2-D grid (2048 lanes = 8 full 256-wide MXU passes) instead of shrinking
    # tile_n.
    if dcols % 128 == 0 and dcols > 4096:
        tile_d = 2048
    else:
        tile_d = dcols

    # ---- Generation-aware VMEM budget and row-tile sizing. ----
    vmem_cap = _tpu_vmem_bytes()
    usable = max(24 * 1024 * 1024,
                 min(int(0.78 * vmem_cap), vmem_cap - 16 * 1024 * 1024))
    x_bytes = jnp.dtype(params["x_dtype"]).itemsize
    out_bytes = jnp.dtype(out_dtype).itemsize
    lane_d = _round_up(tile_d, 128)                    # VMEM lane padding
    # Per-row VMEM: double-buffered x tile (lane-padded to 128) + double-
    # buffered output tile + hidden activation (+ its bf16 copy when layer-1 is
    # f32) + the f32 matmul result prior to the output cast/store.
    h_row = hidden * (2 if x_bytes == 2 else 6)
    per_row = 2 * 128 * x_bytes + 2 * lane_d * out_bytes + h_row + lane_d * 4
    # Grid-invariant / per-column-tile operands (double-buffered by Pallas).
    weight_bytes = 2 * (8 * hidden * x_bytes + hidden * x_bytes
                        + hidden * lane_d * 2 + lane_d * 4)
    budget = max(2 * 1024 * 1024, usable - weight_bytes - 2 * 1024 * 1024)
    cap = max(8, (budget // per_row) // 8 * 8)

    tile_n = int(min(tile_n, cap, _round_up(N, 8)))
    # Keep >= ~8 row steps on large N so the "parallel" axis actually shards
    # across v7x's two TensorCores and the pipeline has steps to overlap, while
    # each step stays >= 2048 rows to amortize the ~0.35us fixed step cost.
    min_rows = 2048
    if N >= 2 * min_rows:
        tile_n = min(tile_n, max(min_rows, _round_up(_cdiv(N, 8), 8)))
    tile_n = max(8, _round_up(tile_n, 8))

    grid = (_cdiv(N, tile_n), _cdiv(dcols, tile_d))

    return pl.pallas_call(
        _pos2weight_kernel,
        out_shape=jax.ShapeDtypeStruct((N, dcols), out_dtype),
        grid_spec=pltpu.PrefetchScalarGridSpec(
            num_scalar_prefetch=0,
            grid=grid,
            in_specs=[
                pl.BlockSpec((tile_n, din), lambda i, j: (i, 0)),      # x rows
                pl.BlockSpec((din, hidden), lambda i, j: (0, 0)),      # W1
                pl.BlockSpec((1, hidden), lambda i, j: (0, 0)),        # b1
                pl.BlockSpec((hidden, tile_d), lambda i, j: (0, j)),   # W2 cols
                pl.BlockSpec((1, tile_d), lambda i, j: (0, j)),        # b2 cols
            ],
            out_specs=pl.BlockSpec((tile_n, tile_d), lambda i, j: (i, j)),
        ),
        compiler_params=pltpu.CompilerParams(
            dimension_semantics=("parallel", "parallel"),
            vmem_limit_bytes=int(usable),
        ),
    )(x, w1, b1, w2, b2)


# ------------------------------ param init ----------------------------------

def init_pos2weight_params(key, inC, kernel_size=3, outC=3):
    """PyTorch nn.Linear default init (U[-1/sqrt(fan_in), 1/sqrt(fan_in)]).
    Weights stored as (in_features, out_features)."""
    hidden = 256
    dout = kernel_size * kernel_size * inC * outC
    k1, k2, k3, k4 = jax.random.split(key, 4)
    bound1 = 1.0 / (3.0 ** 0.5)
    bound2 = 1.0 / (hidden ** 0.5)
    w1 = jax.random.uniform(k1, (3, hidden), jnp.float32, -bound1, bound1)
    b1 = jax.random.uniform(k2, (hidden,), jnp.float32, -bound1, bound1)
    w2 = jax.random.uniform(k3, (hidden, dout), jnp.float32, -bound2, bound2)
    b2 = jax.random.uniform(k4, (dout,), jnp.float32, -bound2, bound2)
    return w1, b1, w2, b2


# --------------------------------- test -------------------------------------

if __name__ == "__main__":
    # Module config: inC=4, kernel_size=3, outC=3  ->  out_dim = 3*3*4*3 = 108
    inC, kernel_size, outC = 4, 3, 3
    dout = kernel_size * kernel_size * inC * outC

    key = jax.random.PRNGKey(0)
    kx, kp = jax.random.split(key)
    w1, b1, w2, b2 = init_pos2weight_params(kp, inC, kernel_size, outC)

    N = 1000
    x = jax.random.normal(kx, (N, 3), dtype=jnp.float32)
    ref = jnp.maximum(x @ w1 + b1, 0.0) @ w2 + b2          # f32 reference
    scale = float(jnp.max(jnp.abs(ref)))

    # Path A (default/fast): bf16 output, bf16 layer-1 on v6e/v7x (f32 on v5e),
    # unpadded 108-column output written directly (no post-call slice pass).
    pA = prepare_pos2weight_params(w1, b1, w2, b2)
    outA = jax.block_until_ready(pos2weight_forward(x, pA))
    assert outA.shape == (N, dout)
    errA = float(jnp.max(jnp.abs(outA.astype(jnp.float32) - ref)))
    assert errA < 5e-2 * scale, errA

    # Path B: f32 output, f32 layer-1, lane-dense padded output (consumer
    # slices inside its own fusion), small tile to force a multi-step ragged
    # grid (1000 = 3*256 + 232).
    pB = prepare_pos2weight_params(w1, b1, w2, b2, l1_bf16=False,
                                   out_dtype=jnp.float32, pad_output=True)
    outB = jax.block_until_ready(pos2weight_forward(x, pB, tile_n=256))
    assert outB.shape == (N, _round_up(dout, 128))
    errB = float(jnp.max(jnp.abs(outB[:, :dout] - ref)))
    assert errB < 3e-2 * scale, errB

    print("KERNEL_OK")
</pallas_src>

<mosaic_0001>
module attributes {stable_mosaic.version = 11 : i64} {
  func.func @_pos2weight_kernel(%arg0: i32, %arg1: i32, %arg2: memref<1000x3xbf16, #tpu.memory_space<vmem>>, %arg3: memref<3x256xbf16, #tpu.memory_space<vmem>>, %arg4: memref<1x256xbf16, #tpu.memory_space<vmem>>, %arg5: memref<256x108xbf16, #tpu.memory_space<vmem>>, %arg6: memref<1x108xf32, #tpu.memory_space<vmem>>, %arg7: memref<1000x108xbf16, #tpu.memory_space<vmem>>) attributes {dimension_semantics = [#tpu.dimension_semantics<parallel>, #tpu.dimension_semantics<parallel>], iteration_bounds = array<i64: 1, 1>, scalar_prefetch = 0 : i64, scratch_operands = 0 : i64, tpu.core_type = #tpu.core_type<tc>, window_params = [{transform_indices = @transform_0, window_bounds = array<i64: 1000, 3>}, {pipeline_mode = #tpu.pipeline_mode<synchronous>, transform_indices = @transform_1, window_bounds = array<i64: 3, 256>}, {pipeline_mode = #tpu.pipeline_mode<synchronous>, transform_indices = @transform_2, window_bounds = array<i64: 1, 256>}, {transform_indices = @transform_3, window_bounds = array<i64: 256, 108>}, {transform_indices = @transform_4, window_bounds = array<i64: 1, 108>}, {transform_indices = @transform_5, window_bounds = array<i64: 1000, 108>}]} {
    %c0 = arith.constant 0 : index
    %c0_0 = arith.constant 0 : index
    %0 = vector.load %arg2[%c0, %c0_0] : memref<1000x3xbf16, #tpu.memory_space<vmem>>, vector<1000x3xbf16>
    %c0_1 = arith.constant 0 : index
    %c0_2 = arith.constant 0 : index
    %1 = vector.load %arg3[%c0_1, %c0_2] : memref<3x256xbf16, #tpu.memory_space<vmem>>, vector<3x256xbf16>
    %c0_3 = arith.constant 0 : index
    %c0_4 = arith.constant 0 : index
    %2 = vector.load %arg4[%c0_3, %c0_4] : memref<1x256xbf16, #tpu.memory_space<vmem>>, vector<1x256xbf16>
    %3 = vector.extract_strided_slice %0 {offsets = [0, 0], sizes = [1000, 1], strides = [1, 1]} : vector<1000x3xbf16> to vector<1000x1xbf16>
    %4 = vector.extract_strided_slice %1 {offsets = [0, 0], sizes = [1, 256], strides = [1, 1]} : vector<3x256xbf16> to vector<1x256xbf16>
    %5 = vector.broadcast %3 : vector<1000x1xbf16> to vector<1000x256xbf16>
    %6 = vector.broadcast %4 : vector<1x256xbf16> to vector<1000x256xbf16>
    %7 = arith.mulf %5, %6 : vector<1000x256xbf16>
    %8 = vector.broadcast %2 : vector<1x256xbf16> to vector<1000x256xbf16>
    %9 = arith.addf %8, %7 : vector<1000x256xbf16>
    %10 = vector.extract_strided_slice %0 {offsets = [0, 1], sizes = [1000, 1], strides = [1, 1]} : vector<1000x3xbf16> to vector<1000x1xbf16>
    %11 = vector.extract_strided_slice %1 {offsets = [1, 0], sizes = [1, 256], strides = [1, 1]} : vector<3x256xbf16> to vector<1x256xbf16>
    %12 = vector.broadcast %10 : vector<1000x1xbf16> to vector<1000x256xbf16>
    %13 = vector.broadcast %11 : vector<1x256xbf16> to vector<1000x256xbf16>
    %14 = arith.mulf %12, %13 : vector<1000x256xbf16>
    %15 = arith.addf %9, %14 : vector<1000x256xbf16>
    %16 = vector.extract_strided_slice %0 {offsets = [0, 2], sizes = [1000, 1], strides = [1, 1]} : vector<1000x3xbf16> to vector<1000x1xbf16>
    %17 = vector.extract_strided_slice %1 {offsets = [2, 0], sizes = [1, 256], strides = [1, 1]} : vector<3x256xbf16> to vector<1x256xbf16>
    %18 = vector.broadcast %16 : vector<1000x1xbf16> to vector<1000x256xbf16>
    %19 = vector.broadcast %17 : vector<1x256xbf16> to vector<1000x256xbf16>
    %20 = arith.mulf %18, %19 : vector<1000x256xbf16>
    %21 = arith.addf %15, %20 : vector<1000x256xbf16>
    %cst = arith.constant 0.000000e+00 : bf16
    %22 = vector.broadcast %cst : bf16 to vector<1000x256xbf16>
    %23 = arith.maximumf %21, %22 : vector<1000x256xbf16>
    %c0_5 = arith.constant 0 : index
    %c0_6 = arith.constant 0 : index
    %24 = vector.load %arg5[%c0_5, %c0_6] : memref<256x108xbf16, #tpu.memory_space<vmem>>, vector<256x108xbf16>
    %cst_7 = arith.constant dense<0.000000e+00> : vector<1000x108xf32>
    %25 = tpu.matmul %23, %24, %cst_7 {dimension_numbers = #tpu.dot_dimension_numbers<[1], [0], [0], [1], [0, 0, 1, 1], [], []>} : vector<1000x256xbf16>, vector<256x108xbf16>, vector<1000x108xf32> -> vector<1000x108xf32>
    %c0_8 = arith.constant 0 : index
    %c0_9 = arith.constant 0 : index
    %26 = vector.load %arg6[%c0_8, %c0_9] : memref<1x108xf32, #tpu.memory_space<vmem>>, vector<1x108xf32>
    %27 = vector.broadcast %26 : vector<1x108xf32> to vector<1000x108xf32>
    %28 = arith.addf %25, %27 : vector<1000x108xf32>
    %29 = arith.truncf %28 : vector<1000x108xf32> to vector<1000x108xbf16>
    %c0_10 = arith.constant 0 : index
    %c0_11 = arith.constant 0 : index
    %30 = vector.load %arg7[%c0_10, %c0_11] : memref<1000x108xbf16, #tpu.memory_space<vmem>>, vector<1000x108xbf16>
    tpu.vector_store %arg7[%c0_10, %c0_11], %29 {strides = array<i32>} : memref<1000x108xbf16, #tpu.memory_space<vmem>>, vector<1000x108xbf16>,
    return
  }
  func.func @transform_0(%arg0: i32, %arg1: i32) -> (i32, i32) {
    %c0_i32 = arith.constant 0 : i32
    %c0_i32_0 = arith.constant 0 : i32
    return %arg0, %c0_i32 : i32, i32
  }
  func.func @transform_1(%arg0: i32, %arg1: i32) -> (i32, i32) {
    %c0_i32 = arith.constant 0 : i32
    %c0_i32_0 = arith.constant 0 : i32
    %c0_i32_1 = arith.constant 0 : i32
    return %c0_i32, %c0_i32_0 : i32, i32
  }
  func.func @transform_2(%arg0: i32, %arg1: i32) -> (i32, i32) {
    %c0_i32 = arith.constant 0 : i32
    %c0_i32_0 = arith.constant 0 : i32
    %c0_i32_1 = arith.constant 0 : i32
    return %c0_i32, %c0_i32_0 : i32, i32
  }
  func.func @transform_3(%arg0: i32, %arg1: i32) -> (i32, i32) {
    %c0_i32 = arith.constant 0 : i32
    %c0_i32_0 = arith.constant 0 : i32
    return %c0_i32, %arg1 : i32, i32
  }
  func.func @transform_4(%arg0: i32, %arg1: i32) -> (i32, i32) {
    %c0_i32 = arith.constant 0 : i32
    %c0_i32_0 = arith.constant 0 : i32
    return %c0_i32, %arg1 : i32, i32
  }
  func.func @transform_5(%arg0: i32, %arg1: i32) -> (i32, i32) {
    %c0_i32 = arith.constant 0 : i32
    return %arg0, %arg1 : i32, i32
  }
}

</mosaic_0001>

<bundles_post_ra>
// kernel: tpu_custom_call.1
= control target key start
LH: loop header
LB: loop body
LE: loop exit
PB: predicated region body
PF: predicated region fallthrough
CT: control target
= control target key end

     0   :  { %10 = vsyncpa [#allocation3], 0  ;;  %s13189_s0 = inlined_call_operand.hbm [shape: bf16[1000,3], index: 0, kind: input, shape index: {}]   ;;  %s13190_s1 = inlined_call_operand.hbm [shape: bf16[3,256], index: 1, kind: input, shape index: {}]   ;;  %s13191_s2 = inlined_call_operand.hbm [shape: bf16[1,256], index: 2, kind: input, shape index: {}]   ;;  %s13192_s3 = inlined_call_operand.hbm [shape: bf16[256,108], index: 3, kind: input, shape index: {}]   ;;  %s13193_s4 = inlined_call_operand.hbm [shape: f32[1,108], index: 4, kind: input, shape index: {}]   ;;  %s13194_s5 = inlined_call_operand.hbm [shape: bf16[1000,108], index: 5, kind: output, shape index: {}]  }
   0x1   :  { %11 = vsyncpa [#allocation6], 0 }
   0x2   :  { %12 = vsyncpa [#allocation9], 0 }
   0x3   :  { %13 = vsyncpa [#allocation4], 0  ;;  %s9633_s18 = smov [#allocation5]   ;;  %s9493_s22 = scalar_lea.hbm %s13190_s1, 64 }
   0x4   :  { %s32_s19 = sshll.u32 %s9633_s18, 4  ;;  %p9494_p0 = scmp.ne.s32.totalorder %s13190_s1, %s9493_s22  ;;  %s33_s19 = int_to_ptr.vmem [resolvable:$true] %s32_s19 }
   0x5   :  { %p9497_p1 = scmp.lt.u32.totalorder %s9493_s22, %s13190_s1 }
   0x7   :  { %p9499_p2 = pnand %p9497_p1, %p9494_p0 }
   0x9   :  { %9502 = shalt.err (!%p9499_p2)
}
   0xa   :  { %s9503_s27 = scalar_lea.vmem %s33_s19, 64  ;;  %p9508_p4 = scmp.lt.s32.totalorder %s33_s19, %s33_s19 }
   0xb   :  { %p9504_p3 = scmp.ne.s32.totalorder %s33_s19, %s9503_s27  ;;  %p9509_p5 = scmp.lt.s32.totalorder %s9503_s27, %s9503_s27 }
   0xd   :  { %p9510_p6 = por %p9509_p5, %p9508_p4 }
   0xf   :  { %p9511_p7 = pnand %p9510_p6, %p9504_p3 }
  0x11   :  { %9514 = shalt.err (!%p9511_p7)
}
  0x12   :  { %35 = dma.hbm_to_vmem [thread:$0]  %s13190_s1, 64, %s33_s19, [#allocation6]  }
  0x13   :  { %s9634_s30 = smov [#allocation8]   ;;  %s9635_s7 = smov [#allocation2]  }
  0x14   :  { %s51_s6 = sshll.u32 %s9634_s30, 4  ;;  %s19_s8 = sshll.u32 %s9635_s7, 4  ;;  %s52_s6 = int_to_ptr.vmem [resolvable:$true] %s51_s6  ;;  %s20_s8 = int_to_ptr.vmem [resolvable:$true] %s19_s8 }
  0x15   :  { %s9515_s11 = scalar_lea.hbm %s13192_s3, 2048 }
  0x16   :  { %p9516_p8 = scmp.ne.s32.totalorder %s13192_s3, %s9515_s11  ;;  %p9519_p9 = scmp.lt.u32.totalorder %s9515_s11, %s13192_s3 }
  0x18   :  { %p9521_p10 = pnand %p9519_p9, %p9516_p8 }
  0x1a   :  { %9524 = shalt.err (!%p9521_p10)
}
  0x1b   :  { %s9525_s1 = scalar_lea.vmem %s52_s6, 2048  ;;  %p9530_p12 = scmp.lt.s32.totalorder %s52_s6, %s52_s6 }
  0x1c   :  { %p9526_p11 = scmp.ne.s32.totalorder %s52_s6, %s9525_s1  ;;  %p9531_p13 = scmp.lt.s32.totalorder %s9525_s1, %s9525_s1 }
  0x1e   :  { %p9532_p0 = por %p9531_p13, %p9530_p12 }
  0x20   :  { %p9533_p1 = pnand %p9532_p0, %p9526_p11 }
  0x22   :  { %9536 = shalt.err (!%p9533_p1)
}
  0x23   :  { %s9636_s16 = smov 64   ;;  %s9637_s17 = smov 4  }
  0x24   :  { %57 = dma.hbm_to_vmem [thread:$0]  %s13192_s3, 2048, %s52_s6, [#allocation9], %s9636_s16, %s9636_s16, %s9637_s17  }
  0x25   :  { %s9537_s22 = scalar_lea.hbm %s13189_s0, 8000 }
  0x26   :  { %p9538_p2 = scmp.ne.s32.totalorder %s13189_s0, %s9537_s22  ;;  %p9541_p3 = scmp.lt.u32.totalorder %s9537_s22, %s13189_s0 }
  0x28   :  { %p9543_p4 = pnand %p9541_p3, %p9538_p2 }
  0x2a   :  { %9546 = shalt.err (!%p9543_p4)
}
  0x2b   :  { %s9547_s27 = scalar_lea.vmem %s20_s8, 8000  ;;  %p9552_p6 = scmp.lt.s32.totalorder %s20_s8, %s20_s8 }
  0x2c   :  { %p9548_p5 = scmp.ne.s32.totalorder %s20_s8, %s9547_s27  ;;  %p9553_p7 = scmp.lt.s32.totalorder %s9547_s27, %s9547_s27 }
  0x2e   :  { %p9554_p8 = por %p9553_p7, %p9552_p6 }
  0x30   :  { %p9555_p9 = pnand %p9554_p8, %p9548_p5 }
  0x32   :  { %9558 = shalt.err (!%p9555_p9)
}
  0x33   :  { %25 = dma.hbm_to_vmem [thread:$0]  %s13189_s0, 8000, %s20_s8, [#allocation3], %s9636_s16, %s9636_s16, %s9637_s17  }
  0x34   :  { %s9638_s29 = smov [#allocation7]   ;;  %s9639_s6 = smov [#allocation10]  }
  0x35   :  { %s42_s30 = sshll.u32 %s9638_s29, 4  ;;  %s64_s7 = sshll.u32 %s9639_s6, 4  ;;  %s43_s30 = int_to_ptr.vmem [resolvable:$true] %s42_s30  ;;  %s65_s7 = int_to_ptr.vmem [resolvable:$true] %s64_s7 }
  0x36   :  { %s9559_s11 = scalar_lea.hbm %s13191_s2, 32 }
  0x37   :  { %p9560_p10 = scmp.ne.s32.totalorder %s13191_s2, %s9559_s11  ;;  %p9563_p11 = scmp.lt.u32.totalorder %s9559_s11, %s13191_s2 }
  0x39   :  { %p9565_p12 = pnand %p9563_p11, %p9560_p10 }
  0x3b   :  { %9568 = shalt.err (!%p9565_p12)
}
  0x3c   :  { %s9569_s0 = scalar_lea.vmem %s43_s30, 32  ;;  %p9574_p0 = scmp.lt.s32.totalorder %s43_s30, %s43_s30 }
  0x3d   :  { %p9570_p13 = scmp.ne.s32.totalorder %s43_s30, %s9569_s0  ;;  %p9575_p1 = scmp.lt.s32.totalorder %s9569_s0, %s9569_s0 }
  0x3f   :  { %p9576_p2 = por %p9575_p1, %p9574_p0 }
  0x41   :  { %p9577_p3 = pnand %p9576_p2, %p9570_p13 }
  0x43   :  { %9580 = shalt.err (!%p9577_p3)
}
  0x44   :  { %45 = dma.hbm_to_vmem [thread:$0]  %s13191_s2, 32, %s43_s30, [#allocation6]  }
  0x45   :  { %s9581_s20 = scalar_lea.hbm %s13193_s4, 16 }
  0x46   :  { %p9582_p4 = scmp.ne.s32.totalorder %s13193_s4, %s9581_s20  ;;  %p9585_p5 = scmp.lt.u32.totalorder %s9581_s20, %s13193_s4 }
  0x48   :  { %p9587_p6 = pnand %p9585_p5, %p9582_p4 }
  0x4a   :  { %9590 = shalt.err (!%p9587_p6)
}
  0x4b   :  { %s9591_s25 = scalar_lea.vmem %s65_s7, 16  ;;  %s9595_s26 = scalar_lea.vmem %s65_s7, 32 }
  0x4c   :  { %p9592_p7 = scmp.ne.s32.totalorder %s65_s7, %s9591_s25  ;;  %p9596_p8 = scmp.lt.s32.totalorder %s65_s7, %s65_s7 }
  0x4d   :  { %p9597_p9 = scmp.lt.s32.totalorder %s9595_s26, %s9591_s25 }
  0x4f   :  { %p9598_p10 = por %p9597_p9, %p9596_p8 }
  0x51   :  { %p9599_p11 = pnand %p9598_p10, %p9592_p7 }
  0x53   :  { %9602 = shalt.err (!%p9599_p11)
}
  0x54   :  { %67 = dma.hbm_to_vmem [thread:$0]  %s13193_s4, 16, %s65_s7, [#allocation9]  }
  0x55   :  { %9625 = dma.done.wait [#allocation3], 8000  }
  0x56   :  { %9626 = vsyncadd [#allocation3], 4294959296 }
  0x57   :  { %9627 = dma.done.wait [#allocation6], 96  }
  0x58   :  { %9628 = vsyncadd [#allocation6], 4294967200 }
  0x59   :  { %9629 = dma.done.wait [#allocation9], 2064  }
  0x5a   :  { %9630 = vsyncadd [#allocation9], 4294965232  ;;  %v13195_v0 = vmov 0   ;;  %v9746_v1 = vld [vmem:[#allocation2 + $0x8] sm:$0xf]  ;;  %vm8493_vm0 = vcmask 879616  }
  0x5b   :  { %9334 = vset.pattern.permute.xlu1 %v13195_v0  ;;  %9333 = vset.pattern.permute.xlu0 %v13195_v0  ;;  %v9748_v2 = vld [vmem:[#allocation2] sm:$0xf]  ;;  %v9752_v3 = vld [vmem:[#allocation2 + $0xc] sm:$0xf]  ;;  %v9754_v4 = vld [vmem:[#allocation2 + $0x4] sm:$0xf] }
  0x5c   :  { %7456 = vmatprep.subr.bf16.mxu0 %v13195_v0  ;;  %9288 = vmatprep.subr.bf16.mxu1 %v13195_v0  ;;  %v9758_v5 = vld [vmem:[#allocation2 + $0x14] sm:$0xf]  ;;  %v9760_v6 = vld [vmem:[#allocation2 + $0x10] sm:$0xf]  ;;  %v9764_v7 = vld [vmem:[#allocation2 + $0x1c] sm:$0xf] }
  0x5d   :  { %237 = vperm.xlu1 %9334, %v9746_v1   ;;  %213 = vperm.xlu0 %9333, %v9748_v2   ;;  %v9766_v8 = vld [vmem:[#allocation2 + $0x18] sm:$0xf]  ;;  %v9770_v9 = vld [vmem:[#allocation2 + $0x24] sm:$0xf]  ;;  %v9772_v10 = vld [vmem:[#allocation2 + $0x20] sm:$0xf] }
  0x5e   :  { %v9776_v11 = vld [vmem:[#allocation2 + $0x2c] sm:$0xf]  ;;  %v9778_v12 = vld [vmem:[#allocation2 + $0x28] sm:$0xf]  ;;  %v9782_v13 = vld [vmem:[#allocation2 + $0x34] sm:$0xf] }
  0x5f   :  { %v9784_v14 = vld [vmem:[#allocation2 + $0x30] sm:$0xf]  ;;  %v9788_v15 = vld [vmem:[#allocation2 + $0x3c] sm:$0xf]  ;;  %v9790_v16 = vld [vmem:[#allocation2 + $0x38] sm:$0xf] }
  0x60   :  { %v9794_v17 = vld [vmem:[#allocation2 + $0x44] sm:$0xf]  ;;  %v9796_v18 = vld [vmem:[#allocation2 + $0x40] sm:$0xf]  ;;  %v9800_v19 = vld [vmem:[#allocation2 + $0x4c] sm:$0xf] }
  0x61   :  { %249 = vperm.xlu1 %9334, %v9752_v3   ;;  %225 = vperm.xlu0 %9333, %v9754_v4   ;;  %v9802_v20 = vld [vmem:[#allocation2 + $0x48] sm:$0xf]  ;;  %v9806_v21 = vld [vmem:[#allocation2 + $0x54] sm:$0xf]  ;;  %v9808_v22 = vld [vmem:[#allocation2 + $0x50] sm:$0xf] }
  0x62   :  { %v9812_v23 = vld [vmem:[#allocation2 + $0x5c] sm:$0xf]  ;;  %v9814_v24 = vld [vmem:[#allocation2 + $0x58] sm:$0xf]  ;;  %v9818_v25 = vld [vmem:[#allocation2 + $0x64] sm:$0xf] }
  0x63   :  { %v9820_v26 = vld [vmem:[#allocation2 + $0x60] sm:$0xf]  ;;  %v9824_v27 = vld [vmem:[#allocation2 + $0x6c] sm:$0xf]  ;;  %v9826_v28 = vld [vmem:[#allocation2 + $0x68] sm:$0xf] }
  0x64   :  { %v9830_v29 = vld [vmem:[#allocation2 + $0x74] sm:$0xf]  ;;  %v9832_v30 = vld [vmem:[#allocation2 + $0x70] sm:$0xf]  ;;  %v9836_v31 = vld [vmem:[#allocation2 + $0x7c] sm:$0xf] }
  0x65   :  { %273 = vperm.xlu1 %9334, %v9758_v5   ;;  %261 = vperm.xlu0 %9333, %v9760_v6   ;;  %v9838_v32 = vld [vmem:[#allocation2 + $0x78] sm:$0xf]  ;;  %v9842_v33 = vld [vmem:[#allocation2 + $0x84] sm:$0xf]  ;;  %v9844_v34 = vld [vmem:[#allocation2 + $0x80] sm:$0xf] }
  0x66   :  { %v9848_v35 = vld [vmem:[#allocation2 + $0x8c] sm:$0xf]  ;;  %v9850_v36 = vld [vmem:[#allocation2 + $0x88] sm:$0xf]  ;;  %v9854_v37 = vld [vmem:[#allocation2 + $0x94] sm:$0xf] }
  0x67   :  { %v9856_v38 = vld [vmem:[#allocation2 + $0x90] sm:$0xf]  ;;  %v9860_v39 = vld [vmem:[#allocation2 + $0x9c] sm:$0xf]  ;;  %v9862_v40 = vld [vmem:[#allocation2 + $0x98] sm:$0xf] }
  0x68   :  { %v9866_v41 = vld [vmem:[#allocation2 + $0xa4] sm:$0xf]  ;;  %v9868_v42 = vld [vmem:[#allocation2 + $0xa0] sm:$0xf]  ;;  %v9872_v43 = vld [vmem:[#allocation2 + $0xac] sm:$0xf] }
  0x69   :  { %297 = vperm.xlu1 %9334, %v9764_v7   ;;  %285 = vperm.xlu0 %9333, %v9766_v8   ;;  %v9874_v44 = vld [vmem:[#allocation2 + $0xa8] sm:$0xf]  ;;  %v9878_v45 = vld [vmem:[#allocation2 + $0xb4] sm:$0xf]  ;;  %v9880_v46 = vld [vmem:[#allocation2 + $0xb0] sm:$0xf] }
  0x6a   :  { %v9884_v47 = vld [vmem:[#allocation2 + $0xbc] sm:$0xf]  ;;  %v9886_v48 = vld [vmem:[#allocation2 + $0xb8] sm:$0xf]  ;;  %v9890_v49 = vld [vmem:[#allocation2 + $0xc4] sm:$0xf] }
  0x6b   :  { %v9892_v50 = vld [vmem:[#allocation2 + $0xc0] sm:$0xf]  ;;  %v9896_v51 = vld [vmem:[#allocation2 + $0xcc] sm:$0xf]  ;;  %v9898_v52 = vld [vmem:[#allocation2 + $0xc8] sm:$0xf] }
  0x6c   :  { %v9902_v53 = vld [vmem:[#allocation2 + $0xd4] sm:$0xf]  ;;  %v9904_v54 = vld [vmem:[#allocation2 + $0xd0] sm:$0xf]  ;;  %v9908_v55 = vld [vmem:[#allocation2 + $0xdc] sm:$0xf] }
  0x6d   :  { %321 = vperm.xlu1 %9334, %v9770_v9   ;;  %309 = vperm.xlu0 %9333, %v9772_v10   ;;  %13289 = vst [vmem:[#allocation16_spill] sm:$0xff] %v9902_v53  ;;  %13290 = vst [vmem:[#allocation17_spill] sm:$0xff] %v9904_v54  ;;  %v9910_v56 = vld [vmem:[#allocation2 + $0xd8] sm:$0xf]  ;;  %v9914_v57 = vld [vmem:[#allocation2 + $0xe4] sm:$0xf] }
  0x6e   :  { %13291 = vst [vmem:[#allocation18_spill] sm:$0xff] %v9908_v55  ;;  %13292 = vst [vmem:[#allocation19_spill] sm:$0xff] %v9910_v56  ;;  %v9916_v58 = vld [vmem:[#allocation2 + $0xe0] sm:$0xf]  ;;  %v9920_v59 = vld [vmem:[#allocation2 + $0xec] sm:$0xf] }
  0x6f   :  { %13293 = vst [vmem:[#allocation20_spill] sm:$0xff] %v9914_v57  ;;  %13294 = vst [vmem:[#allocation21_spill] sm:$0xff] %v9916_v58  ;;  %v9922_v60 = vld [vmem:[#allocation2 + $0xe8] sm:$0xf]  ;;  %v9926_v61 = vld [vmem:[#allocation2 + $0xf4] sm:$0xf] }
  0x70   :  { %13295 = vst [vmem:[#allocation22_spill] sm:$0xff] %v9920_v59  ;;  %13296 = vst [vmem:[#allocation23_spill] sm:$0xff] %v9922_v60  ;;  %v9928_v62 = vld [vmem:[#allocation2 + $0xf0] sm:$0xf]  ;;  %v9932_v63 = vld [vmem:[#allocation2 + $0xfc] sm:$0xf] }
  0x71   :  { %345 = vperm.xlu1 %9334, %v9776_v11   ;;  %333 = vperm.xlu0 %9333, %v9778_v12   ;;  %13297 = vst [vmem:[#allocation24_spill] sm:$0xff] %v9926_v61  ;;  %13298 = vst [vmem:[#allocation25_spill] sm:$0xff] %v9928_v62  ;;  %v9934_v0 = vld [vmem:[#allocation2 + $0xf8] sm:$0xf]  ;;  %s9645_s4 = smov [#allocation11]  }
  0x72   :  { %13299 = vst [vmem:[#allocation26_spill] sm:$0xff] %v9932_v63  ;;  %13300 = vst [vmem:[#allocation27_spill] sm:$0xff] %v9934_v0  ;;  %s8624_s3 = sshll.u32 %s9645_s4, 4  ;;  %s8625_s3 = int_to_ptr.vmem [resolvable:$true] %s8624_s3 }
  0x73   :  { %s9603_s28 = scalar_lea.vmem %s8625_s3, 8000  ;;  %p9608_p13 = scmp.lt.s32.totalorder %s8625_s3, %s8625_s3 }
  0x74   :  { %p9604_p12 = scmp.ne.s32.totalorder %s8625_s3, %s9603_s28  ;;  %p9609_p0 = scmp.lt.s32.totalorder %s9603_s28, %s9603_s28 }
  0x75   :  { %369 = vperm.xlu1 %9334, %v9782_v13   ;;  %357 = vperm.xlu0 %9333, %v9784_v14  }
  0x76   :  { %p9610_p1 = por %p9609_p0, %p9608_p13 }
  0x78   :  { %p9611_p2 = pnand %p9610_p1, %p9604_p12 }
  0x79   :  { %393 = vperm.xlu1 %9334, %v9788_v15   ;;  %381 = vperm.xlu0 %9333, %v9790_v16  }
  0x7d   :  { %417 = vperm.xlu1 %9334, %v9794_v17   ;;  %405 = vperm.xlu0 %9333, %v9796_v18  }
  0x81   :  { %441 = vperm.xlu1 %9334, %v9800_v19   ;;  %429 = vperm.xlu0 %9333, %v9802_v20  }
  0x85   :  { %465 = vperm.xlu1 %9334, %v9806_v21   ;;  %453 = vperm.xlu0 %9333, %v9808_v22  }
  0x89   :  { %489 = vperm.xlu1 %9334, %v9812_v23   ;;  %477 = vperm.xlu0 %9333, %v9814_v24  }
  0x8d   :  { %513 = vperm.xlu1 %9334, %v9818_v25   ;;  %501 = vperm.xlu0 %9333, %v9820_v26  }
  0x91   :  { %537 = vperm.xlu1 %9334, %v9824_v27   ;;  %525 = vperm.xlu0 %9333, %v9826_v28  }
  0x95   :  { %561 = vperm.xlu1 %9334, %v9830_v29   ;;  %549 = vperm.xlu0 %9333, %v9832_v30  }
  0x99   :  { %585 = vperm.xlu1 %9334, %v9836_v31   ;;  %573 = vperm.xlu0 %9333, %v9838_v32  }
  0x9d   :  { %609 = vperm.xlu1 %9334, %v9842_v33   ;;  %597 = vperm.xlu0 %9333, %v9844_v34  }
  0xa1   :  { %633 = vperm.xlu1 %9334, %v9848_v35   ;;  %621 = vperm.xlu0 %9333, %v9850_v36  }
  0xa5   :  { %657 = vperm.xlu1 %9334, %v9854_v37   ;;  %645 = vperm.xlu0 %9333, %v9856_v38  }
  0xa9   :  { %681 = vperm.xlu1 %9334, %v9860_v39   ;;  %669 = vperm.xlu0 %9333, %v9862_v40  }
  0xad   :  { %705 = vperm.xlu1 %9334, %v9866_v41   ;;  %693 = vperm.xlu0 %9333, %v9868_v42  }
  0xb1   :  { %729 = vperm.xlu1 %9334, %v9872_v43   ;;  %717 = vperm.xlu0 %9333, %v9874_v44  }
  0xb5   :  { %753 = vperm.xlu1 %9334, %v9878_v45   ;;  %741 = vperm.xlu0 %9333, %v9880_v46  }
  0xb9   :  { %777 = vperm.xlu1 %9334, %v9884_v47   ;;  %765 = vperm.xlu0 %9333, %v9886_v48  }
  0xbd   :  { %801 = vperm.xlu1 %9334, %v9890_v49   ;;  %789 = vperm.xlu0 %9333, %v9892_v50  }
  0xc1   :  { %825 = vperm.xlu1 %9334, %v9896_v51   ;;  %813 = vperm.xlu0 %9333, %v9898_v52  }
  0xc5   :  { %849 = vperm.xlu1 %9334, %v9902_v53   ;;  %837 = vperm.xlu0 %9333, %v9904_v54  }
  0xc9   :  { %873 = vperm.xlu1 %9334, %v9908_v55   ;;  %861 = vperm.xlu0 %9333, %v9910_v56   ;;  %v192_v56 = vld [vmem:[#allocation2 + $0x1b0] sm:$0xf] }
  0xcd   :  { %897 = vperm.xlu1 %9334, %v9914_v57   ;;  %885 = vperm.xlu0 %9333, %v9916_v58   ;;  %v9938_v57 = vld [vmem:[#allocation2 + $0x104] sm:$0xf] }
  0xce   :  { %13301 = vst [vmem:[#allocation28_spill] sm:$0xff] %v9938_v57 }
  0xd1   :  { %921 = vperm.xlu1 %9334, %v9920_v59   ;;  %909 = vperm.xlu0 %9333, %v9922_v60   ;;  %v9940_v59 = vld [vmem:[#allocation2 + $0x100] sm:$0xf] }
  0xd2   :  { %13302 = vst [vmem:[#allocation29_spill] sm:$0xff] %v9940_v59 }
  0xd5   :  { %945 = vperm.xlu1 %9334, %v9926_v61   ;;  %933 = vperm.xlu0 %9333, %v9928_v62   ;;  %v9948_v61 = vld [vmem:[#allocation2 + $0x10c] sm:$0xf]  ;;  %v9950_v62 = vld [vmem:[#allocation2 + $0x108] sm:$0xf] }
  0xd6   :  { %13305 = vst [vmem:[#allocation32_spill] sm:$0xff] %v9948_v61  ;;  %13306 = vst [vmem:[#allocation33_spill] sm:$0xff] %v9950_v62 }
  0xd9   :  { %969 = vperm.xlu1 %9334, %v9932_v63   ;;  %957 = vperm.xlu0 %9333, %v9934_v0   ;;  %v9958_v0 = vld [vmem:[#allocation2 + $0x114] sm:$0xf] }
  0xda   :  { %13309 = vst [vmem:[#allocation36_spill] sm:$0xff] %v9958_v0 }
  0xdc   :  { %v9942_v60 = vpop.permute.xlu1 %237  ;;  %v9944_v58 = vpop.permute.xlu0 %213 }
  0xdd   :  { %13303 = vst [vmem:[#allocation30_spill] sm:$0xff] %v9942_v60  ;;  %13304 = vst [vmem:[#allocation31_spill] sm:$0xff] %v9944_v58  ;;  %993 = vperm.xlu1 %9334, %v9938_v57   ;;  %981 = vperm.xlu0 %9333, %v9940_v59   ;;  %v9960_v60 = vld [vmem:[#allocation2 + $0x110] sm:$0xf]  ;;  %v9968_v59 = vld [vmem:[#allocation2 + $0x11c] sm:$0xf] }
  0xde   :  { %13310 = vst [vmem:[#allocation37_spill] sm:$0xff] %v9960_v60  ;;  %13313 = vst [vmem:[#allocation40_spill] sm:$0xff] %v9968_v59 }
  0xe0   :  { %v9952_v55 = vpop.permute.xlu1 %249  ;;  %v9954_v63 = vpop.permute.xlu0 %225 }
  0xe1   :  { %13307 = vst [vmem:[#allocation34_spill] sm:$0xff] %v9952_v55  ;;  %13308 = vst [vmem:[#allocation35_spill] sm:$0xff] %v9954_v63  ;;  %1017 = vperm.xlu1 %9334, %v9948_v61   ;;  %1005 = vperm.xlu0 %9333, %v9950_v62   ;;  %v9970_v55 = vld [vmem:[#allocation2 + $0x118] sm:$0xf]  ;;  %v9978_v62 = vld [vmem:[#allocation2 + $0x124] sm:$0xf] }
  0xe2   :  { %13314 = vst [vmem:[#allocation41_spill] sm:$0xff] %v9970_v55  ;;  %13317 = vst [vmem:[#allocation44_spill] sm:$0xff] %v9978_v62 }
  0xe4   :  { %v9962_v58 = vpop.permute.xlu1 %273  ;;  %v9964_v57 = vpop.permute.xlu0 %261 }
  0xe5   :  { %13311 = vst [vmem:[#allocation38_spill] sm:$0xff] %v9962_v58  ;;  %13312 = vst [vmem:[#allocation39_spill] sm:$0xff] %v9964_v57  ;;  %1041 = vperm.xlu1 %9334, %v9958_v0   ;;  %1029 = vperm.xlu0 %9333, %v9960_v60   ;;  %v9980_v58 = vld [vmem:[#allocation2 + $0x120] sm:$0xf]  ;;  %v9988_v60 = vld [vmem:[#allocation2 + $0x12c] sm:$0xf] }
  0xe6   :  { %13318 = vst [vmem:[#allocation45_spill] sm:$0xff] %v9980_v58  ;;  %13321 = vst [vmem:[#allocation48_spill] sm:$0xff] %v9988_v60 }
  0xe8   :  { %v9972_v63 = vpop.permute.xlu1 %297  ;;  %v9974_v61 = vpop.permute.xlu0 %285 }
  0xe9   :  { %13315 = vst [vmem:[#allocation42_spill] sm:$0xff] %v9972_v63  ;;  %13316 = vst [vmem:[#allocation43_spill] sm:$0xff] %v9974_v61  ;;  %1065 = vperm.xlu1 %9334, %v9968_v59   ;;  %1053 = vperm.xlu0 %9333, %v9970_v55   ;;  %v9990_v63 = vld [vmem:[#allocation2 + $0x128] sm:$0xf]  ;;  %v9998_v55 = vld [vmem:[#allocation2 + $0x134] sm:$0xf] }
  0xea   :  { %13322 = vst [vmem:[#allocation49_spill] sm:$0xff] %v9990_v63  ;;  %13325 = vst [vmem:[#allocation52_spill] sm:$0xff] %v9998_v55 }
  0xec   :  { %v9982_v57 = vpop.permute.xlu1 %321  ;;  %v9984_v0 = vpop.permute.xlu0 %309 }
  0xed   :  { %13319 = vst [vmem:[#allocation46_spill] sm:$0xff] %v9982_v57  ;;  %13320 = vst [vmem:[#allocation47_spill] sm:$0xff] %v9984_v0  ;;  %1089 = vperm.xlu1 %9334, %v9978_v62   ;;  %1077 = vperm.xlu0 %9333, %v9980_v58   ;;  %v10000_v57 = vld [vmem:[#allocation2 + $0x130] sm:$0xf]  ;;  %v10008_v58 = vld [vmem:[#allocation2 + $0x13c] sm:$0xf] }
  0xee   :  { %13326 = vst [vmem:[#allocation53_spill] sm:$0xff] %v10000_v57  ;;  %13329 = vst [vmem:[#allocation56_spill] sm:$0xff] %v10008_v58 }
  0xf0   :  { %v9992_v61 = vpop.permute.xlu1 %345  ;;  %v9994_v59 = vpop.permute.xlu0 %333 }
  0xf1   :  { %13323 = vst [vmem:[#allocation50_spill] sm:$0xff] %v9992_v61  ;;  %13324 = vst [vmem:[#allocation51_spill] sm:$0xff] %v9994_v59  ;;  %1113 = vperm.xlu1 %9334, %v9988_v60   ;;  %1101 = vperm.xlu0 %9333, %v9990_v63   ;;  %v10010_v61 = vld [vmem:[#allocation2 + $0x138] sm:$0xf]  ;;  %v10018_v63 = vld [vmem:[#allocation2 + $0x144] sm:$0xf] }
  0xf2   :  { %13330 = vst [vmem:[#allocation57_spill] sm:$0xff] %v10010_v61  ;;  %13333 = vst [vmem:[#allocation60_spill] sm:$0xff] %v10018_v63 }
  0xf4   :  { %v10002_v0 = vpop.permute.xlu1 %369  ;;  %v10004_v62 = vpop.permute.xlu0 %357 }
  0xf5   :  { %13327 = vst [vmem:[#allocation54_spill] sm:$0xff] %v10002_v0  ;;  %13328 = vst [vmem:[#allocation55_spill] sm:$0xff] %v10004_v62  ;;  %1137 = vperm.xlu1 %9334, %v9998_v55   ;;  %1125 = vperm.xlu0 %9333, %v10000_v57   ;;  %v10020_v0 = vld [vmem:[#allocation2 + $0x140] sm:$0xf]  ;;  %v10028_v57 = vld [vmem:[#allocation2 + $0x14c] sm:$0xf] }
  0xf6   :  { %13334 = vst [vmem:[#allocation61_spill] sm:$0xff] %v10020_v0  ;;  %13337 = vst [vmem:[#allocation64_spill] sm:$0xff] %v10028_v57 }
  0xf8   :  { %v10012_v59 = vpop.permute.xlu1 %393  ;;  %v10014_v60 = vpop.permute.xlu0 %381 }
  0xf9   :  { %13331 = vst [vmem:[#allocation58_spill] sm:$0xff] %v10012_v59  ;;  %13332 = vst [vmem:[#allocation59_spill] sm:$0xff] %v10014_v60  ;;  %1161 = vperm.xlu1 %9334, %v10008_v58   ;;  %1149 = vperm.xlu0 %9333, %v10010_v61   ;;  %v10030_v59 = vld [vmem:[#allocation2 + $0x148] sm:$0xf]  ;;  %v10038_v61 = vld [vmem:[#allocation2 + $0x154] sm:$0xf] }
  0xfa   :  { %13338 = vst [vmem:[#allocation65_spill] sm:$0xff] %v10030_v59  ;;  %13341 = vst [vmem:[#allocation68_spill] sm:$0xff] %v10038_v61 }
  0xfc   :  { %v10022_v62 = vpop.permute.xlu1 %417  ;;  %v10024_v55 = vpop.permute.xlu0 %405 }
  0xfd   :  { %13335 = vst [vmem:[#allocation62_spill] sm:$0xff] %v10022_v62  ;;  %13336 = vst [vmem:[#allocation63_spill] sm:$0xff] %v10024_v55  ;;  %1185 = vperm.xlu1 %9334, %v10018_v63   ;;  %1173 = vperm.xlu0 %9333, %v10020_v0   ;;  %v10040_v62 = vld [vmem:[#allocation2 + $0x150] sm:$0xf]  ;;  %v10048_v0 = vld [vmem:[#allocation2 + $0x15c] sm:$0xf] }
  0xfe   :  { %13342 = vst [vmem:[#allocation69_spill] sm:$0xff] %v10040_v62  ;;  %13345 = vst [vmem:[#allocation72_spill] sm:$0xff] %v10048_v0 }
 0x100   :  { %v10032_v60 = vpop.permute.xlu1 %441  ;;  %v10034_v58 = vpop.permute.xlu0 %429 }
 0x101   :  { %13339 = vst [vmem:[#allocation66_spill] sm:$0xff] %v10032_v60  ;;  %13340 = vst [vmem:[#allocation67_spill] sm:$0xff] %v10034_v58  ;;  %1209 = vperm.xlu1 %9334, %v10028_v57   ;;  %1197 = vperm.xlu0 %9333, %v10030_v59   ;;  %v10050_v60 = vld [vmem:[#allocation2 + $0x158] sm:$0xf]  ;;  %v10058_v59 = vld [vmem:[#allocation2 + $0x164] sm:$0xf] }
 0x102   :  { %13346 = vst [vmem:[#allocation73_spill] sm:$0xff] %v10050_v60  ;;  %13349 = vst [vmem:[#allocation76_spill] sm:$0xff] %v10058_v59 }
 0x104   :  { %v10042_v55 = vpop.permute.xlu1 %465  ;;  %v10044_v63 = vpop.permute.xlu0 %453 }
 0x105   :  { %13343 = vst [vmem:[#allocation70_spill] sm:$0xff] %v10042_v55  ;;  %13344 = vst [vmem:[#allocation71_spill] sm:$0xff] %v10044_v63  ;;  %1233 = vperm.xlu1 %9334, %v10038_v61   ;;  %1221 = vperm.xlu0 %9333, %v10040_v62   ;;  %v10060_v55 = vld [vmem:[#allocation2 + $0x160] sm:$0xf]  ;;  %v10068_v62 = vld [vmem:[#allocation2 + $0x16c] sm:$0xf] }
 0x106   :  { %13350 = vst [vmem:[#allocation77_spill] sm:$0xff] %v10060_v55  ;;  %13353 = vst [vmem:[#allocation80_spill] sm:$0xff] %v10068_v62 }
 0x108   :  { %v10052_v58 = vpop.permute.xlu1 %489  ;;  %v10054_v57 = vpop.permute.xlu0 %477 }
 0x109   :  { %13347 = vst [vmem:[#allocation74_spill] sm:$0xff] %v10052_v58  ;;  %13348 = vst [vmem:[#allocation75_spill] sm:$0xff] %v10054_v57  ;;  %1257 = vperm.xlu1 %9334, %v10048_v0   ;;  %1245 = vperm.xlu0 %9333, %v10050_v60   ;;  %v10070_v58 = vld [vmem:[#allocation2 + $0x168] sm:$0xf]  ;;  %v10078_v60 = vld [vmem:[#allocation2 + $0x174] sm:$0xf] }
 0x10a   :  { %13354 = vst [vmem:[#allocation81_spill] sm:$0xff] %v10070_v58  ;;  %13357 = vst [vmem:[#allocation84_spill] sm:$0xff] %v10078_v60 }
 0x10c   :  { %v10062_v63 = vpop.permute.xlu1 %513  ;;  %v10064_v61 = vpop.permute.xlu0 %501 }
 0x10d   :  { %13351 = vst [vmem:[#allocation78_spill] sm:$0xff] %v10062_v63  ;;  %13352 = vst [vmem:[#allocation79_spill] sm:$0xff] %v10064_v61  ;;  %1281 = vperm.xlu1 %9334, %v10058_v59   ;;  %1269 = vperm.xlu0 %9333, %v10060_v55   ;;  %v10080_v63 = vld [vmem:[#allocation2 + $0x170] sm:$0xf]  ;;  %v10088_v55 = vld [vmem:[#allocation2 + $0x17c] sm:$0xf] }
 0x10e   :  { %13358 = vst [vmem:[#allocation85_spill] sm:$0xff] %v10080_v63  ;;  %13361 = vst [vmem:[#allocation88_spill] sm:$0xff] %v10088_v55 }
 0x110   :  { %v10072_v57 = vpop.permute.xlu1 %537  ;;  %v10074_v0 = vpop.permute.xlu0 %525 }
 0x111   :  { %13355 = vst [vmem:[#allocation82_spill] sm:$0xff] %v10072_v57  ;;  %13356 = vst [vmem:[#allocation83_spill] sm:$0xff] %v10074_v0  ;;  %1305 = vperm.xlu1 %9334, %v10068_v62   ;;  %1293 = vperm.xlu0 %9333, %v10070_v58   ;;  %v10090_v57 = vld [vmem:[#allocation2 + $0x178] sm:$0xf]  ;;  %v10098_v58 = vld [vmem:[#allocation2 + $0x184] sm:$0xf] }
 0x112   :  { %13362 = vst [vmem:[#allocation89_spill] sm:$0xff] %v10090_v57  ;;  %13365 = vst [vmem:[#allocation92_spill] sm:$0xff] %v10098_v58 }
 0x114   :  { %v10082_v61 = vpop.permute.xlu1 %561  ;;  %v10084_v59 = vpop.permute.xlu0 %549 }
 0x115   :  { %13359 = vst [vmem:[#allocation86_spill] sm:$0xff] %v10082_v61  ;;  %13360 = vst [vmem:[#allocation87_spill] sm:$0xff] %v10084_v59  ;;  %1329 = vperm.xlu1 %9334, %v10078_v60   ;;  %1317 = vperm.xlu0 %9333, %v10080_v63   ;;  %v10100_v61 = vld [vmem:[#allocation2 + $0x180] sm:$0xf]  ;;  %v10108_v63 = vld [vmem:[#allocation2 + $0x18c] sm:$0xf] }
 0x116   :  { %13366 = vst [vmem:[#allocation93_spill] sm:$0xff] %v10100_v61  ;;  %13369 = vst [vmem:[#allocation96_spill] sm:$0xff] %v10108_v63 }
 0x118   :  { %v10092_v0 = vpop.permute.xlu1 %585  ;;  %v10094_v62 = vpop.permute.xlu0 %573 }
 0x119   :  { %13363 = vst [vmem:[#allocation90_spill] sm:$0xff] %v10092_v0  ;;  %13364 = vst [vmem:[#allocation91_spill] sm:$0xff] %v10094_v62  ;;  %1353 = vperm.xlu1 %9334, %v10088_v55   ;;  %1341 = vperm.xlu0 %9333, %v10090_v57   ;;  %v10110_v0 = vld [vmem:[#allocation2 + $0x188] sm:$0xf]  ;;  %v10118_v57 = vld [vmem:[#allocation2 + $0x194] sm:$0xf] }
 0x11a   :  { %13370 = vst [vmem:[#allocation97_spill] sm:$0xff] %v10110_v0  ;;  %13373 = vst [vmem:[#allocation100_spill] sm:$0xff] %v10118_v57 }
 0x11c   :  { %v10102_v59 = vpop.permute.xlu1 %609  ;;  %v10104_v60 = vpop.permute.xlu0 %597 }
 0x11d   :  { %13367 = vst [vmem:[#allocation94_spill] sm:$0xff] %v10102_v59  ;;  %13368 = vst [vmem:[#allocation95_spill] sm:$0xff] %v10104_v60  ;;  %1377 = vperm.xlu1 %9334, %v10098_v58   ;;  %1365 = vperm.xlu0 %9333, %v10100_v61   ;;  %v10120_v59 = vld [vmem:[#allocation2 + $0x190] sm:$0xf]  ;;  %v10128_v61 = vld [vmem:[#allocation2 + $0x19c] sm:$0xf] }
 0x11e   :  { %13374 = vst [vmem:[#allocation101_spill] sm:$0xff] %v10120_v59  ;;  %13377 = vst [vmem:[#allocation104_spill] sm:$0xff] %v10128_v61 }
 0x120   :  { %v10112_v62 = vpop.permute.xlu1 %633  ;;  %v10114_v55 = vpop.permute.xlu0 %621 }
 0x121   :  { %13371 = vst [vmem:[#allocation98_spill] sm:$0xff] %v10112_v62  ;;  %13372 = vst [vmem:[#allocation99_spill] sm:$0xff] %v10114_v55  ;;  %1401 = vperm.xlu1 %9334, %v10108_v63   ;;  %1389 = vperm.xlu0 %9333, %v10110_v0   ;;  %v10130_v62 = vld [vmem:[#allocation2 + $0x198] sm:$0xf]  ;;  %v10138_v0 = vld [vmem:[#allocation2 + $0x1a4] sm:$0xf] }
 0x122   :  { %13378 = vst [vmem:[#allocation105_spill] sm:$0xff] %v10130_v62  ;;  %13381 = vst [vmem:[#allocation108_spill] sm:$0xff] %v10138_v0 }
 0x124   :  { %v10122_v60 = vpop.permute.xlu1 %657  ;;  %v10124_v58 = vpop.permute.xlu0 %645 }
 0x125   :  { %13375 = vst [vmem:[#allocation102_spill] sm:$0xff] %v10122_v60  ;;  %13376 = vst [vmem:[#allocation103_spill] sm:$0xff] %v10124_v58  ;;  %1425 = vperm.xlu1 %9334, %v10118_v57   ;;  %1413 = vperm.xlu0 %9333, %v10120_v59   ;;  %v10140_v60 = vld [vmem:[#allocation2 + $0x1a0] sm:$0xf]  ;;  %v10148_v59 = vld [vmem:[#allocation2 + $0x1ac] sm:$0xf] }
 0x126   :  { %13382 = vst [vmem:[#allocation109_spill] sm:$0xff] %v10140_v60  ;;  %13385 = vst [vmem:[#allocation112_spill] sm:$0xff] %v10148_v59 }
 0x128   :  { %v10132_v55 = vpop.permute.xlu1 %681  ;;  %v10134_v63 = vpop.permute.xlu0 %669 }
 0x129   :  { %13379 = vst [vmem:[#allocation106_spill] sm:$0xff] %v10132_v55  ;;  %13380 = vst [vmem:[#allocation107_spill] sm:$0xff] %v10134_v63  ;;  %1449 = vperm.xlu1 %9334, %v10128_v61   ;;  %1437 = vperm.xlu0 %9333, %v10130_v62   ;;  %v190_v55 = vld [vmem:[#allocation2 + $0x1a8] sm:$0xf]  ;;  %v10155_v62 = vld [vmem:[#allocation2 + $0x1b4] sm:$0xf] }
 0x12a   :  { %13388 = vst [vmem:[#allocation115_spill] sm:$0xff] %v10155_v62 }
 0x12c   :  { %v10142_v58 = vpop.permute.xlu1 %705  ;;  %v10144_v57 = vpop.permute.xlu0 %693 }
 0x12d   :  { %13383 = vst [vmem:[#allocation110_spill] sm:$0xff] %v10142_v58  ;;  %13384 = vst [vmem:[#allocation111_spill] sm:$0xff] %v10144_v57  ;;  %1473 = vperm.xlu1 %9334, %v10138_v0   ;;  %1461 = vperm.xlu0 %9333, %v10140_v60   ;;  %v10162_v0 = vld [vmem:[#allocation2 + $0x1bc] sm:$0xf]  ;;  %v194_v60 = vld [vmem:[#allocation2 + $0x1b8] sm:$0xf] }
 0x12e   :  { %13391 = vst [vmem:[#allocation118_spill] sm:$0xff] %v10162_v0 }
 0x130   :  { %v10150_v63 = vpop.permute.xlu1 %729  ;;  %v10152_v61 = vpop.permute.xlu0 %717 }
 0x131   :  { %13386 = vst [vmem:[#allocation113_spill] sm:$0xff] %v10150_v63  ;;  %13387 = vst [vmem:[#allocation114_spill] sm:$0xff] %v10152_v61  ;;  %1497 = vperm.xlu1 %9334, %v10148_v59   ;;  %1485 = vperm.xlu0 %9333, %v190_v55   ;;  %v10169_v55 = vld [vmem:[#allocation2 + $0x1c4] sm:$0xf]  ;;  %v196_v61 = vld [vmem:[#allocation2 + $0x1c0] sm:$0xf] }
 0x132   :  { %13394 = vst [vmem:[#allocation121_spill] sm:$0xff] %v10169_v55 }
 0x134   :  { %v10157_v58 = vpop.permute.xlu1 %753  ;;  %v10159_v57 = vpop.permute.xlu0 %741 }
 0x135   :  { %13389 = vst [vmem:[#allocation116_spill] sm:$0xff] %v10157_v58  ;;  %13390 = vst [vmem:[#allocation117_spill] sm:$0xff] %v10159_v57  ;;  %1521 = vperm.xlu1 %9334, %v10155_v62   ;;  %1509 = vperm.xlu0 %9333, %v192_v56   ;;  %v199_v56 = vld [vmem:[#allocation2 + $0x1cc] sm:$0xf]  ;;  %v198_v57 = vld [vmem:[#allocation2 + $0x1c8] sm:$0xf] }
 0x138   :  { %v10164_v53 = vpop.permute.xlu1 %777  ;;  %v10166_v63 = vpop.permute.xlu0 %765 }
 0x139   :  { %13392 = vst [vmem:[#allocation119_spill] sm:$0xff] %v10164_v53  ;;  %13393 = vst [vmem:[#allocation120_spill] sm:$0xff] %v10166_v63  ;;  %1545 = vperm.xlu1 %9334, %v10162_v0   ;;  %1533 = vperm.xlu0 %9333, %v194_v60   ;;  %v201_v63 = vld [vmem:[#allocation2 + $0x1d4] sm:$0xf]  ;;  %v200_v60 = vld [vmem:[#allocation2 + $0x1d0] sm:$0xf] }
 0x13c   :  { %v10171_v59 = vpop.permute.xlu1 %801  ;;  %v10173_v58 = vpop.permute.xlu0 %789 }
 0x13d   :  { %13395 = vst [vmem:[#allocation122_spill] sm:$0xff] %v10171_v59  ;;  %13396 = vst [vmem:[#allocation123_spill] sm:$0xff] %v10173_v58  ;;  %1569 = vperm.xlu1 %9334, %v10169_v55   ;;  %1557 = vperm.xlu0 %9333, %v196_v61   ;;  %v203_v58 = vld [vmem:[#allocation2 + $0x1dc] sm:$0xf]  ;;  %v202_v59 = vld [vmem:[#allocation2 + $0x1d8] sm:$0xf] }
 0x140   :  { %v10176_v62 = vpop.permute.xlu1 %825  ;;  %v10178_v53 = vpop.permute.xlu0 %813 }
 0x141   :  { %13397 = vst [vmem:[#allocation124_spill] sm:$0xff] %v10176_v62  ;;  %13398 = vst [vmem:[#allocation125_spill] sm:$0xff] %v10178_v53  ;;  %1593 = vperm.xlu1 %9334, %v199_v56   ;;  %1581 = vperm.xlu0 %9333, %v198_v57   ;;  %v205_v62 = vld [vmem:[#allocation2 + $0x1e4] sm:$0xf]  ;;  %v204_v53 = vld [vmem:[#allocation2 + $0x1e0] sm:$0xf] }
 0x144   :  { %v10180_v0 = vpop.permute.xlu1 %849  ;;  %v10182_v54 = vpop.permute.xlu0 %837 }
 0x145   :  { %13399 = vst [vmem:[#allocation126_spill] sm:$0xff] %v10180_v0  ;;  %13400 = vst [vmem:[#allocation127_spill] sm:$0xff] %v10182_v54  ;;  %1617 = vperm.xlu1 %9334, %v201_v63   ;;  %1605 = vperm.xlu0 %9333, %v200_v60   ;;  %v207_v0 = vld [vmem:[#allocation2 + $0x1ec] sm:$0xf]  ;;  %v206_v54 = vld [vmem:[#allocation2 + $0x1e8] sm:$0xf] }
 0x148   :  { %v10184_v55 = vpop.permute.xlu1 %873  ;;  %v10186_v61 = vpop.permute.xlu0 %861 }
 0x149   :  { %13401 = vst [vmem:[#allocation128_spill] sm:$0xff] %v10184_v55  ;;  %13402 = vst [vmem:[#allocation129_spill] sm:$0xff] %v10186_v61  ;;  %1641 = vperm.xlu1 %9334, %v203_v58   ;;  %1629 = vperm.xlu0 %9333, %v202_v59   ;;  %v208_v55 = vld [vmem:[#allocation2 + $0x1f0] sm:$0xf]  ;;  %v13259_v59 = vmov 1  }
 0x14c   :  { %v10188_v56 = vpop.permute.xlu1 %897  ;;  %v10190_v57 = vpop.permute.xlu0 %885 }
 0x14d   :  { %13403 = vst [vmem:[#allocation130_spill] sm:$0xff] %v10188_v56  ;;  %13404 = vst [vmem:[#allocation131_spill] sm:$0xff] %v10190_v57  ;;  %1665 = vperm.xlu1 %9334, %v205_v62   ;;  %1653 = vperm.xlu0 %9333, %v204_v53  }
 0x150   :  { %v10192_v63 = vpop.permute.xlu1 %921  ;;  %v10194_v60 = vpop.permute.xlu0 %909 }
 0x151   :  { %13405 = vst [vmem:[#allocation132_spill] sm:$0xff] %v10192_v63  ;;  %13406 = vst [vmem:[#allocation133_spill] sm:$0xff] %v10194_v60  ;;  %1689 = vperm.xlu1 %9334, %v207_v0   ;;  %1677 = vperm.xlu0 %9333, %v206_v54   ;;  %v13443_v63 = vld [vmem:[#allocation23_spill] sm:$0xff] }
 0x154   :  { %v10196_v61 = vpop.permute.xlu1 %945  ;;  %v10198_v58 = vpop.permute.xlu0 %933 }
 0x155   :  { %13407 = vst [vmem:[#allocation134_spill] sm:$0xff] %v10196_v61  ;;  %13408 = vst [vmem:[#allocation135_spill] sm:$0xff] %v10198_v58  ;;  %9335 = vset.pattern.permute.xlu1 %v13259_v59  ;;  %1701 = vperm.xlu0 %9333, %v208_v55   ;;  %v13439_v61 = vld [vmem:[#allocation21_spill] sm:$0xff] }
 0x156   :  { %2656 = vperm.xlu1 %9335, %v9748_v2  }
 0x158   :  { %v10202_v53 = vpop.permute.xlu1 %969  ;;  %v10204_v62 = vpop.permute.xlu0 %957 }
 0x159   :  { %13409 = vst [vmem:[#allocation136_spill] sm:$0xff] %v10202_v53  ;;  %13410 = vst [vmem:[#allocation137_spill] sm:$0xff] %v10204_v62  ;;  %9336 = vset.pattern.permute.xlu0 %v13259_v59  ;;  %v13435_v53 = vld [vmem:[#allocation19_spill] sm:$0xff] }
 0x15a   :  { %2678 = vperm.xlu1 %9335, %v9746_v1   ;;  %2667 = vperm.xlu0 %9336, %v9754_v4  }
 0x15c   :  { %v10209_v0 = vpop.permute.xlu1 %993  ;;  %v10211_v54 = vpop.permute.xlu0 %981 }
 0x15e   :  { %2689 = vperm.xlu1 %9335, %v9752_v3   ;;  %2700 = vperm.xlu0 %9336, %v9760_v6  }
 0x160   :  { %v10215_v55 = vpop.permute.xlu1 %1017  ;;  %v10217_v2 = vpop.permute.xlu0 %1005 }
 0x162   :  { %2711 = vperm.xlu1 %9335, %v9758_v5   ;;  %2722 = vperm.xlu0 %9336, %v9766_v8  }
 0x164   :  { %v10221_v59 = vpop.permute.xlu1 %1041  ;;  %v10223_v1 = vpop.permute.xlu0 %1029 }
 0x166   :  { %2733 = vperm.xlu1 %9335, %v9764_v7   ;;  %2744 = vperm.xlu0 %9336, %v9772_v10  }
 0x168   :  { %v10227_v4 = vpop.permute.xlu1 %1065  ;;  %v10229_v3 = vpop.permute.xlu0 %1053 }
 0x16a   :  { %2755 = vperm.xlu1 %9335, %v9770_v9   ;;  %2766 = vperm.xlu0 %9336, %v9778_v12  }
 0x16c   :  { %v10233_v6 = vpop.permute.xlu1 %1089  ;;  %v10235_v5 = vpop.permute.xlu0 %1077 }
 0x16e   :  { %2777 = vperm.xlu1 %9335, %v9776_v11   ;;  %2788 = vperm.xlu0 %9336, %v9784_v14  }
 0x170   :  { %v10239_v8 = vpop.permute.xlu1 %1113  ;;  %v10241_v7 = vpop.permute.xlu0 %1101 }
 0x172   :  { %2799 = vperm.xlu1 %9335, %v9782_v13   ;;  %2810 = vperm.xlu0 %9336, %v9790_v16  }
 0x174   :  { %v10245_v10 = vpop.permute.xlu1 %1137  ;;  %v10247_v9 = vpop.permute.xlu0 %1125 }
 0x176   :  { %2821 = vperm.xlu1 %9335, %v9788_v15   ;;  %2832 = vperm.xlu0 %9336, %v9796_v18  }
 0x178   :  { %v10251_v12 = vpop.permute.xlu1 %1161  ;;  %v10253_v11 = vpop.permute.xlu0 %1149 }
 0x17a   :  { %2843 = vperm.xlu1 %9335, %v9794_v17   ;;  %2854 = vperm.xlu0 %9336, %v9802_v20  }
 0x17c   :  { %v10257_v14 = vpop.permute.xlu1 %1185  ;;  %v10259_v13 = vpop.permute.xlu0 %1173 }
 0x17e   :  { %2865 = vperm.xlu1 %9335, %v9800_v19   ;;  %2876 = vperm.xlu0 %9336, %v9808_v22  }
 0x180   :  { %v10263_v16 = vpop.permute.xlu1 %1209  ;;  %v10265_v15 = vpop.permute.xlu0 %1197 }
 0x182   :  { %2887 = vperm.xlu1 %9335, %v9806_v21   ;;  %2898 = vperm.xlu0 %9336, %v9814_v24  }
 0x184   :  { %v10269_v18 = vpop.permute.xlu1 %1233  ;;  %v10271_v17 = vpop.permute.xlu0 %1221 }
 0x186   :  { %2909 = vperm.xlu1 %9335, %v9812_v23   ;;  %2920 = vperm.xlu0 %9336, %v9820_v26  }
 0x188   :  { %v10275_v20 = vpop.permute.xlu1 %1257  ;;  %v10277_v19 = vpop.permute.xlu0 %1245 }
 0x18a   :  { %2931 = vperm.xlu1 %9335, %v9818_v25   ;;  %2942 = vperm.xlu0 %9336, %v9826_v28  }
 0x18c   :  { %v10281_v22 = vpop.permute.xlu1 %1281  ;;  %v10283_v21 = vpop.permute.xlu0 %1269 }
 0x18e   :  { %2953 = vperm.xlu1 %9335, %v9824_v27   ;;  %2964 = vperm.xlu0 %9336, %v9832_v30  }
 0x190   :  { %v10287_v24 = vpop.permute.xlu1 %1305  ;;  %v10289_v23 = vpop.permute.xlu0 %1293 }
 0x192   :  { %2975 = vperm.xlu1 %9335, %v9830_v29   ;;  %2986 = vperm.xlu0 %9336, %v9838_v32  }
 0x194   :  { %v10293_v26 = vpop.permute.xlu1 %1329  ;;  %v10295_v25 = vpop.permute.xlu0 %1317 }
 0x196   :  { %2997 = vperm.xlu1 %9335, %v9836_v31   ;;  %3008 = vperm.xlu0 %9336, %v9844_v34  }
 0x198   :  { %v10299_v28 = vpop.permute.xlu1 %1353  ;;  %v10301_v27 = vpop.permute.xlu0 %1341 }
 0x199   :  { %13411 = vst [vmem:[#allocation138_spill] sm:$0xff] %v10299_v28  ;;  %13412 = vst [vmem:[#allocation139_spill] sm:$0xff] %v10301_v27 }
 0x19a   :  { %3019 = vperm.xlu1 %9335, %v9842_v33   ;;  %3030 = vperm.xlu0 %9336, %v9850_v36  }
 0x19c   :  { %v10305_v30 = vpop.permute.xlu1 %1377  ;;  %v10307_v29 = vpop.permute.xlu0 %1365 }
 0x19d   :  { %13413 = vst [vmem:[#allocation140_spill] sm:$0xff] %v10305_v30  ;;  %13414 = vst [vmem:[#allocation141_spill] sm:$0xff] %v10307_v29 }
 0x19e   :  { %3041 = vperm.xlu1 %9335, %v9848_v35   ;;  %3052 = vperm.xlu0 %9336, %v9856_v38  }
 0x1a0   :  { %v10311_v32 = vpop.permute.xlu1 %1401  ;;  %v10313_v31 = vpop.permute.xlu0 %1389 }
 0x1a1   :  { %13415 = vst [vmem:[#allocation142_spill] sm:$0xff] %v10311_v32  ;;  %13416 = vst [vmem:[#allocation143_spill] sm:$0xff] %v10313_v31 }
 0x1a2   :  { %3063 = vperm.xlu1 %9335, %v9854_v37   ;;  %3074 = vperm.xlu0 %9336, %v9862_v40  }
 0x1a4   :  { %v10317_v34 = vpop.permute.xlu1 %1425  ;;  %v10319_v33 = vpop.permute.xlu0 %1413 }
 0x1a5   :  { %13417 = vst [vmem:[#allocation144_spill] sm:$0xff] %v10317_v34  ;;  %13418 = vst [vmem:[#allocation145_spill] sm:$0xff] %v10319_v33 }
 0x1a6   :  { %3085 = vperm.xlu1 %9335, %v9860_v39   ;;  %3096 = vperm.xlu0 %9336, %v9868_v42  }
 0x1a8   :  { %v10323_v36 = vpop.permute.xlu1 %1449  ;;  %v10325_v35 = vpop.permute.xlu0 %1437 }
 0x1a9   :  { %13419 = vst [vmem:[#allocation146_spill] sm:$0xff] %v10323_v36  ;;  %13420 = vst [vmem:[#allocation147_spill] sm:$0xff] %v10325_v35 }
 0x1aa   :  { %3107 = vperm.xlu1 %9335, %v9866_v41   ;;  %3118 = vperm.xlu0 %9336, %v9874_v44  }
 0x1ac   :  { %v10329_v38 = vpop.permute.xlu1 %1473  ;;  %v10331_v37 = vpop.permute.xlu0 %1461 }
 0x1ad   :  { %13421 = vst [vmem:[#allocation148_spill] sm:$0xff] %v10329_v38  ;;  %13422 = vst [vmem:[#allocation149_spill] sm:$0xff] %v10331_v37 }
 0x1ae   :  { %3129 = vperm.xlu1 %9335, %v9872_v43   ;;  %3140 = vperm.xlu0 %9336, %v9880_v46  }
 0x1b0   :  { %v10335_v40 = vpop.permute.xlu1 %1497  ;;  %v10337_v39 = vpop.permute.xlu0 %1485 }
 0x1b1   :  { %13423 = vst [vmem:[#allocation150_spill] sm:$0xff] %v10335_v40  ;;  %13424 = vst [vmem:[#allocation151_spill] sm:$0xff] %v10337_v39 }
 0x1b2   :  { %3151 = vperm.xlu1 %9335, %v9878_v45   ;;  %3162 = vperm.xlu0 %9336, %v9886_v48   ;;  %v13431_v48 = vld [vmem:[#allocation17_spill] sm:$0xff] }
 0x1b4   :  { %v10341_v42 = vpop.permute.xlu1 %1521  ;;  %v10343_v41 = vpop.permute.xlu0 %1509 }
 0x1b5   :  { %13425 = vst [vmem:[#allocation152_spill] sm:$0xff] %v10341_v42  ;;  %13426 = vst [vmem:[#allocation153_spill] sm:$0xff] %v10343_v41  ;;  %v13539_v41 = vld [vmem:[#allocation109_spill] sm:$0xff] }
 0x1b6   :  { %3173 = vperm.xlu1 %9335, %v9884_v47   ;;  %3184 = vperm.xlu0 %9336, %v9892_v50   ;;  %v13434_v50 = vld [vmem:[#allocation16_spill] sm:$0xff] }
 0x1b8   :  { %v10347_v44 = vpop.permute.xlu1 %1545  ;;  %v10349_v43 = vpop.permute.xlu0 %1533 }
 0x1b9   :  { %13427 = vst [vmem:[#allocation154_spill] sm:$0xff] %v10347_v44  ;;  %13428 = vst [vmem:[#allocation155_spill] sm:$0xff] %v10349_v43  ;;  %v9360_v43 = vld [vmem:[#allocation8 + $0x38] sm:$0xff]  }
 0x1ba   :  { %3195 = vperm.xlu1 %9335, %v9890_v49   ;;  %3206 = vperm.xlu0 %9336, %v9898_v52   ;;  %v13438_v52 = vld [vmem:[#allocation18_spill] sm:$0xff] }
 0x1bc   :  { %v10353_v46 = vpop.permute.xlu1 %1569  ;;  %v10355_v45 = vpop.permute.xlu0 %1557 }
 0x1bd   :  { %13429 = vst [vmem:[#allocation156_spill] sm:$0xff] %v10353_v46  ;;  %13430 = vst [vmem:[#allocation157_spill] sm:$0xff] %v10355_v45 }
 0x1be   :  { %3217 = vperm.xlu1 %9335, %v9896_v51   ;;  %3228 = vperm.xlu0 %9336, %v13431_v48   ;;  %v13442_v48 = vld [vmem:[#allocation20_spill] sm:$0xff] }
 0x1c0   :  { %v10359_v62 = vpop.permute.xlu1 %1593  ;;  %v10361_v47 = vpop.permute.xlu0 %1581 }
 0x1c1   :  { %13432 = vst [vmem:[#allocation17_spill] sm:$0xff] %v10359_v62  ;;  %13433 = vst [vmem:[#allocation158_spill] sm:$0xff] %v10361_v47  ;;  %v13466_v47 = vld [vmem:[#allocation36_spill] sm:$0xff]  ;;  %v13467_v62 = vld [vmem:[#allocation41_spill] sm:$0xff] }
 0x1c2   :  { %3239 = vperm.xlu1 %9335, %v13434_v50   ;;  %3250 = vperm.xlu0 %9336, %v13435_v53   ;;  %v13446_v53 = vld [vmem:[#allocation22_spill] sm:$0xff] }
 0x1c4   :  { %v10365_v58 = vpop.permute.xlu1 %1617  ;;  %v10367_v49 = vpop.permute.xlu0 %1605 }
 0x1c5   :  { %13436 = vst [vmem:[#allocation16_spill] sm:$0xff] %v10365_v58  ;;  %13437 = vst [vmem:[#allocation19_spill] sm:$0xff] %v10367_v49  ;;  %v13447_v58 = vld [vmem:[#allocation25_spill] sm:$0xff] }
 0x1c6   :  { %3261 = vperm.xlu1 %9335, %v13438_v52   ;;  %3272 = vperm.xlu0 %9336, %v13439_v61   ;;  %v13450_v61 = vld [vmem:[#allocation24_spill] sm:$0xff] }
 0x1c8   :  { %v10371_v60 = vpop.permute.xlu1 %1641  ;;  %v10373_v51 = vpop.permute.xlu0 %1629 }
 0x1c9   :  { %13440 = vst [vmem:[#allocation18_spill] sm:$0xff] %v10371_v60  ;;  %13441 = vst [vmem:[#allocation21_spill] sm:$0xff] %v10373_v51  ;;  %v13451_v60 = vld [vmem:[#allocation27_spill] sm:$0xff] }
 0x1ca   :  { %3283 = vperm.xlu1 %9335, %v13442_v48   ;;  %3294 = vperm.xlu0 %9336, %v13443_v63   ;;  %v13454_v63 = vld [vmem:[#allocation26_spill] sm:$0xff] }
 0x1cc   :  { %v10377_v57 = vpop.permute.xlu1 %1665  ;;  %v10379_v50 = vpop.permute.xlu0 %1653 }
 0x1cd   :  { %13444 = vst [vmem:[#allocation20_spill] sm:$0xff] %v10377_v57  ;;  %13445 = vst [vmem:[#allocation23_spill] sm:$0xff] %v10379_v50  ;;  %v13455_v57 = vld [vmem:[#allocation29_spill] sm:$0xff] }
 0x1ce   :  { %3305 = vperm.xlu1 %9335, %v13446_v53   ;;  %3316 = vperm.xlu0 %9336, %v13447_v58   ;;  %v13458_v58 = vld [vmem:[#allocation28_spill] sm:$0xff] }
 0x1d0   :  { %v10383_v49 = vpop.permute.xlu1 %1689  ;;  %v10385_v52 = vpop.permute.xlu0 %1677 }
 0x1d1   :  { %13448 = vst [vmem:[#allocation22_spill] sm:$0xff] %v10383_v49  ;;  %13449 = vst [vmem:[#allocation25_spill] sm:$0xff] %v10385_v52  ;;  %v13459_v49 = vld [vmem:[#allocation33_spill] sm:$0xff] }
 0x1d2   :  { %3327 = vperm.xlu1 %9335, %v13450_v61   ;;  %3338 = vperm.xlu0 %9336, %v13451_v60   ;;  %v13462_v60 = vld [vmem:[#allocation32_spill] sm:$0xff] }
 0x1d4   :  { %v10389_v51 = vpop.permute.xlu0 %1701 }
 0x1d5   :  { %13452 = vst [vmem:[#allocation24_spill] sm:$0xff] %v10389_v51  ;;  %v10391_v48 = vpop.permute.xlu1 %2656  ;;  %v13463_v51 = vld [vmem:[#allocation37_spill] sm:$0xff] }
 0x1d6   :  { %13453 = vst [vmem:[#allocation27_spill] sm:$0xff] %v10391_v48  ;;  %3349 = vperm.xlu1 %9335, %v13454_v63   ;;  %3360 = vperm.xlu0 %9336, %v13455_v57   ;;  %v13470_v48 = vld [vmem:[#allocation40_spill] sm:$0xff] }
 0x1d9   :  { %v10395_v50 = vpop.permute.xlu1 %2678  ;;  %v10397_v53 = vpop.permute.xlu0 %2667 }
 0x1da   :  { %13456 = vst [vmem:[#allocation26_spill] sm:$0xff] %v10395_v50  ;;  %13457 = vst [vmem:[#allocation29_spill] sm:$0xff] %v10397_v53  ;;  %3371 = vperm.xlu1 %9335, %v13458_v58   ;;  %3382 = vperm.xlu0 %9336, %v13459_v49   ;;  %v13528_v53 = vld [vmem:[#allocation101_spill] sm:$0xff] }
 0x1dd   :  { %v10401_v52 = vpop.permute.xlu1 %2689  ;;  %v10403_v61 = vpop.permute.xlu0 %2700 }
 0x1de   :  { %13460 = vst [vmem:[#allocation28_spill] sm:$0xff] %v10401_v52  ;;  %13461 = vst [vmem:[#allocation33_spill] sm:$0xff] %v10403_v61  ;;  %3393 = vperm.xlu1 %9335, %v13462_v60   ;;  %3404 = vperm.xlu0 %9336, %v13463_v51   ;;  %v13471_v52 = vld [vmem:[#allocation45_spill] sm:$0xff]  ;;  %v13474_v51 = vld [vmem:[#allocation44_spill] sm:$0xff] }
 0x1e1   :  { %v10407_v56 = vpop.permute.xlu1 %2711  ;;  %v10409_v63 = vpop.permute.xlu0 %2722 }
 0x1e2   :  { %13464 = vst [vmem:[#allocation32_spill] sm:$0xff] %v10407_v56  ;;  %13465 = vst [vmem:[#allocation37_spill] sm:$0xff] %v10409_v63  ;;  %3415 = vperm.xlu1 %9335, %v13466_v47   ;;  %3426 = vperm.xlu0 %9336, %v13467_v62   ;;  %v13475_v56 = vld [vmem:[#allocation49_spill] sm:$0xff]  ;;  %v13478_v62 = vld [vmem:[#allocation48_spill] sm:$0xff] }
 0x1e5   :  { %v10413_v50 = vpop.permute.xlu1 %2733  ;;  %v10415_v58 = vpop.permute.xlu0 %2744 }
 0x1e6   :  { %13468 = vst [vmem:[#allocation36_spill] sm:$0xff] %v10413_v50  ;;  %13469 = vst [vmem:[#allocation41_spill] sm:$0xff] %v10415_v58  ;;  %3437 = vperm.xlu1 %9335, %v13470_v48   ;;  %3448 = vperm.xlu0 %9336, %v13471_v52   ;;  %v13479_v50 = vld [vmem:[#allocation53_spill] sm:$0xff]  ;;  %v13482_v52 = vld [vmem:[#allocation52_spill] sm:$0xff] }
 0x1e9   :  { %v10419_v61 = vpop.permute.xlu1 %2755  ;;  %v10421_v60 = vpop.permute.xlu0 %2766 }
 0x1ea   :  { %13472 = vst [vmem:[#allocation40_spill] sm:$0xff] %v10419_v61  ;;  %13473 = vst [vmem:[#allocation45_spill] sm:$0xff] %v10421_v60  ;;  %3459 = vperm.xlu1 %9335, %v13474_v51   ;;  %3470 = vperm.xlu0 %9336, %v13475_v56   ;;  %v13483_v61 = vld [vmem:[#allocation57_spill] sm:$0xff]  ;;  %v13486_v56 = vld [vmem:[#allocation56_spill] sm:$0xff] }
 0x1ed   :  { %v10425_v63 = vpop.permute.xlu1 %2777  ;;  %v10427_v47 = vpop.permute.xlu0 %2788 }
 0x1ee   :  { %13476 = vst [vmem:[#allocation44_spill] sm:$0xff] %v10425_v63  ;;  %13477 = vst [vmem:[#allocation49_spill] sm:$0xff] %v10427_v47  ;;  %3481 = vperm.xlu1 %9335, %v13478_v62   ;;  %3492 = vperm.xlu0 %9336, %v13479_v50   ;;  %v13487_v63 = vld [vmem:[#allocation61_spill] sm:$0xff]  ;;  %v13490_v50 = vld [vmem:[#allocation60_spill] sm:$0xff] }
 0x1f1   :  { %v10431_v58 = vpop.permute.xlu1 %2799  ;;  %v10433_v48 = vpop.permute.xlu0 %2810 }
 0x1f2   :  { %13480 = vst [vmem:[#allocation48_spill] sm:$0xff] %v10431_v58  ;;  %13481 = vst [vmem:[#allocation53_spill] sm:$0xff] %v10433_v48  ;;  %3503 = vperm.xlu1 %9335, %v13482_v52   ;;  %3514 = vperm.xlu0 %9336, %v13483_v61   ;;  %v13491_v58 = vld [vmem:[#allocation65_spill] sm:$0xff]  ;;  %v13494_v61 = vld [vmem:[#allocation64_spill] sm:$0xff] }
 0x1f5   :  { %v10437_v60 = vpop.permute.xlu1 %2821  ;;  %v10439_v51 = vpop.permute.xlu0 %2832 }
 0x1f6   :  { %13484 = vst [vmem:[#allocation52_spill] sm:$0xff] %v10437_v60  ;;  %13485 = vst [vmem:[#allocation57_spill] sm:$0xff] %v10439_v51  ;;  %3525 = vperm.xlu1 %9335, %v13486_v56   ;;  %3536 = vperm.xlu0 %9336, %v13487_v63   ;;  %v13495_v60 = vld [vmem:[#allocation69_spill] sm:$0xff]  ;;  %v13498_v63 = vld [vmem:[#allocation68_spill] sm:$0xff] }
 0x1f9   :  { %v10443_v47 = vpop.permute.xlu1 %2843  ;;  %v10445_v62 = vpop.permute.xlu0 %2854 }
 0x1fa   :  { %13488 = vst [vmem:[#allocation56_spill] sm:$0xff] %v10443_v47  ;;  %13489 = vst [vmem:[#allocation61_spill] sm:$0xff] %v10445_v62  ;;  %3547 = vperm.xlu1 %9335, %v13490_v50   ;;  %3558 = vperm.xlu0 %9336, %v13491_v58   ;;  %v13499_v47 = vld [vmem:[#allocation73_spill] sm:$0xff]  ;;  %v13502_v58 = vld [vmem:[#allocation72_spill] sm:$0xff] }
 0x1fd   :  { %v10449_v48 = vpop.permute.xlu1 %2865  ;;  %v10451_v52 = vpop.permute.xlu0 %2876 }
 0x1fe   :  { %13492 = vst [vmem:[#allocation60_spill] sm:$0xff] %v10449_v48  ;;  %13493 = vst [vmem:[#allocation65_spill] sm:$0xff] %v10451_v52  ;;  %3569 = vperm.xlu1 %9335, %v13494_v61   ;;  %3580 = vperm.xlu0 %9336, %v13495_v60   ;;  %v13503_v48 = vld [vmem:[#allocation77_spill] sm:$0xff]  ;;  %v13506_v60 = vld [vmem:[#allocation76_spill] sm:$0xff] }
 0x201   :  { %v10455_v51 = vpop.permute.xlu1 %2887  ;;  %v10457_v56 = vpop.permute.xlu0 %2898 }
 0x202   :  { %13496 = vst [vmem:[#allocation64_spill] sm:$0xff] %v10455_v51  ;;  %13497 = vst [vmem:[#allocation69_spill] sm:$0xff] %v10457_v56  ;;  %3591 = vperm.xlu1 %9335, %v13498_v63   ;;  %3602 = vperm.xlu0 %9336, %v13499_v47   ;;  %v9353_v51 = vld [vmem:[#allocation8] sm:$0xff]   ;;  %v13509_v63 = vmov 0  }
 0x203   :  { %v13507_v56 = vld [vmem:[#allocation81_spill] sm:$0xff]  ;;  %7457 = vmatpush1.bf16.msra.mxu0 %v9353_v51  ;;  %9304 = vmatpush1.bf16.msra.mxu1 %v9353_v51 }
 0x204   :  { %7458 = vmatprep.subr.bf16.mxu0 %v13509_v63  ;;  %9289 = vmatprep.subr.bf16.mxu1 %v13509_v63 }
 0x205   :  { %v10461_v62 = vpop.permute.xlu1 %2909  ;;  %v10463_v50 = vpop.permute.xlu0 %2920 }
 0x206   :  { %13500 = vst [vmem:[#allocation68_spill] sm:$0xff] %v10461_v62  ;;  %13501 = vst [vmem:[#allocation73_spill] sm:$0xff] %v10463_v50  ;;  %3613 = vperm.xlu1 %9335, %v13502_v58   ;;  %3624 = vperm.xlu0 %9336, %v13503_v48   ;;  %v13511_v48 = vld [vmem:[#allocation80_spill] sm:$0xff]  ;;  %v9354_v50 = vld [vmem:[#allocation8 + $0x8] sm:$0xff]  }
 0x207   :  { %7459 = vmatpush1.bf16.msra.mxu0 %v9354_v50  ;;  %9305 = vmatpush1.bf16.msra.mxu1 %v9354_v50  ;;  %v13519_v50 = vld [vmem:[#allocation88_spill] sm:$0xff] }
 0x208   :  { %7460 = vmatprep.subr.bf16.mxu0 %v13509_v63  ;;  %9290 = vmatprep.subr.bf16.mxu1 %v13509_v63 }
 0x209   :  { %v10467_v52 = vpop.permute.xlu1 %2931  ;;  %v10469_v61 = vpop.permute.xlu0 %2942 }
 0x20a   :  { %13504 = vst [vmem:[#allocation72_spill] sm:$0xff] %v10467_v52  ;;  %13505 = vst [vmem:[#allocation77_spill] sm:$0xff] %v10469_v61  ;;  %3635 = vperm.xlu1 %9335, %v13506_v60   ;;  %3646 = vperm.xlu0 %9336, %v13507_v56   ;;  %v13512_v52 = vld [vmem:[#allocation85_spill] sm:$0xff]  ;;  %v13515_v56 = vld [vmem:[#allocation84_spill] sm:$0xff] }
 0x20b   :  { %v9355_v61 = vld [vmem:[#allocation8 + $0x10] sm:$0xff]  }
 0x20c   :  { %7461 = vmatpush1.bf16.msra.mxu0 %v9355_v61  ;;  %9306 = vmatpush1.bf16.msra.mxu1 %v9355_v61 }
 0x20d   :  { %v10473_v47 = vpop.permute.xlu1 %2953  ;;  %v10477_v58 = vpop.permute.xlu0 %2964  ;;  %7462 = vmatprep.subr.bf16.mxu0 %v13509_v63  ;;  %9291 = vmatprep.subr.bf16.mxu1 %v13509_v63 }
 0x20e   :  { %13508 = vst [vmem:[#allocation76_spill] sm:$0xff] %v10473_v47  ;;  %13510 = vst [vmem:[#allocation81_spill] sm:$0xff] %v10477_v58  ;;  %3657 = vperm.xlu1 %9335, %v13511_v48   ;;  %3668 = vperm.xlu0 %9336, %v13512_v52   ;;  %v13516_v47 = vld [vmem:[#allocation89_spill] sm:$0xff] }
 0x20f   :  { %v9356_v58 = vld [vmem:[#allocation8 + $0x18] sm:$0xff]  }
 0x210   :  { %7463 = vmatpush1.bf16.msra.mxu0 %v9356_v58  ;;  %9307 = vmatpush1.bf16.msra.mxu1 %v9356_v58  ;;  %v10509_v58 = vld.sshfl [vmem:[#allocation5] sm:$0x33 pattern:$0x76325410] }
 0x211   :  { %v10481_v60 = vpop.permute.xlu1 %2975  ;;  %v10485_v51 = vpop.permute.xlu0 %2986  ;;  %7464 = vmatprep.subr.bf16.mxu0 %v13509_v63  ;;  %9292 = vmatprep.subr.bf16.mxu1 %v13509_v63  ;;  %v10531_v46 = vpack.i.b16 %v10509_v58, %v10509_v58 }
 0x212   :  { %13513 = vst [vmem:[#allocation80_spill] sm:$0xff] %v10481_v60  ;;  %13514 = vst [vmem:[#allocation85_spill] sm:$0xff] %v10485_v51  ;;  %3679 = vperm.xlu1 %9335, %v13515_v56   ;;  %3690 = vperm.xlu0 %9336, %v13516_v47   ;;  %v13520_v60 = vld [vmem:[#allocation93_spill] sm:$0xff]  ;;  %v13523_v47 = vld [vmem:[#allocation92_spill] sm:$0xff] }
 0x213   :  { %v9357_v51 = vld [vmem:[#allocation8 + $0x20] sm:$0xff]  }
 0x214   :  { %7465 = vmatpush1.bf16.msra.mxu0 %v9357_v51  ;;  %9308 = vmatpush1.bf16.msra.mxu1 %v9357_v51 }
 0x215   :  { %v10489_v48 = vpop.permute.xlu1 %2997  ;;  %v10493_v52 = vpop.permute.xlu0 %3008  ;;  %7466 = vmatprep.subr.bf16.mxu0 %v13509_v63  ;;  %9293 = vmatprep.subr.bf16.mxu1 %v13509_v63 }
 0x216   :  { %13517 = vst [vmem:[#allocation84_spill] sm:$0xff] %v10489_v48  ;;  %13518 = vst [vmem:[#allocation89_spill] sm:$0xff] %v10493_v52  ;;  %3701 = vperm.xlu1 %9335, %v13519_v50   ;;  %3712 = vperm.xlu0 %9336, %v13520_v60   ;;  %v13524_v48 = vld [vmem:[#allocation97_spill] sm:$0xff]  ;;  %v219_v50 = vlaneseq }
 0x218   :  { %v10515_v51 = vshrl.u32 %v219_v50, 7  ;;  %v13533_v50 = vld [vmem:[#allocation105_spill] sm:$0xff] }
 0x219   :  { %v10497_v56 = vpop.permute.xlu1 %3019  ;;  %v10501_v61 = vpop.permute.xlu0 %3030 }
 0x21a   :  { %13521 = vst [vmem:[#allocation88_spill] sm:$0xff] %v10497_v56  ;;  %13522 = vst [vmem:[#allocation93_spill] sm:$0xff] %v10501_v61  ;;  %3723 = vperm.xlu1 %9335, %v13523_v47   ;;  %3734 = vperm.xlu0 %9336, %v13524_v48   ;;  %v13527_v56 = vld [vmem:[#allocation96_spill] sm:$0xff]  ;;  %v9358_v61 = vld [vmem:[#allocation8 + $0x28] sm:$0xff]   ;;  %v9642_v47 = vmov 1966171168   ;;  %v10519_v48 = vcombine.high %v10509_v58, %v10509_v58 }
 0x21b   :  { %v1875_v62 = vunpack.c.l.s4 %v9642_v47  ;;  %7467 = vmatpush1.bf16.msra.mxu0 %v9358_v61  ;;  %9309 = vmatpush1.bf16.msra.mxu1 %v9358_v61  ;;  %13529 = vst [vmem:[#allocation96_spill] sm:$0xff] %v10515_v51  ;;  %v13532_v47 = vld [vmem:[#allocation100_spill] sm:$0xff] }
 0x21c   :  { %7468 = vmatprep.subr.bf16.mxu0 %v13509_v63  ;;  %9294 = vmatprep.subr.bf16.mxu1 %v13509_v63  ;;  %13534 = vst [vmem:[#allocation100_spill] sm:$0xff] %v10531_v46 }
 0x21d   :  { %v10505_v52 = vpop.permute.xlu1 %3041  ;;  %v10511_v60 = vpop.permute.xlu0 %3052  ;;  %v1876_v61 = vunpack.c.0.s8 %v1875_v62 }
 0x21e   :  { %13525 = vst [vmem:[#allocation92_spill] sm:$0xff] %v10505_v52  ;;  %13526 = vst [vmem:[#allocation97_spill] sm:$0xff] %v10511_v60  ;;  %3745 = vperm.xlu1 %9335, %v13527_v56   ;;  %3756 = vperm.xlu0 %9336, %v13528_v53   ;;  %v9643_v56 = vmov 839922192   ;;  %v9359_v53 = vld [vmem:[#allocation8 + $0x30] sm:$0xff]  }
 0x21f   :  { %v217_v60 = vunpack.c.l.s4 %v9643_v56  ;;  %7469 = vmatpush1.bf16.msra.mxu0 %v9359_v53  ;;  %9310 = vmatpush1.bf16.msra.mxu1 %v9359_v53  ;;  %v10538_v56 = vpack.i.b16 %v10519_v48, %v10519_v48  ;;  %v1879_v44 = vsub.s32 %v1876_v61, %v10515_v51 }
 0x220   :  { %7470 = vmatprep.subr.bf16.mxu0 %v13509_v63  ;;  %9295 = vmatprep.subr.bf16.mxu1 %v13509_v63 }
 0x221   :  { %v10521_v52 = vpop.permute.xlu1 %3063  ;;  %v10525_v45 = vpop.permute.xlu0 %3074  ;;  %13535 = vst [vmem:[#allocation105_spill] sm:$0xff] %v10538_v56  ;;  %v218_v62 = vunpack.c.0.s8 %v217_v60 }
 0x222   :  { %13530 = vst [vmem:[#allocation101_spill] sm:$0xff] %v10521_v52  ;;  %13531 = vst [vmem:[#allocation159_spill] sm:$0xff] %v10525_v45  ;;  %3767 = vperm.xlu1 %9335, %v13532_v47   ;;  %3778 = vperm.xlu0 %9336, %v13533_v50   ;;  %v10534_v52 = vsub.s32 0, %v10515_v51  ;;  %v13538_v50 = vld [vmem:[#allocation104_spill] sm:$0xff] }
 0x223   :  { %v8640_v47 = vld.sshfl [vmem:[#allocation7] sm:$0x11 pattern:$0x75316420]  ;;  %7471 = vmatpush1.bf16.msra.mxu0 %v9360_v43  ;;  %9311 = vmatpush1.bf16.msra.mxu1 %v9360_v43  ;;  %v9361_v43 = vld [vmem:[#allocation8 + $0x40] sm:$0xff]  }
 0x224   :  { %v1733_v42 = vrot.slane %v10538_v56, %v10534_v52  ;;  %v1873_v39 = vcombine.high %v8640_v47, %v8640_v47  ;;  %7472 = vmatprep.subr.bf16.mxu0 %v13509_v63  ;;  %9296 = vmatprep.subr.bf16.mxu1 %v13509_v63  ;;  %v13543_v56 = vld [vmem:[#allocation34_spill] sm:$0xff] }
 0x225   :  { %v10540_v45 = vpop.permute.xlu1 %3085  ;;  %v10544_v53 = vpop.permute.xlu0 %3096 }
 0x226   :  { %13536 = vst [vmem:[#allocation160_spill] sm:$0xff] %v10540_v45  ;;  %13537 = vst [vmem:[#allocation161_spill] sm:$0xff] %v10544_v53  ;;  %3789 = vperm.xlu1 %9335, %v13538_v50   ;;  %3800 = vperm.xlu0 %9336, %v13539_v41   ;;  %v1726_v45 = vrot.slane %v10531_v46, %v10534_v52  ;;  %v10558_v50 = vsub.s32 %v218_v62, %v10515_v51  ;;  %v13542_v41 = vld [vmem:[#allocation108_spill] sm:$0xff]  ;;  %v13269_v46 = vmov 2   ;;  %v13548_v51 = vld [vmem:[#allocation35_spill] sm:$0xff] }
 0x227   :  { %v1880_v53 = vrot.slane %v8640_v47, %v1879_v44  ;;  %7473 = vmatpush1.bf16.msra.mxu0 %v9361_v43  ;;  %v1887_v38 = vrot.slane %v1873_v39, %v1879_v44  ;;  %9312 = vmatpush1.bf16.msra.mxu1 %v9361_v43 }
 0x228   :  { %v258_v40 = vrot.slane %v13543_v56, %v10558_v50  ;;  %v10566_v37 = vcombine.low %v1726_v45, %v1733_v42  ;;  %7474 = vmatprep.subr.bf16.mxu0 %v13509_v63  ;;  %v234_v56 = vrot.slane %v13548_v51, %v10558_v50  ;;  %v9362_v42 = vld [vmem:[#allocation8 + $0x48] sm:$0xff]   ;;  %9297 = vmatprep.subr.bf16.mxu1 %v13509_v63 }
 0x229   :  { %v10553_v60 = vpop.permute.xlu1 %3107  ;;  %v10560_v61 = vpop.permute.xlu0 %3118  ;;  %v1889_v39 = vpack.i.b16 %v1880_v53, %v1880_v53  ;;  %v13551_v45 = vld [vmem:[#allocation38_spill] sm:$0xff] }
 0x22a   :  { %13540 = vst [vmem:[#allocation104_spill] sm:$0xff] %v10553_v60  ;;  %13541 = vst [vmem:[#allocation109_spill] sm:$0xff] %v10560_v61  ;;  %3811 = vperm.xlu1 %9335, %v13542_v41   ;;  %9338 = vset.pattern.permute.xlu0 %v13269_v46  ;;  %v9369_v60 = vld [vmem:[#allocation2 + $0x4] sm:$0xf]  ;;  %v13547_v61 = vld [vmem:[#allocation31_spill] sm:$0xff]  ;;  %v1743_v44 = vmul.bf16 %v10566_v37, %v258_v40  ;;  %v282_v43 = vrot.slane %v13551_v45, %v10558_v50 }
 0x22b   :  { %4940 = vperm.xlu0 %9338, %v9369_v60   ;;  %13544 = vst [vmem:[#allocation108_spill] sm:$0xff] %v10566_v37  ;;  %v13546_v41 = vld [vmem:[#allocation30_spill] sm:$0xff]  ;;  %v222_v46 = vrot.slane %v13547_v61, %v10558_v50  ;;  %v13550_v60 = vld [vmem:[#allocation112_spill] sm:$0xff]  ;;  %7475 = vmatpush1.bf16.msra.mxu0 %v9362_v42  ;;  %v13552_v61 = vld [vmem:[#allocation39_spill] sm:$0xff]  ;;  %v1741_v40 = vmul.bf16 %v10566_v37, %v234_v56 }
 0x22c   :  { %v246_v47 = vrot.slane %v13546_v41, %v10558_v50  ;;  %v270_v41 = vrot.slane %v13552_v61, %v10558_v50  ;;  %7476 = vmatprep.subr.bf16.mxu0 %v13509_v63  ;;  %9313 = vmatpush1.bf16.msra.mxu1 %v9362_v42  ;;  %v9363_v45 = vld [vmem:[#allocation8 + $0x50] sm:$0xff]   ;;  %v10597_v36 = vrot.slane %v1889_v39, %v10534_v52  ;;  %v13557_v42 = vld [vmem:[#allocation42_spill] sm:$0xff] }
 0x22d   :  { %v10568_v62 = vpop.permute.xlu1 %3129  ;;  %v10577_v35 = vpop.permute.xlu0 %3140  ;;  %v1740_v53 = vmul.bf16 %v10566_v37, %v222_v46  ;;  %9298 = vmatprep.subr.bf16.mxu1 %v13509_v63  ;;  %v1745_v56 = vmul.bf16 %v10566_v37, %v282_v43 }
 0x22e   :  { %13545 = vst [vmem:[#allocation34_spill] sm:$0xff] %v10568_v62  ;;  %13549 = vst [vmem:[#allocation30_spill] sm:$0xff] %v10577_v35  ;;  %3833 = vperm.xlu1 %9335, %v13550_v60   ;;  %v1742_v60 = vmul.bf16 %v10566_v37, %v246_v47  ;;  %v1896_v35 = vpack.i.b16 %v1887_v38, %v1887_v38  ;;  %v13555_v62 = vld [vmem:[#allocation115_spill] sm:$0xff]  ;;  %v9370_v38 = vld [vmem:[#allocation2 + $0x10] sm:$0xf] }
 0x22f   :  { %5633 = vperm.xlu0 %9338, %v13455_v57   ;;  %13556 = vst [vmem:[#allocation112_spill] sm:$0xff] %v10597_v36  ;;  %v13558_v47 = vld [vmem:[#allocation43_spill] sm:$0xff]  ;;  %7477 = vmatpush1.bf16.msra.mxu0 %v9363_v45  ;;  %v8642_v43 = vcombine.high %v1740_v53, %v1741_v40 }
 0x230   :  { %v8643_v61 = vcombine.low %v1742_v60, %v1743_v44  ;;  %v294_v46 = vrot.slane %v13558_v47, %v10558_v50  ;;  %7478 = vmatprep.subr.bf16.mxu0 %v13509_v63  ;;  %9314 = vmatpush1.bf16.msra.mxu1 %v9363_v45  ;;  %v10610_v39 = vrot.slane %v1896_v35, %v10534_v52  ;;  %v13562_v47 = vld [vmem:[#allocation118_spill] sm:$0xff] }
 0x231   :  { %v10587_v51 = vpop.permute.xlu1 %3151  ;;  %v10593_v57 = vpop.permute.xlu0 %3162  ;;  %v8644_v33 = vcombine.high %v1742_v60, %v1743_v44  ;;  %9299 = vmatprep.subr.bf16.mxu1 %v13509_v63 }
 0x232   :  { %13553 = vst [vmem:[#allocation31_spill] sm:$0xff] %v10587_v51  ;;  %13554 = vst [vmem:[#allocation35_spill] sm:$0xff] %v10593_v57  ;;  %3855 = vperm.xlu1 %9335, %v13555_v62   ;;  %v306_v51 = vrot.slane %v13557_v42, %v10558_v50  ;;  %v1744_v62 = vmul.bf16 %v10566_v37, %v270_v41  ;;  %v8641_v42 = vcombine.low %v1740_v53, %v1741_v40  ;;  %v13563_v41 = vld [vmem:[#allocation46_spill] sm:$0xff]  ;;  %v13567_v40 = vld [vmem:[#allocation51_spill] sm:$0xff] }
 0x233   :  { %4973 = vperm.xlu0 %9338, %v9370_v38   ;;  %13560 = vst [vmem:[#allocation39_spill] sm:$0xff] %v10610_v39  ;;  %v9364_v38 = vld [vmem:[#allocation8 + $0x58] sm:$0xff]   ;;  %v330_v31 = vrot.slane %v13563_v41, %v10558_v50  ;;  %v10621_v45 = vadd.bf16 %v8643_v61, %v10597_v36  ;;  %v1746_v44 = vmul.bf16 %v10566_v37, %v294_v46 }
 0x234   :  { %v1747_v35 = vmul.bf16 %v10566_v37, %v306_v51  ;;  %7479 = vmatpush1.bf16.msra.mxu0 %v9364_v38  ;;  %v8645_v60 = vcombine.low %v1744_v62, %v1745_v56  ;;  %v342_v41 = vrot.slane %v13567_v40, %v10558_v50  ;;  %9315 = vmatpush1.bf16.msra.mxu1 %v9364_v38  ;;  %v13572_v46 = vld [vmem:[#allocation121_spill] sm:$0xff]  ;;  %v13573_v38 = vld [vmem:[#allocation54_spill] sm:$0xff] }
 0x235   :  { %v10606_v57 = vpop.permute.xlu1 %3173  ;;  %v10612_v34 = vpop.permute.xlu0 %3184  ;;  %13565 = vst [vmem:[#allocation42_spill] sm:$0xff] %v10621_v45  ;;  %7480 = vmatprep.subr.bf16.mxu0 %v13509_v63  ;;  %v10637_v51 = vadd.bf16 %v8641_v42, %v10597_v36  ;;  %9300 = vmatprep.subr.bf16.mxu1 %v13509_v63  ;;  %v1749_v40 = vmul.bf16 %v10566_v37, %v330_v31 }
 0x236   :  { %13559 = vst [vmem:[#allocation38_spill] sm:$0xff] %v10606_v57  ;;  %13561 = vst [vmem:[#allocation115_spill] sm:$0xff] %v10612_v34  ;;  %3877 = vperm.xlu1 %9335, %v13562_v47   ;;  %v13564_v57 = vld [vmem:[#allocation47_spill] sm:$0xff]  ;;  %v13566_v47 = vld [vmem:[#allocation50_spill] sm:$0xff]  ;;  %v378_v45 = vrot.slane %v13573_v38, %v10558_v50  ;;  %v8647_v42 = vcombine.low %v1746_v44, %v1747_v35 }
 0x237   :  { %v318_v32 = vrot.slane %v13564_v57, %v10558_v50  ;;  %5655 = vperm.xlu0 %9338, %v13459_v49   ;;  %v354_v53 = vrot.slane %v13566_v47, %v10558_v50  ;;  %v10634_v57 = vadd.bf16 %v8644_v33, %v10610_v39  ;;  %13570 = vst [vmem:[#allocation46_spill] sm:$0xff] %v10637_v51  ;;  %v9365_v47 = vld [vmem:[#allocation8 + $0x60] sm:$0xff]   ;;  %v13574_v33 = vld [vmem:[#allocation55_spill] sm:$0xff] }
 0x238   :  { %v8646_v49 = vcombine.high %v1744_v62, %v1745_v56  ;;  %v8648_v51 = vcombine.high %v1746_v44, %v1747_v35  ;;  %v9371_v56 = vld [vmem:[#allocation2 + $0x18] sm:$0xf]  ;;  %7481 = vmatpush1.bf16.msra.mxu0 %v9365_v47  ;;  %v10650_v62 = vadd.bf16 %v8642_v43, %v10610_v39  ;;  %9316 = vmatpush1.bf16.msra.mxu1 %v9365_v47  ;;  %v13579_v44 = vld [vmem:[#allocation58_spill] sm:$0xff]  ;;  %v13580_v43 = vld [vmem:[#allocation59_spill] sm:$0xff] }
 0x239   :  { %v10630_v34 = vpop.permute.xlu1 %3195  ;;  %13569 = vst [vmem:[#allocation118_spill] sm:$0xff] %v10634_v57  ;;  %v10639_v61 = vpop.permute.xlu0 %3206  ;;  %v366_v57 = vrot.slane %v13574_v33, %v10558_v50  ;;  %v1751_v31 = vmul.bf16 %v10566_v37, %v354_v53  ;;  %7482 = vmatprep.subr.bf16.mxu0 %v13509_v63  ;;  %v402_v38 = vrot.slane %v13579_v44, %v10558_v50  ;;  %v9366_v53 = vld [vmem:[#allocation8 + $0x68] sm:$0xff]  }
 0x23a   :  { %13568 = vst [vmem:[#allocation43_spill] sm:$0xff] %v10630_v34  ;;  %13571 = vst [vmem:[#allocation47_spill] sm:$0xff] %v10639_v61  ;;  %3899 = vperm.xlu1 %9335, %v13572_v46   ;;  %v1748_v34 = vmul.bf16 %v10566_v37, %v318_v32  ;;  %v10653_v46 = vadd.bf16 %v8645_v60, %v10597_v36  ;;  %v1750_v32 = vmul.bf16 %v10566_v37, %v342_v41 }
 0x23b   :  { %4995 = vperm.xlu0 %9338, %v9371_v56   ;;  %13575 = vst [vmem:[#allocation50_spill] sm:$0xff] %v10650_v62  ;;  %v10661_v35 = vadd.bf16 %v8646_v49, %v10610_v39  ;;  %v390_v33 = vrot.slane %v13580_v43, %v10558_v50  ;;  %v13582_v56 = vmov 2   ;;  %9301 = vmatprep.subr.bf16.mxu1 %v13509_v63  ;;  %v13583_v49 = vld [vmem:[#allocation62_spill] sm:$0xff]  ;;  %v9373_v62 = vld [vmem:[#allocation2 + $0x110] sm:$0xf] }
 0x23c   :  { %13576 = vst [vmem:[#allocation51_spill] sm:$0xff] %v10653_v46  ;;  %v8649_v41 = vcombine.low %v1748_v34, %v1749_v40  ;;  %v1752_v47 = vmul.bf16 %v10566_v37, %v366_v57  ;;  %v9372_v46 = vld [vmem:[#allocation2] sm:$0xf]  ;;  %v10676_v44 = vadd.bf16 %v8647_v42, %v10597_v36  ;;  %v10679_v43 = vadd.bf16 %v8648_v51, %v10610_v39 }
 0x23d   :  { %v10657_v61 = vpop.permute.xlu1 %3217  ;;  %13578 = vst [vmem:[#allocation54_spill] sm:$0xff] %v10661_v35  ;;  %v10667_v60 = vpop.permute.xlu0 %3228  ;;  %v426_v35 = vrot.slane %v13583_v49, %v10558_v50  ;;  %7483 = vmatpush1.bf16.msra.mxu0 %v9366_v53  ;;  %v8651_v29 = vcombine.low %v1750_v32, %v1751_v31  ;;  %v8652_v57 = vcombine.high %v1750_v32, %v1751_v31  ;;  %v13588_v51 = vld [vmem:[#allocation66_spill] sm:$0xff] }
 0x23e   :  { %13577 = vst [vmem:[#allocation121_spill] sm:$0xff] %v10657_v61  ;;  %13581 = vst [vmem:[#allocation55_spill] sm:$0xff] %v10667_v60  ;;  %9337 = vset.pattern.permute.xlu1 %v13582_v56  ;;  %v1753_v61 = vmul.bf16 %v10566_v37, %v378_v45  ;;  %v13586_v60 = vld [vmem:[#allocation63_spill] sm:$0xff]  ;;  %v8650_v45 = vcombine.high %v1748_v34, %v1749_v40  ;;  %7484 = vmatprep.subr.bf16.mxu0 %v13509_v63 }
 0x23f   :  { %4929 = vperm.xlu1 %9337, %v9372_v46   ;;  %13584 = vst [vmem:[#allocation58_spill] sm:$0xff] %v10676_v44  ;;  %13585 = vst [vmem:[#allocation59_spill] sm:$0xff] %v10679_v43  ;;  %v414_v56 = vrot.slane %v13586_v60, %v10558_v50  ;;  %5677 = vperm.xlu0 %9338, %v9373_v62   ;;  %v1755_v42 = vmul.bf16 %v10566_v37, %v402_v38  ;;  %v13589_v60 = vld [vmem:[#allocation67_spill] sm:$0xff]  ;;  %v9375_v44 = vld [vmem:[#allocation2 + $0x20] sm:$0xf] }
 0x240   :  { %9317 = vmatpush1.bf16.msra.mxu1 %v9366_v53  ;;  %v1754_v46 = vmul.bf16 %v10566_v37, %v390_v33  ;;  %v450_v49 = vrot.slane %v13588_v51, %v10558_v50  ;;  %v438_v43 = vrot.slane %v13589_v60, %v10558_v50  ;;  %v9367_v34 = vld [vmem:[#allocation8 + $0x70] sm:$0xff]   ;;  %v10696_v40 = vadd.bf16 %v8649_v41, %v10597_v36  ;;  %v13592_v51 = vld [vmem:[#allocation70_spill] sm:$0xff] }
 0x241   :  { %v10683_v30 = vpop.permute.xlu1 %3239  ;;  %v10692_v62 = vpop.permute.xlu0 %3250  ;;  %9302 = vmatprep.subr.bf16.mxu1 %v13509_v63  ;;  %v8653_v31 = vcombine.low %v1752_v47, %v1753_v61  ;;  %v8654_v32 = vcombine.high %v1752_v47, %v1753_v61  ;;  %v10699_v38 = vmul.bf16 %v10566_v37, %v426_v35  ;;  %v9374_v33 = vld [vmem:[#allocation2 + $0x8] sm:$0xf]  ;;  %v1756_v53 = vmul.bf16 %v10566_v37, %v414_v56 }
 0x242   :  { %13587 = vst [vmem:[#allocation62_spill] sm:$0xff] %v10683_v30  ;;  %13590 = vst [vmem:[#allocation63_spill] sm:$0xff] %v10692_v62  ;;  %v474_v60 = vrot.slane %v13592_v51, %v10558_v50  ;;  %v13593_v62 = vld [vmem:[#allocation71_spill] sm:$0xff]  ;;  %7485 = vmatpush1.bf16.msra.mxu0 %v9367_v34  ;;  %v10707_v41 = vadd.bf16 %v8650_v45, %v10610_v39  ;;  %v10710_v61 = vadd.bf16 %v8651_v29, %v10597_v36  ;;  %v9368_v45 = vld [vmem:[#allocation8 + $0x78] sm:$0xff]  }
 0x243   :  { %13591 = vst [vmem:[#allocation66_spill] sm:$0xff] %v10696_v40  ;;  %4951 = vperm.xlu1 %9337, %v9374_v33   ;;  %v462_v30 = vrot.slane %v13593_v62, %v10558_v50  ;;  %5017 = vperm.xlu0 %9338, %v9375_v44   ;;  %v10713_v35 = vadd.bf16 %v8652_v57, %v10610_v39 }
 0x244   :  { %13594 = vst [vmem:[#allocation67_spill] sm:$0xff] %v10707_v41  ;;  %13595 = vst [vmem:[#allocation70_spill] sm:$0xff] %v10710_v61  ;;  %7486 = vmatprep.subr.bf16.mxu0 %v13509_v63  ;;  %9318 = vmatpush1.bf16.msra.mxu1 %v9367_v34  ;;  %v8655_v56 = vcombine.low %v1754_v46, %v1755_v42  ;;  %v8656_v33 = vcombine.high %v1754_v46, %v1755_v42  ;;  %v13602_v42 = vld [vmem:[#allocation75_spill] sm:$0xff] }
 0x245   :  { %13596 = vst [vmem:[#allocation71_spill] sm:$0xff] %v10713_v35  ;;  %v10715_v47 = vpop.permute.xlu1 %3261  ;;  %v1759_v62 = vmul.bf16 %v10566_v37, %v450_v49  ;;  %v1758_v44 = vmul.bf16 %v10566_v37, %v438_v43  ;;  %v10720_v51 = vpop.permute.xlu0 %3272  ;;  %9303 = vmatprep.subr.bf16.mxu1 %v13509_v63  ;;  %v10724_v29 = vadd.bf16 %v8653_v31, %v10597_v36  ;;  %v9376_v49 = vld [vmem:[#allocation2 + $0xc] sm:$0xf]  ;;  %v9377_v35 = vld [vmem:[#allocation2 + $0x118] sm:$0xf]  ;;  %v13603_v31 = vld [vmem:[#allocation78_spill] sm:$0xff] }
 0x246   :  { %13597 = vst [vmem:[#allocation162_spill] sm:$0xff] %v10715_v47  ;;  %13598 = vst [vmem:[#allocation163_spill] sm:$0xff] %v10720_v51  ;;  %v10727_v57 = vadd.bf16 %v8654_v32, %v10610_v39  ;;  %v13601_v47 = vld [vmem:[#allocation74_spill] sm:$0xff]  ;;  %v486_v46 = vrot.slane %v13602_v42, %v10558_v50  ;;  %v8657_v43 = vcombine.low %v1756_v53, %v10699_v38  ;;  %7487 = vmatpush1.bf16.msra.mxu0 %v9368_v45 }
 0x247   :  { %13599 = vst [vmem:[#allocation164_spill] sm:$0xff] %v10724_v29  ;;  %v498_v34 = vrot.slane %v13601_v47, %v10558_v50  ;;  %4962 = vperm.xlu1 %9337, %v9376_v49   ;;  %v1761_v51 = vmul.bf16 %v10566_v37, %v474_v60  ;;  %v1760_v63 = vmul.bf16 %v10566_v37, %v462_v30  ;;  %v13605_v29 = vld [vmem:[#allocation82_spill] sm:$0xff]  ;;  %v13606_v49 = vld [vmem:[#allocation83_spill] sm:$0xff] }
 0x248   :  { %13600 = vst [vmem:[#allocation165_spill] sm:$0xff] %v10727_v57  ;;  %5699 = vperm.xlu0 %9338, %v9377_v35   ;;  %v522_v32 = vrot.slane %v13603_v31, %v10558_v50  ;;  %v13604_v57 = vld [vmem:[#allocation79_spill] sm:$0xff]  ;;  %v546_v42 = vrot.slane %v13605_v29, %v10558_v50  ;;  %v534_v61 = vrot.slane %v13606_v49, %v10558_v50  ;;  %v13611_v49 = vld [vmem:[#allocation86_spill] sm:$0xff] }
 0x249   :  { %v510_v47 = vrot.slane %v13604_v57, %v10558_v50  ;;  %v10744_v41 = vpop.permute.xlu1 %3283  ;;  %9319 = vmatpush1.bf16.msra.mxu1 %v9368_v45  ;;  %v10747_v30 = vadd.bf16 %v8655_v56, %v10597_v36  ;;  %v10750_v60 = vadd.bf16 %v8656_v33, %v10610_v39  ;;  %v8658_v35 = vcombine.high %v1756_v53, %v10699_v38  ;;  %v10753_v40 = vpop.permute.xlu0 %3294  ;;  %v13612_v45 = vld [vmem:[#allocation87_spill] sm:$0xff]  ;;  %v9378_v56 = vld [vmem:[#allocation2 + $0x104] sm:$0xf] }
 0x24a   :  { %13607 = vst [vmem:[#allocation74_spill] sm:$0xff] %v10744_v41  ;;  %v8659_v31 = vcombine.low %v1758_v44, %v1759_v62  ;;  %13610 = vst [vmem:[#allocation79_spill] sm:$0xff] %v10753_v40  ;;  %v1763_v57 = vmul.bf16 %v10566_v37, %v498_v34  ;;  %v1762_v29 = vmul.bf16 %v10566_v37, %v486_v46 }
 0x24b   :  { %13608 = vst [vmem:[#allocation75_spill] sm:$0xff] %v10747_v30  ;;  %13609 = vst [vmem:[#allocation78_spill] sm:$0xff] %v10750_v60  ;;  %v570_v27 = vrot.slane %v13611_v49, %v10558_v50  ;;  %v558_v41 = vrot.slane %v13612_v45, %v10558_v50  ;;  %5644 = vperm.xlu1 %9337, %v9378_v56   ;;  %v10762_v33 = vadd.bf16 %v8657_v43, %v10597_v36  ;;  %v9379_v30 = vld [vmem:[#allocation2 + $0x28] sm:$0xf]  ;;  %v9380_v56 = vld [vmem:[#allocation2 + $0x14] sm:$0xf] }
 0x24c   :  { %v8660_v60 = vcombine.high %v1758_v44, %v1759_v62  ;;  %v8661_v38 = vcombine.low %v1760_v63, %v1761_v51  ;;  %v8662_v53 = vcombine.high %v1760_v63, %v1761_v51  ;;  %5039 = vperm.xlu0 %9338, %v9379_v30   ;;  %v1765_v34 = vmul.bf16 %v10566_v37, %v522_v32  ;;  %v13617_v63 = vld [vmem:[#allocation90_spill] sm:$0xff]  ;;  %v13618_v44 = vld [vmem:[#allocation91_spill] sm:$0xff] }
 0x24d   :  { %13613 = vst [vmem:[#allocation82_spill] sm:$0xff] %v10762_v33  ;;  %v1764_v46 = vmul.bf16 %v10566_v37, %v510_v47  ;;  %v1767_v40 = vmul.bf16 %v10566_v37, %v546_v42  ;;  %v1766_v49 = vmul.bf16 %v10566_v37, %v534_v61  ;;  %v10768_v28 = vpop.permute.xlu1 %3305  ;;  %v10771_v45 = vadd.bf16 %v8658_v35, %v10610_v39  ;;  %v10780_v32 = vpop.permute.xlu0 %3316  ;;  %v9383_v33 = vld [vmem:[#allocation2 + $0x30] sm:$0xf] }
 0x24e   :  { %13614 = vst [vmem:[#allocation83_spill] sm:$0xff] %v10768_v28  ;;  %v10774_v43 = vadd.bf16 %v8659_v31, %v10597_v36  ;;  %v594_v62 = vrot.slane %v13617_v63, %v10558_v50  ;;  %v582_v51 = vrot.slane %v13618_v44, %v10558_v50  ;;  %13619 = vst [vmem:[#allocation90_spill] sm:$0xff] %v10780_v32  ;;  %v13622_v63 = vld [vmem:[#allocation94_spill] sm:$0xff]  ;;  %v13623_v44 = vld [vmem:[#allocation95_spill] sm:$0xff] }
 0x24f   :  { %13615 = vst [vmem:[#allocation86_spill] sm:$0xff] %v10771_v45  ;;  %v8663_v47 = vcombine.low %v1762_v29, %v1763_v57  ;;  %v8664_v42 = vcombine.high %v1762_v29, %v1763_v57  ;;  %v1769_v61 = vmul.bf16 %v10566_v37, %v570_v27  ;;  %v1768_v30 = vmul.bf16 %v10566_v37, %v558_v41 }
 0x250   :  { %13616 = vst [vmem:[#allocation87_spill] sm:$0xff] %v10774_v43  ;;  %4984 = vperm.xlu1 %9337, %v9380_v56   ;;  %v10785_v35 = vadd.bf16 %v8660_v60, %v10610_v39  ;;  %v10788_v31 = vadd.bf16 %v8661_v38, %v10597_v36  ;;  %v618_v28 = vrot.slane %v13622_v63, %v10558_v50  ;;  %v9381_v43 = vld [vmem:[#allocation2 + $0x120] sm:$0xf] }
 0x251   :  { %v606_v32 = vrot.slane %v13623_v44, %v10558_v50  ;;  %5721 = vperm.xlu0 %9338, %v9381_v43   ;;  %v10795_v27 = vadd.bf16 %v8662_v53, %v10610_v39  ;;  %v8665_v41 = vcombine.low %v1764_v46, %v1765_v34  ;;  %v8666_v57 = vcombine.high %v1764_v46, %v1765_v34  ;;  %v10797_v56 = vpop.permute.xlu1 %3327  ;;  %v10805_v45 = vpop.permute.xlu0 %3338 }
 0x252   :  { %13620 = vst [vmem:[#allocation91_spill] sm:$0xff] %v10785_v35  ;;  %13621 = vst [vmem:[#allocation166_spill] sm:$0xff] %v10788_v31  ;;  %v8667_v29 = vcombine.low %v1766_v49, %v1767_v40  ;;  %v1771_v60 = vmul.bf16 %v10566_v37, %v594_v62  ;;  %v1770_v38 = vmul.bf16 %v10566_v37, %v582_v51  ;;  %v13626_v31 = vld [vmem:[#allocation98_spill] sm:$0xff]  ;;  %v13627_v35 = vld [vmem:[#allocation99_spill] sm:$0xff] }
 0x253   :  { %13624 = vst [vmem:[#allocation94_spill] sm:$0xff] %v10795_v27  ;;  %13625 = vst [vmem:[#allocation95_spill] sm:$0xff] %v10797_v56  ;;  %v642_v63 = vrot.slane %v13626_v31, %v10558_v50  ;;  %v630_v44 = vrot.slane %v13627_v35, %v10558_v50  ;;  %v10808_v53 = vadd.bf16 %v8663_v47, %v10597_v36  ;;  %v9382_v56 = vld [vmem:[#allocation2 + $0x10c] sm:$0xf]  ;;  %v13631_v31 = vld [vmem:[#allocation102_spill] sm:$0xff] }
 0x254   :  { %13628 = vst [vmem:[#allocation98_spill] sm:$0xff] %v10805_v45  ;;  %v10811_v34 = vadd.bf16 %v8664_v42, %v10610_v39  ;;  %v8668_v46 = vcombine.high %v1766_v49, %v1767_v40  ;;  %v8669_v43 = vcombine.low %v1768_v30, %v1769_v61  ;;  %5666 = vperm.xlu1 %9337, %v9382_v56   ;;  %v13632_v35 = vld [vmem:[#allocation103_spill] sm:$0xff] }
 0x255   :  { %13629 = vst [vmem:[#allocation99_spill] sm:$0xff] %v10808_v53  ;;  %v1773_v62 = vmul.bf16 %v10566_v37, %v618_v28  ;;  %v1772_v51 = vmul.bf16 %v10566_v37, %v606_v32  ;;  %v666_v27 = vrot.slane %v13631_v31, %v10558_v50  ;;  %v654_v45 = vrot.slane %v13632_v35, %v10558_v50  ;;  %v10828_v42 = vpop.permute.xlu1 %3349 }
 0x256   :  { %13630 = vst [vmem:[#allocation167_spill] sm:$0xff] %v10811_v34  ;;  %5061 = vperm.xlu0 %9338, %v9383_v33   ;;  %v10820_v47 = vadd.bf16 %v8665_v41, %v10597_v36  ;;  %v10823_v40 = vadd.bf16 %v8666_v57, %v10610_v39  ;;  %v10826_v49 = vadd.bf16 %v8667_v29, %v10597_v36  ;;  %13636 = vst [vmem:[#allocation169_spill] sm:$0xff] %v10828_v42  ;;  %v10832_v34 = vpop.permute.xlu0 %3360  ;;  %v13640_v57 = vld [vmem:[#allocation106_spill] sm:$0xff]  ;;  %v9384_v42 = vld [vmem:[#allocation2 + $0x1c] sm:$0xf] }
 0x257   :  { %v8670_v28 = vcombine.high %v1768_v30, %v1769_v61  ;;  %v8671_v32 = vcombine.low %v1770_v38, %v1771_v60  ;;  %v8672_v56 = vcombine.high %v1770_v38, %v1771_v60  ;;  %v1775_v31 = vmul.bf16 %v10566_v37, %v642_v63  ;;  %13637 = vst [vmem:[#allocation170_spill] sm:$0xff] %v10832_v34  ;;  %v13641_v61 = vld [vmem:[#allocation107_spill] sm:$0xff] }
 0x258   :  { %13633 = vst [vmem:[#allocation102_spill] sm:$0xff] %v10820_v47  ;;  %13634 = vst [vmem:[#allocation103_spill] sm:$0xff] %v10823_v40  ;;  %v1774_v35 = vmul.bf16 %v10566_v37, %v630_v44  ;;  %v10835_v33 = vadd.bf16 %v8668_v46, %v10610_v39  ;;  %v10838_v41 = vadd.bf16 %v8669_v43, %v10597_v36  ;;  %5006 = vperm.xlu1 %9337, %v9384_v42   ;;  %v9385_v34 = vld [vmem:[#allocation2 + $0x128] sm:$0xf]  ;;  %v13642_v46 = vld [vmem:[#allocation110_spill] sm:$0xff] }
 0x259   :  { %13635 = vst [vmem:[#allocation168_spill] sm:$0xff] %v10826_v49  ;;  %v690_v29 = vrot.slane %v13640_v57, %v10558_v50  ;;  %v678_v30 = vrot.slane %v13641_v61, %v10558_v50  ;;  %v8673_v60 = vcombine.low %v1772_v51, %v1773_v62  ;;  %v8674_v38 = vcombine.high %v1772_v51, %v1773_v62  ;;  %v13644_v57 = vld [vmem:[#allocation113_spill] sm:$0xff]  ;;  %v13645_v61 = vld [vmem:[#allocation114_spill] sm:$0xff]  ;;  %v10854_v40 = vpop.permute.xlu1 %3371 }
 0x25a   :  { %13638 = vst [vmem:[#allocation171_spill] sm:$0xff] %v10835_v33  ;;  %13639 = vst [vmem:[#allocation172_spill] sm:$0xff] %v10838_v41  ;;  %v1777_v63 = vmul.bf16 %v10566_v37, %v666_v27  ;;  %v1776_v44 = vmul.bf16 %v10566_v37, %v654_v45  ;;  %5743 = vperm.xlu0 %9338, %v9385_v34   ;;  %v714_v43 = vrot.slane %v13642_v46, %v10558_v50  ;;  %v13643_v41 = vld [vmem:[#allocation111_spill] sm:$0xff]  ;;  %v10865_v51 = vpop.permute.xlu0 %3382 }
 0x25b   :  { %v702_v33 = vrot.slane %v13643_v41, %v10558_v50  ;;  %v738_v49 = vrot.slane %v13644_v57, %v10558_v50  ;;  %v726_v42 = vrot.slane %v13645_v61, %v10558_v50  ;;  %13646 = vst [vmem:[#allocation106_spill] sm:$0xff] %v10854_v40  ;;  %v10857_v27 = vadd.bf16 %v8670_v28, %v10610_v39  ;;  %v13651_v57 = vld [vmem:[#allocation116_spill] sm:$0xff]  ;;  %v13652_v40 = vld [vmem:[#allocation117_spill] sm:$0xff] }
 0x25c   :  { %v10860_v45 = vadd.bf16 %v8671_v32, %v10597_v36  ;;  %v10863_v34 = vadd.bf16 %v8672_v56, %v10610_v39  ;;  %v8675_v62 = vcombine.low %v1774_v35, %v1775_v31  ;;  %13650 = vst [vmem:[#allocation113_spill] sm:$0xff] %v10865_v51  ;;  %v1779_v41 = vmul.bf16 %v10566_v37, %v690_v29 }
 0x25d   :  { %13647 = vst [vmem:[#allocation107_spill] sm:$0xff] %v10857_v27  ;;  %v1778_v46 = vmul.bf16 %v10566_v37, %v678_v30  ;;  %v762_v61 = vrot.slane %v13651_v57, %v10558_v50  ;;  %v750_v28 = vrot.slane %v13652_v40, %v10558_v50  ;;  %v9386_v27 = vld [vmem:[#allocation2 + $0x114] sm:$0xf]  ;;  %v10874_v32 = vadd.bf16 %v8673_v60, %v10597_v36  ;;  %v10883_v47 = vpop.permute.xlu1 %3393 }
 0x25e   :  { %13648 = vst [vmem:[#allocation110_spill] sm:$0xff] %v10860_v45  ;;  %13649 = vst [vmem:[#allocation111_spill] sm:$0xff] %v10863_v34  ;;  %5688 = vperm.xlu1 %9337, %v9386_v27   ;;  %v10877_v56 = vadd.bf16 %v8674_v38, %v10610_v39  ;;  %v8676_v34 = vcombine.high %v1774_v35, %v1775_v31  ;;  %v8677_v51 = vcombine.low %v1776_v44, %v1777_v63  ;;  %v9387_v45 = vld [vmem:[#allocation2 + $0x38] sm:$0xf]  ;;  %v13657_v38 = vld [vmem:[#allocation119_spill] sm:$0xff] }
 0x25f   :  { %13653 = vst [vmem:[#allocation114_spill] sm:$0xff] %v10874_v32  ;;  %5083 = vperm.xlu0 %9338, %v9387_v45   ;;  %v1781_v29 = vmul.bf16 %v10566_v37, %v714_v43  ;;  %v1780_v30 = vmul.bf16 %v10566_v37, %v702_v33  ;;  %v1783_v57 = vmul.bf16 %v10566_v37, %v738_v49  ;;  %13655 = vst [vmem:[#allocation117_spill] sm:$0xff] %v10883_v47  ;;  %v13658_v35 = vld [vmem:[#allocation120_spill] sm:$0xff]  ;;  %v9388_v32 = vld [vmem:[#allocation2 + $0x24] sm:$0xf] }
 0x260   :  { %13654 = vst [vmem:[#allocation116_spill] sm:$0xff] %v10877_v56  ;;  %v1782_v40 = vmul.bf16 %v10566_v37, %v726_v42  ;;  %v10886_v60 = vadd.bf16 %v8675_v62, %v10597_v36  ;;  %v8678_v27 = vcombine.high %v1776_v44, %v1777_v63  ;;  %v786_v31 = vrot.slane %v13657_v38, %v10558_v50  ;;  %v10892_v56 = vpop.permute.xlu0 %3404  ;;  %v13662_v44 = vld [vmem:[#allocation122_spill] sm:$0xff] }
 0x261   :  { %v774_v45 = vrot.slane %v13658_v35, %v10558_v50  ;;  %13659 = vst [vmem:[#allocation119_spill] sm:$0xff] %v10892_v56  ;;  %v8679_v43 = vcombine.low %v1778_v46, %v1779_v41  ;;  %v8680_v33 = vcombine.high %v1778_v46, %v1779_v41  ;;  %v1785_v49 = vmul.bf16 %v10566_v37, %v762_v61  ;;  %v13663_v35 = vld [vmem:[#allocation123_spill] sm:$0xff]  ;;  %v10906_v47 = vpop.permute.xlu1 %3415 }
 0x262   :  { %13656 = vst [vmem:[#allocation173_spill] sm:$0xff] %v10886_v60  ;;  %v1784_v42 = vmul.bf16 %v10566_v37, %v750_v28  ;;  %5028 = vperm.xlu1 %9337, %v9388_v32   ;;  %v10897_v62 = vadd.bf16 %v8676_v34, %v10610_v39  ;;  %v10900_v63 = vadd.bf16 %v8677_v51, %v10597_v36  ;;  %v9389_v60 = vld [vmem:[#allocation2 + $0x130] sm:$0xf] }
 0x263   :  { %v810_v38 = vrot.slane %v13662_v44, %v10558_v50  ;;  %v798_v56 = vrot.slane %v13663_v35, %v10558_v50  ;;  %5765 = vperm.xlu0 %9338, %v9389_v60   ;;  %v8681_v41 = vcombine.low %v1780_v30, %v1781_v29  ;;  %v8682_v46 = vcombine.high %v1780_v30, %v1781_v29  ;;  %v13664_v51 = vld [vmem:[#allocation124_spill] sm:$0xff]  ;;  %v13665_v44 = vld [vmem:[#allocation125_spill] sm:$0xff]  ;;  %v13669_v35 = vld [vmem:[#allocation126_spill] sm:$0xff] }
 0x264   :  { %13660 = vst [vmem:[#allocation120_spill] sm:$0xff] %v10897_v62  ;;  %13661 = vst [vmem:[#allocation174_spill] sm:$0xff] %v10900_v63  ;;  %v8683_v61 = vcombine.low %v1782_v40, %v1783_v57  ;;  %v8684_v28 = vcombine.high %v1782_v40, %v1783_v57  ;;  %v1787_v34 = vmul.bf16 %v10566_v37, %v786_v31  ;;  %v10914_v53 = vpop.permute.xlu0 %3426  ;;  %v9390_v40 = vld [vmem:[#allocation2 + $0x11c] sm:$0xf] }
 0x265   :  { %v1786_v32 = vmul.bf16 %v10566_v37, %v774_v45  ;;  %v834_v63 = vrot.slane %v13664_v51, %v10558_v50  ;;  %v822_v62 = vrot.slane %v13665_v44, %v10558_v50  ;;  %v10917_v60 = vadd.bf16 %v8678_v27, %v10610_v39  ;;  %v13670_v44 = vld [vmem:[#allocation127_spill] sm:$0xff] }
 0x266   :  { %v10920_v29 = vadd.bf16 %v8679_v43, %v10597_v36  ;;  %v10923_v30 = vadd.bf16 %v8680_v33, %v10610_v39  ;;  %v8685_v57 = vcombine.low %v1784_v42, %v1785_v49  ;;  %5710 = vperm.xlu1 %9337, %v9390_v40   ;;  %v1789_v31 = vmul.bf16 %v10566_v37, %v810_v38 }
 0x267   :  { %13666 = vst [vmem:[#allocation122_spill] sm:$0xff] %v10917_v60  ;;  %v1788_v45 = vmul.bf16 %v10566_v37, %v798_v56  ;;  %v858_v51 = vrot.slane %v13669_v35, %v10558_v50  ;;  %v846_v27 = vrot.slane %v13670_v44, %v10558_v50  ;;  %v9391_v60 = vld [vmem:[#allocation2 + $0x40] sm:$0xf]  ;;  %v10932_v43 = vadd.bf16 %v8681_v41, %v10597_v36  ;;  %v10943_v56 = vpop.permute.xlu1 %3437 }
 0x268   :  { %13667 = vst [vmem:[#allocation123_spill] sm:$0xff] %v10920_v29  ;;  %13668 = vst [vmem:[#allocation124_spill] sm:$0xff] %v10923_v30  ;;  %5105 = vperm.xlu0 %9338, %v9391_v60   ;;  %v10935_v33 = vadd.bf16 %v8682_v46, %v10610_v39  ;;  %v10938_v40 = vadd.bf16 %v8683_v61, %v10597_v36  ;;  %v10941_v38 = vadd.bf16 %v8684_v28, %v10610_v39  ;;  %v10947_v29 = vpop.permute.xlu0 %3448  ;;  %v9392_v28 = vld [vmem:[#allocation2 + $0x2c] sm:$0xf] }
 0x269   :  { %13671 = vst [vmem:[#allocation125_spill] sm:$0xff] %v10932_v43  ;;  %v8686_v35 = vcombine.high %v1784_v42, %v1785_v49  ;;  %v8687_v30 = vcombine.low %v1786_v32, %v1787_v34  ;;  %v1791_v44 = vmul.bf16 %v10566_v37, %v834_v63  ;;  %v1790_v60 = vmul.bf16 %v10566_v37, %v822_v62  ;;  %v9393_v62 = vld [vmem:[#allocation2 + $0x138] sm:$0xf]  ;;  %v9407_v43 = vld [vmem:[#allocation2 + $0x60] sm:$0xf] }
 0x26a   :  { %13672 = vst [vmem:[#allocation126_spill] sm:$0xff] %v10935_v33  ;;  %13673 = vst [vmem:[#allocation127_spill] sm:$0xff] %v10938_v40  ;;  %v10950_v41 = vadd.bf16 %v8685_v57, %v10597_v36  ;;  %v8688_v46 = vcombine.high %v1786_v32, %v1787_v34  ;;  %v4030_v61 = vshrl.u32 %v10509_v58, 16  ;;  %v4037_v40 = vshrl.u32 %v10519_v48, 16  ;;  %5050 = vperm.xlu1 %9337, %v9392_v28   ;;  %v9394_v28 = vld [vmem:[#allocation2 + $0x124] sm:$0xf] }
 0x26b   :  { %13674 = vst [vmem:[#allocation175_spill] sm:$0xff] %v10941_v38  ;;  %v8689_v38 = vcombine.low %v1788_v45, %v1789_v31  ;;  %v8690_v33 = vcombine.high %v1788_v45, %v1789_v31  ;;  %v10955_v49 = vmul.bf16 %v10566_v37, %v858_v51  ;;  %v10958_v42 = vmul.bf16 %v10566_v37, %v846_v27  ;;  %v10968_v32 = vpop.permute.xlu1 %3459 }
 0x26c   :  { %13675 = vst [vmem:[#allocation176_spill] sm:$0xff] %v10950_v41  ;;  %5787 = vperm.xlu0 %9338, %v9393_v62   ;;  %v1002_v63 = vrot.slane %v10209_v0, %v10558_v50  ;;  %v990_v58 = vrot.slane %v10211_v54, %v10558_v50  ;;  %v1026_v48 = vrot.slane %v10215_v55, %v10558_v50  ;;  %v10976_v0 = vpop.permute.xlu0 %3470 }
 0x26d   :  { %13676 = vst [vmem:[#allocation177_spill] sm:$0xff] %v10955_v49  ;;  %13677 = vst [vmem:[#allocation178_spill] sm:$0xff] %v10958_v42  ;;  %v1014_v34 = vrot.slane %v10217_v2, %v10558_v50  ;;  %v10971_v57 = vadd.bf16 %v8686_v35, %v10610_v39  ;;  %v10974_v31 = vadd.bf16 %v8687_v30, %v10597_v36 }
 0x26e   :  { %v8691_v45 = vcombine.low %v1790_v60, %v1791_v44  ;;  %v8692_v51 = vcombine.high %v1790_v60, %v1791_v44  ;;  %v1050_v54 = vrot.slane %v10221_v59, %v10558_v50  ;;  %v1038_v55 = vrot.slane %v10223_v1, %v10558_v50  ;;  %5732 = vperm.xlu1 %9337, %v9394_v28   ;;  %v9395_v59 = vld [vmem:[#allocation2 + $0x48] sm:$0xf] }
 0x26f   :  { %13678 = vst [vmem:[#allocation179_spill] sm:$0xff] %v10971_v57  ;;  %13679 = vst [vmem:[#allocation180_spill] sm:$0xff] %v10974_v31  ;;  %v4031_v27 = vpack.i.b16 %v4030_v61, %v4030_v61  ;;  %v4038_v2 = vpack.i.b16 %v4037_v40, %v4037_v40  ;;  %v10983_v35 = vadd.bf16 %v8688_v46, %v10610_v39  ;;  %v10997_v62 = vpop.permute.xlu1 %3481  ;;  %v9403_v31 = vld [vmem:[#allocation2 + $0x58] sm:$0xf] }
 0x270   :  { %v10986_v30 = vadd.bf16 %v8689_v38, %v10597_v36  ;;  %v10989_v44 = vadd.bf16 %v8690_v33, %v10610_v39  ;;  %v8693_v60 = vcombine.low %v10958_v42, %v10955_v49  ;;  %5127 = vperm.xlu0 %9338, %v9395_v59   ;;  %v1805_v1 = vmul.bf16 %v10566_v37, %v1002_v63  ;;  %v11009_v59 = vpop.permute.xlu0 %3492 }
 0x271   :  { %13680 = vst [vmem:[#allocation181_spill] sm:$0xff] %v10983_v35  ;;  %v1804_v40 = vmul.bf16 %v10566_v37, %v990_v58  ;;  %v1807_v61 = vmul.bf16 %v10566_v37, %v1026_v48  ;;  %v1806_v46 = vmul.bf16 %v10566_v37, %v1014_v34  ;;  %v11000_v38 = vadd.bf16 %v8691_v45, %v10597_v36 }
 0x272   :  { %13681 = vst [vmem:[#allocation182_spill] sm:$0xff] %v10986_v30  ;;  %13682 = vst [vmem:[#allocation183_spill] sm:$0xff] %v10989_v44  ;;  %v11003_v33 = vadd.bf16 %v8692_v51, %v10610_v39  ;;  %v1074_v28 = vrot.slane %v10227_v4, %v10558_v50  ;;  %v1062_v63 = vrot.slane %v10229_v3, %v10558_v50  ;;  %v9397_v30 = vld [vmem:[#allocation2 + $0x140] sm:$0xf]  ;;  %v9400_v3 = vld [vmem:[#allocation2 + $0x3c] sm:$0xf] }
 0x273   :  { %13683 = vst [vmem:[#allocation184_spill] sm:$0xff] %v11000_v38  ;;  %13685 = vst [vmem:[#allocation186_spill] sm:$0xff] %v11009_v59  ;;  %v1809_v58 = vmul.bf16 %v10566_v37, %v1050_v54  ;;  %v1808_v48 = vmul.bf16 %v10566_v37, %v1038_v55  ;;  %v4036_v34 = vrot.slane %v4031_v27, %v10534_v52  ;;  %v9396_v38 = vld [vmem:[#allocation2 + $0x34] sm:$0xf] }
 0x274   :  { %13684 = vst [vmem:[#allocation185_spill] sm:$0xff] %v11003_v33  ;;  %v4043_v45 = vrot.slane %v4038_v2, %v10534_v52  ;;  %5072 = vperm.xlu1 %9337, %v9396_v38   ;;  %v11018_v4 = vadd.bf16 %v8693_v60, %v10597_v36  ;;  %5809 = vperm.xlu0 %9338, %v9397_v30   ;;  %v11024_v2 = vpop.permute.xlu1 %3503 }
 0x275   :  { %v8705_v55 = vcombine.low %v1804_v40, %v1805_v1  ;;  %v8706_v27 = vcombine.high %v1804_v40, %v1805_v1  ;;  %v8707_v35 = vcombine.low %v1806_v46, %v1807_v61  ;;  %v8708_v52 = vcombine.high %v1806_v46, %v1807_v61  ;;  %13689 = vst [vmem:[#allocation188_spill] sm:$0xff] %v11024_v2  ;;  %v9398_v61 = vld [vmem:[#allocation2 + $0x12c] sm:$0xf] }
 0x276   :  { %13686 = vst [vmem:[#allocation187_spill] sm:$0xff] %v11018_v4  ;;  %v1811_v38 = vmul.bf16 %v10566_v37, %v1074_v28  ;;  %v1810_v51 = vmul.bf16 %v10566_v37, %v1062_v63  ;;  %v1098_v60 = vrot.slane %v10233_v6, %v10558_v50  ;;  %v1086_v33 = vrot.slane %v10235_v5, %v10558_v50  ;;  %v11032_v4 = vpop.permute.xlu0 %3514 }
 0x277   :  { %13690 = vst [vmem:[#allocation189_spill] sm:$0xff] %v11032_v4  ;;  %v8709_v54 = vcombine.low %v1808_v48, %v1809_v58  ;;  %v1122_v30 = vrot.slane %v10239_v8, %v10558_v50  ;;  %v1110_v1 = vrot.slane %v10241_v7, %v10558_v50  ;;  %v11038_v40 = vcombine.low %v4036_v34, %v4043_v45  ;;  %v9399_v8 = vld [vmem:[#allocation2 + $0x50] sm:$0xf] }
 0x278   :  { %5754 = vperm.xlu1 %9337, %v9398_v61   ;;  %v1146_v46 = vrot.slane %v10245_v10, %v10558_v50  ;;  %v1134_v6 = vrot.slane %v10247_v9, %v10558_v50  ;;  %v1170_v5 = vrot.slane %v10251_v12, %v10558_v50  ;;  %v1158_v28 = vrot.slane %v10253_v11, %v10558_v50  ;;  %v11057_v10 = vpop.permute.xlu1 %3525 }
 0x279   :  { %5149 = vperm.xlu0 %9338, %v9399_v8   ;;  %v11049_v7 = vadd.bf16 %v8705_v55, %v10597_v36  ;;  %v11052_v63 = vadd.bf16 %v8707_v35, %v10597_v36  ;;  %v11055_v34 = vadd.bf16 %v8708_v52, %v10610_v39  ;;  %13691 = vst [vmem:[#allocation190_spill] sm:$0xff] %v11057_v10  ;;  %v13827_v10 = vld [vmem:[#allocation78_spill] sm:$0xff] }
 0x27a   :  { %v11060_v9 = vadd.bf16 %v8706_v27, %v10610_v39  ;;  %v8710_v12 = vcombine.high %v1808_v48, %v1809_v58  ;;  %v8711_v45 = vcombine.low %v1810_v51, %v1811_v38  ;;  %v1813_v11 = vmul.bf16 %v10566_v37, %v1098_v60  ;;  %v11064_v8 = vpop.permute.xlu0 %3536  ;;  %v9401_v60 = vld [vmem:[#allocation2 + $0x148] sm:$0xf] }
 0x27b   :  { %v1812_v61 = vmul.bf16 %v10566_v37, %v1086_v33  ;;  %13692 = vst [vmem:[#allocation191_spill] sm:$0xff] %v11064_v8  ;;  %v11067_v55 = vadd.bf16 %v8709_v54, %v10597_v36  ;;  %v8712_v35 = vcombine.high %v1810_v51, %v1811_v38  ;;  %v1815_v52 = vmul.bf16 %v10566_v37, %v1122_v30 }
 0x27c   :  { %v1814_v44 = vmul.bf16 %v10566_v37, %v1110_v1  ;;  %5094 = vperm.xlu1 %9337, %v9400_v3   ;;  %v1817_v27 = vmul.bf16 %v10566_v37, %v1146_v46  ;;  %v1816_v58 = vmul.bf16 %v10566_v37, %v1134_v6  ;;  %v1819_v48 = vmul.bf16 %v10566_v37, %v1170_v5  ;;  %v11083_v30 = vpop.permute.xlu1 %3547 }
 0x27d   :  { %v1818_v33 = vmul.bf16 %v10566_v37, %v1158_v28  ;;  %5831 = vperm.xlu0 %9338, %v9401_v60   ;;  %v1194_v54 = vrot.slane %v10257_v14, %v10558_v50  ;;  %v1182_v51 = vrot.slane %v10259_v13, %v10558_v50  ;;  %v1218_v38 = vrot.slane %v10263_v16, %v10558_v50  ;;  %v9402_v60 = vld [vmem:[#allocation2 + $0x134] sm:$0xf] }
 0x27e   :  { %v1206_v3 = vrot.slane %v10265_v15, %v10558_v50  ;;  %13693 = vst [vmem:[#allocation192_spill] sm:$0xff] %v11083_v30  ;;  %v11086_v1 = vadd.bf16 %v8710_v12, %v10610_v39  ;;  %v11089_v46 = vadd.bf16 %v8711_v45, %v10597_v36  ;;  %v8713_v6 = vcombine.low %v1812_v61, %v1813_v11  ;;  %v11091_v14 = vpop.permute.xlu0 %3558 }
 0x27f   :  { %v8714_v5 = vcombine.high %v1812_v61, %v1813_v11  ;;  %13694 = vst [vmem:[#allocation193_spill] sm:$0xff] %v11091_v14  ;;  %v11094_v13 = vadd.bf16 %v8712_v35, %v10610_v39  ;;  %v8715_v28 = vcombine.low %v1814_v44, %v1815_v52  ;;  %v1242_v16 = vrot.slane %v10269_v18, %v10558_v50 }
 0x280   :  { %v1230_v15 = vrot.slane %v10271_v17, %v10558_v50  ;;  %5776 = vperm.xlu1 %9337, %v9402_v60   ;;  %v8716_v12 = vcombine.high %v1814_v44, %v1815_v52  ;;  %v8717_v49 = vcombine.low %v1816_v58, %v1817_v27  ;;  %v8718_v45 = vcombine.high %v1816_v58, %v1817_v27  ;;  %v11104_v18 = vpop.permute.xlu1 %3569 }
 0x281   :  { %v8719_v42 = vcombine.low %v1818_v33, %v1819_v48  ;;  %5171 = vperm.xlu0 %9338, %v9403_v31   ;;  %v1821_v11 = vmul.bf16 %v10566_v37, %v1194_v54  ;;  %v1820_v61 = vmul.bf16 %v10566_v37, %v1182_v51  ;;  %v1823_v35 = vmul.bf16 %v10566_v37, %v1218_v38 }
 0x282   :  { %v1822_v57 = vmul.bf16 %v10566_v37, %v1206_v3  ;;  %13695 = vst [vmem:[#allocation194_spill] sm:$0xff] %v11104_v18  ;;  %v11107_v17 = vadd.bf16 %v8713_v6, %v10597_v36  ;;  %v11110_v44 = vadd.bf16 %v8714_v5, %v10610_v39  ;;  %v1266_v52 = vrot.slane %v10275_v20, %v10558_v50  ;;  %v11116_v27 = vpop.permute.xlu0 %3580  ;;  %v9404_v3 = vld [vmem:[#allocation2 + $0x44] sm:$0xf] }
 0x283   :  { %v1254_v31 = vrot.slane %v10277_v19, %v10558_v50  ;;  %13697 = vst [vmem:[#allocation196_spill] sm:$0xff] %v11116_v27  ;;  %v11119_v58 = vadd.bf16 %v8715_v28, %v10597_v36  ;;  %v8720_v54 = vcombine.high %v1818_v33, %v1819_v48  ;;  %v1825_v51 = vmul.bf16 %v10566_v37, %v1242_v16  ;;  %v9405_v28 = vld [vmem:[#allocation2 + $0x150] sm:$0xf] }
 0x284   :  { %13696 = vst [vmem:[#allocation195_spill] sm:$0xff] %v11110_v44  ;;  %v1824_v38 = vmul.bf16 %v10566_v37, %v1230_v15  ;;  %5116 = vperm.xlu1 %9337, %v9404_v3   ;;  %v11124_v6 = vadd.bf16 %v8716_v12, %v10610_v39  ;;  %v11127_v20 = vadd.bf16 %v8717_v49, %v10597_v36  ;;  %v11135_v60 = vpop.permute.xlu1 %3591  ;;  %v13869_v44 = vld [vmem:[#allocation172_spill] sm:$0xff] }
 0x285   :  { %13698 = vst [vmem:[#allocation197_spill] sm:$0xff] %v11119_v58  ;;  %v11130_v19 = vadd.bf16 %v8718_v45, %v10610_v39  ;;  %v11133_v5 = vadd.bf16 %v8719_v42, %v10597_v36  ;;  %5853 = vperm.xlu0 %9338, %v9405_v28   ;;  %v8721_v48 = vcombine.low %v1820_v61, %v1821_v11  ;;  %13703 = vst [vmem:[#allocation202_spill] sm:$0xff] %v11135_v60 }
 0x286   :  { %13699 = vst [vmem:[#allocation198_spill] sm:$0xff] %v11124_v6  ;;  %13700 = vst [vmem:[#allocation199_spill] sm:$0xff] %v11127_v20  ;;  %v8722_v33 = vcombine.high %v1820_v61, %v1821_v11  ;;  %v8723_v16 = vcombine.low %v1822_v57, %v1823_v35  ;;  %v8724_v15 = vcombine.high %v1822_v57, %v1823_v35  ;;  %v11143_v42 = vpop.permute.xlu0 %3602  ;;  %v9406_v35 = vld [vmem:[#allocation2 + $0x13c] sm:$0xf]  ;;  %v9429_v20 = vld [vmem:[#allocation2 + $0x180] sm:$0xf] }
 0x287   :  { %13701 = vst [vmem:[#allocation200_spill] sm:$0xff] %v11130_v19  ;;  %13702 = vst [vmem:[#allocation201_spill] sm:$0xff] %v11133_v5  ;;  %v1827_v12 = vmul.bf16 %v10566_v37, %v1266_v52  ;;  %v1826_v3 = vmul.bf16 %v10566_v37, %v1254_v31  ;;  %v1290_v49 = vrot.slane %v10281_v22, %v10558_v50  ;;  %v13706_v52 = vld [vmem:[#allocation138_spill] sm:$0xff]  ;;  %v13832_v6 = vld [vmem:[#allocation73_spill] sm:$0xff] }
 0x288   :  { %v1278_v45 = vrot.slane %v10283_v21, %v10558_v50  ;;  %13704 = vst [vmem:[#allocation203_spill] sm:$0xff] %v11143_v42  ;;  %v11146_v28 = vadd.bf16 %v8720_v54, %v10610_v39  ;;  %v8725_v11 = vcombine.low %v1824_v38, %v1825_v51  ;;  %v1314_v57 = vrot.slane %v10287_v24, %v10558_v50  ;;  %v13707_v54 = vld [vmem:[#allocation139_spill] sm:$0xff] }
 0x289   :  { %v1302_v61 = vrot.slane %v10289_v23, %v10558_v50  ;;  %5798 = vperm.xlu1 %9337, %v9406_v35   ;;  %v1338_v22 = vrot.slane %v10293_v26, %v10558_v50  ;;  %v1326_v21 = vrot.slane %v10295_v25, %v10558_v50  ;;  %v1362_v31 = vrot.slane %v13706_v52, %v10558_v50  ;;  %v11172_v25 = vpop.permute.xlu1 %3613 }
 0x28a   :  { %13705 = vst [vmem:[#allocation204_spill] sm:$0xff] %v11146_v28  ;;  %v1350_v41 = vrot.slane %v13707_v54, %v10558_v50  ;;  %5193 = vperm.xlu0 %9338, %v9407_v43   ;;  %v11161_v24 = vadd.bf16 %v8721_v48, %v10597_v36  ;;  %v11164_v23 = vadd.bf16 %v8722_v33, %v10610_v39  ;;  %13712 = vst [vmem:[#allocation207_spill] sm:$0xff] %v11172_v25  ;;  %v11176_v27 = vpop.permute.xlu0 %3624 }
 0x28b   :  { %v11167_v35 = vadd.bf16 %v8723_v16, %v10597_v36  ;;  %v11170_v26 = vadd.bf16 %v8724_v15, %v10610_v39  ;;  %v8726_v52 = vcombine.high %v1824_v38, %v1825_v51  ;;  %v8727_v42 = vcombine.low %v1826_v3, %v1827_v12  ;;  %13713 = vst [vmem:[#allocation208_spill] sm:$0xff] %v11176_v27  ;;  %v9408_v15 = vld [vmem:[#allocation2 + $0x4c] sm:$0xf] }
 0x28c   :  { %13708 = vst [vmem:[#allocation138_spill] sm:$0xff] %v11161_v24  ;;  %13709 = vst [vmem:[#allocation139_spill] sm:$0xff] %v11164_v23  ;;  %v1829_v54 = vmul.bf16 %v10566_v37, %v1290_v49  ;;  %v1828_v43 = vmul.bf16 %v10566_v37, %v1278_v45  ;;  %v11179_v48 = vadd.bf16 %v8725_v11, %v10597_v36  ;;  %v9409_v45 = vld [vmem:[#allocation2 + $0x158] sm:$0xf]  ;;  %v13715_v11 = vld [vmem:[#allocation140_spill] sm:$0xff] }
 0x28d   :  { %13710 = vst [vmem:[#allocation205_spill] sm:$0xff] %v11167_v35  ;;  %13711 = vst [vmem:[#allocation206_spill] sm:$0xff] %v11170_v26  ;;  %v8728_v33 = vcombine.high %v1826_v3, %v1827_v12  ;;  %v1831_v16 = vmul.bf16 %v10566_v37, %v1314_v57  ;;  %v1830_v35 = vmul.bf16 %v10566_v37, %v1302_v61  ;;  %5138 = vperm.xlu1 %9337, %v9408_v15   ;;  %v13716_v12 = vld [vmem:[#allocation141_spill] sm:$0xff]  ;;  %v13717_v57 = vld [vmem:[#allocation142_spill] sm:$0xff] }
 0x28e   :  { %13714 = vst [vmem:[#allocation209_spill] sm:$0xff] %v11179_v48  ;;  %v1833_v25 = vmul.bf16 %v10566_v37, %v1338_v22  ;;  %v1832_v51 = vmul.bf16 %v10566_v37, %v1326_v21  ;;  %v1835_v38 = vmul.bf16 %v10566_v37, %v1362_v31  ;;  %v1834_v49 = vmul.bf16 %v10566_v37, %v1350_v41  ;;  %v13718_v15 = vld [vmem:[#allocation143_spill] sm:$0xff]  ;;  %v11195_v48 = vpop.permute.xlu1 %3635  ;;  %v9410_v23 = vld [vmem:[#allocation2 + $0x144] sm:$0xf] }
 0x28f   :  { %5875 = vperm.xlu0 %9338, %v9409_v45   ;;  %v1386_v27 = vrot.slane %v13715_v11, %v10558_v50  ;;  %v1374_v3 = vrot.slane %v13716_v12, %v10558_v50  ;;  %v1410_v61 = vrot.slane %v13717_v57, %v10558_v50  ;;  %v1398_v22 = vrot.slane %v13718_v15, %v10558_v50  ;;  %v11203_v11 = vpop.permute.xlu0 %3646  ;;  %v13724_v57 = vld [vmem:[#allocation144_spill] sm:$0xff]  ;;  %v13725_v15 = vld [vmem:[#allocation145_spill] sm:$0xff]  ;;  %v9411_v24 = vld [vmem:[#allocation2 + $0x68] sm:$0xf] }
 0x290   :  { %13719 = vst [vmem:[#allocation140_spill] sm:$0xff] %v11195_v48  ;;  %v11198_v21 = vadd.bf16 %v8726_v52, %v10610_v39  ;;  %v11201_v41 = vadd.bf16 %v8727_v42, %v10597_v36  ;;  %v8729_v31 = vcombine.low %v1828_v43, %v1829_v54  ;;  %v8730_v45 = vcombine.high %v1828_v43, %v1829_v54 }
 0x291   :  { %13722 = vst [vmem:[#allocation143_spill] sm:$0xff] %v11203_v11  ;;  %v11206_v12 = vadd.bf16 %v8728_v33, %v10610_v39  ;;  %v8731_v26 = vcombine.low %v1830_v35, %v1831_v16  ;;  %v1434_v60 = vrot.slane %v13724_v57, %v10558_v50  ;;  %v1422_v48 = vrot.slane %v13725_v15, %v10558_v50 }
 0x292   :  { %13720 = vst [vmem:[#allocation141_spill] sm:$0xff] %v11198_v21  ;;  %13721 = vst [vmem:[#allocation142_spill] sm:$0xff] %v11201_v41  ;;  %5820 = vperm.xlu1 %9337, %v9410_v23   ;;  %v8732_v52 = vcombine.high %v1830_v35, %v1831_v16  ;;  %v8733_v21 = vcombine.low %v1832_v51, %v1833_v25  ;;  %v8734_v42 = vcombine.high %v1832_v51, %v1833_v25  ;;  %v11216_v57 = vpop.permute.xlu1 %3657  ;;  %v13729_v35 = vld [vmem:[#allocation146_spill] sm:$0xff] }
 0x293   :  { %13723 = vst [vmem:[#allocation210_spill] sm:$0xff] %v11206_v12  ;;  %v8735_v41 = vcombine.low %v1834_v49, %v1835_v38  ;;  %5215 = vperm.xlu0 %9338, %v9411_v24   ;;  %v1837_v54 = vmul.bf16 %v10566_v37, %v1386_v27  ;;  %v1836_v43 = vmul.bf16 %v10566_v37, %v1374_v3  ;;  %13726 = vst [vmem:[#allocation144_spill] sm:$0xff] %v11216_v57  ;;  %v13730_v24 = vld [vmem:[#allocation147_spill] sm:$0xff]  ;;  %v11228_v16 = vpop.permute.xlu0 %3668 }
 0x294   :  { %v1839_v33 = vmul.bf16 %v10566_v37, %v1410_v61  ;;  %v1838_v11 = vmul.bf16 %v10566_v37, %v1398_v22  ;;  %v11219_v15 = vadd.bf16 %v8729_v31, %v10597_v36  ;;  %v11222_v23 = vadd.bf16 %v8730_v45, %v10610_v39  ;;  %13731 = vst [vmem:[#allocation146_spill] sm:$0xff] %v11228_v16  ;;  %v9412_v31 = vld [vmem:[#allocation2 + $0x54] sm:$0xf] }
 0x295   :  { %v1458_v25 = vrot.slane %v13729_v35, %v10558_v50  ;;  %v1446_v27 = vrot.slane %v13730_v24, %v10558_v50  ;;  %v11231_v51 = vadd.bf16 %v8731_v26, %v10597_v36  ;;  %v8736_v3 = vcombine.high %v1834_v49, %v1835_v38  ;;  %v9413_v26 = vld [vmem:[#allocation2 + $0x160] sm:$0xf] }
 0x296   :  { %13727 = vst [vmem:[#allocation145_spill] sm:$0xff] %v11219_v15  ;;  %13728 = vst [vmem:[#allocation211_spill] sm:$0xff] %v11222_v23  ;;  %v1841_v61 = vmul.bf16 %v10566_v37, %v1434_v60  ;;  %v1840_v22 = vmul.bf16 %v10566_v37, %v1422_v48  ;;  %5160 = vperm.xlu1 %9337, %v9412_v31   ;;  %v11236_v45 = vadd.bf16 %v8732_v52, %v10610_v39  ;;  %v9415_v23 = vld [vmem:[#allocation2 + $0x70] sm:$0xf] }
 0x297   :  { %13732 = vst [vmem:[#allocation147_spill] sm:$0xff] %v11231_v51  ;;  %v11239_v35 = vadd.bf16 %v8733_v21, %v10597_v36  ;;  %v11242_v24 = vadd.bf16 %v8734_v42, %v10610_v39  ;;  %v11245_v16 = vadd.bf16 %v8735_v41, %v10597_v36  ;;  %5897 = vperm.xlu0 %9338, %v9413_v26   ;;  %v11247_v51 = vpop.permute.xlu1 %3679  ;;  %v13738_v21 = vld [vmem:[#allocation148_spill] sm:$0xff]  ;;  %v13739_v42 = vld [vmem:[#allocation149_spill] sm:$0xff]  ;;  %v11255_v41 = vpop.permute.xlu0 %3690 }
 0x298   :  { %13733 = vst [vmem:[#allocation212_spill] sm:$0xff] %v11236_v45  ;;  %v8737_v38 = vcombine.low %v1836_v43, %v1837_v54  ;;  %v8738_v60 = vcombine.high %v1836_v43, %v1837_v54  ;;  %v8739_v49 = vcombine.low %v1838_v11, %v1839_v33  ;;  %v8740_v48 = vcombine.high %v1838_v11, %v1839_v33  ;;  %v13742_v11 = vld [vmem:[#allocation150_spill] sm:$0xff]  ;;  %v13743_v33 = vld [vmem:[#allocation151_spill] sm:$0xff]  ;;  %v13745_v45 = vld [vmem:[#allocation153_spill] sm:$0xff] }
 0x299   :  { %13734 = vst [vmem:[#allocation213_spill] sm:$0xff] %v11239_v35  ;;  %13735 = vst [vmem:[#allocation214_spill] sm:$0xff] %v11242_v24  ;;  %v1843_v52 = vmul.bf16 %v10566_v37, %v1458_v25  ;;  %v1842_v31 = vmul.bf16 %v10566_v37, %v1446_v27  ;;  %v1482_v35 = vrot.slane %v13738_v21, %v10558_v50  ;;  %v13744_v27 = vld [vmem:[#allocation152_spill] sm:$0xff] }
 0x29a   :  { %13736 = vst [vmem:[#allocation215_spill] sm:$0xff] %v11245_v16  ;;  %13737 = vst [vmem:[#allocation216_spill] sm:$0xff] %v11247_v51  ;;  %v1470_v24 = vrot.slane %v13739_v42, %v10558_v50  ;;  %v11258_v26 = vadd.bf16 %v8736_v3, %v10610_v39  ;;  %v8741_v54 = vcombine.low %v1840_v22, %v1841_v61  ;;  %v9414_v16 = vld [vmem:[#allocation2 + $0x14c] sm:$0xf] }
 0x29b   :  { %13740 = vst [vmem:[#allocation148_spill] sm:$0xff] %v11255_v41  ;;  %v1506_v43 = vrot.slane %v13742_v11, %v10558_v50  ;;  %v1494_v25 = vrot.slane %v13743_v33, %v10558_v50  ;;  %5842 = vperm.xlu1 %9337, %v9414_v16   ;;  %v1530_v21 = vrot.slane %v13744_v27, %v10558_v50  ;;  %v13746_v41 = vld [vmem:[#allocation154_spill] sm:$0xff]  ;;  %v13747_v3 = vld [vmem:[#allocation155_spill] sm:$0xff]  ;;  %v11281_v15 = vpop.permute.xlu1 %3701  ;;  %v11288_v57 = vpop.permute.xlu0 %3712 }
 0x29c   :  { %13741 = vst [vmem:[#allocation149_spill] sm:$0xff] %v11258_v26  ;;  %v1518_v42 = vrot.slane %v13745_v45, %v10558_v50  ;;  %v1554_v51 = vrot.slane %v13746_v41, %v10558_v50  ;;  %v1542_v26 = vrot.slane %v13747_v3, %v10558_v50  ;;  %5237 = vperm.xlu0 %9338, %v9415_v23   ;;  %13751 = vst [vmem:[#allocation153_spill] sm:$0xff] %v11281_v15  ;;  %v9419_v15 = vld [vmem:[#allocation2 + $0x78] sm:$0xf] }
 0x29d   :  { %v11273_v11 = vadd.bf16 %v8737_v38, %v10597_v36  ;;  %v11276_v33 = vadd.bf16 %v8738_v60, %v10610_v39  ;;  %v11279_v16 = vadd.bf16 %v8739_v49, %v10597_v36  ;;  %v8742_v27 = vcombine.high %v1840_v22, %v1841_v61  ;;  %13753 = vst [vmem:[#allocation155_spill] sm:$0xff] %v11288_v57  ;;  %v9416_v22 = vld [vmem:[#allocation2 + $0x5c] sm:$0xf]  ;;  %v9418_v57 = vld [vmem:[#allocation2 + $0x154] sm:$0xf] }
 0x29e   :  { %v11284_v45 = vadd.bf16 %v8740_v48, %v10610_v39  ;;  %v8743_v41 = vcombine.low %v1842_v31, %v1843_v52  ;;  %v1845_v3 = vmul.bf16 %v10566_v37, %v1482_v35  ;;  %v1844_v23 = vmul.bf16 %v10566_v37, %v1470_v24 }
 0x29f   :  { %13748 = vst [vmem:[#allocation150_spill] sm:$0xff] %v11273_v11  ;;  %13749 = vst [vmem:[#allocation151_spill] sm:$0xff] %v11276_v33  ;;  %v11291_v38 = vadd.bf16 %v8741_v54, %v10597_v36  ;;  %v8744_v60 = vcombine.high %v1842_v31, %v1843_v52  ;;  %v1847_v49 = vmul.bf16 %v10566_v37, %v1506_v43  ;;  %5182 = vperm.xlu1 %9337, %v9416_v22   ;;  %v13756_v52 = vld [vmem:[#allocation156_spill] sm:$0xff]  ;;  %v13757_v43 = vld [vmem:[#allocation157_spill] sm:$0xff] }
 0x2a0   :  { %13750 = vst [vmem:[#allocation152_spill] sm:$0xff] %v11279_v16  ;;  %13752 = vst [vmem:[#allocation154_spill] sm:$0xff] %v11284_v45  ;;  %v1846_v61 = vmul.bf16 %v10566_v37, %v1494_v25  ;;  %v1849_v48 = vmul.bf16 %v10566_v37, %v1530_v21  ;;  %v1848_v45 = vmul.bf16 %v10566_v37, %v1518_v42  ;;  %v9417_v16 = vld [vmem:[#allocation2 + $0x168] sm:$0xf]  ;;  %v13758_v22 = vld [vmem:[#allocation29_spill] sm:$0xff] }
 0x2a1   :  { %13754 = vst [vmem:[#allocation217_spill] sm:$0xff] %v11291_v38  ;;  %v1851_v35 = vmul.bf16 %v10566_v37, %v1554_v51  ;;  %v1850_v24 = vmul.bf16 %v10566_v37, %v1542_v26  ;;  %5919 = vperm.xlu0 %9338, %v9417_v16   ;;  %v11300_v54 = vadd.bf16 %v8742_v27, %v10610_v39  ;;  %v11308_v38 = vpop.permute.xlu1 %3723  ;;  %v13761_v16 = vld [vmem:[#allocation28_spill] sm:$0xff]  ;;  %v13764_v11 = vld [vmem:[#allocation27_spill] sm:$0xff] }
 0x2a2   :  { %v1578_v31 = vrot.slane %v13756_v52, %v10558_v50  ;;  %v1566_v25 = vrot.slane %v13757_v43, %v10558_v50  ;;  %v2676_v21 = vrot.slane %v13758_v22, %v10558_v50  ;;  %13759 = vst [vmem:[#allocation156_spill] sm:$0xff] %v11308_v38  ;;  %v11311_v51 = vadd.bf16 %v8743_v41, %v10597_v36 }
 0x2a3   :  { %13755 = vst [vmem:[#allocation218_spill] sm:$0xff] %v11300_v54  ;;  %v8745_v26 = vcombine.low %v1844_v23, %v1845_v3  ;;  %v8746_v42 = vcombine.high %v1844_v23, %v1845_v3  ;;  %v2698_v27 = vrot.slane %v13761_v16, %v10558_v50  ;;  %v11315_v54 = vpop.permute.xlu0 %3734  ;;  %v11318_v52 = vadd.bf16 %v8744_v60, %v10610_v39  ;;  %v13765_v3 = vld [vmem:[#allocation26_spill] sm:$0xff] }
 0x2a4   :  { %13760 = vst [vmem:[#allocation157_spill] sm:$0xff] %v11311_v51  ;;  %13762 = vst [vmem:[#allocation29_spill] sm:$0xff] %v11315_v54  ;;  %v8747_v33 = vcombine.low %v1846_v61, %v1847_v49  ;;  %v8748_v43 = vcombine.high %v1846_v61, %v1847_v49  ;;  %v2665_v22 = vrot.slane %v13764_v11, %v10558_v50  ;;  %5864 = vperm.xlu1 %9337, %v9418_v57   ;;  %v13768_v11 = vld [vmem:[#allocation33_spill] sm:$0xff] }
 0x2a5   :  { %13763 = vst [vmem:[#allocation28_spill] sm:$0xff] %v11318_v52  ;;  %v8749_v38 = vcombine.low %v1848_v45, %v1849_v48  ;;  %v8750_v41 = vcombine.high %v1848_v45, %v1849_v48  ;;  %v8751_v51 = vcombine.low %v1850_v24, %v1851_v35  ;;  %v2687_v23 = vrot.slane %v13765_v3, %v10558_v50  ;;  %v11333_v57 = vpop.permute.xlu1 %3745  ;;  %v13794_v52 = vld [vmem:[#allocation42_spill] sm:$0xff] }
 0x2a6   :  { %5259 = vperm.xlu0 %9338, %v9419_v15   ;;  %v11325_v16 = vmul.bf16 %v10566_v37, %v1578_v31  ;;  %v11328_v60 = vmul.bf16 %v10566_v37, %v1566_v25  ;;  %v4051_v49 = vmul.bf16 %v11038_v40, %v2676_v21  ;;  %v2709_v61 = vrot.slane %v13768_v11, %v10558_v50  ;;  %v13772_v31 = vld [vmem:[#allocation32_spill] sm:$0xff] }
 0x2a7   :  { %13769 = vst [vmem:[#allocation33_spill] sm:$0xff] %v11333_v57  ;;  %v11336_v45 = vadd.bf16 %v8745_v26, %v10597_v36  ;;  %v11339_v48 = vadd.bf16 %v8746_v42, %v10610_v39  ;;  %v4053_v15 = vmul.bf16 %v11038_v40, %v2698_v27  ;;  %v2720_v3 = vrot.slane %v13772_v31, %v10558_v50  ;;  %v11344_v25 = vpop.permute.xlu0 %3756 }
 0x2a8   :  { %13766 = vst [vmem:[#allocation27_spill] sm:$0xff] %v11325_v16  ;;  %13767 = vst [vmem:[#allocation26_spill] sm:$0xff] %v11328_v60  ;;  %v11347_v21 = vadd.bf16 %v8747_v33, %v10597_v36  ;;  %v11350_v11 = vadd.bf16 %v8748_v43, %v10610_v39  ;;  %v8752_v37 = vcombine.high %v1850_v24, %v1851_v35 }
 0x2a9   :  { %13770 = vst [vmem:[#allocation219_spill] sm:$0xff] %v11336_v45  ;;  %13771 = vst [vmem:[#allocation220_spill] sm:$0xff] %v11339_v48  ;;  %v4050_v26 = vmul.bf16 %v11038_v40, %v2665_v22  ;;  %v9420_v45 = vld [vmem:[#allocation2 + $0x64] sm:$0xf]  ;;  %v11354_v42 = vadd.bf16 %v8749_v38, %v10597_v36  ;;  %v11357_v27 = vadd.bf16 %v8750_v41, %v10610_v39  ;;  %v11368_v38 = vpop.permute.xlu1 %3767  ;;  %v9422_v48 = vld [vmem:[#allocation2 + $0x15c] sm:$0xf] }
 0x2aa   :  { %13773 = vst [vmem:[#allocation32_spill] sm:$0xff] %v11344_v25  ;;  %13774 = vst [vmem:[#allocation221_spill] sm:$0xff] %v11347_v21  ;;  %5204 = vperm.xlu1 %9337, %v9420_v45   ;;  %v11360_v31 = vadd.bf16 %v8751_v51, %v10597_v36  ;;  %v4052_v33 = vmul.bf16 %v11038_v40, %v2687_v23  ;;  %v9421_v21 = vld [vmem:[#allocation2 + $0x170] sm:$0xf]  ;;  %v8754_v35 = vcombine.high %v11328_v60, %v11325_v16  ;;  %v13780_v51 = vld [vmem:[#allocation37_spill] sm:$0xff] }
 0x2ab   :  { %13775 = vst [vmem:[#allocation222_spill] sm:$0xff] %v11350_v11  ;;  %13776 = vst [vmem:[#allocation223_spill] sm:$0xff] %v11354_v42  ;;  %5941 = vperm.xlu0 %9338, %v9421_v21   ;;  %v8768_v24 = vcombine.low %v4050_v26, %v4051_v49  ;;  %v8769_v43 = vcombine.high %v4050_v26, %v4051_v49  ;;  %v11366_v22 = vmul.bf16 %v11038_v40, %v2709_v61  ;;  %v13781_v23 = vld [vmem:[#allocation36_spill] sm:$0xff]  ;;  %v13785_v26 = vld [vmem:[#allocation41_spill] sm:$0xff] }
 0x2ac   :  { %13777 = vst [vmem:[#allocation224_spill] sm:$0xff] %v11357_v27  ;;  %13778 = vst [vmem:[#allocation225_spill] sm:$0xff] %v11360_v31  ;;  %v8770_v45 = vcombine.low %v4052_v33, %v4053_v15  ;;  %v11371_v41 = vmul.bf16 %v11038_v40, %v2720_v3  ;;  %v2731_v36 = vrot.slane %v13780_v51, %v10558_v50  ;;  %v11377_v31 = vpop.permute.xlu0 %3778  ;;  %v13786_v3 = vld [vmem:[#allocation40_spill] sm:$0xff]  ;;  %v9423_v49 = vld [vmem:[#allocation2 + $0x80] sm:$0xf] }
 0x2ad   :  { %13779 = vst [vmem:[#allocation226_spill] sm:$0xff] %v11368_v38  ;;  %v2742_v21 = vrot.slane %v13781_v23, %v10558_v50  ;;  %13782 = vst [vmem:[#allocation37_spill] sm:$0xff] %v11377_v31  ;;  %v11380_v42 = vadd.bf16 %v8752_v37, %v10610_v39  ;;  %v2753_v27 = vrot.slane %v13785_v26, %v10558_v50  ;;  %v13788_v37 = vld [vmem:[#allocation45_spill] sm:$0xff]  ;;  %v13789_v31 = vld [vmem:[#allocation44_spill] sm:$0xff]  ;;  %v11402_v38 = vpop.permute.xlu1 %3789 }
 0x2ae   :  { %v2764_v11 = vrot.slane %v13786_v3, %v10558_v50  ;;  %5886 = vperm.xlu1 %9337, %v9422_v48   ;;  %v2786_v61 = vrot.slane %v13789_v31, %v10558_v50  ;;  %v11397_v26 = vadd.bf16 %v8754_v35, %v10610_v39  ;;  %v13791_v3 = vld [vmem:[#allocation46_spill] sm:$0xff]  ;;  %v8771_v48 = vcombine.high %v4052_v33, %v4053_v15  ;;  %v13796_v33 = vld [vmem:[#allocation49_spill] sm:$0xff]  ;;  %v13799_v23 = vld [vmem:[#allocation52_spill] sm:$0xff] }
 0x2af   :  { %13783 = vst [vmem:[#allocation36_spill] sm:$0xff] %v11380_v42  ;;  %v2775_v42 = vrot.slane %v13788_v37, %v10558_v50  ;;  %5281 = vperm.xlu0 %9338, %v9423_v49   ;;  %v11400_v25 = vadd.bf16 %v8768_v24, %v13791_v3  ;;  %13792 = vst [vmem:[#allocation40_spill] sm:$0xff] %v11402_v38  ;;  %v13793_v51 = vld [vmem:[#allocation50_spill] sm:$0xff]  ;;  %v11408_v60 = vadd.bf16 %v8770_v45, %v13794_v52  ;;  %v9424_v45 = vld [vmem:[#allocation2 + $0x6c] sm:$0xf] }
 0x2b0   :  { %13790 = vst [vmem:[#allocation41_spill] sm:$0xff] %v11397_v26  ;;  %v11405_v16 = vadd.bf16 %v8769_v43, %v13793_v51  ;;  %v8772_v31 = vcombine.low %v11366_v22, %v11371_v41  ;;  %v4056_v49 = vmul.bf16 %v11038_v40, %v2731_v36  ;;  %v4057_v35 = vmul.bf16 %v11038_v40, %v2742_v21  ;;  %v11414_v37 = vpop.permute.xlu0 %3800  ;;  %v13797_v51 = vld [vmem:[#allocation48_spill] sm:$0xff]  ;;  %v13798_v21 = vld [vmem:[#allocation53_spill] sm:$0xff] }
 0x2b1   :  { %13795 = vst [vmem:[#allocation45_spill] sm:$0xff] %v11414_v37  ;;  %v4058_v24 = vmul.bf16 %v11038_v40, %v2753_v27  ;;  %v4059_v15 = vmul.bf16 %v11038_v40, %v2764_v11  ;;  %v2797_v43 = vrot.slane %v13796_v33, %v10558_v50  ;;  %v2808_v52 = vrot.slane %v13797_v51, %v10558_v50  ;;  %v9425_v26 = vld [vmem:[#allocation2 + $0x178] sm:$0xf]  ;;  %v13800_v11 = vld [vmem:[#allocation118_spill] sm:$0xff]  ;;  %v11437_v38 = vpop.permute.xlu1 %3811 }
 0x2b2   :  { %5226 = vperm.xlu1 %9337, %v9424_v45   ;;  %v4060_v3 = vmul.bf16 %v11038_v40, %v2775_v42  ;;  %v4061_v36 = vmul.bf16 %v11038_v40, %v2786_v61  ;;  %v2819_v39 = vrot.slane %v13798_v21, %v10558_v50  ;;  %v2830_v27 = vrot.slane %v13799_v23, %v10558_v50  ;;  %v13801_v51 = vld [vmem:[#allocation57_spill] sm:$0xff]  ;;  %v13802_v42 = vld [vmem:[#allocation56_spill] sm:$0xff]  ;;  %v13804_v21 = vld [vmem:[#allocation51_spill] sm:$0xff] }
 0x2b3   :  { %5963 = vperm.xlu0 %9338, %v9425_v26   ;;  %v11429_v37 = vadd.bf16 %v8771_v48, %v13800_v11  ;;  %v8773_v33 = vcombine.high %v11366_v22, %v11371_v41  ;;  %v2841_v45 = vrot.slane %v13801_v51, %v10558_v50  ;;  %v2852_v61 = vrot.slane %v13802_v42, %v10558_v50  ;;  %v13805_v26 = vld [vmem:[#allocation61_spill] sm:$0xff]  ;;  %v13806_v48 = vld [vmem:[#allocation60_spill] sm:$0xff]  ;;  %v9426_v42 = vld [vmem:[#allocation2 + $0x164] sm:$0xf] }
 0x2b4   :  { %13803 = vst [vmem:[#allocation44_spill] sm:$0xff] %v11437_v38  ;;  %v11440_v54 = vadd.bf16 %v8772_v31, %v13804_v21  ;;  %v8774_v23 = vcombine.low %v4056_v49, %v4057_v35  ;;  %v2863_v57 = vrot.slane %v13805_v26, %v10558_v50  ;;  %v2874_v11 = vrot.slane %v13806_v48, %v10558_v50  ;;  %v11448_v14 = vpop.permute.xlu0 %4940  ;;  %v9427_v26 = vld [vmem:[#allocation2 + $0x88] sm:$0xf] }
 0x2b5   :  { %v8775_v12 = vcombine.high %v4056_v49, %v4057_v35  ;;  %v8776_v22 = vcombine.low %v4058_v24, %v4059_v15  ;;  %v4062_v41 = vmul.bf16 %v11038_v40, %v2797_v43  ;;  %v4063_v51 = vmul.bf16 %v11038_v40, %v2808_v52  ;;  %v13807_v35 = vld [vmem:[#allocation65_spill] sm:$0xff]  ;;  %v13808_v52 = vld [vmem:[#allocation64_spill] sm:$0xff]  ;;  %v11458_v5 = vpop.permute.xlu1 %3833 }
 0x2b6   :  { %5908 = vperm.xlu1 %9337, %v9426_v42   ;;  %v8777_v38 = vcombine.high %v4058_v24, %v4059_v15  ;;  %v8778_v31 = vcombine.low %v4060_v3, %v4061_v36  ;;  %v4064_v21 = vmul.bf16 %v11038_v40, %v2819_v39  ;;  %v4065_v18 = vmul.bf16 %v11038_v40, %v2830_v27  ;;  %v13810_v24 = vld [vmem:[#allocation54_spill] sm:$0xff] }
 0x2b7   :  { %5303 = vperm.xlu0 %9338, %v9427_v26   ;;  %v4066_v48 = vmul.bf16 %v11038_v40, %v2841_v45  ;;  %v4067_v49 = vmul.bf16 %v11038_v40, %v2852_v61  ;;  %v2885_v43 = vrot.slane %v13807_v35, %v10558_v50  ;;  %v2896_v28 = vrot.slane %v13808_v52, %v10558_v50  ;;  %v13811_v39 = vld [vmem:[#allocation58_spill] sm:$0xff]  ;;  %v13812_v26 = vld [vmem:[#allocation59_spill] sm:$0xff]  ;;  %v9428_v52 = vld [vmem:[#allocation2 + $0x74] sm:$0xf] }
 0x2b8   :  { %13809 = vst [vmem:[#allocation46_spill] sm:$0xff] %v11458_v5  ;;  %v11461_v15 = vadd.bf16 %v8773_v33, %v13810_v24  ;;  %v11464_v42 = vadd.bf16 %v8774_v23, %v13811_v39  ;;  %v4068_v27 = vmul.bf16 %v11038_v40, %v2863_v57  ;;  %v4069_v45 = vmul.bf16 %v11038_v40, %v2874_v11  ;;  %v11471_v19 = vpop.permute.xlu0 %5633  ;;  %v13813_v5 = vld [vmem:[#allocation66_spill] sm:$0xff]  ;;  %v13814_v24 = vld [vmem:[#allocation67_spill] sm:$0xff] }
 0x2b9   :  { %v11469_v61 = vadd.bf16 %v8775_v12, %v13812_v26  ;;  %v8779_v8 = vcombine.high %v4060_v3, %v4061_v36  ;;  %v8780_v35 = vcombine.low %v4062_v41, %v4063_v51  ;;  %v8781_v30 = vcombine.high %v4062_v41, %v4063_v51  ;;  %v13815_v11 = vld [vmem:[#allocation70_spill] sm:$0xff]  ;;  %v11484_v51 = vpop.permute.xlu1 %3855 }
 0x2ba   :  { %5248 = vperm.xlu1 %9337, %v9428_v52   ;;  %v11474_v33 = vadd.bf16 %v8776_v22, %v13813_v5  ;;  %v11477_v23 = vadd.bf16 %v8777_v38, %v13814_v24  ;;  %v8782_v39 = vcombine.low %v4064_v21, %v4065_v18  ;;  %v8783_v57 = vcombine.high %v4064_v21, %v4065_v18  ;;  %v13817_v22 = vld [vmem:[#allocation69_spill] sm:$0xff]  ;;  %v13818_v52 = vld [vmem:[#allocation68_spill] sm:$0xff]  ;;  %v13819_v21 = vld [vmem:[#allocation71_spill] sm:$0xff] }
 0x2bb   :  { %5985 = vperm.xlu0 %9338, %v9429_v20   ;;  %v11480_v12 = vadd.bf16 %v8778_v31, %v13815_v11  ;;  %v8784_v3 = vcombine.low %v4066_v48, %v4067_v49  ;;  %v4070_v36 = vmul.bf16 %v11038_v40, %v2885_v43  ;;  %v4071_v41 = vmul.bf16 %v11038_v40, %v2896_v28  ;;  %v13820_v31 = vld [vmem:[#allocation164_spill] sm:$0xff]  ;;  %v13822_v11 = vld [vmem:[#allocation165_spill] sm:$0xff] }
 0x2bc   :  { %13816 = vst [vmem:[#allocation50_spill] sm:$0xff] %v11484_v51  ;;  %v8785_v26 = vcombine.high %v4066_v48, %v4067_v49  ;;  %v8786_v5 = vcombine.low %v4068_v27, %v4069_v45  ;;  %v2907_v38 = vrot.slane %v13817_v22, %v10558_v50  ;;  %v2918_v18 = vrot.slane %v13818_v52, %v10558_v50  ;;  %v13824_v28 = vld [vmem:[#allocation96_spill] sm:$0xff]  ;;  %v11500_v51 = vpop.permute.xlu0 %4973  ;;  %v9430_v48 = vld [vmem:[#allocation2 + $0x16c] sm:$0xf] }
 0x2bd   :  { %v11491_v20 = vadd.bf16 %v8779_v8, %v13819_v21  ;;  %v11494_v24 = vadd.bf16 %v8780_v35, %v13820_v31  ;;  %v11497_v43 = vadd.bf16 %v8781_v30, %v13822_v11  ;;  %v6305_v4 = vsub.s32 1, %v13824_v28  ;;  %v13825_v49 = vld [vmem:[#allocation75_spill] sm:$0xff]  ;;  %v13829_v21 = vld [vmem:[#allocation72_spill] sm:$0xff]  ;;  %v13830_v30 = vld [vmem:[#allocation82_spill] sm:$0xff] }
 0x2be   :  { %5930 = vperm.xlu1 %9337, %v9430_v48   ;;  %v11503_v22 = vadd.bf16 %v8782_v39, %v13825_v49  ;;  %v11506_v52 = vadd.bf16 %v8783_v57, %v13827_v10  ;;  %v8787_v8 = vcombine.high %v4068_v27, %v4069_v45  ;;  %v2940_v35 = vrot.slane %v13829_v21, %v10558_v50  ;;  %v9431_v31 = vld [vmem:[#allocation2 + $0x90] sm:$0xf]  ;;  %v11517_v49 = vpop.permute.xlu1 %3877  ;;  %v13835_v10 = vld [vmem:[#allocation86_spill] sm:$0xff]  ;;  %v13837_v27 = vld [vmem:[#allocation87_spill] sm:$0xff] }
 0x2bf   :  { %13821 = vst [vmem:[#allocation42_spill] sm:$0xff] %v11494_v24  ;;  %13823 = vst [vmem:[#allocation49_spill] sm:$0xff] %v11497_v43  ;;  %5325 = vperm.xlu0 %9338, %v9431_v31   ;;  %v11511_v11 = vadd.bf16 %v8784_v3, %v13830_v30  ;;  %v8788_v28 = vcombine.low %v4070_v36, %v4071_v41  ;;  %v2929_v58 = vrot.slane %v13832_v6, %v10558_v50  ;;  %v13833_v48 = vld [vmem:[#allocation76_spill] sm:$0xff]  ;;  %v13839_v31 = vld [vmem:[#allocation77_spill] sm:$0xff] }
 0x2c0   :  { %13826 = vst [vmem:[#allocation48_spill] sm:$0xff] %v11503_v22  ;;  %13828 = vst [vmem:[#allocation53_spill] sm:$0xff] %v11506_v52  ;;  %v2962_v39 = vrot.slane %v13833_v48, %v10558_v50  ;;  %v11520_v57 = vadd.bf16 %v8785_v26, %v13835_v10  ;;  %v11523_v45 = vadd.bf16 %v8786_v5, %v13837_v27  ;;  %v13840_v6 = vld [vmem:[#allocation80_spill] sm:$0xff]  ;;  %v13842_v52 = vld [vmem:[#allocation105_spill] sm:$0xff]  ;;  %v11533_v24 = vpop.permute.xlu0 %5655 }
 0x2c1   :  { %13831 = vst [vmem:[#allocation52_spill] sm:$0xff] %v11511_v11  ;;  %13834 = vst [vmem:[#allocation118_spill] sm:$0xff] %v11517_v49  ;;  %v4072_v21 = vmul.bf16 %v11038_v40, %v2907_v38  ;;  %v4073_v3 = vmul.bf16 %v11038_v40, %v2918_v18  ;;  %v2951_v30 = vrot.slane %v13839_v31, %v10558_v50  ;;  %v13841_v22 = vld [vmem:[#allocation100_spill] sm:$0xff]  ;;  %v9432_v26 = vld [vmem:[#allocation2 + $0x7c] sm:$0xf] }
 0x2c2   :  { %13836 = vst [vmem:[#allocation57_spill] sm:$0xff] %v11520_v57  ;;  %13838 = vst [vmem:[#allocation56_spill] sm:$0xff] %v11523_v45  ;;  %v2984_v11 = vrot.slane %v13840_v6, %v10558_v50  ;;  %v6306_v48 = vrot.slane %v13841_v22, %v6305_v4  ;;  %v6310_v49 = vrot.slane %v13842_v52, %v6305_v4  ;;  %5270 = vperm.xlu1 %9337, %v9432_v26   ;;  %v13843_v5 = vld [vmem:[#allocation91_spill] sm:$0xff]  ;;  %v13845_v27 = vld [vmem:[#allocation84_spill] sm:$0xff] }
 0x2c3   :  { %v11536_v10 = vadd.bf16 %v8787_v8, %v13843_v5  ;;  %v8789_v38 = vcombine.high %v4070_v36, %v4071_v41  ;;  %v4075_v18 = vmul.bf16 %v11038_v40, %v2940_v35  ;;  %v3006_v31 = vrot.slane %v13845_v27, %v10558_v50  ;;  %v9433_v45 = vld [vmem:[#allocation2 + $0x188] sm:$0xf]  ;;  %v13846_v6 = vld [vmem:[#allocation166_spill] sm:$0xff]  ;;  %v13848_v52 = vld [vmem:[#allocation81_spill] sm:$0xff]  ;;  %v11548_v8 = vpop.permute.xlu1 %3899 }
 0x2c4   :  { %6007 = vperm.xlu0 %9338, %v9433_v45   ;;  %v11542_v57 = vadd.bf16 %v8788_v28, %v13846_v6  ;;  %v4074_v4 = vmul.bf16 %v11038_v40, %v2929_v58  ;;  %v4077_v22 = vmul.bf16 %v11038_v40, %v2962_v39  ;;  %v2973_v26 = vrot.slane %v13848_v52, %v10558_v50  ;;  %v13850_v35 = vld [vmem:[#allocation85_spill] sm:$0xff]  ;;  %v13851_v27 = vld [vmem:[#allocation88_spill] sm:$0xff]  ;;  %v11560_v52 = vpop.permute.xlu0 %4995  ;;  %v13855_v43 = vld [vmem:[#allocation99_spill] sm:$0xff] }
 0x2c5   :  { %13844 = vst [vmem:[#allocation51_spill] sm:$0xff] %v11536_v10  ;;  %13849 = vst [vmem:[#allocation60_spill] sm:$0xff] %v11548_v8  ;;  %v8790_v36 = vcombine.low %v4072_v21, %v4073_v3  ;;  %v8791_v41 = vcombine.high %v4072_v21, %v4073_v3  ;;  %v2995_v5 = vrot.slane %v13850_v35, %v10558_v50  ;;  %v9434_v8 = vld [vmem:[#allocation2 + $0x174] sm:$0xf]  ;;  %v13852_v21 = vld [vmem:[#allocation94_spill] sm:$0xff] }
 0x2c6   :  { %13847 = vst [vmem:[#allocation61_spill] sm:$0xff] %v11542_v57  ;;  %v3028_v45 = vrot.slane %v13851_v27, %v10558_v50  ;;  %v4076_v28 = vmul.bf16 %v11038_v40, %v2951_v30  ;;  %v4079_v6 = vmul.bf16 %v11038_v40, %v2984_v11  ;;  %v11556_v58 = vcombine.low %v6306_v48, %v6310_v49  ;;  %v13854_v27 = vld [vmem:[#allocation89_spill] sm:$0xff] }
 0x2c7   :  { %v4949_v39 = vrot.slane %v11448_v14, %v10558_v50  ;;  %5952 = vperm.xlu1 %9337, %v9434_v8   ;;  %v11563_v3 = vadd.bf16 %v8789_v38, %v13852_v21  ;;  %v8792_v35 = vcombine.low %v4074_v4, %v4075_v18  ;;  %v4081_v57 = vmul.bf16 %v11038_v40, %v3006_v31  ;;  %v9435_v10 = vld [vmem:[#allocation2 + $0x98] sm:$0xf]  ;;  %v13857_v8 = vld [vmem:[#allocation167_spill] sm:$0xff]  ;;  %v4930_v21 = vpop.permute.xlu1 %4929 }
 0x2c8   :  { %v3017_v30 = vrot.slane %v13854_v27, %v10558_v50  ;;  %5347 = vperm.xlu0 %9338, %v9435_v10   ;;  %v8793_v11 = vcombine.high %v4074_v4, %v4075_v18  ;;  %v8794_v49 = vcombine.low %v4076_v28, %v4077_v22  ;;  %v8795_v48 = vcombine.high %v4076_v28, %v4077_v22  ;;  %v11579_v4 = vpop.permute.xlu0 %5677  ;;  %v9436_v22 = vld [vmem:[#allocation2 + $0x84] sm:$0xf]  ;;  %v9437_v28 = vld [vmem:[#allocation2 + $0x190] sm:$0xf] }
 0x2c9   :  { %13853 = vst [vmem:[#allocation65_spill] sm:$0xff] %v11563_v3  ;;  %v4078_v14 = vmul.bf16 %v11038_v40, %v2973_v26  ;;  %v11570_v59 = vadd.bf16 %v8790_v36, %v13855_v43  ;;  %v11573_v2 = vadd.bf16 %v8791_v41, %v13857_v8  ;;  %v4080_v38 = vmul.bf16 %v11038_v40, %v2995_v5  ;;  %v13859_v43 = vld [vmem:[#allocation102_spill] sm:$0xff]  ;;  %v13861_v5 = vld [vmem:[#allocation92_spill] sm:$0xff] }
 0x2ca   :  { %v4083_v31 = vmul.bf16 %v11038_v40, %v3028_v45  ;;  %v6318_v10 = vmul.bf16 %v11556_v58, %v4949_v39  ;;  %v4938_v18 = vrot.slane %v4930_v21, %v10558_v50  ;;  %v11582_v26 = vadd.bf16 %v8792_v35, %v13859_v43  ;;  %v13863_v39 = vld [vmem:[#allocation168_spill] sm:$0xff]  ;;  %v13865_v21 = vld [vmem:[#allocation171_spill] sm:$0xff] }
 0x2cb   :  { %13856 = vst [vmem:[#allocation64_spill] sm:$0xff] %v11570_v59  ;;  %13858 = vst [vmem:[#allocation54_spill] sm:$0xff] %v11573_v2  ;;  %v8796_v3 = vcombine.low %v4078_v14, %v4079_v6  ;;  %v8797_v27 = vcombine.high %v4078_v14, %v4079_v6  ;;  %5292 = vperm.xlu1 %9337, %v9436_v22   ;;  %v8798_v36 = vcombine.low %v4080_v38, %v4081_v57  ;;  %v13862_v6 = vld [vmem:[#allocation103_spill] sm:$0xff] }
 0x2cc   :  { %13860 = vst [vmem:[#allocation58_spill] sm:$0xff] %v11582_v26  ;;  %v4082_v41 = vmul.bf16 %v11038_v40, %v3017_v30  ;;  %v3050_v45 = vrot.slane %v13861_v5, %v10558_v50  ;;  %6029 = vperm.xlu0 %9338, %v9437_v28   ;;  %v11588_v14 = vadd.bf16 %v8793_v11, %v13862_v6  ;;  %v13867_v30 = vld [vmem:[#allocation93_spill] sm:$0xff]  ;;  %v13868_v5 = vld [vmem:[#allocation106_spill] sm:$0xff]  ;;  %v4952_v28 = vpop.permute.xlu1 %4951  ;;  %v13871_v6 = vld [vmem:[#allocation107_spill] sm:$0xff] }
 0x2cd   :  { %v11591_v8 = vadd.bf16 %v8794_v49, %v13863_v39  ;;  %v11594_v59 = vadd.bf16 %v8795_v48, %v13865_v21  ;;  %v6317_v35 = vmul.bf16 %v11556_v58, %v4938_v18  ;;  %v8799_v22 = vcombine.high %v4080_v38, %v4081_v57  ;;  %v11607_v48 = vpop.permute.xlu0 %5017  ;;  %v9438_v21 = vld [vmem:[#allocation2 + $0x17c] sm:$0xf]  ;;  %v13873_v38 = vld [vmem:[#allocation110_spill] sm:$0xff] }
 0x2ce   :  { %v8800_v43 = vcombine.low %v4082_v41, %v4083_v31  ;;  %v3039_v26 = vrot.slane %v13867_v30, %v10558_v50  ;;  %v3380_v2 = vrot.slane %v13868_v5, %v10558_v50  ;;  %v11602_v11 = vadd.bf16 %v8796_v3, %v13869_v44  ;;  %v13875_v5 = vld [vmem:[#allocation170_spill] sm:$0xff]  ;;  %v13876_v3 = vld [vmem:[#allocation97_spill] sm:$0xff] }
 0x2cf   :  { %13864 = vst [vmem:[#allocation59_spill] sm:$0xff] %v11591_v8  ;;  %13866 = vst [vmem:[#allocation66_spill] sm:$0xff] %v11594_v59  ;;  %v11605_v49 = vadd.bf16 %v8797_v27, %v13871_v6  ;;  %v8895_v39 = vcombine.low %v6317_v35, %v6318_v10  ;;  %5974 = vperm.xlu1 %9337, %v9438_v21   ;;  %v8896_v57 = vcombine.high %v6317_v35, %v6318_v10  ;;  %v9439_v44 = vld [vmem:[#allocation2 + $0xa0] sm:$0xf]  ;;  %v13877_v35 = vld [vmem:[#allocation111_spill] sm:$0xff] }
 0x2d0   :  { %13870 = vst [vmem:[#allocation67_spill] sm:$0xff] %v11602_v11  ;;  %v11610_v18 = vadd.bf16 %v8798_v36, %v13873_v38  ;;  %v8801_v30 = vcombine.high %v4082_v41, %v4083_v31  ;;  %v4085_v8 = vmul.bf16 %v11038_v40, %v3050_v45  ;;  %v3369_v59 = vrot.slane %v13875_v5, %v10558_v50  ;;  %v13879_v31 = vld [vmem:[#allocation114_spill] sm:$0xff]  ;;  %v4963_v38 = vpop.permute.xlu1 %4962 }
 0x2d1   :  { %13872 = vst [vmem:[#allocation70_spill] sm:$0xff] %v11605_v49  ;;  %5369 = vperm.xlu0 %9338, %v9439_v44   ;;  %v3061_v27 = vrot.slane %v13876_v3, %v10558_v50  ;;  %v4960_v6 = vrot.slane %v4952_v28, %v10558_v50  ;;  %v7070_v11 = vadd.bf16 %v8896_v57, %v11405_v16  ;;  %v11631_v44 = vpop.permute.xlu0 %5699  ;;  %v9440_v16 = vld [vmem:[#allocation2 + $0x8c] sm:$0xf]  ;;  %v9443_v49 = vld [vmem:[#allocation2 + $0xa8] sm:$0xf] }
 0x2d2   :  { %13874 = vst [vmem:[#allocation69_spill] sm:$0xff] %v11610_v18  ;;  %v7069_v10 = vadd.bf16 %v8895_v39, %v11400_v25  ;;  %v11621_v36 = vadd.bf16 %v8799_v22, %v13877_v35  ;;  %v11624_v41 = vadd.bf16 %v8800_v43, %v13879_v31  ;;  %v4084_v45 = vmul.bf16 %v11038_v40, %v3039_v26  ;;  %v13882_v43 = vld [vmem:[#allocation116_spill] sm:$0xff]  ;;  %v9441_v35 = vld [vmem:[#allocation2 + $0x198] sm:$0xf] }
 0x2d3   :  { %v4115_v21 = vmul.bf16 %v11038_v40, %v3380_v2  ;;  %v5642_v5 = vrot.slane %v11471_v19, %v10558_v50  ;;  %v4971_v28 = vrot.slane %v4963_v38, %v10558_v50  ;;  %5314 = vperm.xlu1 %9337, %v9440_v16   ;;  %v13881_v25 = vmov 0   ;;  %v13884_v31 = vld [vmem:[#allocation117_spill] sm:$0xff]  ;;  %v13888_v18 = vld [vmem:[#allocation120_spill] sm:$0xff] }
 0x2d4   :  { %13878 = vst [vmem:[#allocation68_spill] sm:$0xff] %v11621_v36  ;;  %13880 = vst [vmem:[#allocation71_spill] sm:$0xff] %v11624_v41  ;;  %v7196_v22 = vmax.bf16 %v13881_v25, %v7070_v11  ;;  %v7195_v39 = vmax.bf16 %v13881_v25, %v7069_v10  ;;  %v11636_v57 = vadd.bf16 %v8801_v30, %v13882_v43  ;;  %v13885_v30 = vld [vmem:[#allocation101_spill] sm:$0xff] }
 0x2d5   :  { %v8802_v26 = vcombine.low %v4084_v45, %v4085_v8  ;;  %v8803_v3 = vcombine.high %v4084_v45, %v4085_v8  ;;  %v4114_v2 = vmul.bf16 %v11038_v40, %v3369_v59  ;;  %6051 = vperm.xlu0 %9338, %v9441_v35   ;;  %v11640_v19 = vmul.bf16 %v11038_v40, %v3061_v27  ;;  %v13886_v8 = vld [vmem:[#allocation113_spill] sm:$0xff]  ;;  %v5645_v27 = vpop.permute.xlu1 %5644 }
 0x2d6   :  { %13883 = vst [vmem:[#allocation164_spill] sm:$0xff] %v11636_v57  ;;  %v3402_v38 = vrot.slane %v13884_v31, %v10558_v50  ;;  %v6319_v16 = vmul.bf16 %v11556_v58, %v4960_v6  ;;  %v6320_v11 = vmul.bf16 %v11556_v58, %v4971_v28  ;;  %7488 = vmatprep.mubr.bf16.mxu0 %v7196_v22  ;;  %v11654_v28 = vpop.permute.xlu0 %5039  ;;  %v9442_v22 = vld [vmem:[#allocation2 + $0x184] sm:$0xf] }
 0x2d7   :  { %v3072_v10 = vrot.slane %v13885_v30, %v10558_v50  ;;  %v8832_v43 = vcombine.low %v4114_v2, %v4115_v21  ;;  %v3391_v59 = vrot.slane %v13886_v8, %v10558_v50  ;;  %v4982_v45 = vrot.slane %v11500_v51, %v10558_v50  ;;  %7489 = vmatmul.mubr.bf16.vlgmr.msra.gmra.mrb[0].mxu0 %v7195_v39  ;;  %v13887_v30 = vld [vmem:[#allocation173_spill] sm:$0xff]  ;;  %v13889_v51 = vld [vmem:[#allocation159_spill] sm:$0xff] }
 0x2d8   :  { %v6381_v35 = vmul.bf16 %v11556_v58, %v5642_v5  ;;  %v8897_v31 = vcombine.low %v6319_v16, %v6320_v11  ;;  %v8898_v41 = vcombine.high %v6319_v16, %v6320_v11  ;;  %v5653_v6 = vrot.slane %v5645_v27, %v10558_v50  ;;  %5996 = vperm.xlu1 %9337, %v9442_v22  }
 0x2d9   :  { %v11657_v57 = vadd.bf16 %v8802_v26, %v13887_v30  ;;  %v11660_v8 = vadd.bf16 %v8803_v3, %v13888_v18  ;;  %v3083_v36 = vrot.slane %v13889_v51, %v10558_v50  ;;  %v8833_v39 = vcombine.high %v4114_v2, %v4115_v21  ;;  %5391 = vperm.xlu0 %9338, %v9443_v49   ;;  %v4985_v21 = vpop.permute.xlu1 %4984 }
 0x2da   :  { %v4117_v5 = vmul.bf16 %v11038_v40, %v3402_v38  ;;  %v6382_v16 = vmul.bf16 %v11556_v58, %v5653_v6  ;;  %v7072_v11 = vadd.bf16 %v8898_v41, %v11429_v37  ;;  %v7071_v27 = vadd.bf16 %v8897_v31, %v11408_v60  ;;  %v11674_v38 = vpop.permute.xlu0 %5721  ;;  %v9444_v6 = vld [vmem:[#allocation2 + $0x94] sm:$0xf] }
 0x2db   :  { %v4866_v26 = vadd.bf16 %v8832_v43, %v11049_v7  ;;  %v4116_v22 = vmul.bf16 %v11038_v40, %v3391_v59  ;;  %v6321_v18 = vmul.bf16 %v11556_v58, %v4982_v45  ;;  %v5664_v3 = vrot.slane %v11533_v24, %v10558_v50  ;;  %v9445_v43 = vld [vmem:[#allocation2 + $0x1a0] sm:$0xf] }
 0x2dc   :  { %v8959_v2 = vcombine.low %v6381_v35, %v6382_v16  ;;  %v4993_v49 = vrot.slane %v4985_v21, %v10558_v50  ;;  %5336 = vperm.xlu1 %9337, %v9444_v6   ;;  %v7198_v37 = vmax.bf16 %v13881_v25, %v7072_v11  ;;  %v7197_v60 = vmax.bf16 %v13881_v25, %v7071_v27 }
 0x2dd   :  { %v11679_v7 = vmul.bf16 %v11038_v40, %v3072_v10  ;;  %v11682_v41 = vmul.bf16 %v11038_v40, %v3083_v36  ;;  %6073 = vperm.xlu0 %9338, %v9445_v43   ;;  %v4867_v24 = vadd.bf16 %v8833_v39, %v11060_v9  ;;  %v8960_v59 = vcombine.high %v6381_v35, %v6382_v16  ;;  %v5667_v27 = vpop.permute.xlu1 %5666 }
 0x2de   :  { %v8834_v45 = vcombine.low %v4116_v22, %v4117_v5  ;;  %v8835_v31 = vcombine.high %v4116_v22, %v4117_v5  ;;  %v6322_v30 = vmul.bf16 %v11556_v58, %v4993_v49  ;;  %7496 = vmatprep.mubr.bf16.mxu0 %v7198_v37  ;;  %v7133_v51 = vadd.bf16 %v8959_v2, %v4866_v26  ;;  %v11692_v39 = vpop.permute.xlu0 %5061  ;;  %v9446_v5 = vld [vmem:[#allocation2 + $0x18c] sm:$0xf]  ;;  %v13891_v2 = vld [vmem:[#allocation160_spill] sm:$0xff] }
 0x2df   :  { %v3424_v11 = vrot.slane %v10906_v47, %v10558_v50  ;;  %v6383_v10 = vmul.bf16 %v11556_v58, %v5664_v3  ;;  %v5004_v36 = vrot.slane %v11560_v52, %v10558_v50  ;;  %7497 = vmatmul.mubr.bf16.gmra.mrb[4].mxu0 %v7197_v60  ;;  %v7134_v21 = vadd.bf16 %v8960_v59, %v4867_v24  ;;  %v13890_v52 = vld [vmem:[#allocation119_spill] sm:$0xff]  ;;  %v9447_v3 = vld [vmem:[#allocation2 + $0xb0] sm:$0xf] }
 0x2e0   :  { %v8899_v6 = vcombine.low %v6321_v18, %v6322_v30  ;;  %v8900_v9 = vcombine.high %v6321_v18, %v6322_v30  ;;  %v5675_v35 = vrot.slane %v5667_v27, %v10558_v50  ;;  %6018 = vperm.xlu1 %9337, %v9446_v5   ;;  %v7259_v16 = vmax.bf16 %v13881_v25, %v7133_v51  ;;  %v13893_v5 = vld [vmem:[#allocation174_spill] sm:$0xff] }
 0x2e1   :  { %v8804_v47 = vcombine.low %v11640_v19, %v11679_v7  ;;  %v8805_v26 = vcombine.high %v11640_v19, %v11679_v7  ;;  %v3413_v22 = vrot.slane %v13890_v52, %v10558_v50  ;;  %5413 = vperm.xlu0 %9338, %v9447_v3   ;;  %v7260_v18 = vmax.bf16 %v13881_v25, %v7134_v21  ;;  %v5007_v30 = vpop.permute.xlu1 %5006 }
 0x2e2   :  { %v3094_v49 = vrot.slane %v13891_v2, %v10558_v50  ;;  %v6384_v37 = vmul.bf16 %v11556_v58, %v5675_v35  ;;  %v7074_v60 = vadd.bf16 %v8900_v9, %v11461_v15  ;;  %v7073_v43 = vadd.bf16 %v8899_v6, %v11440_v54  ;;  %v11712_v35 = vpop.permute.xlu0 %5743  ;;  %v9448_v15 = vld [vmem:[#allocation2 + $0x9c] sm:$0xf] }
 0x2e3   :  { %v4868_v24 = vadd.bf16 %v8834_v45, %v11052_v63  ;;  %v4869_v19 = vadd.bf16 %v8835_v31, %v11055_v34  ;;  %v4119_v7 = vmul.bf16 %v11038_v40, %v3424_v11  ;;  %v6323_v59 = vmul.bf16 %v11556_v58, %v5004_v36  ;;  %7744 = vmatprep.mubr.bf16.mxu1 %v7260_v18  ;;  %v13892_v54 = vld [vmem:[#allocation161_spill] sm:$0xff]  ;;  %v11717_v45 = vld [vmem:[#allocation2 + $0x1a8] sm:$0xf] }
 0x2e4   :  { %v8961_v51 = vcombine.low %v6383_v10, %v6384_v37  ;;  %v8962_v27 = vcombine.high %v6383_v10, %v6384_v37  ;;  %v5015_v21 = vrot.slane %v5007_v30, %v10558_v50  ;;  %7745 = vmatmul.mubr.bf16.vlgmr.msra.gmra.mrb[0].mxu1 %v7259_v16  ;;  %5358 = vperm.xlu1 %9337, %v9448_v15   ;;  %v9450_v30 = vld [vmem:[#allocation2 + $0x194] sm:$0xf]  ;;  %v13894_v15 = vld [vmem:[#allocation122_spill] sm:$0xff] }
 0x2e5   :  { %v3105_v63 = vrot.slane %v13892_v54, %v10558_v50  ;;  %v4118_v34 = vmul.bf16 %v11038_v40, %v3413_v22  ;;  %6095 = vperm.xlu0 %9338, %v11717_v45   ;;  %v7200_v31 = vmax.bf16 %v13881_v25, %v7074_v60  ;;  %v7199_v11 = vmax.bf16 %v13881_v25, %v7073_v43  ;;  %v5689_v18 = vpop.permute.xlu1 %5688 }
 0x2e6   :  { %v5686_v10 = vrot.slane %v11579_v4, %v10558_v50  ;;  %v6324_v36 = vmul.bf16 %v11556_v58, %v5015_v21  ;;  %v7136_v6 = vadd.bf16 %v8962_v27, %v4869_v19  ;;  %v7135_v9 = vadd.bf16 %v8961_v51, %v4868_v24  ;;  %v11731_v4 = vpop.permute.xlu0 %5083  ;;  %v9451_v19 = vld [vmem:[#allocation2 + $0xb8] sm:$0xf] }
 0x2e7   :  { %v11726_v16 = vadd.bf16 %v8804_v47, %v13893_v5  ;;  %v8836_v52 = vcombine.low %v4118_v34, %v4119_v7  ;;  %v8837_v22 = vcombine.high %v4118_v34, %v4119_v7  ;;  %v3446_v3 = vrot.slane %v10943_v56, %v10558_v50  ;;  %7504 = vmatprep.mubr.bf16.mxu0 %v7200_v31 }
 0x2e8   :  { %v8901_v37 = vcombine.low %v6323_v59, %v6324_v36  ;;  %v8902_v60 = vcombine.high %v6323_v59, %v6324_v36  ;;  %v5697_v43 = vrot.slane %v5689_v18, %v10558_v50  ;;  %7505 = vmatmul.mubr.bf16.gmra.mrb[8].mxu0 %v7199_v11  ;;  %6040 = vperm.xlu1 %9337, %v9450_v30  }
 0x2e9   :  { %v3435_v47 = vrot.slane %v10914_v53, %v10558_v50  ;;  %v5026_v24 = vrot.slane %v11607_v48, %v10558_v50  ;;  %5435 = vperm.xlu0 %9338, %v9451_v19   ;;  %v7262_v56 = vmax.bf16 %v13881_v25, %v7136_v6  ;;  %v7261_v7 = vmax.bf16 %v13881_v25, %v7135_v9  ;;  %v5029_v11 = vpop.permute.xlu1 %5028 }
 0x2ea   :  { %v6385_v59 = vmul.bf16 %v11556_v58, %v5686_v10  ;;  %v6386_v51 = vmul.bf16 %v11556_v58, %v5697_v43  ;;  %v7076_v27 = vadd.bf16 %v8902_v60, %v11469_v61  ;;  %v7075_v21 = vadd.bf16 %v8901_v37, %v11464_v42  ;;  %v11750_v9 = vpop.permute.xlu0 %5765  ;;  %v9452_v61 = vld [vmem:[#allocation2 + $0xa4] sm:$0xf] }
 0x2eb   :  { %v11744_v34 = vadd.bf16 %v8805_v26, %v13894_v15  ;;  %v4870_v53 = vadd.bf16 %v8836_v52, %v11067_v55  ;;  %v4871_v48 = vadd.bf16 %v8837_v22, %v11086_v1  ;;  %v4121_v31 = vmul.bf16 %v11038_v40, %v3446_v3  ;;  %7752 = vmatprep.mubr.bf16.mxu1 %v7262_v56  ;;  %v11754_v55 = vld [vmem:[#allocation2 + $0x1b0] sm:$0xf] }
 0x2ec   :  { %v8963_v36 = vcombine.low %v6385_v59, %v6386_v51  ;;  %v8964_v6 = vcombine.high %v6385_v59, %v6386_v51  ;;  %v5037_v10 = vrot.slane %v5029_v11, %v10558_v50  ;;  %7753 = vmatmul.mubr.bf16.gmra.mrb[4].mxu1 %v7261_v7  ;;  %5380 = vperm.xlu1 %9337, %v9452_v61   ;;  %v9454_v7 = vld [vmem:[#allocation2 + $0x19c] sm:$0xf]  ;;  %v9455_v59 = vld [vmem:[#allocation2 + $0xc0] sm:$0xf] }
 0x2ed   :  { %v4120_v42 = vmul.bf16 %v11038_v40, %v3435_v47  ;;  %v6325_v26 = vmul.bf16 %v11556_v58, %v5026_v24  ;;  %6117 = vperm.xlu0 %9338, %v11754_v55   ;;  %v7202_v1 = vmax.bf16 %v13881_v25, %v7076_v27  ;;  %v7201_v5 = vmax.bf16 %v13881_v25, %v7075_v21  ;;  %v5711_v47 = vpop.permute.xlu1 %5710 }
 0x2ee   :  { %v5708_v52 = vrot.slane %v11631_v44, %v10558_v50  ;;  %v6326_v22 = vmul.bf16 %v11556_v58, %v5037_v10  ;;  %v7138_v3 = vadd.bf16 %v8964_v6, %v4871_v48  ;;  %v7137_v18 = vadd.bf16 %v8963_v36, %v4870_v53  ;;  %v11771_v56 = vpop.permute.xlu0 %5105  ;;  %v9456_v10 = vld [vmem:[#allocation2 + $0xac] sm:$0xf] }
 0x2ef   :  { %v11766_v37 = vmul.bf16 %v11038_v40, %v3094_v49  ;;  %v8838_v60 = vcombine.low %v4120_v42, %v4121_v31  ;;  %v8839_v43 = vcombine.high %v4120_v42, %v4121_v31  ;;  %v3468_v30 = vrot.slane %v10968_v32, %v10558_v50  ;;  %7512 = vmatprep.mubr.bf16.mxu0 %v7202_v1 }
 0x2f0   :  { %v8903_v24 = vcombine.low %v6325_v26, %v6326_v22  ;;  %v8904_v19 = vcombine.high %v6325_v26, %v6326_v22  ;;  %v5719_v44 = vrot.slane %v5711_v47, %v10558_v50  ;;  %7513 = vmatmul.mubr.bf16.gmra.mrb[12].mxu0 %v7201_v5  ;;  %6062 = vperm.xlu1 %9337, %v9454_v7   ;;  %v9459_v7 = vld [vmem:[#allocation2 + $0xc8] sm:$0xf] }
 0x2f1   :  { %v3457_v2 = vrot.slane %v10947_v29, %v10558_v50  ;;  %v5048_v49 = vrot.slane %v11654_v28, %v10558_v50  ;;  %5457 = vperm.xlu0 %9338, %v9455_v59   ;;  %v7264_v32 = vmax.bf16 %v13881_v25, %v7138_v3  ;;  %v7263_v51 = vmax.bf16 %v13881_v25, %v7137_v18  ;;  %v5051_v11 = vpop.permute.xlu1 %5050 }
 0x2f2   :  { %v6387_v27 = vmul.bf16 %v11556_v58, %v5708_v52  ;;  %v6388_v21 = vmul.bf16 %v11556_v58, %v5719_v44  ;;  %v7078_v15 = vadd.bf16 %v8904_v19, %v11477_v23  ;;  %v7077_v53 = vadd.bf16 %v8903_v24, %v11474_v33  ;;  %v11793_v33 = vpop.permute.xlu0 %5787  ;;  %v9458_v24 = vld [vmem:[#allocation2 + $0x1a4] sm:$0xf] }
 0x2f3   :  { %v11787_v29 = vmul.bf16 %v11038_v40, %v3105_v63  ;;  %v4872_v28 = vadd.bf16 %v8838_v60, %v11089_v46  ;;  %v4873_v48 = vadd.bf16 %v8839_v43, %v11094_v13  ;;  %v4123_v31 = vmul.bf16 %v11038_v40, %v3468_v30  ;;  %7760 = vmatprep.mubr.bf16.mxu1 %v7264_v32  ;;  %v11797_v46 = vld [vmem:[#allocation2 + $0x1b8] sm:$0xf] }
 0x2f4   :  { %v8965_v36 = vcombine.low %v6387_v27, %v6388_v21  ;;  %v8966_v6 = vcombine.high %v6387_v27, %v6388_v21  ;;  %v5059_v23 = vrot.slane %v5051_v11, %v10558_v50  ;;  %7761 = vmatmul.mubr.bf16.gmra.mrb[8].mxu1 %v7263_v51  ;;  %5402 = vperm.xlu1 %9337, %v9456_v10  }
 0x2f5   :  { %v4122_v54 = vmul.bf16 %v11038_v40, %v3457_v2  ;;  %v6327_v63 = vmul.bf16 %v11556_v58, %v5048_v49  ;;  %6139 = vperm.xlu0 %9338, %v11797_v46   ;;  %v7204_v13 = vmax.bf16 %v13881_v25, %v7078_v15  ;;  %v7203_v61 = vmax.bf16 %v13881_v25, %v7077_v53  ;;  %v5733_v60 = vpop.permute.xlu1 %5732 }
 0x2f6   :  { %v5730_v42 = vrot.slane %v11674_v38, %v10558_v50  ;;  %v6328_v26 = vmul.bf16 %v11556_v58, %v5059_v23  ;;  %v7140_v1 = vadd.bf16 %v8966_v6, %v4873_v48  ;;  %v7139_v5 = vadd.bf16 %v8965_v36, %v4872_v28  ;;  %v11810_v38 = vpop.permute.xlu0 %5127 }
 0x2f7   :  { %v8806_v52 = vcombine.low %v11682_v41, %v11766_v37  ;;  %v8840_v22 = vcombine.low %v4122_v54, %v4123_v31  ;;  %v8841_v3 = vcombine.high %v4122_v54, %v4123_v31  ;;  %v3490_v18 = vrot.slane %v10997_v62, %v10558_v50  ;;  %7520 = vmatprep.mubr.bf16.mxu0 %v7204_v13 }
 0x2f8   :  { %v8905_v43 = vcombine.low %v6327_v63, %v6328_v26  ;;  %v8906_v30 = vcombine.high %v6327_v63, %v6328_v26  ;;  %v5741_v47 = vrot.slane %v5733_v60, %v10558_v50  ;;  %7521 = vmatmul.mubr.bf16.gmra.mrb[16].mxu0 %v7203_v61  ;;  %6084 = vperm.xlu1 %9337, %v9458_v24   ;;  %v13896_v61 = vld [vmem:[#allocation104_spill] sm:$0xff] }
 0x2f9   :  { %v3479_v19 = vrot.slane %v10976_v0, %v10558_v50  ;;  %v5070_v44 = vrot.slane %v11692_v39, %v10558_v50  ;;  %5479 = vperm.xlu0 %9338, %v9459_v7   ;;  %v7266_v62 = vmax.bf16 %v13881_v25, %v7140_v1  ;;  %v7265_v2 = vmax.bf16 %v13881_v25, %v7139_v5  ;;  %v13895_v39 = vld [vmem:[#allocation195_spill] sm:$0xff]  ;;  %v5073_v53 = vpop.permute.xlu1 %5072  ;;  %v13897_v5 = vld [vmem:[#allocation188_spill] sm:$0xff] }
 0x2fa   :  { %v6389_v49 = vmul.bf16 %v11556_v58, %v5730_v42  ;;  %v6390_v59 = vmul.bf16 %v11556_v58, %v5741_v47  ;;  %v7080_v32 = vadd.bf16 %v8906_v30, %v11491_v20  ;;  %v7079_v51 = vadd.bf16 %v8905_v43, %v11480_v12  ;;  %v11828_v11 = vpop.permute.xlu0 %5809  ;;  %v9460_v20 = vld [vmem:[#allocation2 + $0xb4] sm:$0xf]  ;;  %v9462_v30 = vld [vmem:[#allocation2 + $0x1ac] sm:$0xf]  ;;  %v13898_v47 = vld [vmem:[#allocation186_spill] sm:$0xff] }
 0x2fb   :  { %v8807_v0 = vcombine.high %v11682_v41, %v11766_v37  ;;  %v4874_v27 = vadd.bf16 %v8840_v22, %v11107_v17  ;;  %v4875_v21 = vadd.bf16 %v8841_v3, %v13895_v39  ;;  %v4125_v15 = vmul.bf16 %v11038_v40, %v3490_v18  ;;  %7768 = vmatprep.mubr.bf16.mxu1 %v7266_v62  ;;  %v11832_v17 = vld [vmem:[#allocation2 + $0x1c0] sm:$0xf]  ;;  %v13902_v39 = vld [vmem:[#allocation109_spill] sm:$0xff] }
 0x2fc   :  { %v8967_v28 = vcombine.low %v6389_v49, %v6390_v59  ;;  %v8968_v48 = vcombine.high %v6389_v49, %v6390_v59  ;;  %v5081_v31 = vrot.slane %v5073_v53, %v10558_v50  ;;  %7769 = vmatmul.mubr.bf16.gmra.mrb[12].mxu1 %v7265_v2  ;;  %5424 = vperm.xlu1 %9337, %v9460_v20   ;;  %v13900_v59 = vld [vmem:[#allocation49_spill] sm:$0xff]  ;;  %v13904_v53 = vld [vmem:[#allocation198_spill] sm:$0xff] }
 0x2fd   :  { %v4124_v12 = vmul.bf16 %v11038_v40, %v3479_v19  ;;  %v6329_v36 = vmul.bf16 %v11556_v58, %v5070_v44  ;;  %6161 = vperm.xlu0 %9338, %v11832_v17   ;;  %v7206_v6 = vmax.bf16 %v13881_v25, %v7080_v32  ;;  %v7205_v23 = vmax.bf16 %v13881_v25, %v7079_v51  ;;  %v5755_v3 = vpop.permute.xlu1 %5754  ;;  %v13901_v51 = vld [vmem:[#allocation42_spill] sm:$0xff] }
 0x2fe   :  { %v5752_v10 = vrot.slane %v11712_v35, %v10558_v50  ;;  %v6330_v54 = vmul.bf16 %v11556_v58, %v5081_v31  ;;  %v7142_v63 = vadd.bf16 %v8968_v48, %v4875_v21  ;;  %v7141_v13 = vadd.bf16 %v8967_v28, %v4874_v27  ;;  %v11845_v35 = vpop.permute.xlu0 %5149 }
 0x2ff   :  { %v3116_v42 = vrot.slane %v13896_v61, %v10558_v50  ;;  %v8842_v26 = vcombine.low %v4124_v12, %v4125_v15  ;;  %v8843_v1 = vcombine.high %v4124_v12, %v4125_v15  ;;  %v3512_v22 = vrot.slane %v13897_v5, %v10558_v50  ;;  %7528 = vmatprep.mubr.bf16.mxu0 %v7206_v6  ;;  %v9463_v6 = vld [vmem:[#allocation2 + $0xbc] sm:$0xf]  ;;  %v13914_v61 = vld [vmem:[#allocation191_spill] sm:$0xff] }
 0x300   :  { %v8907_v18 = vcombine.low %v6329_v36, %v6330_v54  ;;  %v8908_v60 = vcombine.high %v6329_v36, %v6330_v54  ;;  %v5763_v43 = vrot.slane %v5755_v3, %v10558_v50  ;;  %7529 = vmatmul.mubr.bf16.gmra.mrb[20].mxu0 %v7205_v23  ;;  %6106 = vperm.xlu1 %9337, %v9462_v30   ;;  %v13899_v44 = vmov 1  }
 0x301   :  { %v3501_v24 = vrot.slane %v13898_v47, %v10558_v50  ;;  %v5092_v19 = vrot.slane %v11731_v4, %v10558_v50  ;;  %9339 = vset.pattern.permute.xlu0 %v13899_v44  ;;  %v7268_v7 = vmax.bf16 %v13881_v25, %v7142_v63  ;;  %v7267_v62 = vmax.bf16 %v13881_v25, %v7141_v13  ;;  %v13903_v4 = vld [vmem:[#allocation197_spill] sm:$0xff]  ;;  %v5095_v31 = vpop.permute.xlu1 %5094 }
 0x302   :  { %v6391_v2 = vmul.bf16 %v11556_v58, %v5752_v10  ;;  %v6392_v49 = vmul.bf16 %v11556_v58, %v5763_v43  ;;  %3822 = vperm.xlu0 %9339, %v11717_v45   ;;  %v7082_v32 = vadd.bf16 %v8908_v60, %v13900_v59  ;;  %v7081_v27 = vadd.bf16 %v8907_v18, %v13901_v51  ;;  %v11865_v45 = vpop.permute.xlu0 %5831  ;;  %v13906_v43 = vld [vmem:[#allocation190_spill] sm:$0xff] }
 0x303   :  { %v3127_v21 = vrot.slane %v13902_v39, %v10558_v50  ;;  %v4876_v15 = vadd.bf16 %v8842_v26, %v13903_v4  ;;  %v4877_v28 = vadd.bf16 %v8843_v1, %v13904_v53  ;;  %v4127_v48 = vmul.bf16 %v11038_v40, %v3512_v22  ;;  %7776 = vmatprep.mubr.bf16.mxu1 %v7268_v7  ;;  %v13905_v22 = vld [vmem:[#allocation123_spill] sm:$0xff]  ;;  %v9464_v7 = vld [vmem:[#allocation2 + $0x1b4] sm:$0xf] }
 0x304   :  { %v8969_v20 = vcombine.low %v6391_v2, %v6392_v49  ;;  %v8970_v12 = vcombine.high %v6391_v2, %v6392_v49  ;;  %v5103_v36 = vrot.slane %v5095_v31, %v10558_v50  ;;  %7777 = vmatmul.mubr.bf16.gmra.mrb[16].mxu1 %v7267_v62  ;;  %5446 = vperm.xlu1 %9337, %v9463_v6   ;;  %v13907_v62 = vld [vmem:[#allocation189_spill] sm:$0xff] }
 0x305   :  { %v4126_v23 = vmul.bf16 %v11038_v40, %v3501_v24  ;;  %v6331_v10 = vmul.bf16 %v11556_v58, %v5092_v19  ;;  %v7208_v54 = vmax.bf16 %v13881_v25, %v7082_v32  ;;  %v7207_v63 = vmax.bf16 %v13881_v25, %v7081_v27  ;;  %v5777_v47 = vpop.permute.xlu1 %5776  ;;  %v13908_v27 = vld [vmem:[#allocation53_spill] sm:$0xff] }
 0x306   :  { %v5774_v13 = vrot.slane %v11750_v9, %v10558_v50  ;;  %v6332_v26 = vmul.bf16 %v11556_v58, %v5103_v36  ;;  %3844 = vperm.xlu0 %9339, %v11754_v55   ;;  %v7144_v1 = vadd.bf16 %v8970_v12, %v4877_v28  ;;  %v7143_v5 = vadd.bf16 %v8969_v20, %v4876_v15  ;;  %v11884_v55 = vpop.permute.xlu0 %5171  ;;  %v13909_v15 = vld [vmem:[#allocation48_spill] sm:$0xff] }
 0x307   :  { %v11879_v3 = vadd.bf16 %v8806_v52, %v13905_v22  ;;  %v8844_v18 = vcombine.low %v4126_v23, %v4127_v48  ;;  %v8845_v60 = vcombine.high %v4126_v23, %v4127_v48  ;;  %v3534_v30 = vrot.slane %v13906_v43, %v10558_v50  ;;  %7536 = vmatprep.mubr.bf16.mxu0 %v7208_v54  ;;  %v13910_v28 = vld [vmem:[#allocation124_spill] sm:$0xff] }
 0x308   :  { %v8909_v9 = vcombine.low %v6331_v10, %v6332_v26  ;;  %v8910_v24 = vcombine.high %v6331_v10, %v6332_v26  ;;  %v5785_v19 = vrot.slane %v5777_v47, %v10558_v50  ;;  %7537 = vmatmul.mubr.bf16.gmra.mrb[24].mxu0 %v7207_v63  ;;  %6128 = vperm.xlu1 %9337, %v9464_v7   ;;  %v13912_v20 = vld [vmem:[#allocation200_spill] sm:$0xff]  ;;  %v9465_v63 = vld [vmem:[#allocation2 + $0xc4] sm:$0xf]  ;;  %v9466_v7 = vld [vmem:[#allocation2 + $0x1bc] sm:$0xf] }
 0x309   :  { %v3523_v52 = vrot.slane %v13907_v62, %v10558_v50  ;;  %v5114_v2 = vrot.slane %v11771_v56, %v10558_v50  ;;  %v7270_v49 = vmax.bf16 %v13881_v25, %v7144_v1  ;;  %v7269_v59 = vmax.bf16 %v13881_v25, %v7143_v5  ;;  %v13911_v56 = vld [vmem:[#allocation199_spill] sm:$0xff]  ;;  %v5117_v6 = vpop.permute.xlu1 %5116 }
 0x30a   :  { %v6393_v32 = vmul.bf16 %v11556_v58, %v5774_v13  ;;  %v6394_v51 = vmul.bf16 %v11556_v58, %v5785_v19  ;;  %3866 = vperm.xlu0 %9339, %v11797_v46   ;;  %v7084_v4 = vadd.bf16 %v8910_v24, %v13908_v27  ;;  %v7083_v53 = vadd.bf16 %v8909_v9, %v13909_v15  ;;  %v11907_v54 = vpop.permute.xlu0 %5853 }
 0x30b   :  { %v11901_v48 = vadd.bf16 %v8807_v0, %v13910_v28  ;;  %v4878_v31 = vadd.bf16 %v8844_v18, %v13911_v56  ;;  %v4879_v12 = vadd.bf16 %v8845_v60, %v13912_v20  ;;  %v4129_v36 = vmul.bf16 %v11038_v40, %v3534_v30  ;;  %7784 = vmatprep.mubr.bf16.mxu1 %v7270_v49  ;;  %v13913_v30 = vld [vmem:[#allocation192_spill] sm:$0xff] }
 0x30c   :  { %v8971_v23 = vcombine.low %v6393_v32, %v6394_v51  ;;  %v8972_v46 = vcombine.high %v6393_v32, %v6394_v51  ;;  %v5125_v10 = vrot.slane %v5117_v6, %v10558_v50  ;;  %7785 = vmatmul.mubr.bf16.gmra.mrb[20].mxu1 %v7269_v59  ;;  %5468 = vperm.xlu1 %9337, %v9465_v63   ;;  %v11936_v32 = vld [vmem:[#allocation2 + $0x1c8] sm:$0xf]  ;;  %v13915_v51 = vld [vmem:[#allocation57_spill] sm:$0xff]  ;;  %v13918_v56 = vld [vmem:[#allocation204_spill] sm:$0xff] }
 0x30d   :  { %v4128_v41 = vmul.bf16 %v11038_v40, %v3523_v52  ;;  %v6333_v37 = vmul.bf16 %v11556_v58, %v5114_v2  ;;  %v7210_v0 = vmax.bf16 %v13881_v25, %v7084_v4  ;;  %v7209_v13 = vmax.bf16 %v13881_v25, %v7083_v53  ;;  %v5799_v9 = vpop.permute.xlu1 %5798  ;;  %v13916_v4 = vld [vmem:[#allocation52_spill] sm:$0xff]  ;;  %v13917_v53 = vld [vmem:[#allocation201_spill] sm:$0xff] }
 0x30e   :  { %v5796_v26 = vrot.slane %v11793_v33, %v10558_v50  ;;  %v6334_v1 = vmul.bf16 %v11556_v58, %v5125_v10  ;;  %3888 = vperm.xlu0 %9339, %v11832_v17   ;;  %v7146_v5 = vadd.bf16 %v8972_v46, %v4879_v12  ;;  %v7145_v22 = vadd.bf16 %v8971_v23, %v4878_v31  ;;  %v11926_v17 = vpop.permute.xlu0 %5193  ;;  %v9468_v10 = vld [vmem:[#allocation2 + $0xcc] sm:$0xf] }
 0x30f   :  { %v11921_v18 = vmul.bf16 %v11038_v40, %v3116_v42  ;;  %v8846_v60 = vcombine.low %v4128_v41, %v4129_v36  ;;  %v8847_v43 = vcombine.high %v4128_v41, %v4129_v36  ;;  %v3556_v47 = vrot.slane %v13913_v30, %v10558_v50  ;;  %7544 = vmatprep.mubr.bf16.mxu0 %v7210_v0 }
 0x310   :  { %v8911_v33 = vcombine.low %v6333_v37, %v6334_v1  ;;  %v8912_v24 = vcombine.high %v6333_v37, %v6334_v1  ;;  %v5807_v19 = vrot.slane %v5799_v9, %v10558_v50  ;;  %7545 = vmatmul.mubr.bf16.gmra.mrb[28].mxu0 %v7209_v13  ;;  %6150 = vperm.xlu1 %9337, %v9466_v7   ;;  %v11960_v13 = vld [vmem:[#allocation2 + $0x1cc] sm:$0xf]  ;;  %v13920_v7 = vld [vmem:[#allocation193_spill] sm:$0xff] }
 0x311   :  { %v3545_v42 = vrot.slane %v13914_v61, %v10558_v50  ;;  %v5136_v62 = vrot.slane %v11810_v38, %v10558_v50  ;;  %v7272_v52 = vmax.bf16 %v13881_v25, %v7146_v5  ;;  %v7271_v2 = vmax.bf16 %v13881_v25, %v7145_v22  ;;  %v5139_v12 = vpop.permute.xlu1 %5138 }
 0x312   :  { %v6395_v49 = vmul.bf16 %v11556_v58, %v5796_v26  ;;  %v6396_v59 = vmul.bf16 %v11556_v58, %v5807_v19  ;;  %3910 = vperm.xlu0 %9339, %v11936_v32   ;;  %v7086_v27 = vadd.bf16 %v8912_v24, %v13915_v51  ;;  %v7085_v15 = vadd.bf16 %v8911_v33, %v13916_v4  ;;  %v11951_v46 = vpop.permute.xlu0 %5875  ;;  %v9470_v19 = vld [vmem:[#allocation2 + $0x1c4] sm:$0xf]  ;;  %v13921_v51 = vld [vmem:[#allocation51_spill] sm:$0xff]  ;;  %v13922_v4 = vld [vmem:[#allocation56_spill] sm:$0xff] }
 0x313   :  { %v11945_v38 = vmul.bf16 %v11038_v40, %v3127_v21  ;;  %v4880_v28 = vadd.bf16 %v8846_v60, %v13917_v53  ;;  %v4881_v31 = vadd.bf16 %v8847_v43, %v13918_v56  ;;  %v4131_v20 = vmul.bf16 %v11038_v40, %v3556_v47  ;;  %7792 = vmatprep.mubr.bf16.mxu1 %v7272_v52  ;;  %v13919_v43 = vld [vmem:[#allocation194_spill] sm:$0xff]  ;;  %v13924_v56 = vld [vmem:[#allocation139_spill] sm:$0xff] }
 0x314   :  { %v8973_v36 = vcombine.low %v6395_v49, %v6396_v59  ;;  %v8974_v6 = vcombine.high %v6395_v49, %v6396_v59  ;;  %v5147_v23 = vrot.slane %v5139_v12, %v10558_v50  ;;  %7793 = vmatmul.mubr.bf16.gmra.mrb[24].mxu1 %v7271_v2  ;;  %5490 = vperm.xlu1 %9337, %v9468_v10   ;;  %v11978_v59 = vld [vmem:[#allocation2 + $0x1d4] sm:$0xf] }
 0x315   :  { %v4130_v39 = vmul.bf16 %v11038_v40, %v3545_v42  ;;  %v6335_v21 = vmul.bf16 %v11556_v58, %v5136_v62  ;;  %v7212_v63 = vmax.bf16 %v13881_v25, %v7086_v27  ;;  %v7211_v41 = vmax.bf16 %v13881_v25, %v7085_v15  ;;  %v5821_v47 = vpop.permute.xlu1 %5820 }
 0x316   :  { %v5818_v37 = vrot.slane %v11828_v11, %v10558_v50  ;;  %v6336_v0 = vmul.bf16 %v11556_v58, %v5147_v23  ;;  %3921 = vperm.xlu0 %9339, %v11960_v13   ;;  %v7148_v26 = vadd.bf16 %v8974_v6, %v4881_v31  ;;  %v7147_v1 = vadd.bf16 %v8973_v36, %v4880_v28  ;;  %v11968_v24 = vpop.permute.xlu0 %5215 }
 0x317   :  { %v8808_v5 = vcombine.low %v11787_v29, %v11921_v18  ;;  %v8848_v22 = vcombine.low %v4130_v39, %v4131_v20  ;;  %v8849_v60 = vcombine.high %v4130_v39, %v4131_v20  ;;  %v3578_v30 = vrot.slane %v13919_v43, %v10558_v50  ;;  %7552 = vmatprep.mubr.bf16.mxu0 %v7212_v63  ;;  %v9472_v39 = vld [vmem:[#allocation2 + $0xd0] sm:$0xf]  ;;  %v13925_v43 = vld [vmem:[#allocation34_spill] sm:$0xff] }
 0x318   :  { %v8913_v9 = vcombine.low %v6335_v21, %v6336_v0  ;;  %v8914_v11 = vcombine.high %v6335_v21, %v6336_v0  ;;  %v5829_v33 = vrot.slane %v5821_v47, %v10558_v50  ;;  %7553 = vmatmul.mubr.bf16.gmra.mrb[32].mxu0 %v7211_v41  ;;  %6172 = vperm.xlu1 %9337, %v9470_v19  }
 0x319   :  { %v3567_v61 = vrot.slane %v13920_v7, %v10558_v50  ;;  %v5158_v42 = vrot.slane %v11845_v35, %v10558_v50  ;;  %v7274_v62 = vmax.bf16 %v13881_v25, %v7148_v26  ;;  %v7273_v52 = vmax.bf16 %v13881_v25, %v7147_v1  ;;  %v13923_v35 = vld [vmem:[#allocation138_spill] sm:$0xff]  ;;  %v5161_v12 = vpop.permute.xlu1 %5160  ;;  %v11998_v1 = vld [vmem:[#allocation2 + $0x1dc] sm:$0xf] }
 0x31a   :  { %v6397_v2 = vmul.bf16 %v11556_v58, %v5818_v37  ;;  %v6398_v49 = vmul.bf16 %v11556_v58, %v5829_v33  ;;  %3943 = vperm.xlu0 %9339, %v11978_v59   ;;  %v7088_v27 = vadd.bf16 %v8914_v11, %v13921_v51  ;;  %v7087_v15 = vadd.bf16 %v8913_v9, %v13922_v4  ;;  %v11989_v10 = vpop.permute.xlu0 %5897  ;;  %v13926_v11 = vld [vmem:[#allocation202_spill] sm:$0xff] }
 0x31b   :  { %v8809_v53 = vcombine.high %v11787_v29, %v11921_v18  ;;  %v4882_v28 = vadd.bf16 %v8848_v22, %v13923_v35  ;;  %v4883_v31 = vadd.bf16 %v8849_v60, %v13924_v56  ;;  %v4133_v20 = vmul.bf16 %v11038_v40, %v3578_v30  ;;  %7800 = vmatprep.mubr.bf16.mxu1 %v7274_v62  ;;  %v9474_v62 = vld [vmem:[#allocation2 + $0xd4] sm:$0xf] }
 0x31c   :  { %v8975_v36 = vcombine.low %v6397_v2, %v6398_v49  ;;  %v8976_v6 = vcombine.high %v6397_v2, %v6398_v49  ;;  %v5169_v23 = vrot.slane %v5161_v12, %v10558_v50  ;;  %7801 = vmatmul.mubr.bf16.gmra.mrb[28].mxu1 %v7273_v52  ;;  %5501 = vperm.xlu1 %9337, %v9472_v39   ;;  %v13927_v52 = vld [vmem:[#allocation196_spill] sm:$0xff]  ;;  %v13928_v35 = vmov 2   ;;  %v13931_v12 = vld [vmem:[#allocation205_spill] sm:$0xff] }
 0x31d   :  { %v4132_v21 = vmul.bf16 %v11038_v40, %v3567_v61  ;;  %v6337_v63 = vmul.bf16 %v11556_v58, %v5158_v42  ;;  %v7214_v41 = vmax.bf16 %v13881_v25, %v7088_v27  ;;  %v7213_v37 = vmax.bf16 %v13881_v25, %v7087_v15  ;;  %v5843_v19 = vpop.permute.xlu1 %5842 }
 0x31e   :  { %v5840_v0 = vrot.slane %v11865_v45, %v10558_v50  ;;  %v6338_v26 = vmul.bf16 %v11556_v58, %v5169_v23  ;;  %3965 = vperm.xlu0 %9339, %v11998_v1   ;;  %v7150_v22 = vadd.bf16 %v8976_v6, %v4883_v31  ;;  %v7149_v60 = vadd.bf16 %v8975_v36, %v4882_v28  ;;  %v12006_v42 = vpop.permute.xlu0 %5237  ;;  %v13929_v28 = vld [vmem:[#allocation65_spill] sm:$0xff]  ;;  %v13932_v6 = vld [vmem:[#allocation206_spill] sm:$0xff] }
 0x31f   :  { %v3138_v30 = vrot.slane %v13925_v43, %v10558_v50  ;;  %v8850_v47 = vcombine.low %v4132_v21, %v4133_v20  ;;  %v8851_v9 = vcombine.high %v4132_v21, %v4133_v20  ;;  %v3600_v33 = vrot.slane %v13926_v11, %v10558_v50  ;;  %7560 = vmatprep.mubr.bf16.mxu0 %v7214_v41  ;;  %v13930_v31 = vld [vmem:[#allocation61_spill] sm:$0xff] }
 0x320   :  { %v8915_v7 = vcombine.low %v6337_v63, %v6338_v26  ;;  %v8916_v45 = vcombine.high %v6337_v63, %v6338_v26  ;;  %v5851_v61 = vrot.slane %v5843_v19, %v10558_v50  ;;  %7561 = vmatmul.mubr.bf16.gmra.mrb[36].mxu0 %v7213_v37  ;;  %5512 = vperm.xlu1 %9337, %v9474_v62  }
 0x321   :  { %v3589_v2 = vrot.slane %v13927_v52, %v10558_v50  ;;  %v5180_v49 = vrot.slane %v11884_v55, %v10558_v50  ;;  %v7276_v51 = vmax.bf16 %v13881_v25, %v7150_v22  ;;  %v7275_v27 = vmax.bf16 %v13881_v25, %v7149_v60  ;;  %v5183_v39 = vpop.permute.xlu1 %5182 }
 0x322   :  { %v6399_v4 = vmul.bf16 %v11556_v58, %v5840_v0  ;;  %v6400_v15 = vmul.bf16 %v11556_v58, %v5851_v61  ;;  %9343 = vset.pattern.permute.xlu0 %v13928_v35  ;;  %v7090_v56 = vadd.bf16 %v8916_v45, %v13929_v28  ;;  %v7089_v20 = vadd.bf16 %v8915_v7, %v13930_v31  ;;  %v12024_v37 = vpop.permute.xlu0 %5919  ;;  %v13933_v7 = vld [vmem:[#allocation207_spill] sm:$0xff]  ;;  %v9475_v61 = vld [vmem:[#allocation2 + $0x1d0] sm:$0xf]  ;;  %v13935_v31 = vld [vmem:[#allocation54_spill] sm:$0xff] }
 0x323   :  { %v4884_v36 = vadd.bf16 %v8850_v47, %v13931_v12  ;;  %v4885_v23 = vadd.bf16 %v8851_v9, %v13932_v6  ;;  %v4135_v55 = vmul.bf16 %v11038_v40, %v3600_v33  ;;  %7808 = vmatprep.mubr.bf16.mxu1 %v7276_v51  ;;  %6183 = vperm.xlu0 %9343, %v11936_v32   ;;  %v13936_v12 = vld [vmem:[#allocation64_spill] sm:$0xff]  ;;  %v13937_v6 = vld [vmem:[#allocation209_spill] sm:$0xff] }
 0x324   :  { %v8977_v21 = vcombine.low %v6399_v4, %v6400_v15  ;;  %v8978_v63 = vcombine.high %v6399_v4, %v6400_v15  ;;  %v5191_v41 = vrot.slane %v5183_v39, %v10558_v50  ;;  %7809 = vmatmul.mubr.bf16.gmra.mrb[32].mxu1 %v7275_v27  ;;  %6194 = vperm.xlu1 %9337, %v11960_v13  }
 0x325   :  { %v4134_v0 = vmul.bf16 %v11038_v40, %v3589_v2  ;;  %v6339_v26 = vmul.bf16 %v11556_v58, %v5180_v49  ;;  %v7216_v22 = vmax.bf16 %v13881_v25, %v7090_v56  ;;  %v7215_v60 = vmax.bf16 %v13881_v25, %v7089_v20  ;;  %v5865_v45 = vpop.permute.xlu1 %5864 }
 0x326   :  { %v5862_v32 = vrot.slane %v11907_v54, %v10558_v50  ;;  %v6340_v47 = vmul.bf16 %v11556_v58, %v5191_v41  ;;  %v7152_v9 = vadd.bf16 %v8978_v63, %v4885_v23  ;;  %v7151_v11 = vadd.bf16 %v8977_v21, %v4884_v36  ;;  %v12037_v49 = vpop.permute.xlu0 %5259  ;;  %v13934_v54 = vld [vmem:[#allocation203_spill] sm:$0xff]  ;;  %v12053_v63 = vld [vmem:[#allocation2 + $0x1d8] sm:$0xf] }
 0x327   :  { %v8852_v33 = vcombine.low %v4134_v0, %v4135_v55  ;;  %v8853_v19 = vcombine.high %v4134_v0, %v4135_v55  ;;  %v3622_v13 = vrot.slane %v13933_v7, %v10558_v50  ;;  %7568 = vmatprep.mubr.bf16.mxu0 %v7216_v22  ;;  %6205 = vperm.xlu0 %9343, %v9475_v61   ;;  %v13938_v55 = vld [vmem:[#allocation141_spill] sm:$0xff] }
 0x328   :  { %v8917_v62 = vcombine.low %v6339_v26, %v6340_v47  ;;  %v8918_v52 = vcombine.high %v6339_v26, %v6340_v47  ;;  %v5873_v2 = vrot.slane %v5865_v45, %v10558_v50  ;;  %7569 = vmatmul.mubr.bf16.gmra.mrb[40].mxu0 %v7215_v60  ;;  %9340 = vset.pattern.permute.xlu1 %v13899_v44  ;;  %v13939_v45 = vld [vmem:[#allocation30_spill] sm:$0xff] }
 0x329   :  { %v3611_v51 = vrot.slane %v13934_v54, %v10558_v50  ;;  %v5202_v27 = vrot.slane %v11926_v17, %v10558_v50  ;;  %3932 = vperm.xlu1 %9340, %v9475_v61   ;;  %v7278_v4 = vmax.bf16 %v13881_v25, %v7152_v9  ;;  %v7277_v15 = vmax.bf16 %v13881_v25, %v7151_v11  ;;  %v5205_v17 = vpop.permute.xlu1 %5204 }
 0x32a   :  { %v6401_v28 = vmul.bf16 %v11556_v58, %v5862_v32  ;;  %v6402_v56 = vmul.bf16 %v11556_v58, %v5873_v2  ;;  %v7092_v20 = vadd.bf16 %v8918_v52, %v13935_v31  ;;  %v7091_v36 = vadd.bf16 %v8917_v62, %v13936_v12  ;;  %v12057_v22 = vpop.permute.xlu0 %5941  ;;  %v13940_v2 = vld [vmem:[#allocation140_spill] sm:$0xff] }
 0x32b   :  { %v4886_v23 = vadd.bf16 %v8852_v33, %v13937_v6  ;;  %v4887_v39 = vadd.bf16 %v8853_v19, %v13938_v55  ;;  %v4137_v21 = vmul.bf16 %v11038_v40, %v3622_v13  ;;  %7816 = vmatprep.mubr.bf16.mxu1 %v7278_v4  ;;  %6227 = vperm.xlu0 %9343, %v12053_v63   ;;  %v9477_v19 = vld [vmem:[#allocation2 + $0xd8] sm:$0xf]  ;;  %v13941_v31 = vld [vmem:[#allocation208_spill] sm:$0xff]  ;;  %v9479_v55 = vld [vmem:[#allocation2 + $0xdc] sm:$0xf] }
 0x32c   :  { %v8979_v41 = vcombine.low %v6401_v28, %v6402_v56  ;;  %v8980_v0 = vcombine.high %v6401_v28, %v6402_v56  ;;  %v5213_v26 = vrot.slane %v5205_v17, %v10558_v50  ;;  %7817 = vmatmul.mubr.bf16.gmra.mrb[36].mxu1 %v7277_v15  ;;  %v7218_v60 = vmax.bf16 %v13881_v25, %v7092_v20 }
 0x32d   :  { %v4136_v32 = vmul.bf16 %v11038_v40, %v3611_v51  ;;  %v6341_v47 = vmul.bf16 %v11556_v58, %v5202_v27  ;;  %v5884_v9 = vrot.slane %v11951_v46, %v10558_v50  ;;  %9341 = vset.pattern.permute.xlu1 %v13928_v35  ;;  %v7217_v11 = vmax.bf16 %v13881_v25, %v7091_v36  ;;  %v5887_v46 = vpop.permute.xlu1 %5886  ;;  %v12071_v51 = vld [vmem:[#allocation2 + $0x1e0] sm:$0xf] }
 0x32e   :  { %v6342_v33 = vmul.bf16 %v11556_v58, %v5213_v26  ;;  %5523 = vperm.xlu1 %9341, %v9477_v19   ;;  %7576 = vmatprep.mubr.bf16.mxu0 %v7218_v60  ;;  %v7154_v7 = vadd.bf16 %v8980_v0, %v4887_v39  ;;  %v7153_v13 = vadd.bf16 %v8979_v41, %v4886_v23  ;;  %v12075_v28 = vpop.permute.xlu0 %5281  ;;  %v13943_v41 = vld [vmem:[#allocation125_spill] sm:$0xff]  ;;  %v13944_v26 = vld [vmem:[#allocation142_spill] sm:$0xff] }
 0x32f   :  { %v3149_v61 = vrot.slane %v13939_v45, %v10558_v50  ;;  %v8854_v62 = vcombine.low %v4136_v32, %v4137_v21  ;;  %v8855_v52 = vcombine.high %v4136_v32, %v4137_v21  ;;  %v3644_v54 = vrot.slane %v13940_v2, %v10558_v50  ;;  %6249 = vperm.xlu0 %9343, %v12071_v51   ;;  %v13942_v21 = vld [vmem:[#allocation58_spill] sm:$0xff] }
 0x330   :  { %v8919_v27 = vcombine.low %v6341_v47, %v6342_v33  ;;  %v8920_v4 = vcombine.high %v6341_v47, %v6342_v33  ;;  %v5895_v15 = vrot.slane %v5887_v46, %v10558_v50  ;;  %7577 = vmatmul.mubr.bf16.gmra.mrb[44].mxu0 %v7217_v11  ;;  %v7280_v56 = vmax.bf16 %v13881_v25, %v7154_v7  ;;  %v12106_v2 = vld [vmem:[#allocation2 + $0x1e4] sm:$0xf] }
 0x331   :  { %v3633_v20 = vrot.slane %v13941_v31, %v10558_v50  ;;  %v6403_v12 = vmul.bf16 %v11556_v58, %v5884_v9  ;;  %v5224_v36 = vrot.slane %v11968_v24, %v10558_v50  ;;  %v7279_v6 = vmax.bf16 %v13881_v25, %v7153_v13  ;;  %v13945_v24 = vld [vmem:[#allocation210_spill] sm:$0xff]  ;;  %v5227_v9 = vpop.permute.xlu1 %5226  ;;  %v13947_v31 = vld [vmem:[#allocation144_spill] sm:$0xff] }
 0x332   :  { %v6404_v23 = vmul.bf16 %v11556_v58, %v5895_v15  ;;  %5534 = vperm.xlu1 %9341, %v9479_v55   ;;  %7824 = vmatprep.mubr.bf16.mxu1 %v7280_v56  ;;  %v7094_v39 = vadd.bf16 %v8920_v4, %v11588_v14  ;;  %v7093_v17 = vadd.bf16 %v8919_v27, %v13942_v21  ;;  %v12098_v19 = vpop.permute.xlu0 %5963  ;;  %v13946_v4 = vld [vmem:[#allocation126_spill] sm:$0xff] }
 0x333   :  { %v12091_v0 = vadd.bf16 %v8808_v5, %v13943_v41  ;;  %v4888_v60 = vadd.bf16 %v8854_v62, %v13944_v26  ;;  %v4889_v32 = vadd.bf16 %v8855_v52, %v13945_v24  ;;  %v4139_v47 = vmul.bf16 %v11038_v40, %v3644_v54  ;;  %9347 = vset.pattern.permute.xlu0 %v13899_v44  ;;  %v13949_v26 = vld [vmem:[#allocation66_spill] sm:$0xff]  ;;  %v13950_v24 = vld [vmem:[#allocation59_spill] sm:$0xff] }
 0x334   :  { %v8981_v11 = vcombine.low %v6403_v12, %v6404_v23  ;;  %v8982_v33 = vcombine.high %v6403_v12, %v6404_v23  ;;  %v5235_v14 = vrot.slane %v5227_v9, %v10558_v50  ;;  %7825 = vmatmul.mubr.bf16.gmra.mrb[40].mxu1 %v7279_v6  ;;  %v7220_v7 = vmax.bf16 %v13881_v25, %v7094_v39  ;;  %v13948_v39 = vld [vmem:[#allocation143_spill] sm:$0xff]  ;;  %v13954_v45 = vld [vmem:[#allocation146_spill] sm:$0xff] }
 0x335   :  { %v4138_v5 = vmul.bf16 %v11038_v40, %v3633_v20  ;;  %v6343_v13 = vmul.bf16 %v11556_v58, %v5224_v36  ;;  %v5906_v62 = vrot.slane %v11989_v10, %v10558_v50  ;;  %v7219_v52 = vmax.bf16 %v13881_v25, %v7093_v17  ;;  %3987 = vperm.xlu0 %9347, %v12106_v2   ;;  %v5909_v12 = vpop.permute.xlu1 %5908  ;;  %v12129_v17 = vld [vmem:[#allocation2 + $0x1ec] sm:$0xf] }
 0x336   :  { %v6344_v54 = vmul.bf16 %v11556_v58, %v5235_v14  ;;  %6216 = vperm.xlu1 %9341, %v11978_v59   ;;  %7584 = vmatprep.mubr.bf16.mxu0 %v7220_v7  ;;  %v7156_v46 = vadd.bf16 %v8982_v33, %v4889_v32  ;;  %v7155_v27 = vadd.bf16 %v8981_v11, %v4888_v60  ;;  %v12120_v59 = vpop.permute.xlu0 %5303  ;;  %v13952_v11 = vld [vmem:[#allocation211_spill] sm:$0xff] }
 0x337   :  { %v12115_v15 = vadd.bf16 %v8809_v53, %v13946_v4  ;;  %v8856_v10 = vcombine.low %v4138_v5, %v4139_v47  ;;  %v8857_v56 = vcombine.high %v4138_v5, %v4139_v47  ;;  %v3666_v20 = vrot.slane %v13947_v31, %v10558_v50  ;;  %v13951_v47 = vld [vmem:[#allocation145_spill] sm:$0xff] }
 0x338   :  { %v8921_v36 = vcombine.low %v6343_v13, %v6344_v54  ;;  %v8922_v6 = vcombine.high %v6343_v13, %v6344_v54  ;;  %v5917_v23 = vrot.slane %v5909_v12, %v10558_v50  ;;  %7585 = vmatmul.mubr.bf16.gmra.mrb[48].mxu0 %v7219_v52  ;;  %v7282_v55 = vmax.bf16 %v13881_v25, %v7156_v46  ;;  %v13953_v12 = vld [vmem:[#allocation216_spill] sm:$0xff] }
 0x339   :  { %v3655_v29 = vrot.slane %v13948_v39, %v10558_v50  ;;  %v6405_v18 = vmul.bf16 %v11556_v58, %v5906_v62  ;;  %v5246_v53 = vrot.slane %v12006_v42, %v10558_v50  ;;  %v7281_v21 = vmax.bf16 %v13881_v25, %v7155_v27  ;;  %4009 = vperm.xlu0 %9347, %v12129_v17   ;;  %v5249_v7 = vpop.permute.xlu1 %5248 }
 0x33a   :  { %v6406_v41 = vmul.bf16 %v11556_v58, %v5917_v23  ;;  %9342 = vset.pattern.permute.xlu1 %v13899_v44  ;;  %7832 = vmatprep.mubr.bf16.mxu1 %v7282_v55  ;;  %v7096_v60 = vadd.bf16 %v8922_v6, %v13949_v26  ;;  %v7095_v32 = vadd.bf16 %v8921_v36, %v13950_v24  ;;  %v12147_v52 = vpop.permute.xlu0 %5985  ;;  %v13955_v24 = vld [vmem:[#allocation70_spill] sm:$0xff] }
 0x33b   :  { %v12140_v42 = vmul.bf16 %v11038_v40, %v3138_v30  ;;  %v4890_v9 = vadd.bf16 %v8856_v10, %v13951_v47  ;;  %v4891_v33 = vadd.bf16 %v8857_v56, %v13952_v11  ;;  %v4141_v14 = vmul.bf16 %v11038_v40, %v3666_v20  ;;  %3954 = vperm.xlu1 %9342, %v12053_v63   ;;  %v12157_v56 = vld [vmem:[#allocation2 + $0x1e8] sm:$0xf]  ;;  %v9484_v11 = vld [vmem:[#allocation2 + $0xf8] sm:$0xf] }
 0x33c   :  { %v8983_v5 = vcombine.low %v6405_v18, %v6406_v41  ;;  %v8984_v13 = vcombine.high %v6405_v18, %v6406_v41  ;;  %v5257_v62 = vrot.slane %v5249_v7, %v10558_v50  ;;  %7833 = vmatmul.mubr.bf16.gmra.mrb[44].mxu1 %v7281_v21  ;;  %v7222_v43 = vmax.bf16 %v13881_v25, %v7096_v60  ;;  %v9483_v18 = vld [vmem:[#allocation2 + $0xe0] sm:$0xf]  ;;  %v13956_v47 = vld [vmem:[#allocation67_spill] sm:$0xff] }
 0x33d   :  { %v4140_v30 = vmul.bf16 %v11038_v40, %v3655_v29  ;;  %v6345_v54 = vmul.bf16 %v11556_v58, %v5246_v53  ;;  %v5928_v46 = vrot.slane %v12024_v37, %v10558_v50  ;;  %v7221_v27 = vmax.bf16 %v13881_v25, %v7095_v32  ;;  %9350 = vset.pattern.permute.xlu0 %v13928_v35  ;;  %v5931_v6 = vpop.permute.xlu1 %5930 }
 0x33e   :  { %v6346_v63 = vmul.bf16 %v11556_v58, %v5257_v62  ;;  %7592 = vmatprep.mubr.bf16.mxu0 %v7222_v43  ;;  %v7158_v4 = vadd.bf16 %v8984_v13, %v4891_v33  ;;  %v7157_v10 = vadd.bf16 %v8983_v5, %v4890_v9  ;;  %6271 = vperm.xlu0 %9350, %v12157_v56   ;;  %v12170_v29 = vpop.permute.xlu0 %5325  ;;  %v13958_v5 = vld [vmem:[#allocation212_spill] sm:$0xff] }
 0x33f   :  { %v12164_v31 = vmul.bf16 %v11038_v40, %v3149_v61  ;;  %v8858_v37 = vcombine.low %v4140_v30, %v4141_v14  ;;  %v8859_v20 = vcombine.high %v4140_v30, %v4141_v14  ;;  %v3688_v36 = vrot.slane %v13953_v12, %v10558_v50  ;;  %9344 = vset.pattern.permute.xlu1 %v13928_v35  ;;  %v13957_v14 = vld [vmem:[#allocation147_spill] sm:$0xff] }
 0x340   :  { %v8923_v23 = vcombine.low %v6345_v54, %v6346_v63  ;;  %v8924_v55 = vcombine.high %v6345_v54, %v6346_v63  ;;  %v5939_v39 = vrot.slane %v5931_v6, %v10558_v50  ;;  %7593 = vmatmul.mubr.bf16.gmra.mrb[52].mxu0 %v7221_v27  ;;  %5545 = vperm.xlu1 %9344, %v9483_v18   ;;  %v9485_v27 = vld [vmem:[#allocation2 + $0xe4] sm:$0xf] }
 0x341   :  { %v3677_v61 = vrot.slane %v13954_v45, %v10558_v50  ;;  %v6407_v53 = vmul.bf16 %v11556_v58, %v5928_v46  ;;  %v7284_v21 = vmax.bf16 %v13881_v25, %v7158_v4  ;;  %v7283_v41 = vmax.bf16 %v13881_v25, %v7157_v10  ;;  %v5271_v43 = vpop.permute.xlu1 %5270 }
 0x342   :  { %v5268_v26 = vrot.slane %v12037_v49, %v10558_v50  ;;  %v6408_v60 = vmul.bf16 %v11556_v58, %v5939_v39  ;;  %v7098_v32 = vadd.bf16 %v8924_v55, %v13955_v24  ;;  %v7097_v9 = vadd.bf16 %v8923_v23, %v13956_v47  ;;  %5611 = vperm.xlu0 %9350, %v9484_v11   ;;  %v12197_v23 = vld [vmem:[#allocation2 + $0x1f0] sm:$0xf] }
 0x343   :  { %v8810_v33 = vcombine.low %v11945_v38, %v12140_v42  ;;  %v4892_v7 = vadd.bf16 %v8858_v37, %v13957_v14  ;;  %v4893_v13 = vadd.bf16 %v8859_v20, %v13958_v5  ;;  %v4143_v62 = vmul.bf16 %v11038_v40, %v3688_v36  ;;  %7840 = vmatprep.mubr.bf16.mxu1 %v7284_v21  ;;  %v12188_v46 = vpop.permute.xlu0 %6007 }
 0x344   :  { %v8985_v49 = vcombine.low %v6407_v53, %v6408_v60  ;;  %v8986_v30 = vcombine.high %v6407_v53, %v6408_v60  ;;  %v5279_v54 = vrot.slane %v5271_v43, %v10558_v50  ;;  %7841 = vmatmul.mubr.bf16.gmra.mrb[48].mxu1 %v7283_v41  ;;  %5556 = vperm.xlu1 %9344, %v9485_v27   ;;  %v13960_v60 = vld [vmem:[#allocation148_spill] sm:$0xff] }
 0x345   :  { %v4142_v63 = vmul.bf16 %v11038_v40, %v3677_v61  ;;  %v5950_v4 = vrot.slane %v12057_v22, %v10558_v50  ;;  %v7224_v10 = vmax.bf16 %v13881_v25, %v7098_v32  ;;  %v7223_v37 = vmax.bf16 %v13881_v25, %v7097_v9  ;;  %v13959_v22 = vld [vmem:[#allocation153_spill] sm:$0xff] }
 0x346   :  { %v6347_v20 = vmul.bf16 %v11556_v58, %v5268_v26  ;;  %v6348_v12 = vmul.bf16 %v11556_v58, %v5279_v54  ;;  %v7160_v36 = vadd.bf16 %v8986_v30, %v4893_v13  ;;  %v7159_v6 = vadd.bf16 %v8985_v49, %v4892_v7  ;;  %6293 = vperm.xlu0 %9350, %v12197_v23   ;;  %v5953_v61 = vpop.permute.xlu1 %5952  ;;  %v13961_v7 = vld [vmem:[#allocation68_spill] sm:$0xff]  ;;  %v13962_v13 = vld [vmem:[#allocation69_spill] sm:$0xff]  ;;  %v13965_v54 = vld [vmem:[#allocation214_spill] sm:$0xff] }
 0x347   :  { %v8811_v55 = vcombine.high %v11945_v38, %v12140_v42  ;;  %v8860_v39 = vcombine.low %v4142_v63, %v4143_v62  ;;  %v8861_v18 = vcombine.high %v4142_v63, %v4143_v62  ;;  %v3710_v45 = vrot.slane %v13959_v22, %v10558_v50  ;;  %7600 = vmatprep.mubr.bf16.mxu0 %v7224_v10  ;;  %v12205_v26 = vpop.permute.xlu0 %5347  ;;  %v13964_v49 = vld [vmem:[#allocation213_spill] sm:$0xff] }
 0x348   :  { %v8925_v53 = vcombine.low %v6347_v20, %v6348_v12  ;;  %v8926_v21 = vcombine.high %v6347_v20, %v6348_v12  ;;  %v5961_v41 = vrot.slane %v5953_v61, %v10558_v50  ;;  %7601 = vmatmul.mubr.bf16.gmra.mrb[56].mxu0 %v7223_v37  ;;  %6238 = vperm.xlu1 %9344, %v11998_v1   ;;  %v13963_v1 = vld [vmem:[#allocation31_spill] sm:$0xff] }
 0x349   :  { %v3699_v24 = vrot.slane %v13960_v60, %v10558_v50  ;;  %v6409_v32 = vmul.bf16 %v11556_v58, %v5950_v4  ;;  %v7286_v47 = vmax.bf16 %v13881_v25, %v7160_v36  ;;  %v7285_v9 = vmax.bf16 %v13881_v25, %v7159_v6 }
 0x34a   :  { %v5290_v11 = vrot.slane %v12075_v28, %v10558_v50  ;;  %v6410_v14 = vmul.bf16 %v11556_v58, %v5961_v41  ;;  %v7100_v5 = vadd.bf16 %v8926_v21, %v13961_v7  ;;  %v7099_v62 = vadd.bf16 %v8925_v53, %v13962_v13  ;;  %v5293_v4 = vpop.permute.xlu1 %5292  ;;  %v13966_v53 = vld [vmem:[#allocation35_spill] sm:$0xff] }
 0x34b   :  { %v3160_v43 = vrot.slane %v13963_v1, %v10558_v50  ;;  %v4894_v30 = vadd.bf16 %v8860_v39, %v13964_v49  ;;  %v4895_v27 = vadd.bf16 %v8861_v18, %v13965_v54  ;;  %v4145_v63 = vmul.bf16 %v11038_v40, %v3710_v45  ;;  %7848 = vmatprep.mubr.bf16.mxu1 %v7286_v47  ;;  %v12224_v20 = vpop.permute.xlu0 %6029  ;;  %v13968_v7 = vld [vmem:[#allocation155_spill] sm:$0xff] }
 0x34c   :  { %v8987_v10 = vcombine.low %v6409_v32, %v6410_v14  ;;  %v8988_v37 = vcombine.high %v6409_v32, %v6410_v14  ;;  %v5301_v28 = vrot.slane %v5293_v4, %v10558_v50  ;;  %7849 = vmatmul.mubr.bf16.gmra.mrb[52].mxu1 %v7285_v9  ;;  %9345 = vset.pattern.permute.xlu1 %v13899_v44  ;;  %v9487_v54 = vld [vmem:[#allocation2 + $0xe8] sm:$0xf] }
 0x34d   :  { %v4144_v12 = vmul.bf16 %v11038_v40, %v3699_v24  ;;  %v5972_v36 = vrot.slane %v12098_v19, %v10558_v50  ;;  %3976 = vperm.xlu1 %9345, %v12071_v51   ;;  %v7226_v6 = vmax.bf16 %v13881_v25, %v7100_v5  ;;  %v7225_v39 = vmax.bf16 %v13881_v25, %v7099_v62  ;;  %v13967_v24 = vld [vmem:[#allocation156_spill] sm:$0xff]  ;;  %v13970_v4 = vld [vmem:[#allocation71_spill] sm:$0xff] }
 0x34e   :  { %v6349_v18 = vmul.bf16 %v11556_v58, %v5290_v11  ;;  %v6350_v22 = vmul.bf16 %v11556_v58, %v5301_v28  ;;  %v7162_v45 = vadd.bf16 %v8988_v37, %v4895_v27  ;;  %v7161_v61 = vadd.bf16 %v8987_v10, %v4894_v30  ;;  %v5975_v51 = vpop.permute.xlu1 %5974  ;;  %v13969_v27 = vld [vmem:[#allocation164_spill] sm:$0xff]  ;;  %v13971_v37 = vld [vmem:[#allocation127_spill] sm:$0xff] }
 0x34f   :  { %v3171_v21 = vrot.slane %v13966_v53, %v10558_v50  ;;  %v8862_v41 = vcombine.low %v4144_v12, %v4145_v63  ;;  %v8863_v60 = vcombine.high %v4144_v12, %v4145_v63  ;;  %v3732_v19 = vrot.slane %v13967_v24, %v10558_v50  ;;  %7608 = vmatprep.mubr.bf16.mxu0 %v7226_v6 }
 0x350   :  { %v8927_v32 = vcombine.low %v6349_v18, %v6350_v22  ;;  %v8928_v47 = vcombine.high %v6349_v18, %v6350_v22  ;;  %v5983_v9 = vrot.slane %v5975_v51, %v10558_v50  ;;  %7609 = vmatmul.mubr.bf16.gmra.mrb[60].mxu0 %v7225_v39  ;;  %v12240_v11 = vpop.permute.xlu0 %5369  ;;  %v7288_v14 = vmax.bf16 %v13881_v25, %v7162_v45 }
 0x351   :  { %v3721_v5 = vrot.slane %v13968_v7, %v10558_v50  ;;  %v6411_v13 = vmul.bf16 %v11556_v58, %v5972_v36  ;;  %v5312_v62 = vrot.slane %v12120_v59, %v10558_v50  ;;  %9346 = vset.pattern.permute.xlu1 %v13928_v35  ;;  %v7287_v49 = vmax.bf16 %v13881_v25, %v7161_v61  ;;  %v13972_v59 = vld [vmem:[#allocation215_spill] sm:$0xff]  ;;  %v13973_v36 = vld [vmem:[#allocation149_spill] sm:$0xff] }
 0x352   :  { %v6412_v30 = vmul.bf16 %v11556_v58, %v5983_v9  ;;  %5567 = vperm.xlu1 %9346, %v9487_v54   ;;  %7856 = vmatprep.mubr.bf16.mxu1 %v7288_v14  ;;  %v7102_v63 = vadd.bf16 %v8928_v47, %v13969_v27  ;;  %v7101_v10 = vadd.bf16 %v8927_v32, %v13970_v4  ;;  %v5315_v18 = vpop.permute.xlu1 %5314  ;;  %v9488_v47 = vld [vmem:[#allocation2 + $0xec] sm:$0xf] }
 0x353   :  { %v12257_v28 = vadd.bf16 %v8810_v33, %v13971_v37  ;;  %v4896_v12 = vadd.bf16 %v8862_v41, %v13972_v59  ;;  %v4897_v6 = vadd.bf16 %v8863_v60, %v13973_v36  ;;  %v4147_v39 = vmul.bf16 %v11038_v40, %v3732_v19  ;;  %v13974_v7 = vld [vmem:[#allocation175_spill] sm:$0xff]  ;;  %v13976_v37 = vld [vmem:[#allocation29_spill] sm:$0xff] }
 0x354   :  { %v8989_v22 = vcombine.low %v6411_v13, %v6412_v30  ;;  %v8990_v45 = vcombine.high %v6411_v13, %v6412_v30  ;;  %v5323_v61 = vrot.slane %v5315_v18, %v10558_v50  ;;  %7857 = vmatmul.mubr.bf16.gmra.mrb[56].mxu1 %v7287_v49  ;;  %v12263_v24 = vpop.permute.xlu0 %6051  ;;  %v7228_v51 = vmax.bf16 %v13881_v25, %v7102_v63  ;;  %v13975_v49 = vld [vmem:[#allocation33_spill] sm:$0xff]  ;;  %v13977_v18 = vld [vmem:[#allocation150_spill] sm:$0xff] }
 0x355   :  { %v4146_v32 = vmul.bf16 %v11038_v40, %v3721_v5  ;;  %v6351_v33 = vmul.bf16 %v11556_v58, %v5312_v62  ;;  %v5994_v41 = vrot.slane %v12147_v52, %v10558_v50  ;;  %v7227_v60 = vmax.bf16 %v13881_v25, %v7101_v10 }
 0x356   :  { %v6352_v19 = vmul.bf16 %v11556_v58, %v5323_v61  ;;  %5578 = vperm.xlu1 %9346, %v9488_v47   ;;  %7616 = vmatprep.mubr.bf16.mxu0 %v7228_v51  ;;  %v7164_v9 = vadd.bf16 %v8990_v45, %v4897_v6  ;;  %v7163_v14 = vadd.bf16 %v8989_v22, %v4896_v12 }
 0x357   :  { %v12276_v13 = vadd.bf16 %v8811_v55, %v13974_v7  ;;  %v8864_v5 = vcombine.low %v4146_v32, %v4147_v39  ;;  %v8865_v62 = vcombine.high %v4146_v32, %v4147_v39  ;;  %v3754_v52 = vrot.slane %v13975_v49, %v10558_v50  ;;  %v5997_v30 = vpop.permute.xlu1 %5996 }
 0x358   :  { %v8929_v54 = vcombine.low %v6351_v33, %v6352_v19  ;;  %v8930_v27 = vcombine.high %v6351_v33, %v6352_v19  ;;  %v6005_v63 = vrot.slane %v5997_v30, %v10558_v50  ;;  %7617 = vmatmul.mubr.bf16.gmra.mrb[64].mxu0 %v7227_v60  ;;  %v12281_v4 = vpop.permute.xlu0 %5391  ;;  %v7290_v10 = vmax.bf16 %v13881_v25, %v7164_v9 }
 0x359   :  { %v3743_v38 = vrot.slane %v13976_v37, %v10558_v50  ;;  %v6413_v42 = vmul.bf16 %v11556_v58, %v5994_v41  ;;  %v5334_v55 = vrot.slane %v12170_v29, %v10558_v50  ;;  %v7289_v59 = vmax.bf16 %v13881_v25, %v7163_v14  ;;  %v13978_v29 = vld [vmem:[#allocation151_spill] sm:$0xff] }
 0x35a   :  { %v6414_v12 = vmul.bf16 %v11556_v58, %v6005_v63  ;;  %6260 = vperm.xlu1 %9346, %v12106_v2   ;;  %7864 = vmatprep.mubr.bf16.mxu1 %v7290_v10  ;;  %v7104_v36 = vadd.bf16 %v8930_v27, %v11660_v8  ;;  %v7103_v6 = vadd.bf16 %v8929_v54, %v11657_v57  ;;  %v13980_v63 = vld [vmem:[#allocation32_spill] sm:$0xff] }
 0x35b   :  { %v12298_v39 = vmul.bf16 %v11038_v40, %v3160_v43  ;;  %v4898_v22 = vadd.bf16 %v8864_v5, %v13977_v18  ;;  %v4899_v45 = vadd.bf16 %v8865_v62, %v13978_v29  ;;  %v4149_v61 = vmul.bf16 %v11038_v40, %v3754_v52  ;;  %v5337_v51 = vpop.permute.xlu1 %5336  ;;  %v13979_v62 = vld [vmem:[#allocation226_spill] sm:$0xff] }
 0x35c   :  { %v8991_v32 = vcombine.low %v6413_v42, %v6414_v12  ;;  %v8992_v2 = vcombine.high %v6413_v42, %v6414_v12  ;;  %v5345_v33 = vrot.slane %v5337_v51, %v10558_v50  ;;  %7865 = vmatmul.mubr.bf16.gmra.mrb[60].mxu1 %v7289_v59  ;;  %v12304_v8 = vpop.permute.xlu0 %6073  ;;  %v7230_v57 = vmax.bf16 %v13881_v25, %v7104_v36  ;;  %v13981_v36 = vld [vmem:[#allocation152_spill] sm:$0xff]  ;;  %v13982_v18 = vld [vmem:[#allocation154_spill] sm:$0xff] }
 0x35d   :  { %v4148_v1 = vmul.bf16 %v11038_v40, %v3743_v38  ;;  %v6353_v43 = vmul.bf16 %v11556_v58, %v5334_v55  ;;  %v6016_v41 = vrot.slane %v12188_v46, %v10558_v50  ;;  %v7229_v60 = vmax.bf16 %v13881_v25, %v7103_v6 }
 0x35e   :  { %v6354_v19 = vmul.bf16 %v11556_v58, %v5345_v33  ;;  %9348 = vset.pattern.permute.xlu1 %v13899_v44  ;;  %7624 = vmatprep.mubr.bf16.mxu0 %v7230_v57  ;;  %v7166_v47 = vadd.bf16 %v8992_v2, %v4899_v45  ;;  %v7165_v9 = vadd.bf16 %v8991_v32, %v4898_v22 }
 0x35f   :  { %v12318_v14 = vmul.bf16 %v11038_v40, %v3171_v21  ;;  %v8866_v7 = vcombine.low %v4148_v1, %v4149_v61  ;;  %v8867_v5 = vcombine.high %v4148_v1, %v4149_v61  ;;  %v3776_v46 = vrot.slane %v13979_v62, %v10558_v50  ;;  %3998 = vperm.xlu1 %9348, %v12157_v56   ;;  %v6019_v49 = vpop.permute.xlu1 %6018 }
 0x360   :  { %v8931_v52 = vcombine.low %v6353_v43, %v6354_v19  ;;  %v8932_v30 = vcombine.high %v6353_v43, %v6354_v19  ;;  %v6027_v54 = vrot.slane %v6019_v49, %v10558_v50  ;;  %7625 = vmatmul.mubr.bf16.gmra.mrb[68].mxu0 %v7229_v60  ;;  %v12324_v27 = vpop.permute.xlu0 %5413  ;;  %v7292_v53 = vmax.bf16 %v13881_v25, %v7166_v47  ;;  %v13983_v19 = vld [vmem:[#allocation38_spill] sm:$0xff] }
 0x361   :  { %v8812_v21 = vcombine.low %v12164_v31, %v12298_v39  ;;  %v3765_v10 = vrot.slane %v13980_v63, %v10558_v50  ;;  %v5356_v37 = vrot.slane %v12205_v26, %v10558_v50  ;;  %v7291_v56 = vmax.bf16 %v13881_v25, %v7165_v9 }
 0x362   :  { %v6415_v38 = vmul.bf16 %v11556_v58, %v6016_v41  ;;  %v6416_v42 = vmul.bf16 %v11556_v58, %v6027_v54  ;;  %7872 = vmatprep.mubr.bf16.mxu1 %v7292_v53  ;;  %v7106_v55 = vadd.bf16 %v8932_v30, %v11744_v34  ;;  %v7105_v59 = vadd.bf16 %v8931_v52, %v11726_v16  ;;  %v9489_v16 = vld [vmem:[#allocation2 + $0xf0] sm:$0xf]  ;;  %v9490_v54 = vld [vmem:[#allocation2 + $0xf4] sm:$0xf]  ;;  %v13985_v53 = vld [vmem:[#allocation37_spill] sm:$0xff] }
 0x363   :  { %v8813_v12 = vcombine.high %v12164_v31, %v12298_v39  ;;  %v4900_v6 = vadd.bf16 %v8866_v7, %v13981_v36  ;;  %v4901_v22 = vadd.bf16 %v8867_v5, %v13982_v18  ;;  %v4151_v26 = vmul.bf16 %v11038_v40, %v3776_v46  ;;  %9349 = vset.pattern.permute.xlu1 %v13928_v35  ;;  %v5359_v29 = vpop.permute.xlu1 %5358  ;;  %v13984_v5 = vld [vmem:[#allocation40_spill] sm:$0xff]  ;;  %v13986_v36 = vld [vmem:[#allocation115_spill] sm:$0xff]  ;;  %v13987_v18 = vld [vmem:[#allocation217_spill] sm:$0xff] }
 0x364   :  { %v8993_v45 = vcombine.low %v6415_v38, %v6416_v42  ;;  %v8994_v61 = vcombine.high %v6415_v38, %v6416_v42  ;;  %v5367_v51 = vrot.slane %v5359_v29, %v10558_v50  ;;  %7873 = vmatmul.mubr.bf16.gmra.mrb[64].mxu1 %v7291_v56  ;;  %v12345_v34 = vpop.permute.xlu0 %6095  ;;  %5589 = vperm.xlu1 %9349, %v9489_v16  }
 0x365   :  { %v4150_v32 = vmul.bf16 %v11038_v40, %v3765_v10  ;;  %v6355_v2 = vmul.bf16 %v11556_v58, %v5356_v37  ;;  %v7232_v33 = vmax.bf16 %v13881_v25, %v7106_v55  ;;  %v7231_v57 = vmax.bf16 %v13881_v25, %v7105_v59 }
 0x366   :  { %v6038_v1 = vrot.slane %v12224_v20, %v10558_v50  ;;  %v6356_v43 = vmul.bf16 %v11556_v58, %v5367_v51  ;;  %v7168_v41 = vadd.bf16 %v8994_v61, %v4901_v22  ;;  %v7167_v60 = vadd.bf16 %v8993_v45, %v4900_v6 }
 0x367   :  { %v3182_v47 = vrot.slane %v13983_v19, %v10558_v50  ;;  %v8868_v9 = vcombine.low %v4150_v32, %v4151_v26  ;;  %v8869_v7 = vcombine.high %v4150_v32, %v4151_v26  ;;  %v3798_v62 = vrot.slane %v13984_v5, %v10558_v50  ;;  %7632 = vmatprep.mubr.bf16.mxu0 %v7232_v33  ;;  %v6041_v46 = vpop.permute.xlu1 %6040  ;;  %v13988_v26 = vld [vmem:[#allocation218_spill] sm:$0xff] }
 0x368   :  { %v8933_v49 = vcombine.low %v6355_v2, %v6356_v43  ;;  %v8934_v52 = vcombine.high %v6355_v2, %v6356_v43  ;;  %v6049_v30 = vrot.slane %v6041_v46, %v10558_v50  ;;  %7633 = vmatmul.mubr.bf16.gmra.mrb[72].mxu0 %v7231_v57  ;;  %v12359_v20 = vpop.permute.xlu0 %5435  ;;  %5600 = vperm.xlu1 %9349, %v9490_v54  }
 0x369   :  { %v3787_v63 = vrot.slane %v13985_v53, %v10558_v50  ;;  %v5378_v10 = vrot.slane %v12240_v11, %v10558_v50  ;;  %v7294_v37 = vmax.bf16 %v13881_v25, %v7168_v41  ;;  %v7293_v56 = vmax.bf16 %v13881_v25, %v7167_v60  ;;  %v13989_v60 = vld [vmem:[#allocation176_spill] sm:$0xff] }
 0x36a   :  { %v6417_v38 = vmul.bf16 %v11556_v58, %v6038_v1  ;;  %v6418_v42 = vmul.bf16 %v11556_v58, %v6049_v30  ;;  %v7108_v55 = vadd.bf16 %v8934_v52, %v11901_v48  ;;  %v7107_v59 = vadd.bf16 %v8933_v49, %v11879_v3  ;;  %v13991_v30 = vld [vmem:[#allocation45_spill] sm:$0xff] }
 0x36b   :  { %v3193_v6 = vrot.slane %v13986_v36, %v10558_v50  ;;  %v4902_v22 = vadd.bf16 %v8868_v9, %v13987_v18  ;;  %v4903_v29 = vadd.bf16 %v8869_v7, %v13988_v26  ;;  %v4153_v11 = vmul.bf16 %v11038_v40, %v3798_v62  ;;  %7880 = vmatprep.mubr.bf16.mxu1 %v7294_v37  ;;  %v5381_v45 = vpop.permute.xlu1 %5380  ;;  %v13990_v7 = vld [vmem:[#allocation44_spill] sm:$0xff] }
 0x36c   :  { %v8995_v61 = vcombine.low %v6417_v38, %v6418_v42  ;;  %v8996_v51 = vcombine.high %v6417_v38, %v6418_v42  ;;  %v5389_v16 = vrot.slane %v5381_v45, %v10558_v50  ;;  %7881 = vmatmul.mubr.bf16.gmra.mrb[68].mxu1 %v7293_v56  ;;  %v12377_v32 = vpop.permute.xlu0 %6117  ;;  %6282 = vperm.xlu1 %9349, %v12129_v17   ;;  %v13992_v42 = vld [vmem:[#allocation157_spill] sm:$0xff] }
 0x36d   :  { %v4152_v3 = vmul.bf16 %v11038_v40, %v3787_v63  ;;  %v6357_v48 = vmul.bf16 %v11556_v58, %v5378_v10  ;;  %v7234_v2 = vmax.bf16 %v13881_v25, %v7108_v55  ;;  %v7233_v33 = vmax.bf16 %v13881_v25, %v7107_v59  ;;  %v13993_v59 = vld [vmem:[#allocation28_spill] sm:$0xff] }
 0x36e   :  { %v6060_v57 = vrot.slane %v12263_v24, %v10558_v50  ;;  %v6358_v1 = vmul.bf16 %v11556_v58, %v5389_v16  ;;  %v7170_v43 = vadd.bf16 %v8996_v51, %v4903_v29  ;;  %v7169_v41 = vadd.bf16 %v8995_v61, %v4902_v22  ;;  %v9491_v16 = vld [vmem:[#allocation2 + $0xfc] sm:$0xf] }
 0x36f   :  { %v12391_v17 = vadd.bf16 %v8812_v21, %v13989_v60  ;;  %v8870_v19 = vcombine.low %v4152_v3, %v4153_v11  ;;  %v8871_v9 = vcombine.high %v4152_v3, %v4153_v11  ;;  %v3820_v5 = vrot.slane %v13990_v7, %v10558_v50  ;;  %7640 = vmatprep.mubr.bf16.mxu0 %v7234_v2  ;;  %v6063_v62 = vpop.permute.xlu1 %6062  ;;  %v13994_v2 = vld [vmem:[#allocation179_spill] sm:$0xff] }
 0x370   :  { %v8935_v46 = vcombine.low %v6357_v48, %v6358_v1  ;;  %v8936_v49 = vcombine.high %v6357_v48, %v6358_v1  ;;  %v6071_v24 = vrot.slane %v6063_v62, %v10558_v50  ;;  %7641 = vmatmul.mubr.bf16.gmra.mrb[76].mxu0 %v7233_v33  ;;  %v12396_v52 = vpop.permute.xlu0 %5457  ;;  %9351 = vset.pattern.permute.xlu1 %v13899_v44 }
 0x371   :  { %v3809_v21 = vrot.slane %v13991_v30, %v10558_v50  ;;  %v5400_v54 = vrot.slane %v12281_v4, %v10558_v50  ;;  %4020 = vperm.xlu1 %9351, %v12197_v23   ;;  %v7296_v53 = vmax.bf16 %v13881_v25, %v7170_v43  ;;  %v7295_v63 = vmax.bf16 %v13881_v25, %v7169_v41 }
 0x372   :  { %v6419_v10 = vmul.bf16 %v11556_v58, %v6060_v57  ;;  %v6420_v37 = vmul.bf16 %v11556_v58, %v6071_v24  ;;  %v7110_v56 = vadd.bf16 %v8936_v49, %v12115_v15  ;;  %v7109_v44 = vadd.bf16 %v8935_v46, %v12091_v0  ;;  %v13995_v57 = vld [vmem:[#allocation43_spill] sm:$0xff] }
 0x373   :  { %v4097_v38 = vmul.bf16 %v11038_v40, %v3182_v47  ;;  %v4904_v55 = vadd.bf16 %v8870_v19, %v13992_v42  ;;  %v4905_v4 = vadd.bf16 %v8871_v9, %v13993_v59  ;;  %v4155_v23 = vmul.bf16 %v11038_v40, %v3820_v5  ;;  %7888 = vmatprep.mubr.bf16.mxu1 %v7296_v53  ;;  %v5403_v18 = vpop.permute.xlu1 %5402  ;;  %v13997_v53 = vld [vmem:[#allocation220_spill] sm:$0xff]  ;;  %v14000_v42 = vld [vmem:[#allocation47_spill] sm:$0xff] }
 0x374   :  { %v8997_v22 = vcombine.low %v6419_v10, %v6420_v37  ;;  %v8998_v26 = vcombine.high %v6419_v10, %v6420_v37  ;;  %v5411_v29 = vrot.slane %v5403_v18, %v10558_v50  ;;  %7889 = vmatmul.mubr.bf16.gmra.mrb[72].mxu1 %v7295_v63  ;;  %v12415_v11 = vpop.permute.xlu0 %6139  ;;  %v7236_v15 = vmax.bf16 %v13881_v25, %v7110_v56 }
 0x375   :  { %v4154_v0 = vmul.bf16 %v11038_v40, %v3809_v21  ;;  %v6359_v47 = vmul.bf16 %v11556_v58, %v5400_v54  ;;  %v6082_v45 = vrot.slane %v12304_v8, %v10558_v50  ;;  %9352 = vset.pattern.permute.xlu1 %v13928_v35  ;;  %v7235_v61 = vmax.bf16 %v13881_v25, %v7109_v44  ;;  %v13996_v21 = vld [vmem:[#allocation219_spill] sm:$0xff]  ;;  %v13998_v44 = vld [vmem:[#allocation180_spill] sm:$0xff] }
 0x376   :  { %v6360_v51 = vmul.bf16 %v11556_v58, %v5411_v29  ;;  %5622 = vperm.xlu1 %9352, %v9491_v16   ;;  %7648 = vmatprep.mubr.bf16.mxu0 %v7236_v15  ;;  %v7172_v3 = vadd.bf16 %v8998_v26, %v4905_v4  ;;  %v7171_v48 = vadd.bf16 %v8997_v22, %v4904_v55  ;;  %v14001_v15 = vld [vmem:[#allocation46_spill] sm:$0xff] }
 0x377   :  { %v4847_v33 = vadd.bf16 %v8813_v12, %v13994_v2  ;;  %v3204_v1 = vrot.slane %v13995_v57, %v10558_v50  ;;  %v8872_v8 = vcombine.low %v4154_v0, %v4155_v23  ;;  %v8873_v43 = vcombine.high %v4154_v0, %v4155_v23  ;;  %v6085_v35 = vpop.permute.xlu1 %6084  ;;  %v14002_v2 = vld [vmem:[#allocation121_spill] sm:$0xff] }
 0x378   :  { %v8937_v41 = vcombine.low %v6359_v47, %v6360_v51  ;;  %v8938_v60 = vcombine.high %v6359_v47, %v6360_v51  ;;  %v6093_v19 = vrot.slane %v6085_v35, %v10558_v50  ;;  %7649 = vmatmul.mubr.bf16.gmra.mrb[80].mxu0 %v7235_v61  ;;  %v12432_v9 = vpop.permute.xlu0 %5479  ;;  %v7298_v7 = vmax.bf16 %v13881_v25, %v7172_v3 }
 0x379   :  { %v8814_v5 = vcombine.low %v12318_v14, %v4097_v38  ;;  %v8815_v31 = vcombine.high %v12318_v14, %v4097_v38  ;;  %v6421_v39 = vmul.bf16 %v11556_v58, %v6082_v45  ;;  %v7297_v12 = vmax.bf16 %v13881_v25, %v7171_v48 }
 0x37a   :  { %v5422_v62 = vrot.slane %v12324_v27, %v10558_v50  ;;  %v6422_v46 = vmul.bf16 %v11556_v58, %v6093_v19  ;;  %7896 = vmatprep.mubr.bf16.mxu1 %v7298_v7  ;;  %v7112_v49 = vadd.bf16 %v8938_v60, %v12276_v13  ;;  %v7111_v24 = vadd.bf16 %v8937_v41, %v12257_v28  ;;  %v14004_v7 = vld [vmem:[#allocation182_spill] sm:$0xff] }
 0x37b   :  { %v4098_v30 = vmul.bf16 %v11038_v40, %v3193_v6  ;;  %v4099_v14 = vmul.bf16 %v11038_v40, %v3204_v1  ;;  %v4906_v54 = vadd.bf16 %v8872_v8, %v13996_v21  ;;  %v4907_v63 = vadd.bf16 %v8873_v43, %v13997_v53  ;;  %v5425_v10 = vpop.permute.xlu1 %5424  ;;  %v13999_v6 = vld [vmem:[#allocation181_spill] sm:$0xff]  ;;  %v14003_v43 = vld [vmem:[#allocation55_spill] sm:$0xff] }
 0x37c   :  { %v8999_v27 = vcombine.low %v6421_v39, %v6422_v46  ;;  %v9000_v37 = vcombine.high %v6421_v39, %v6422_v46  ;;  %v5433_v56 = vrot.slane %v5425_v10, %v10558_v50  ;;  %7897 = vmatmul.mubr.bf16.gmra.mrb[76].mxu1 %v7297_v12  ;;  %v12452_v13 = vpop.permute.xlu0 %6161  ;;  %v7238_v28 = vmax.bf16 %v13881_v25, %v7112_v49 }
 0x37d   :  { %v12456_v36 = vadd.bf16 %v8814_v5, %v13998_v44  ;;  %v12459_v38 = vadd.bf16 %v8815_v31, %v13999_v6  ;;  %v3215_v55 = vrot.slane %v14000_v42, %v10558_v50  ;;  %v7237_v59 = vmax.bf16 %v13881_v25, %v7111_v24  ;;  %v14005_v31 = vld [vmem:[#allocation183_spill] sm:$0xff] }
 0x37e   :  { %v6361_v4 = vmul.bf16 %v11556_v58, %v5422_v62  ;;  %v6362_v23 = vmul.bf16 %v11556_v58, %v5433_v56  ;;  %7656 = vmatprep.mubr.bf16.mxu0 %v7238_v28  ;;  %v7174_v18 = vadd.bf16 %v9000_v37, %v4907_v63  ;;  %v7173_v22 = vadd.bf16 %v8999_v27, %v4906_v54  ;;  %v14007_v28 = vld [vmem:[#allocation118_spill] sm:$0xff] }
 0x37f   :  { %v8816_v26 = vcombine.low %v4098_v30, %v4099_v14  ;;  %v8817_v29 = vcombine.high %v4098_v30, %v4099_v14  ;;  %v3842_v0 = vrot.slane %v14001_v15, %v10558_v50  ;;  %v6104_v47 = vrot.slane %v12345_v34, %v10558_v50  ;;  %v6107_v45 = vpop.permute.xlu1 %6106 }
 0x380   :  { %v8939_v61 = vcombine.low %v6361_v4, %v6362_v23  ;;  %v8940_v51 = vcombine.high %v6361_v4, %v6362_v23  ;;  %v6115_v16 = vrot.slane %v6107_v45, %v10558_v50  ;;  %7657 = vmatmul.mubr.bf16.gmra.mrb[84].mxu0 %v7237_v59  ;;  %v7300_v3 = vmax.bf16 %v13881_v25, %v7174_v18  ;;  %v14009_v4 = vld [vmem:[#allocation222_spill] sm:$0xff] }
 0x381   :  { %v12473_v48 = vmul.bf16 %v11038_v40, %v3215_v55  ;;  %v3226_v57 = vrot.slane %v14002_v2, %v10558_v50  ;;  %v5444_v1 = vrot.slane %v12359_v20, %v10558_v50  ;;  %v3823_v8 = vpop.permute.xlu0 %3822  ;;  %v7299_v34 = vmax.bf16 %v13881_v25, %v7173_v22  ;;  %v14006_v20 = vld [vmem:[#allocation50_spill] sm:$0xff]  ;;  %v14008_v55 = vld [vmem:[#allocation221_spill] sm:$0xff] }
 0x382   :  { %v3237_v35 = vrot.slane %v14003_v43, %v10558_v50  ;;  %v3831_v41 = vrot.slane %v3823_v8, %v10558_v50  ;;  %7904 = vmatprep.mubr.bf16.mxu1 %v7300_v3  ;;  %v7114_v60 = vadd.bf16 %v8940_v51, %v4847_v33  ;;  %v7113_v19 = vadd.bf16 %v8939_v61, %v12391_v17  ;;  %v14025_v43 = vld [vmem:[#allocation26_spill] sm:$0xff] }
 0x383   :  { %v12485_v5 = vadd.bf16 %v8816_v26, %v14004_v7  ;;  %v12488_v39 = vadd.bf16 %v8817_v29, %v14005_v31  ;;  %v3864_v12 = vrot.slane %v14006_v20, %v10558_v50  ;;  %v6424_v62 = vmul.bf16 %v11556_v58, %v6115_v16  ;;  %v5447_v46 = vpop.permute.xlu1 %5446 }
 0x384   :  { %v4157_v49 = vmul.bf16 %v11038_v40, %v3842_v0  ;;  %v6423_v24 = vmul.bf16 %v11556_v58, %v6104_v47  ;;  %v4156_v33 = vmul.bf16 %v11038_v40, %v3831_v41  ;;  %v5455_v17 = vrot.slane %v5447_v46, %v10558_v50  ;;  %7905 = vmatmul.mubr.bf16.gmra.mrb[80].mxu1 %v7299_v34 }
 0x385   :  { %v6363_v30 = vmul.bf16 %v11556_v58, %v5444_v1  ;;  %v6126_v14 = vrot.slane %v12377_v32, %v10558_v50  ;;  %v3845_v21 = vpop.permute.xlu0 %3844  ;;  %v7240_v54 = vmax.bf16 %v13881_v25, %v7114_v60  ;;  %v7239_v53 = vmax.bf16 %v13881_v25, %v7113_v19 }
 0x386   :  { %v8874_v63 = vcombine.low %v4156_v33, %v4157_v49  ;;  %v8875_v10 = vcombine.high %v4156_v33, %v4157_v49  ;;  %v6364_v27 = vmul.bf16 %v11556_v58, %v5455_v17  ;;  %v3853_v37 = vrot.slane %v3845_v21, %v10558_v50 }
 0x387   :  { %v4159_v56 = vmul.bf16 %v11038_v40, %v3864_v12  ;;  %v3886_v44 = vrot.slane %v14007_v28, %v10558_v50  ;;  %v9001_v6 = vcombine.low %v6423_v24, %v6424_v62  ;;  %v9002_v42 = vcombine.high %v6423_v24, %v6424_v62  ;;  %7664 = vmatprep.mubr.bf16.mxu0 %v7240_v54  ;;  %v6129_v32 = vpop.permute.xlu1 %6128  ;;  %v14012_v28 = vld [vmem:[#allocation60_spill] sm:$0xff] }
 0x388   :  { %v4908_v59 = vadd.bf16 %v8874_v63, %v14008_v55  ;;  %v4909_v23 = vadd.bf16 %v8875_v10, %v14009_v4  ;;  %v8941_v18 = vcombine.low %v6363_v30, %v6364_v27  ;;  %v8942_v22 = vcombine.high %v6363_v30, %v6364_v27  ;;  %7665 = vmatmul.mubr.bf16.gmra.mrb[88].mxu0 %v7239_v53 }
 0x389   :  { %v6425_v26 = vmul.bf16 %v11556_v58, %v6126_v14  ;;  %v5466_v29 = vrot.slane %v12396_v52, %v10558_v50  ;;  %v4158_v15 = vmul.bf16 %v11038_v40, %v3853_v37  ;;  %v6137_v0 = vrot.slane %v6129_v32, %v10558_v50  ;;  %v3867_v47 = vpop.permute.xlu0 %3866 }
 0x38a   :  { %v3875_v45 = vrot.slane %v3867_v47, %v10558_v50  ;;  %v7176_v61 = vadd.bf16 %v9002_v42, %v4909_v23  ;;  %v7116_v51 = vadd.bf16 %v8942_v22, %v12459_v38  ;;  %v7175_v16 = vadd.bf16 %v9001_v6, %v4908_v59  ;;  %v14010_v38 = vld [vmem:[#allocation224_spill] sm:$0xff]  ;;  %v14013_v22 = vld [vmem:[#allocation62_spill] sm:$0xff] }
 0x38b   :  { %v8876_v3 = vcombine.low %v4158_v15, %v4159_v56  ;;  %v8877_v2 = vcombine.high %v4158_v15, %v4159_v56  ;;  %v6426_v1 = vmul.bf16 %v11556_v58, %v6137_v0  ;;  %v5469_v8 = vpop.permute.xlu1 %5468  ;;  %v7115_v34 = vadd.bf16 %v8941_v18, %v12456_v36  ;;  %v14014_v15 = vld [vmem:[#allocation36_spill] sm:$0xff] }
 0x38c   :  { %v12519_v52 = vmul.bf16 %v11038_v40, %v3226_v57  ;;  %v5477_v41 = vrot.slane %v5469_v8, %v10558_v50  ;;  %v7302_v60 = vmax.bf16 %v13881_v25, %v7176_v61  ;;  %v7242_v19 = vmax.bf16 %v13881_v25, %v7116_v51  ;;  %v14011_v57 = vld [vmem:[#allocation223_spill] sm:$0xff] }
 0x38d   :  { %v4161_v7 = vmul.bf16 %v11038_v40, %v3886_v44  ;;  %v4911_v31 = vadd.bf16 %v8877_v2, %v14010_v38  ;;  %v9004_v20 = vcombine.high %v6425_v26, %v6426_v1  ;;  %v4160_v12 = vmul.bf16 %v11038_v40, %v3875_v45  ;;  %v3889_v62 = vpop.permute.xlu0 %3888  ;;  %v14015_v2 = vld [vmem:[#allocation184_spill] sm:$0xff] }
 0x38e   :  { %v6365_v46 = vmul.bf16 %v11556_v58, %v5466_v29  ;;  %v6148_v36 = vrot.slane %v12415_v11, %v10558_v50  ;;  %v4910_v49 = vadd.bf16 %v8876_v3, %v14011_v57  ;;  %v6366_v24 = vmul.bf16 %v11556_v58, %v5477_v41  ;;  %7912 = vmatprep.mubr.bf16.mxu1 %v7302_v60 }
 0x38f   :  { %v9003_v33 = vcombine.low %v6425_v26, %v6426_v1  ;;  %7672 = vmatprep.mubr.bf16.mxu0 %v7242_v19  ;;  %v7301_v17 = vmax.bf16 %v13881_v25, %v7175_v16  ;;  %v6151_v30 = vpop.permute.xlu1 %6150  ;;  %v7241_v14 = vmax.bf16 %v13881_v25, %v7115_v34  ;;  %v7178_v21 = vadd.bf16 %v9004_v20, %v4911_v31  ;;  %v14016_v31 = vld [vmem:[#allocation185_spill] sm:$0xff] }
 0x390   :  { %v8818_v54 = vcombine.low %v12473_v48, %v12519_v52  ;;  %v8943_v53 = vcombine.low %v6365_v46, %v6366_v24  ;;  %v8944_v63 = vcombine.high %v6365_v46, %v6366_v24  ;;  %v3897_v11 = vrot.slane %v3889_v62, %v10558_v50 }
 0x391   :  { %v8879_v10 = vcombine.high %v4160_v12, %v4161_v7  ;;  %7913 = vmatmul.mubr.bf16.gmra.mrb[84].mxu1 %v7301_v17  ;;  %v6159_v27 = vrot.slane %v6151_v30, %v10558_v50  ;;  %7673 = vmatmul.mubr.bf16.gmra.mrb[92].mxu0 %v7241_v14  ;;  %v12538_v37 = vpop.permute.xlu0 %3910  ;;  %v7304_v56 = vmax.bf16 %v13881_v25, %v7178_v21 }
 0x392   :  { %v3908_v44 = vrot.slane %v14012_v28, %v10558_v50  ;;  %v5488_v6 = vrot.slane %v12432_v9, %v10558_v50  ;;  %v7118_v42 = vadd.bf16 %v8944_v63, %v12488_v39  ;;  %v7117_v32 = vadd.bf16 %v8943_v53, %v12485_v5  ;;  %v14020_v63 = vld [vmem:[#allocation108_spill] sm:$0xff]  ;;  %v14022_v28 = vld [vmem:[#allocation158_spill] sm:$0xff] }
 0x393   :  { %v8819_v55 = vcombine.high %v12473_v48, %v12519_v52  ;;  %v6427_v59 = vmul.bf16 %v11556_v58, %v6148_v36  ;;  %v6428_v4 = vmul.bf16 %v11556_v58, %v6159_v27  ;;  %7920 = vmatprep.mubr.bf16.mxu1 %v7304_v56  ;;  %v5491_v23 = vpop.permute.xlu1 %5490  ;;  %v7177_v18 = vadd.bf16 %v9003_v33, %v4910_v49  ;;  %v14021_v27 = vld [vmem:[#allocation41_spill] sm:$0xff] }
 0x394   :  { %v3248_v26 = vrot.slane %v14013_v22, %v10558_v50  ;;  %v12554_v29 = vmul.bf16 %v11038_v40, %v3897_v11  ;;  %v5499_v9 = vrot.slane %v5491_v23, %v10558_v50  ;;  %v7244_v5 = vmax.bf16 %v13881_v25, %v7118_v42  ;;  %v14026_v23 = vld [vmem:[#allocation27_spill] sm:$0xff] }
 0x395   :  { %v8878_v39 = vcombine.low %v4160_v12, %v4161_v7  ;;  %v4913_v48 = vadd.bf16 %v8879_v10, %v14014_v15  ;;  %v9006_v0 = vcombine.high %v6427_v59, %v6428_v4  ;;  %v3922_v47 = vpop.permute.xlu0 %3921  ;;  %v7243_v45 = vmax.bf16 %v13881_v25, %v7117_v32  ;;  %v14017_v12 = vld [vmem:[#allocation225_spill] sm:$0xff] }
 0x396   :  { %v4163_v61 = vmul.bf16 %v11038_v40, %v3908_v44  ;;  %v6367_v51 = vmul.bf16 %v11556_v58, %v5488_v6  ;;  %v6170_v16 = vrot.slane %v12452_v13, %v10558_v50  ;;  %v6368_v3 = vmul.bf16 %v11556_v58, %v5499_v9  ;;  %7680 = vmatprep.mubr.bf16.mxu0 %v7244_v5 }
 0x397   :  { %v4852_v1 = vadd.bf16 %v8818_v54, %v14015_v2  ;;  %v9005_v8 = vcombine.low %v6427_v59, %v6428_v4  ;;  %v7303_v34 = vmax.bf16 %v13881_v25, %v7177_v18  ;;  %v6173_v52 = vpop.permute.xlu1 %6172  ;;  %v7180_v41 = vadd.bf16 %v9006_v0, %v4913_v48  ;;  %v14018_v54 = vld [vmem:[#allocation17_spill] sm:$0xff]  ;;  %v14024_v4 = vld [vmem:[#allocation112_spill] sm:$0xff]  ;;  %v14028_v0 = vld [vmem:[#allocation39_spill] sm:$0xff] }
 0x398   :  { %v8881_v60 = vcombine.high %v12554_v29, %v4163_v61  ;;  %v8945_v19 = vcombine.low %v6367_v51, %v6368_v3  ;;  %v8946_v7 = vcombine.high %v6367_v51, %v6368_v3  ;;  %v6181_v38 = vrot.slane %v6173_v52, %v10558_v50  ;;  %v14032_v52 = vld [vmem:[#allocation128_spill] sm:$0xff] }
 0x399   :  { %v4853_v20 = vadd.bf16 %v8819_v55, %v14016_v31  ;;  %v4912_v13 = vadd.bf16 %v8878_v39, %v14017_v12  ;;  %7921 = vmatmul.mubr.bf16.gmra.mrb[88].mxu1 %v7303_v34  ;;  %7681 = vmatmul.mubr.bf16.gmra.mrb[96].mxu0 %v7243_v45  ;;  %v7306_v62 = vmax.bf16 %v13881_v25, %v7180_v41  ;;  %v12572_v46 = vpop.permute.xlu0 %3943  ;;  %v14030_v45 = vld [vmem:[#allocation177_spill] sm:$0xff] }
 0x39a   :  { %v4103_v36 = vmul.bf16 %v11038_v40, %v3248_v26  ;;  %v6429_v57 = vmul.bf16 %v11556_v58, %v6170_v16  ;;  %v3919_v49 = vrot.slane %v12538_v37, %v10558_v50  ;;  %v6430_v24 = vmul.bf16 %v11556_v58, %v6181_v38 }
 0x39b   :  { %v3930_v33 = vrot.slane %v3922_v47, %v10558_v50  ;;  %7928 = vmatprep.mubr.bf16.mxu1 %v7306_v62  ;;  %v5502_v17 = vpop.permute.xlu1 %5501  ;;  %v7120_v30 = vadd.bf16 %v8946_v7, %v4853_v20  ;;  %v7179_v14 = vadd.bf16 %v9005_v8, %v4912_v13  ;;  %v7119_v21 = vadd.bf16 %v8945_v19, %v4852_v1  ;;  %v14029_v47 = vld [vmem:[#allocation178_spill] sm:$0xff]  ;;  %v14034_v19 = vld [vmem:[#allocation187_spill] sm:$0xff] }
 0x39c   :  { %v14019_v53 = vrot.slane %v14018_v54, %v10558_v50  ;;  %v4102_v10 = vmul.bf16 %v11038_v40, %v3237_v35  ;;  %v4915_v37 = vadd.bf16 %v8881_v60, %v14021_v27  ;;  %v9008_v56 = vcombine.high %v6429_v57, %v6430_v24 }
 0x39d   :  { %v14023_v44 = vrot.slane %v14022_v28, %v10558_v50  ;;  %v8880_v42 = vcombine.low %v12554_v29, %v4163_v61  ;;  %v7246_v32 = vmax.bf16 %v13881_v25, %v7120_v30  ;;  %v7245_v55 = vmax.bf16 %v13881_v25, %v7119_v21  ;;  %v12596_v59 = vpop.permute.xlu0 %3965  ;;  %v14035_v30 = vld [vmem:[#allocation129_spill] sm:$0xff] }
 0x39e   :  { %v1855_v11 = vmul.bf16 %v14020_v63, %v14019_v53  ;;  %v14027_v35 = vcombine.low %v14025_v43, %v14026_v23  ;;  %v8820_v22 = vcombine.low %v4102_v10, %v4103_v36  ;;  %v5510_v26 = vrot.slane %v5502_v17, %v10558_v50  ;;  %v12634_v23 = vld [vmem:[#allocation10] ss:$0 sm:$0xff] }
 0x39f   :  { %v1854_v6 = vmul.bf16 %v14020_v63, %v14023_v44  ;;  %v7182_v9 = vadd.bf16 %v9008_v56, %v4915_v37  ;;  %v4164_v5 = vmul.bf16 %v11038_v40, %v3919_v49  ;;  %v4165_v39 = vmul.bf16 %v11038_v40, %v3930_v33  ;;  %7688 = vmatprep.mubr.bf16.mxu0 %v7246_v32  ;;  %v5513_v48 = vpop.permute.xlu1 %5512  ;;  %v14037_v56 = vld [vmem:[#allocation162_spill] sm:$0xff] }
 0x3a0   :  { %v2641_v18 = vadd.bf16 %v14027_v35, %v14024_v4  ;;  %v9007_v29 = vcombine.low %v6429_v57, %v6430_v24  ;;  %v7305_v15 = vmax.bf16 %v13881_v25, %v7179_v14  ;;  %v14031_v61 = vcombine.high %v14029_v47, %v14030_v45  ;;  %v14040_v45 = vld [vmem:[#allocation16_spill] sm:$0xff] }
 0x3a1   :  { %v8821_v16 = vcombine.high %v4102_v10, %v4103_v36  ;;  %v5521_v3 = vrot.slane %v5513_v48, %v10558_v50  ;;  %v7308_v2 = vmax.bf16 %v13881_v25, %v7182_v9  ;;  %v8755_v1 = vcombine.low %v1854_v6, %v1855_v11  ;;  %7689 = vmatmul.mubr.bf16.gmra.mrb[100].mxu0 %v7245_v55  ;;  %v14038_v9 = vld [vmem:[#allocation63_spill] sm:$0xff]  ;;  %v14039_v48 = vld [vmem:[#allocation130_spill] sm:$0xff] }
 0x3a2   :  { %v2582_v51 = vadd.bf16 %v14031_v61, %v14028_v0  ;;  %v8756_v8 = vcombine.high %v1854_v6, %v1855_v11  ;;  %v4914_v34 = vadd.bf16 %v8880_v42, %v2641_v18  ;;  %7929 = vmatmul.mubr.bf16.gmra.mrb[92].mxu1 %v7305_v15  ;;  %v14033_v41 = vrot.slane %v14032_v52, %v10558_v50  ;;  %v6184_v20 = vpop.permute.xlu0 %6183 }
 0x3a3   :  { %v4854_v7 = vadd.bf16 %v8820_v22, %v14034_v19  ;;  %v6369_v38 = vmul.bf16 %v11556_v58, %v5510_v26  ;;  %v6370_v31 = vmul.bf16 %v11556_v58, %v5521_v3  ;;  %7936 = vmatprep.mubr.bf16.mxu1 %v7308_v2  ;;  %v8882_v12 = vcombine.low %v4164_v5, %v4165_v39  ;;  %v6195_v62 = vpop.permute.xlu1 %6194 }
 0x3a4   :  { %v12616_v60 = vmul.bf16 %v14020_v63, %v14033_v41  ;;  %v8883_v13 = vcombine.high %v4164_v5, %v4165_v39  ;;  %v6192_v36 = vrot.slane %v6184_v20, %v10558_v50  ;;  %v7181_v57 = vadd.bf16 %v9007_v29, %v4914_v34  ;;  %v14042_v20 = vld [vmem:[#allocation131_spill] sm:$0xff] }
 0x3a5   :  { %v4855_v49 = vadd.bf16 %v8821_v16, %v2582_v51  ;;  %v8947_v24 = vcombine.low %v6369_v38, %v6370_v31  ;;  %v8948_v33 = vcombine.high %v6369_v38, %v6370_v31  ;;  %v6203_v17 = vrot.slane %v6195_v62, %v10558_v50  ;;  %v14041_v51 = vld [vmem:[#allocation19_spill] sm:$0xff] }
 0x3a6   :  { %v14036_v14 = vrot.slane %v14035_v30, %v10558_v50  ;;  %v2643_v54 = vadd.bf16 %v8755_v1, %v14024_v4  ;;  %v2644_v53 = vadd.bf16 %v8756_v8, %v14028_v0  ;;  %v6431_v11 = vmul.bf16 %v11556_v58, %v6192_v36 }
 0x3a7   :  { %v6432_v10 = vmul.bf16 %v11556_v58, %v6203_v17  ;;  %v7122_v27 = vadd.bf16 %v8948_v33, %v4855_v49  ;;  %v7121_v37 = vadd.bf16 %v8947_v24, %v4854_v7  ;;  %v3270_v28 = vrot.slane %v14037_v56, %v10558_v50  ;;  %v6206_v24 = vpop.permute.xlu0 %6205 }
 0x3a8   :  { %v1794_v21 = vmul.bf16 %v14020_v63, %v14036_v14  ;;  %v4916_v44 = vadd.bf16 %v8882_v12, %v2643_v54  ;;  %v4917_v6 = vadd.bf16 %v8883_v13, %v2644_v53  ;;  %v7307_v42 = vmax.bf16 %v13881_v25, %v7181_v57  ;;  %v3933_v43 = vpop.permute.xlu1 %3932 }
 0x3a9   :  { %v9009_v32 = vcombine.low %v6431_v11, %v6432_v10  ;;  %v9010_v55 = vcombine.high %v6431_v11, %v6432_v10  ;;  %v7248_v35 = vmax.bf16 %v13881_v25, %v7122_v27  ;;  %v7247_v18 = vmax.bf16 %v13881_v25, %v7121_v37  ;;  %v14044_v37 = vld [vmem:[#allocation133_spill] sm:$0xff] }
 0x3aa   :  { %v8695_v22 = vcombine.low %v1794_v21, %v12616_v60  ;;  %7937 = vmatmul.mubr.bf16.gmra.mrb[96].mxu1 %v7307_v42  ;;  %v8696_v26 = vcombine.high %v1794_v21, %v12616_v60  ;;  %v3259_v5 = vrot.slane %v14038_v9, %v10558_v50  ;;  %v7490_v39 = vpop.f32.mrb[0].mxu0  ;;  %v906_v47 = vrot.slane %v14039_v48, %v10558_v50 }
 0x3ab   :  { %7696 = vmatprep.mubr.bf16.mxu0 %v7248_v35  ;;  %v7184_v29 = vadd.bf16 %v9010_v55, %v4917_v6  ;;  %v7183_v15 = vadd.bf16 %v9009_v32, %v4916_v44  ;;  %v1626_v61 = vrot.slane %v14040_v45, %v10558_v50  ;;  %v1614_v16 = vrot.slane %v14041_v51, %v10558_v50  ;;  %v7492_v2 = vpop.f32.mrb[1].mxu0 }
 0x3ac   :  { %v7491_v3 = vadd.f32 %v12634_v23, %v7490_v39  ;;  %7697 = vmatmul.mubr.bf16.gmra.mrb[104].mxu0 %v7247_v18  ;;  %v4105_v1 = vmul.bf16 %v11038_v40, %v3270_v28  ;;  %v3952_v8 = vrot.slane %v12572_v46, %v10558_v50  ;;  %v7493_v34 = vpop.f32.mrb[2].mxu0  ;;  %v3941_v41 = vrot.slane %v3933_v43, %v10558_v50  ;;  %v14043_v46 = vld [vmem:[#allocation132_spill] sm:$0xff] }
 0x3ad   :  { %v7310_v52 = vmax.bf16 %v13881_v25, %v7184_v29  ;;  %v7494_v19 = vadd.f32 %v12634_v23, %v7493_v34  ;;  %v5524_v7 = vpop.permute.xlu1 %5523  ;;  %v7495_v38 = vpop.f32.mrb[3].mxu0  ;;  %v7309_v31 = vmax.bf16 %v13881_v25, %v7183_v15  ;;  %v894_v12 = vrot.slane %v14042_v20, %v10558_v50 }
 0x3ae   :  { %v9163_v60 = vpack.c.bf16 %v7491_v3, %v7491_v3  ;;  %v4104_v13 = vmul.bf16 %v11038_v40, %v3259_v5  ;;  %v930_v62 = vrot.slane %v14043_v46, %v10558_v50  ;;  %v1857_v36 = vmul.bf16 %v14020_v63, %v1626_v61 }
 0x3af   :  { %7944 = vmatprep.mubr.bf16.mxu1 %v7310_v52  ;;  %v1856_v57 = vmul.bf16 %v14020_v63, %v1614_v16  ;;  %v9164_v49 = vpack.c.bf16 %v7494_v19, %v7494_v19  ;;  %v2583_v33 = vadd.bf16 %v8695_v22, %v14024_v4  ;;  %v5532_v14 = vrot.slane %v5524_v7, %v10558_v50 }
 0x3b0   :  { %8494 = vst.msk [vmem:[#allocation11] sm:$0xf] %vm8493_vm0, %v9163_v60  ;;  %v8822_v17 = vcombine.low %v4104_v13, %v4105_v1  ;;  %v8823_v30 = vcombine.high %v4104_v13, %v4105_v1  ;;  %v2584_v21 = vadd.bf16 %v8696_v26, %v14028_v0  ;;  %v12668_v54 = vmul.bf16 %v14020_v63, %v906_v47 }
 0x3b1   :  { %v4167_v53 = vmul.bf16 %v11038_v40, %v3952_v8  ;;  %v4166_v11 = vmul.bf16 %v11038_v40, %v3941_v41  ;;  %8495 = vst.msk [vmem:[#allocation11 + $0x4] sm:$0xf] %vm8493_vm0, %v9164_v49  ;;  %v5535_v10 = vpop.permute.xlu1 %5534  ;;  %v12674_v27 = vmul.bf16 %v14020_v63, %v894_v12  ;;  %v918_v56 = vrot.slane %v14044_v37, %v10558_v50 }
 0x3b2   :  { %7945 = vmatmul.mubr.bf16.gmra.mrb[100].mxu1 %v7309_v31  ;;  %v5543_v28 = vrot.slane %v5535_v10, %v10558_v50  ;;  %v7498_v44 = vpop.f32.mrb[4].mxu0  ;;  %v6214_v6 = vrot.slane %v6206_v24, %v10558_v50  ;;  %v12681_v42 = vmul.bf16 %v14020_v63, %v930_v62  ;;  %v8757_v32 = vcombine.low %v1856_v57, %v1857_v36 }
 0x3b3   :  { %v8758_v55 = vcombine.high %v1856_v57, %v1857_v36  ;;  %v7499_v43 = vadd.f32 %v12634_v23, %v7498_v44  ;;  %v7500_v35 = vpop.f32.mrb[5].mxu0  ;;  %v4856_v18 = vadd.bf16 %v8822_v17, %v2583_v33  ;;  %v4857_v22 = vadd.bf16 %v8823_v30, %v2584_v21  ;;  %v14045_v30 = vld [vmem:[#allocation74_spill] sm:$0xff] }
 0x3b4   :  { %v6371_v26 = vmul.bf16 %v11556_v58, %v5532_v14  ;;  %v6372_v9 = vmul.bf16 %v11556_v58, %v5543_v28  ;;  %v7501_v5 = vpop.f32.mrb[6].mxu0  ;;  %v8884_v39 = vcombine.low %v4166_v11, %v4167_v53  ;;  %v8885_v29 = vcombine.high %v4166_v11, %v4167_v53  ;;  %v14046_v28 = vld [vmem:[#allocation134_spill] sm:$0xff]  ;;  %v14049_v35 = vld [vmem:[#allocation163_spill] sm:$0xff] }
 0x3b5   :  { %v9165_v15 = vpack.c.bf16 %v7499_v43, %v7499_v43  ;;  %v7502_v48 = vadd.f32 %v12634_v23, %v7501_v5  ;;  %v6217_v47 = vpop.permute.xlu1 %6216  ;;  %v7503_v45 = vpop.f32.mrb[7].mxu0  ;;  %v6433_v3 = vmul.bf16 %v11556_v58, %v6214_v6  ;;  %v12690_v2 = vmul.bf16 %v14020_v63, %v918_v56  ;;  %v14047_v6 = vld [vmem:[#allocation18_spill] sm:$0xff] }
 0x3b6   :  { %v8949_v61 = vcombine.low %v6371_v26, %v6372_v9  ;;  %v8950_v51 = vcombine.high %v6371_v26, %v6372_v9  ;;  %v6225_v16 = vrot.slane %v6217_v47, %v10558_v50  ;;  %v2645_v1 = vadd.bf16 %v8757_v32, %v14024_v4  ;;  %v14050_v47 = vld [vmem:[#allocation135_spill] sm:$0xff] }
 0x3b7   :  { %v2646_v8 = vadd.bf16 %v8758_v55, %v14028_v0  ;;  %8496 = vst.msk [vmem:[#allocation11 + $0x8] sm:$0xf] %vm8493_vm0, %v9165_v15  ;;  %v9166_v34 = vpack.c.bf16 %v7502_v48, %v7502_v48  ;;  %v7746_v52 = vpop.f32.mrb[0].mxu1  ;;  %v8697_v31 = vcombine.low %v12674_v27, %v12668_v54  ;;  %v8698_v20 = vcombine.high %v12674_v27, %v12668_v54  ;;  %v14048_v55 = vld [vmem:[#allocation21_spill] sm:$0xff] }
 0x3b8   :  { %v6434_v41 = vmul.bf16 %v11556_v58, %v6225_v16  ;;  %v7747_v60 = vadd.f32 %v12634_v23, %v7746_v52  ;;  %v7748_v19 = vpop.f32.mrb[1].mxu1  ;;  %v7124_v7 = vadd.bf16 %v8950_v51, %v4857_v22  ;;  %v7123_v38 = vadd.bf16 %v8949_v61, %v4856_v18 }
 0x3b9   :  { %v4918_v12 = vadd.bf16 %v8884_v39, %v2645_v1  ;;  %v4919_v13 = vadd.bf16 %v8885_v29, %v2646_v8  ;;  %8497 = vst.msk [vmem:[#allocation11 + $0xc] sm:$0xf] %vm8493_vm0, %v9166_v34  ;;  %v7749_v46 = vpop.f32.mrb[2].mxu1  ;;  %v8699_v17 = vcombine.low %v12690_v2, %v12681_v42  ;;  %v3292_v14 = vrot.slane %v14045_v30, %v10558_v50 }
 0x3ba   :  { %v9011_v62 = vcombine.low %v6433_v3, %v6434_v41  ;;  %v9012_v36 = vcombine.high %v6433_v3, %v6434_v41  ;;  %v9227_v57 = vpack.c.bf16 %v7747_v60, %v7747_v60  ;;  %v7750_v49 = vadd.f32 %v12634_v23, %v7749_v46  ;;  %v7751_v24 = vpop.f32.mrb[3].mxu1  ;;  %v12703_v33 = vpop.permute.xlu1 %3954 }
 0x3bb   :  { %v7506_v21 = vpop.f32.mrb[8].mxu0  ;;  %v7250_v54 = vmax.bf16 %v13881_v25, %v7124_v7  ;;  %v7249_v53 = vmax.bf16 %v13881_v25, %v7123_v38  ;;  %v954_v44 = vrot.slane %v14046_v28, %v10558_v50  ;;  %v1650_v32 = vrot.slane %v14047_v6, %v10558_v50 }
 0x3bc   :  { %8558 = vst.msk [vmem:[#allocation11 + $0x100] sm:$0xf] %vm8493_vm0, %v9227_v57  ;;  %v9228_v11 = vpack.c.bf16 %v7750_v49, %v7750_v49  ;;  %v7507_v10 = vadd.f32 %v12634_v23, %v7506_v21  ;;  %v7508_v27 = vpop.f32.mrb[9].mxu0  ;;  %v7186_v37 = vadd.bf16 %v9012_v36, %v4919_v13  ;;  %v7185_v56 = vadd.bf16 %v9011_v62, %v4918_v12 }
 0x3bd   :  { %v1638_v43 = vrot.slane %v14048_v55, %v10558_v50  ;;  %v3281_v18 = vrot.slane %v14049_v35, %v10558_v50  ;;  %v7509_v22 = vpop.f32.mrb[10].mxu0  ;;  %7704 = vmatprep.mubr.bf16.mxu0 %v7250_v54  ;;  %v2585_v15 = vadd.bf16 %v8697_v31, %v14024_v4  ;;  %v2586_v48 = vadd.bf16 %v8698_v20, %v14028_v0 }
 0x3be   :  { %8559 = vst.msk [vmem:[#allocation11 + $0x104] sm:$0xf] %vm8493_vm0, %v9228_v11  ;;  %v9167_v26 = vpack.c.bf16 %v7507_v10, %v7507_v10  ;;  %v7510_v9 = vadd.f32 %v12634_v23, %v7509_v22  ;;  %v7511_v5 = vpop.f32.mrb[11].mxu0  ;;  %7705 = vmatmul.mubr.bf16.gmra.mrb[108].mxu0 %v7249_v53  ;;  %v7312_v39 = vmax.bf16 %v13881_v25, %v7186_v37  ;;  %v6228_v11 = vpop.permute.xlu0 %6227 }
 0x3bf   :  { %v7311_v29 = vmax.bf16 %v13881_v25, %v7185_v56  ;;  %v942_v45 = vrot.slane %v14050_v47, %v10558_v50  ;;  %v4107_v61 = vmul.bf16 %v11038_v40, %v3292_v14  ;;  %v7754_v51 = vpop.f32.mrb[4].mxu1  ;;  %v5546_v16 = vpop.permute.xlu1 %5545  ;;  %v8700_v3 = vcombine.high %v12690_v2, %v12681_v42 }
 0x3c0   :  { %v12733_v1 = vadd.bf16 %v8699_v17, %v14024_v4  ;;  %8498 = vst.msk [vmem:[#allocation11 + $0x10] sm:$0xf] %vm8493_vm0, %v9167_v26  ;;  %v9168_v8 = vpack.c.bf16 %v7510_v9, %v7510_v9  ;;  %v7755_v34 = vadd.f32 %v12634_v23, %v7754_v51  ;;  %v7756_v52 = vpop.f32.mrb[5].mxu1  ;;  %7952 = vmatprep.mubr.bf16.mxu1 %v7312_v39  ;;  %v14051_v17 = vld [vmem:[#allocation20_spill] sm:$0xff] }
 0x3c1   :  { %v1859_v41 = vmul.bf16 %v14020_v63, %v1650_v32  ;;  %v1858_v60 = vmul.bf16 %v14020_v63, %v1638_v43  ;;  %v4106_v19 = vmul.bf16 %v11038_v40, %v3281_v18  ;;  %v3963_v7 = vrot.slane %v12703_v33, %v10558_v50  ;;  %v7757_v38 = vpop.f32.mrb[6].mxu1  ;;  %7953 = vmatmul.mubr.bf16.gmra.mrb[104].mxu1 %v7311_v29  ;;  %v14052_v43 = vld [vmem:[#allocation23_spill] sm:$0xff] }
 0x3c2   :  { %v12743_v31 = vmul.bf16 %v14020_v63, %v954_v44  ;;  %8499 = vst.msk [vmem:[#allocation11 + $0x14] sm:$0xf] %vm8493_vm0, %v9168_v8  ;;  %v9229_v20 = vpack.c.bf16 %v7755_v34, %v7755_v34  ;;  %v5554_v12 = vrot.slane %v5546_v16, %v10558_v50  ;;  %v7758_v13 = vadd.f32 %v12634_v23, %v7757_v38  ;;  %v7759_v46 = vpop.f32.mrb[7].mxu1 }
 0x3c3   :  { %v12749_v62 = vmul.bf16 %v14020_v63, %v942_v45  ;;  %v8824_v36 = vcombine.low %v4106_v19, %v4107_v61  ;;  %v8825_v57 = vcombine.high %v4106_v19, %v4107_v61  ;;  %v3974_v49 = vrot.slane %v12596_v59, %v10558_v50  ;;  %v7514_v24 = vpop.f32.mrb[12].mxu0  ;;  %v5557_v33 = vpop.permute.xlu1 %5556 }
 0x3c4   :  { %v1674_v30 = vrot.slane %v14051_v17, %v10558_v50  ;;  %8560 = vst.msk [vmem:[#allocation11 + $0x108] sm:$0xf] %vm8493_vm0, %v9229_v20  ;;  %v9230_v14 = vpack.c.bf16 %v7758_v13, %v7758_v13  ;;  %v7515_v21 = vadd.f32 %v12634_v23, %v7514_v24  ;;  %v5565_v54 = vrot.slane %v5557_v33, %v10558_v50  ;;  %v7516_v53 = vpop.f32.mrb[13].mxu0 }
 0x3c5   :  { %v8759_v10 = vcombine.low %v1858_v60, %v1859_v41  ;;  %v8760_v27 = vcombine.high %v1858_v60, %v1859_v41  ;;  %v4168_v37 = vmul.bf16 %v11038_v40, %v3963_v7  ;;  %v7517_v56 = vpop.f32.mrb[14].mxu0  ;;  %v6236_v59 = vrot.slane %v6228_v11, %v10558_v50  ;;  %v12773_v41 = vpop.permute.xlu0 %6249 }
 0x3c6   :  { %v6373_v28 = vmul.bf16 %v11556_v58, %v5554_v12  ;;  %8561 = vst.msk [vmem:[#allocation11 + $0x10c] sm:$0xf] %vm8493_vm0, %v9230_v14  ;;  %v9169_v44 = vpack.c.bf16 %v7515_v21, %v7515_v21  ;;  %v6374_v6 = vmul.bf16 %v11556_v58, %v5565_v54  ;;  %v7518_v32 = vadd.f32 %v12634_v23, %v7517_v56  ;;  %v7519_v55 = vpop.f32.mrb[15].mxu0  ;;  %v14053_v12 = vld [vmem:[#allocation83_spill] sm:$0xff] }
 0x3c7   :  { %v1662_v35 = vrot.slane %v14052_v43, %v10558_v50  ;;  %v4858_v18 = vadd.bf16 %v8824_v36, %v2585_v15  ;;  %v4859_v22 = vadd.bf16 %v8825_v57, %v2586_v48  ;;  %v4169_v26 = vmul.bf16 %v11038_v40, %v3974_v49  ;;  %v7762_v9 = vpop.f32.mrb[8].mxu1  ;;  %v6239_v5 = vpop.permute.xlu1 %6238 }
 0x3c8   :  { %8500 = vst.msk [vmem:[#allocation11 + $0x18] sm:$0xf] %vm8493_vm0, %v9169_v44  ;;  %v8951_v39 = vcombine.low %v6373_v28, %v6374_v6  ;;  %v8952_v29 = vcombine.high %v6373_v28, %v6374_v6  ;;  %v9170_v47 = vpack.c.bf16 %v7518_v32, %v7518_v32  ;;  %v7763_v45 = vadd.f32 %v12634_v23, %v7762_v9  ;;  %v7764_v61 = vpop.f32.mrb[9].mxu1  ;;  %v14054_v6 = vld [vmem:[#allocation79_spill] sm:$0xff]  ;;  %v14056_v9 = vld [vmem:[#allocation137_spill] sm:$0xff] }
 0x3c9   :  { %v8886_v51 = vcombine.low %v4168_v37, %v4169_v26  ;;  %v8887_v16 = vcombine.high %v4168_v37, %v4169_v26  ;;  %v6435_v8 = vmul.bf16 %v11556_v58, %v6236_v59  ;;  %v6247_v34 = vrot.slane %v6239_v5, %v10558_v50  ;;  %v7765_v15 = vpop.f32.mrb[10].mxu1 }
 0x3ca   :  { %8501 = vst.msk [vmem:[#allocation11 + $0x1c] sm:$0xf] %vm8493_vm0, %v9170_v47  ;;  %v9231_v48 = vpack.c.bf16 %v7763_v45, %v7763_v45  ;;  %v7766_v52 = vadd.f32 %v12634_v23, %v7765_v15  ;;  %v7767_v60 = vpop.f32.mrb[11].mxu1  ;;  %v7126_v19 = vadd.bf16 %v8952_v29, %v4859_v22  ;;  %v7125_v7 = vadd.bf16 %v8951_v39, %v4858_v18  ;;  %v3988_v22 = vpop.permute.xlu0 %3987 }
 0x3cb   :  { %v2647_v38 = vadd.bf16 %v8759_v10, %v14024_v4  ;;  %v2648_v20 = vadd.bf16 %v8760_v27, %v14028_v0  ;;  %v3314_v13 = vrot.slane %v14053_v12, %v10558_v50  ;;  %v6436_v46 = vmul.bf16 %v11556_v58, %v6247_v34  ;;  %v7522_v36 = vpop.f32.mrb[16].mxu0 }
 0x3cc   :  { %8562 = vst.msk [vmem:[#allocation11 + $0x110] sm:$0xf] %vm8493_vm0, %v9231_v48  ;;  %v9232_v57 = vpack.c.bf16 %v7766_v52, %v7766_v52  ;;  %v7523_v49 = vadd.f32 %v12634_v23, %v7522_v36  ;;  %v7524_v24 = vpop.f32.mrb[17].mxu0  ;;  %v12782_v33 = vpop.permute.xlu1 %3976  ;;  %v7252_v17 = vmax.bf16 %v13881_v25, %v7126_v19  ;;  %v7251_v14 = vmax.bf16 %v13881_v25, %v7125_v7 }
 0x3cd   :  { %v4920_v21 = vadd.bf16 %v8886_v51, %v2647_v38  ;;  %v4921_v54 = vadd.bf16 %v8887_v16, %v2648_v20  ;;  %v9013_v53 = vcombine.low %v6435_v8, %v6436_v46  ;;  %v9014_v11 = vcombine.high %v6435_v8, %v6436_v46  ;;  %v7525_v10 = vpop.f32.mrb[18].mxu0  ;;  %v14057_v16 = vld [vmem:[#allocation22_spill] sm:$0xff] }
 0x3ce   :  { %v12790_v27 = vadd.bf16 %v8700_v3, %v14028_v0  ;;  %v12793_v37 = vmul.bf16 %v14020_v63, %v1674_v30  ;;  %8563 = vst.msk [vmem:[#allocation11 + $0x114] sm:$0xf] %vm8493_vm0, %v9232_v57  ;;  %v9171_v56 = vpack.c.bf16 %v7523_v49, %v7523_v49  ;;  %v7526_v59 = vadd.f32 %v12634_v23, %v7525_v10  ;;  %v7527_v28 = vpop.f32.mrb[19].mxu0  ;;  %v14055_v30 = vld [vmem:[#allocation136_spill] sm:$0xff] }
 0x3cf   :  { %7712 = vmatprep.mubr.bf16.mxu0 %v7252_v17  ;;  %v1860_v44 = vmul.bf16 %v14020_v63, %v1662_v35  ;;  %v3303_v32 = vrot.slane %v14054_v6, %v10558_v50  ;;  %v7770_v55 = vpop.f32.mrb[12].mxu1  ;;  %v7188_v42 = vadd.bf16 %v9014_v11, %v4921_v54  ;;  %v7187_v2 = vadd.bf16 %v9013_v53, %v4920_v21  ;;  %v14058_v21 = vld [vmem:[#allocation25_spill] sm:$0xff] }
 0x3d0   :  { %7713 = vmatmul.mubr.bf16.gmra.mrb[112].mxu0 %v7251_v14  ;;  %v8701_v3 = vcombine.low %v12749_v62, %v12743_v31  ;;  %v978_v43 = vrot.slane %v14055_v30, %v10558_v50  ;;  %8502 = vst.msk [vmem:[#allocation11 + $0x20] sm:$0xf] %vm8493_vm0, %v9171_v56  ;;  %v9172_v18 = vpack.c.bf16 %v7526_v59, %v7526_v59  ;;  %v7772_v35 = vpop.f32.mrb[13].mxu1 }
 0x3d1   :  { %v7771_v26 = vadd.f32 %v12634_v23, %v7770_v55  ;;  %v966_v5 = vrot.slane %v14056_v9, %v10558_v50  ;;  %v4109_v39 = vmul.bf16 %v11038_v40, %v3314_v13  ;;  %v7773_v29 = vpop.f32.mrb[14].mxu1  ;;  %v5568_v47 = vpop.permute.xlu1 %5567  ;;  %v7314_v45 = vmax.bf16 %v13881_v25, %v7188_v42 }
 0x3d2   :  { %v7313_v61 = vmax.bf16 %v13881_v25, %v7187_v2  ;;  %v8702_v51 = vcombine.high %v12749_v62, %v12743_v31  ;;  %v1698_v8 = vrot.slane %v14057_v16, %v10558_v50  ;;  %8503 = vst.msk [vmem:[#allocation11 + $0x24] sm:$0xf] %vm8493_vm0, %v9172_v18  ;;  %v7774_v15 = vadd.f32 %v12634_v23, %v7773_v29  ;;  %v7775_v48 = vpop.f32.mrb[15].mxu1 }
 0x3d3   :  { %v9233_v34 = vpack.c.bf16 %v7771_v26, %v7771_v26  ;;  %v8761_v52 = vcombine.low %v1860_v44, %v12793_v37  ;;  %v4108_v60 = vmul.bf16 %v11038_v40, %v3303_v32  ;;  %v3985_v19 = vrot.slane %v12782_v33, %v10558_v50  ;;  %v7530_v38 = vpop.f32.mrb[20].mxu0  ;;  %7960 = vmatprep.mubr.bf16.mxu1 %v7314_v45  ;;  %v12860_v48 = vpop.permute.xlu0 %4009 }
 0x3d4   :  { %v3996_v7 = vrot.slane %v3988_v22, %v10558_v50  ;;  %v12823_v20 = vmul.bf16 %v14020_v63, %v978_v43  ;;  %v9234_v12 = vpack.c.bf16 %v7774_v15, %v7774_v15  ;;  %v5576_v13 = vrot.slane %v5568_v47, %v10558_v50  ;;  %v7532_v36 = vpop.f32.mrb[21].mxu0  ;;  %7961 = vmatmul.mubr.bf16.gmra.mrb[108].mxu1 %v7313_v61 }
 0x3d5   :  { %8564 = vst.msk [vmem:[#allocation11 + $0x118] sm:$0xf] %vm8493_vm0, %v9233_v34  ;;  %v7531_v46 = vadd.f32 %v12634_v23, %v7530_v38  ;;  %v12829_v57 = vmul.bf16 %v14020_v63, %v966_v5  ;;  %v8762_v49 = vcombine.high %v1860_v44, %v12793_v37  ;;  %v8826_v24 = vcombine.low %v4108_v60, %v4109_v39  ;;  %v7533_v17 = vpop.f32.mrb[22].mxu0  ;;  %v5579_v14 = vpop.permute.xlu1 %5578  ;;  %v14060_v38 = vld [vmem:[#allocation95_spill] sm:$0xff] }
 0x3d6   :  { %v8827_v33 = vcombine.high %v4108_v60, %v4109_v39  ;;  %v1686_v54 = vrot.slane %v14058_v21, %v10558_v50  ;;  %8565 = vst.msk [vmem:[#allocation11 + $0x11c] sm:$0xf] %vm8493_vm0, %v9234_v12  ;;  %v7534_v11 = vadd.f32 %v12634_v23, %v7533_v17  ;;  %v5587_v10 = vrot.slane %v5579_v14, %v10558_v50  ;;  %v7535_v56 = vpop.f32.mrb[23].mxu0 }
 0x3d7   :  { %v9173_v53 = vpack.c.bf16 %v7531_v46, %v7531_v46  ;;  %v2649_v59 = vadd.bf16 %v8761_v52, %v14024_v4  ;;  %v12839_v28 = vmul.bf16 %v14020_v63, %v1698_v8  ;;  %v4170_v37 = vmul.bf16 %v11038_v40, %v3985_v19  ;;  %v7778_v6 = vpop.f32.mrb[16].mxu1  ;;  %v14059_v19 = vld [vmem:[#allocation24_spill] sm:$0xff] }
 0x3d8   :  { %v4171_v44 = vmul.bf16 %v11038_v40, %v3996_v7  ;;  %v6375_v32 = vmul.bf16 %v11556_v58, %v5576_v13  ;;  %v9174_v55 = vpack.c.bf16 %v7534_v11, %v7534_v11  ;;  %v6376_v42 = vmul.bf16 %v11556_v58, %v5587_v10  ;;  %v7780_v30 = vpop.f32.mrb[17].mxu1 }
 0x3d9   :  { %8504 = vst.msk [vmem:[#allocation11 + $0x28] sm:$0xf] %vm8493_vm0, %v9173_v53  ;;  %v7779_v2 = vadd.f32 %v12634_v23, %v7778_v6  ;;  %v2650_v43 = vadd.bf16 %v8762_v49, %v14028_v0  ;;  %v4860_v18 = vadd.bf16 %v8826_v24, %v12733_v1  ;;  %v4861_v22 = vadd.bf16 %v8827_v33, %v12790_v27  ;;  %v7781_v35 = vpop.f32.mrb[18].mxu1  ;;  %v6261_v9 = vpop.permute.xlu1 %6260 }
 0x3da   :  { %v6258_v26 = vrot.slane %v12773_v41, %v10558_v50  ;;  %8505 = vst.msk [vmem:[#allocation11 + $0x2c] sm:$0xf] %vm8493_vm0, %v9174_v55  ;;  %v8953_v5 = vcombine.low %v6375_v32, %v6376_v42  ;;  %v8954_v39 = vcombine.high %v6375_v32, %v6376_v42  ;;  %v7782_v47 = vadd.f32 %v12634_v23, %v7781_v35  ;;  %v7783_v45 = vpop.f32.mrb[19].mxu1 }
 0x3db   :  { %v9235_v29 = vpack.c.bf16 %v7779_v2, %v7779_v2  ;;  %v12855_v61 = vmul.bf16 %v14020_v63, %v1686_v54  ;;  %v8888_v16 = vcombine.low %v4170_v37, %v4171_v44  ;;  %v8889_v1 = vcombine.high %v4170_v37, %v4171_v44  ;;  %v7538_v8 = vpop.f32.mrb[24].mxu0  ;;  %v14061_v2 = vld [vmem:[#allocation90_spill] sm:$0xff] }
 0x3dc   :  { %v6269_v27 = vrot.slane %v6261_v9, %v10558_v50  ;;  %v9236_v41 = vpack.c.bf16 %v7782_v47, %v7782_v47  ;;  %v7539_v34 = vadd.f32 %v12634_v23, %v7538_v8  ;;  %v7540_v15 = vpop.f32.mrb[25].mxu0  ;;  %v7128_v52 = vadd.bf16 %v8954_v39, %v4861_v22 }
 0x3dd   :  { %8566 = vst.msk [vmem:[#allocation11 + $0x120] sm:$0xf] %vm8493_vm0, %v9235_v29  ;;  %v7127_v60 = vadd.bf16 %v8953_v5, %v4860_v18  ;;  %v1710_v7 = vrot.slane %v14059_v19, %v10558_v50  ;;  %v3336_v12 = vrot.slane %v14060_v38, %v10558_v50  ;;  %v6437_v13 = vmul.bf16 %v11556_v58, %v6258_v26  ;;  %v7541_v36 = vpop.f32.mrb[26].mxu0 }
 0x3de   :  { %v6438_v46 = vmul.bf16 %v11556_v58, %v6269_v27  ;;  %8567 = vst.msk [vmem:[#allocation11 + $0x124] sm:$0xf] %vm8493_vm0, %v9236_v41  ;;  %v9175_v49 = vpack.c.bf16 %v7539_v34, %v7539_v34  ;;  %v7542_v24 = vadd.f32 %v12634_v23, %v7541_v36  ;;  %v7543_v33 = vpop.f32.mrb[27].mxu0  ;;  %v3999_v17 = vpop.permute.xlu1 %3998  ;;  %v7254_v14 = vmax.bf16 %v13881_v25, %v7128_v52 }
 0x3df   :  { %v7253_v21 = vmax.bf16 %v13881_v25, %v7127_v60  ;;  %v4922_v54 = vadd.bf16 %v8888_v16, %v2649_v59  ;;  %v4923_v53 = vadd.bf16 %v8889_v1, %v2650_v43  ;;  %v7786_v56 = vpop.f32.mrb[20].mxu1  ;;  %v12876_v37 = vadd.bf16 %v8701_v3, %v14024_v4  ;;  %v12882_v59 = vpop.permute.xlu0 %6271 }
 0x3e0   :  { %v9015_v11 = vcombine.low %v6437_v13, %v6438_v46  ;;  %v9016_v10 = vcombine.high %v6437_v13, %v6438_v46  ;;  %v8703_v44 = vcombine.low %v12829_v57, %v12823_v20  ;;  %8506 = vst.msk [vmem:[#allocation11 + $0x30] sm:$0xf] %vm8493_vm0, %v9175_v49  ;;  %v9176_v6 = vpack.c.bf16 %v7542_v24, %v7542_v24  ;;  %v7788_v55 = vpop.f32.mrb[21].mxu1 }
 0x3e1   :  { %v7787_v32 = vadd.f32 %v12634_v23, %v7786_v56  ;;  %7720 = vmatprep.mubr.bf16.mxu0 %v7254_v14  ;;  %v12885_v42 = vmul.bf16 %v14020_v63, %v1710_v7  ;;  %v3325_v30 = vrot.slane %v14061_v2, %v10558_v50  ;;  %v7789_v3 = vpop.f32.mrb[22].mxu1  ;;  %v8763_v22 = vcombine.low %v12855_v61, %v12839_v28 }
 0x3e2   :  { %7721 = vmatmul.mubr.bf16.gmra.mrb[116].mxu0 %v7253_v21  ;;  %v7190_v43 = vadd.bf16 %v9016_v10, %v4923_v53  ;;  %v7189_v18 = vadd.bf16 %v9015_v11, %v4922_v54  ;;  %v4111_v26 = vmul.bf16 %v11038_v40, %v3336_v12  ;;  %8507 = vst.msk [vmem:[#allocation11 + $0x34] sm:$0xf] %vm8493_vm0, %v9176_v6  ;;  %v7791_v5 = vpop.f32.mrb[23].mxu1  ;;  %v14062_v11 = vld [vmem:[#allocation169_spill] sm:$0xff] }
 0x3e3   :  { %v9237_v35 = vpack.c.bf16 %v7787_v32, %v7787_v32  ;;  %v7790_v9 = vadd.f32 %v12634_v23, %v7789_v3  ;;  %v4007_v63 = vrot.slane %v3999_v17, %v10558_v50  ;;  %v4018_v39 = vrot.slane %v12860_v48, %v10558_v50  ;;  %v7546_v29 = vpop.f32.mrb[28].mxu0  ;;  %v5590_v47 = vpop.permute.xlu1 %5589  ;;  %v14063_v3 = vld [vmem:[#allocation98_spill] sm:$0xff] }
 0x3e4   :  { %v7316_v45 = vmax.bf16 %v13881_v25, %v7190_v43  ;;  %v7315_v16 = vmax.bf16 %v13881_v25, %v7189_v18  ;;  %v2590_v1 = vadd.bf16 %v8702_v51, %v14028_v0  ;;  %v8764_v27 = vcombine.high %v12855_v61, %v12839_v28  ;;  %v7548_v34 = vpop.f32.mrb[29].mxu0  ;;  %v12919_v7 = vpop.permute.xlu0 %5611 }
 0x3e5   :  { %8568 = vst.msk [vmem:[#allocation11 + $0x128] sm:$0xf] %vm8493_vm0, %v9237_v35  ;;  %v9238_v8 = vpack.c.bf16 %v7790_v9, %v7790_v9  ;;  %v7547_v41 = vadd.f32 %v12634_v23, %v7546_v29  ;;  %v8704_v15 = vcombine.high %v12829_v57, %v12823_v20  ;;  %v12910_v48 = vadd.bf16 %v8703_v44, %v14024_v4  ;;  %v7549_v62 = vpop.f32.mrb[30].mxu0 }
 0x3e6   :  { %v8765_v52 = vcombine.low %v12885_v42, %v12885_v42  ;;  %v4110_v31 = vmul.bf16 %v11038_v40, %v3325_v30  ;;  %7968 = vmatprep.mubr.bf16.mxu1 %v7316_v45  ;;  %v2651_v51 = vadd.bf16 %v8763_v22, %v14024_v4  ;;  %v5598_v61 = vrot.slane %v5590_v47, %v10558_v50  ;;  %v7551_v19 = vpop.f32.mrb[31].mxu0 }
 0x3e7   :  { %8569 = vst.msk [vmem:[#allocation11 + $0x12c] sm:$0xf] %vm8493_vm0, %v9238_v8  ;;  %v9177_v28 = vpack.c.bf16 %v7547_v41, %v7547_v41  ;;  %v7550_v60 = vadd.f32 %v12634_v23, %v7549_v62  ;;  %7969 = vmatmul.mubr.bf16.gmra.mrb[112].mxu1 %v7315_v16  ;;  %v4172_v13 = vmul.bf16 %v11038_v40, %v4007_v63  ;;  %v7794_v36 = vpop.f32.mrb[24].mxu1  ;;  %v5601_v49 = vpop.permute.xlu1 %5600 }
 0x3e8   :  { %v8828_v38 = vcombine.low %v4110_v31, %v4111_v26  ;;  %v8829_v12 = vcombine.high %v4110_v31, %v4111_v26  ;;  %v4173_v46 = vmul.bf16 %v11038_v40, %v4018_v39  ;;  %v2652_v24 = vadd.bf16 %v8764_v27, %v14028_v0  ;;  %v7796_v21 = vpop.f32.mrb[25].mxu1  ;;  %v6294_v39 = vpop.permute.xlu0 %6293 }
 0x3e9   :  { %8508 = vst.msk [vmem:[#allocation11 + $0x38] sm:$0xf] %vm8493_vm0, %v9177_v28  ;;  %v9178_v33 = vpack.c.bf16 %v7550_v60, %v7550_v60  ;;  %v7795_v17 = vadd.f32 %v12634_v23, %v7794_v36  ;;  %v5609_v14 = vrot.slane %v5601_v49, %v10558_v50  ;;  %v8766_v54 = vcombine.high %v12885_v42, %v12885_v42  ;;  %v7797_v44 = vpop.f32.mrb[26].mxu1 }
 0x3ea   :  { %v12930_v53 = vadd.bf16 %v8765_v52, %v14024_v4  ;;  %v3358_v10 = vrot.slane %v14062_v11, %v10558_v50  ;;  %v6280_v56 = vrot.slane %v12882_v59, %v10558_v50  ;;  %v6377_v6 = vmul.bf16 %v11556_v58, %v5598_v61  ;;  %v7799_v42 = vpop.f32.mrb[27].mxu1 }
 0x3eb   :  { %8509 = vst.msk [vmem:[#allocation11 + $0x3c] sm:$0xf] %vm8493_vm0, %v9178_v33  ;;  %v9239_v32 = vpack.c.bf16 %v7795_v17, %v7795_v17  ;;  %v6378_v55 = vmul.bf16 %v11556_v58, %v5609_v14  ;;  %v7798_v2 = vadd.f32 %v12634_v23, %v7797_v44  ;;  %v4862_v4 = vadd.bf16 %v8828_v38, %v12876_v37  ;;  %v7554_v22 = vpop.f32.mrb[32].mxu0  ;;  %v6283_v59 = vpop.permute.xlu1 %6282 }
 0x3ec   :  { %v4863_v30 = vadd.bf16 %v8829_v12, %v2590_v1  ;;  %v3347_v43 = vrot.slane %v14063_v3, %v10558_v50  ;;  %v8890_v18 = vcombine.low %v4172_v13, %v4173_v46  ;;  %v7555_v5 = vadd.f32 %v12634_v23, %v7554_v22  ;;  %v7556_v63 = vpop.f32.mrb[33].mxu0 }
 0x3ed   :  { %8570 = vst.msk [vmem:[#allocation11 + $0x130] sm:$0xf] %vm8493_vm0, %v9239_v32  ;;  %v8955_v26 = vcombine.low %v6377_v6, %v6378_v55  ;;  %v8956_v35 = vcombine.high %v6377_v6, %v6378_v55  ;;  %v9240_v9 = vpack.c.bf16 %v7798_v2, %v7798_v2  ;;  %v12946_v29 = vmul.bf16 %v11038_v40, %v3358_v10  ;;  %v7557_v16 = vpop.f32.mrb[34].mxu0 }
 0x3ee   :  { %v8891_v37 = vcombine.high %v4172_v13, %v4173_v46  ;;  %v6439_v47 = vmul.bf16 %v11556_v58, %v6280_v56  ;;  %v6291_v45 = vrot.slane %v6283_v59, %v10558_v50  ;;  %v9179_v1 = vpack.c.bf16 %v7555_v5, %v7555_v5  ;;  %v7559_v8 = vpop.f32.mrb[35].mxu0 }
 0x3ef   :  { %8571 = vst.msk [vmem:[#allocation11 + $0x134] sm:$0xf] %vm8493_vm0, %v9240_v9  ;;  %v7558_v27 = vadd.f32 %v12634_v23, %v7557_v16  ;;  %v7130_v41 = vadd.bf16 %v8956_v35, %v4863_v30  ;;  %v7129_v34 = vadd.bf16 %v8955_v26, %v4862_v4  ;;  %v12953_v52 = vmul.bf16 %v11038_v40, %v3347_v43  ;;  %v7802_v28 = vpop.f32.mrb[28].mxu1 }
 0x3f0   :  { %v4924_v31 = vadd.bf16 %v8890_v18, %v2651_v51  ;;  %v6440_v62 = vmul.bf16 %v11556_v58, %v6291_v45  ;;  %v6302_v61 = vrot.slane %v6294_v39, %v10558_v50  ;;  %8510 = vst.msk [vmem:[#allocation11 + $0x40] sm:$0xf] %vm8493_vm0, %v9179_v1  ;;  %v7803_v19 = vadd.f32 %v12634_v23, %v7802_v28  ;;  %v7804_v38 = vpop.f32.mrb[29].mxu1  ;;  %v4021_v12 = vpop.permute.xlu1 %4020 }
 0x3f1   :  { %v9180_v60 = vpack.c.bf16 %v7558_v27, %v7558_v27  ;;  %v7256_v13 = vmax.bf16 %v13881_v25, %v7130_v41  ;;  %v7255_v46 = vmax.bf16 %v13881_v25, %v7129_v34  ;;  %v4925_v36 = vadd.bf16 %v8891_v37, %v2652_v24  ;;  %v7805_v17 = vpop.f32.mrb[30].mxu1 }
 0x3f2   :  { %v9017_v49 = vcombine.low %v6439_v47, %v6440_v62  ;;  %v9018_v33 = vcombine.high %v6439_v47, %v6440_v62  ;;  %v4029_v51 = vrot.slane %v4021_v12, %v10558_v50  ;;  %v2654_v14 = vadd.bf16 %v8766_v54, %v14028_v0  ;;  %v7807_v56 = vpop.f32.mrb[31].mxu1 }
 0x3f3   :  { %v8830_v21 = vcombine.low %v12953_v52, %v12946_v29  ;;  %8511 = vst.msk [vmem:[#allocation11 + $0x44] sm:$0xf] %vm8493_vm0, %v9180_v60  ;;  %v9241_v11 = vpack.c.bf16 %v7803_v19, %v7803_v19  ;;  %v7806_v10 = vadd.f32 %v12634_v23, %v7805_v17  ;;  %7728 = vmatprep.mubr.bf16.mxu0 %v7256_v13  ;;  %v7562_v6 = vpop.f32.mrb[36].mxu0  ;;  %v13003_v56 = vld [vmem:[#allocation10] ss:$0 sm:$0xff] }
 0x3f4   :  { %v6441_v44 = vmul.bf16 %v11556_v58, %v6302_v61  ;;  %v4174_v24 = vmul.bf16 %v11038_v40, %v4029_v51  ;;  %7729 = vmatmul.mubr.bf16.gmra.mrb[120].mxu0 %v7255_v46  ;;  %v7192_v32 = vadd.bf16 %v9018_v33, %v4925_v36  ;;  %v7191_v55 = vadd.bf16 %v9017_v49, %v4924_v31  ;;  %v7564_v30 = vpop.f32.mrb[37].mxu0 }
 0x3f5   :  { %v8831_v54 = vcombine.high %v12953_v52, %v12946_v29  ;;  %v5620_v2 = vrot.slane %v12919_v7, %v10558_v50  ;;  %8572 = vst.msk [vmem:[#allocation11 + $0x138] sm:$0xf] %vm8493_vm0, %v9241_v11  ;;  %v9242_v42 = vpack.c.bf16 %v7806_v10, %v7806_v10  ;;  %v7563_v4 = vadd.f32 %v12634_v23, %v7562_v6  ;;  %v7565_v18 = vpop.f32.mrb[38].mxu0  ;;  %v5623_v40 = vpop.permute.xlu1 %5622 }
 0x3f6   :  { %v8892_v3 = vcombine.low %v4174_v24, %v4174_v24  ;;  %v8893_v43 = vcombine.high %v4174_v24, %v4174_v24  ;;  %v7318_v22 = vmax.bf16 %v13881_v25, %v7192_v32  ;;  %v7317_v59 = vmax.bf16 %v13881_v25, %v7191_v55  ;;  %v7567_v5 = vpop.f32.mrb[39].mxu0 }
 0x3f7   :  { %v2592_v26 = vadd.bf16 %v8704_v15, %v14028_v0  ;;  %8573 = vst.msk [vmem:[#allocation11 + $0x13c] sm:$0xf] %vm8493_vm0, %v9242_v42  ;;  %v9181_v7 = vpack.c.bf16 %v7563_v4, %v7563_v4  ;;  %v7566_v35 = vadd.f32 %v12634_v23, %v7565_v18  ;;  %v5631_v9 = vrot.slane %v5623_v40, %v10558_v50  ;;  %v7810_v47 = vpop.f32.mrb[32].mxu1 }
 0x3f8   :  { %v9019_v63 = vcombine.low %v6441_v44, %v6441_v44  ;;  %v9020_v39 = vcombine.high %v6441_v44, %v6441_v44  ;;  %v4926_v29 = vadd.bf16 %v8892_v3, %v12930_v53  ;;  %v4927_v37 = vadd.bf16 %v8893_v43, %v2654_v14  ;;  %7976 = vmatprep.mubr.bf16.mxu1 %v7318_v22  ;;  %v7812_v15 = vpop.f32.mrb[33].mxu1 }
 0x3f9   :  { %v6379_v45 = vmul.bf16 %v11556_v58, %v5620_v2  ;;  %8512 = vst.msk [vmem:[#allocation11 + $0x48] sm:$0xf] %vm8493_vm0, %v9181_v7  ;;  %v9182_v0 = vpack.c.bf16 %v7566_v35, %v7566_v35  ;;  %v6380_v20 = vmul.bf16 %v11556_v58, %v5631_v9  ;;  %v7811_v57 = vadd.f32 %v12634_v23, %v7810_v47  ;;  %v7813_v1 = vpop.f32.mrb[34].mxu1 }
 0x3fa   :  { %7977 = vmatmul.mubr.bf16.gmra.mrb[116].mxu1 %v7317_v59  ;;  %v4864_v50 = vadd.bf16 %v8830_v21, %v12910_v48  ;;  %v4865_v16 = vadd.bf16 %v8831_v54, %v2592_v26  ;;  %v7194_v27 = vadd.bf16 %v9020_v39, %v4927_v37  ;;  %v7193_v53 = vadd.bf16 %v9019_v63, %v4926_v29  ;;  %v7815_v31 = vpop.f32.mrb[35].mxu1 }
 0x3fb   :  { %8513 = vst.msk [vmem:[#allocation11 + $0x4c] sm:$0xf] %vm8493_vm0, %v9182_v0  ;;  %v8957_v8 = vcombine.low %v6379_v45, %v6380_v20  ;;  %v8958_v41 = vcombine.high %v6379_v45, %v6380_v20  ;;  %v9243_v34 = vpack.c.bf16 %v7811_v57, %v7811_v57  ;;  %v7814_v52 = vadd.f32 %v12634_v23, %v7813_v1  ;;  %v7570_v62 = vpop.f32.mrb[40].mxu0 }
 0x3fc   :  { %v7320_v58 = vmax.bf16 %v13881_v25, %v7194_v27  ;;  %v7571_v48 = vadd.f32 %v12634_v23, %v7570_v62  ;;  %v7572_v61 = vpop.f32.mrb[41].mxu0  ;;  %v7319_v12 = vmax.bf16 %v13881_v25, %v7193_v53 }
 0x3fd   :  { %8574 = vst.msk [vmem:[#allocation11 + $0x140] sm:$0xf] %vm8493_vm0, %v9243_v34  ;;  %v9244_v28 = vpack.c.bf16 %v7814_v52, %v7814_v52  ;;  %v7132_v60 = vadd.bf16 %v8958_v41, %v4865_v16  ;;  %v7131_v19 = vadd.bf16 %v8957_v8, %v4864_v50  ;;  %v7573_v38 = vpop.f32.mrb[42].mxu0 }
 0x3fe   :  { %7984 = vmatprep.mubr.bf16.mxu1 %v7320_v58  ;;  %v9183_v13 = vpack.c.bf16 %v7571_v48, %v7571_v48  ;;  %v7574_v46 = vadd.f32 %v12634_v23, %v7573_v38  ;;  %v7575_v36 = vpop.f32.mrb[43].mxu0 }
 0x3ff   :  { %8575 = vst.msk [vmem:[#allocation11 + $0x144] sm:$0xf] %vm8493_vm0, %v9244_v28  ;;  %v7258_v49 = vmax.bf16 %v13881_v25, %v7132_v60  ;;  %v7257_v33 = vmax.bf16 %v13881_v25, %v7131_v19  ;;  %v7818_v51 = vpop.f32.mrb[36].mxu1 }
 0x400   :  { %8514 = vst.msk [vmem:[#allocation11 + $0x50] sm:$0xf] %vm8493_vm0, %v9183_v13  ;;  %v9184_v17 = vpack.c.bf16 %v7574_v46, %v7574_v46  ;;  %v7819_v14 = vadd.f32 %v12634_v23, %v7818_v51  ;;  %v7820_v21 = vpop.f32.mrb[37].mxu1 }
 0x401   :  { %7736 = vmatprep.mubr.bf16.mxu0 %v7258_v49  ;;  %v7821_v11 = vpop.f32.mrb[38].mxu1 }
 0x402   :  { %7985 = vmatmul.mubr.bf16.gmra.mrb[120].mxu1 %v7319_v12  ;;  %7737 = vmatmul.mubr.bf16.gmra.mrb[124].mxu0 %v7257_v33  ;;  %8515 = vst.msk [vmem:[#allocation11 + $0x54] sm:$0xf] %vm8493_vm0, %v9184_v17  ;;  %v9245_v10 = vpack.c.bf16 %v7819_v14, %v7819_v14  ;;  %v7822_v44 = vadd.f32 %v13003_v56, %v7821_v11  ;;  %v7823_v24 = vpop.f32.mrb[39].mxu1 }
 0x403   :  { %v7578_v25 = vpop.f32.mrb[44].mxu0 }
 0x404   :  { %8576 = vst.msk [vmem:[#allocation11 + $0x148] sm:$0xf] %vm8493_vm0, %v9245_v10  ;;  %v9246_v6 = vpack.c.bf16 %v7822_v44, %v7822_v44  ;;  %v7579_v32 = vadd.f32 %v13003_v56, %v7578_v25  ;;  %v7580_v23 = vpop.f32.mrb[45].mxu0 }
 0x405   :  { %v7581_v55 = vpop.f32.mrb[46].mxu0 }
 0x406   :  { %8577 = vst.msk [vmem:[#allocation11 + $0x14c] sm:$0xf] %vm8493_vm0, %v9246_v6  ;;  %v9185_v54 = vpack.c.bf16 %v7579_v32, %v7579_v32  ;;  %v7582_v2 = vadd.f32 %v13003_v56, %v7581_v55  ;;  %v7583_v42 = vpop.f32.mrb[47].mxu0 }
 0x407   :  { %v7826_v4 = vpop.f32.mrb[40].mxu1 }
 0x408   :  { %8516 = vst.msk [vmem:[#allocation11 + $0x58] sm:$0xf] %vm8493_vm0, %v9185_v54  ;;  %v9186_v30 = vpack.c.bf16 %v7582_v2, %v7582_v2  ;;  %v7827_v3 = vadd.f32 %v13003_v56, %v7826_v4  ;;  %v7828_v43 = vpop.f32.mrb[41].mxu1 }
 0x409   :  { %v7829_v18 = vpop.f32.mrb[42].mxu1 }
 0x40a   :  { %8517 = vst.msk [vmem:[#allocation11 + $0x5c] sm:$0xf] %vm8493_vm0, %v9186_v30  ;;  %v9247_v40 = vpack.c.bf16 %v7827_v3, %v7827_v3  ;;  %v7830_v22 = vadd.f32 %v13003_v56, %v7829_v18  ;;  %v7831_v59 = vpop.f32.mrb[43].mxu1 }
 0x40b   :  { %v7586_v26 = vpop.f32.mrb[48].mxu0 }
 0x40c   :  { %8578 = vst.msk [vmem:[#allocation11 + $0x150] sm:$0xf] %vm8493_vm0, %v9247_v40  ;;  %v9248_v7 = vpack.c.bf16 %v7830_v22, %v7830_v22  ;;  %v7587_v35 = vadd.f32 %v13003_v56, %v7586_v26  ;;  %v7588_v9 = vpop.f32.mrb[49].mxu0 }
 0x40d   :  { %v7589_v5 = vpop.f32.mrb[50].mxu0 }
 0x40e   :  { %8579 = vst.msk [vmem:[#allocation11 + $0x154] sm:$0xf] %vm8493_vm0, %v9248_v7  ;;  %v9187_v63 = vpack.c.bf16 %v7587_v35, %v7587_v35  ;;  %v7590_v39 = vadd.f32 %v13003_v56, %v7589_v5  ;;  %v7591_v29 = vpop.f32.mrb[51].mxu0 }
 0x40f   :  { %v7834_v37 = vpop.f32.mrb[44].mxu1 }
 0x410   :  { %8518 = vst.msk [vmem:[#allocation11 + $0x60] sm:$0xf] %vm8493_vm0, %v9187_v63  ;;  %v9188_v47 = vpack.c.bf16 %v7590_v39, %v7590_v39  ;;  %v7835_v45 = vadd.f32 %v13003_v56, %v7834_v37  ;;  %v7836_v0 = vpop.f32.mrb[45].mxu1 }
 0x411   :  { %v7837_v20 = vpop.f32.mrb[46].mxu1 }
 0x412   :  { %8519 = vst.msk [vmem:[#allocation11 + $0x64] sm:$0xf] %vm8493_vm0, %v9188_v47  ;;  %v9249_v57 = vpack.c.bf16 %v7835_v45, %v7835_v45  ;;  %v7838_v15 = vadd.f32 %v13003_v56, %v7837_v20  ;;  %v7839_v50 = vpop.f32.mrb[47].mxu1 }
 0x413   :  { %v7594_v16 = vpop.f32.mrb[52].mxu0 }
 0x414   :  { %8580 = vst.msk [vmem:[#allocation11 + $0x158] sm:$0xf] %vm8493_vm0, %v9249_v57  ;;  %v9250_v1 = vpack.c.bf16 %v7838_v15, %v7838_v15  ;;  %v7595_v27 = vadd.f32 %v13003_v56, %v7594_v16  ;;  %v7596_v53 = vpop.f32.mrb[53].mxu0 }
 0x415   :  { %v7597_v8 = vpop.f32.mrb[54].mxu0 }
 0x416   :  { %8581 = vst.msk [vmem:[#allocation11 + $0x15c] sm:$0xf] %vm8493_vm0, %v9250_v1  ;;  %v9189_v41 = vpack.c.bf16 %v7595_v27, %v7595_v27  ;;  %v7598_v34 = vadd.f32 %v13003_v56, %v7597_v8  ;;  %v7599_v52 = vpop.f32.mrb[55].mxu0 }
 0x417   :  { %v7842_v31 = vpop.f32.mrb[48].mxu1 }
 0x418   :  { %8520 = vst.msk [vmem:[#allocation11 + $0x68] sm:$0xf] %vm8493_vm0, %v9189_v41  ;;  %v9190_v62 = vpack.c.bf16 %v7598_v34, %v7598_v34  ;;  %v7843_v58 = vadd.f32 %v13003_v56, %v7842_v31  ;;  %v7844_v28 = vpop.f32.mrb[49].mxu1 }
 0x419   :  { %v7845_v48 = vpop.f32.mrb[50].mxu1 }
 0x41a   :  { %8521 = vst.msk [vmem:[#allocation11 + $0x6c] sm:$0xf] %vm8493_vm0, %v9190_v62  ;;  %v9251_v61 = vpack.c.bf16 %v7843_v58, %v7843_v58  ;;  %v7846_v60 = vadd.f32 %v13003_v56, %v7845_v48  ;;  %v7847_v19 = vpop.f32.mrb[51].mxu1 }
 0x41b   :  { %v7602_v38 = vpop.f32.mrb[56].mxu0 }
 0x41c   :  { %8582 = vst.msk [vmem:[#allocation11 + $0x160] sm:$0xf] %vm8493_vm0, %v9251_v61  ;;  %v9252_v12 = vpack.c.bf16 %v7846_v60, %v7846_v60  ;;  %v7603_v13 = vadd.f32 %v13003_v56, %v7602_v38  ;;  %v7604_v46 = vpop.f32.mrb[57].mxu0 }
 0x41d   :  { %v7605_v36 = vpop.f32.mrb[58].mxu0 }
 0x41e   :  { %8583 = vst.msk [vmem:[#allocation11 + $0x164] sm:$0xf] %vm8493_vm0, %v9252_v12  ;;  %v9191_v49 = vpack.c.bf16 %v7603_v13, %v7603_v13  ;;  %v7606_v33 = vadd.f32 %v13003_v56, %v7605_v36  ;;  %v7607_v51 = vpop.f32.mrb[59].mxu0 }
 0x41f   :  { %v7850_v17 = vpop.f32.mrb[52].mxu1 }
 0x420   :  { %8522 = vst.msk [vmem:[#allocation11 + $0x70] sm:$0xf] %vm8493_vm0, %v9191_v49  ;;  %v9192_v14 = vpack.c.bf16 %v7606_v33, %v7606_v33  ;;  %v7851_v21 = vadd.f32 %v13003_v56, %v7850_v17  ;;  %v7852_v11 = vpop.f32.mrb[53].mxu1 }
 0x421   :  { %v7853_v10 = vpop.f32.mrb[54].mxu1 }
 0x422   :  { %8523 = vst.msk [vmem:[#allocation11 + $0x74] sm:$0xf] %vm8493_vm0, %v9192_v14  ;;  %v9253_v44 = vpack.c.bf16 %v7851_v21, %v7851_v21  ;;  %v7854_v24 = vadd.f32 %v13003_v56, %v7853_v10  ;;  %v7855_v25 = vpop.f32.mrb[55].mxu1 }
 0x423   :  { %v7610_v6 = vpop.f32.mrb[60].mxu0 }
 0x424   :  { %8584 = vst.msk [vmem:[#allocation11 + $0x168] sm:$0xf] %vm8493_vm0, %v9253_v44  ;;  %v9254_v32 = vpack.c.bf16 %v7854_v24, %v7854_v24  ;;  %v7611_v23 = vadd.f32 %v13003_v56, %v7610_v6  ;;  %v7612_v55 = vpop.f32.mrb[61].mxu0 }
 0x425   :  { %v7613_v54 = vpop.f32.mrb[62].mxu0 }
 0x426   :  { %8585 = vst.msk [vmem:[#allocation11 + $0x16c] sm:$0xf] %vm8493_vm0, %v9254_v32  ;;  %v9193_v2 = vpack.c.bf16 %v7611_v23, %v7611_v23  ;;  %v7614_v42 = vadd.f32 %v13003_v56, %v7613_v54  ;;  %v7615_v4 = vpop.f32.mrb[63].mxu0 }
 0x427   :  { %v7858_v30 = vpop.f32.mrb[56].mxu1 }
 0x428   :  { %8524 = vst.msk [vmem:[#allocation11 + $0x78] sm:$0xf] %vm8493_vm0, %v9193_v2  ;;  %v9194_v3 = vpack.c.bf16 %v7614_v42, %v7614_v42  ;;  %v7859_v43 = vadd.f32 %v13003_v56, %v7858_v30  ;;  %v7860_v18 = vpop.f32.mrb[57].mxu1 }
 0x429   :  { %v7861_v40 = vpop.f32.mrb[58].mxu1 }
 0x42a   :  { %8525 = vst.msk [vmem:[#allocation11 + $0x7c] sm:$0xf] %vm8493_vm0, %v9194_v3  ;;  %v9255_v22 = vpack.c.bf16 %v7859_v43, %v7859_v43  ;;  %v7862_v59 = vadd.f32 %v13003_v56, %v7861_v40  ;;  %v7863_v26 = vpop.f32.mrb[59].mxu1 }
 0x42b   :  { %v7618_v7 = vpop.f32.mrb[64].mxu0 }
 0x42c   :  { %8586 = vst.msk [vmem:[#allocation11 + $0x170] sm:$0xf] %vm8493_vm0, %v9255_v22  ;;  %v9256_v35 = vpack.c.bf16 %v7862_v59, %v7862_v59  ;;  %v7619_v9 = vadd.f32 %v13003_v56, %v7618_v7  ;;  %v7620_v5 = vpop.f32.mrb[65].mxu0 }
 0x42d   :  { %v7621_v63 = vpop.f32.mrb[66].mxu0 }
 0x42e   :  { %8587 = vst.msk [vmem:[#allocation11 + $0x174] sm:$0xf] %vm8493_vm0, %v9256_v35  ;;  %v9195_v39 = vpack.c.bf16 %v7619_v9, %v7619_v9  ;;  %v7622_v29 = vadd.f32 %v13003_v56, %v7621_v63  ;;  %v7623_v37 = vpop.f32.mrb[67].mxu0 }
 0x42f   :  { %v7866_v47 = vpop.f32.mrb[60].mxu1 }
 0x430   :  { %8526 = vst.msk [vmem:[#allocation11 + $0x80] sm:$0xf] %vm8493_vm0, %v9195_v39  ;;  %v9196_v45 = vpack.c.bf16 %v7622_v29, %v7622_v29  ;;  %v7867_v0 = vadd.f32 %v13003_v56, %v7866_v47  ;;  %v7868_v20 = vpop.f32.mrb[61].mxu1 }
 0x431   :  { %v7869_v57 = vpop.f32.mrb[62].mxu1 }
 0x432   :  { %8527 = vst.msk [vmem:[#allocation11 + $0x84] sm:$0xf] %vm8493_vm0, %v9196_v45  ;;  %v9257_v15 = vpack.c.bf16 %v7867_v0, %v7867_v0  ;;  %v7870_v50 = vadd.f32 %v13003_v56, %v7869_v57  ;;  %v7871_v16 = vpop.f32.mrb[63].mxu1 }
 0x433   :  { %v7626_v1 = vpop.f32.mrb[68].mxu0 }
 0x434   :  { %8588 = vst.msk [vmem:[#allocation11 + $0x178] sm:$0xf] %vm8493_vm0, %v9257_v15  ;;  %v9258_v27 = vpack.c.bf16 %v7870_v50, %v7870_v50  ;;  %v7627_v53 = vadd.f32 %v13003_v56, %v7626_v1  ;;  %v7628_v8 = vpop.f32.mrb[69].mxu0 }
 0x435   :  { %v7629_v41 = vpop.f32.mrb[70].mxu0 }
 0x436   :  { %8589 = vst.msk [vmem:[#allocation11 + $0x17c] sm:$0xf] %vm8493_vm0, %v9258_v27  ;;  %v9197_v34 = vpack.c.bf16 %v7627_v53, %v7627_v53  ;;  %v7630_v52 = vadd.f32 %v13003_v56, %v7629_v41  ;;  %v7631_v31 = vpop.f32.mrb[71].mxu0 }
 0x437   :  { %v7874_v62 = vpop.f32.mrb[64].mxu1 }
 0x438   :  { %8528 = vst.msk [vmem:[#allocation11 + $0x88] sm:$0xf] %vm8493_vm0, %v9197_v34  ;;  %v9198_v58 = vpack.c.bf16 %v7630_v52, %v7630_v52  ;;  %v7875_v28 = vadd.f32 %v13003_v56, %v7874_v62  ;;  %v7876_v48 = vpop.f32.mrb[65].mxu1 }
 0x439   :  { %v7877_v61 = vpop.f32.mrb[66].mxu1 }
 0x43a   :  { %8529 = vst.msk [vmem:[#allocation11 + $0x8c] sm:$0xf] %vm8493_vm0, %v9198_v58  ;;  %v9259_v60 = vpack.c.bf16 %v7875_v28, %v7875_v28  ;;  %v7878_v19 = vadd.f32 %v13003_v56, %v7877_v61  ;;  %v7879_v38 = vpop.f32.mrb[67].mxu1 }
 0x43b   :  { %v7634_v12 = vpop.f32.mrb[72].mxu0 }
 0x43c   :  { %8590 = vst.msk [vmem:[#allocation11 + $0x180] sm:$0xf] %vm8493_vm0, %v9259_v60  ;;  %v9260_v13 = vpack.c.bf16 %v7878_v19, %v7878_v19  ;;  %v7635_v46 = vadd.f32 %v13003_v56, %v7634_v12  ;;  %v7636_v36 = vpop.f32.mrb[73].mxu0 }
 0x43d   :  { %v7637_v49 = vpop.f32.mrb[74].mxu0 }
 0x43e   :  { %8591 = vst.msk [vmem:[#allocation11 + $0x184] sm:$0xf] %vm8493_vm0, %v9260_v13  ;;  %v9199_v33 = vpack.c.bf16 %v7635_v46, %v7635_v46  ;;  %v7638_v51 = vadd.f32 %v13003_v56, %v7637_v49  ;;  %v7639_v17 = vpop.f32.mrb[75].mxu0 }
 0x43f   :  { %v7882_v14 = vpop.f32.mrb[68].mxu1 }
 0x440   :  { %8530 = vst.msk [vmem:[#allocation11 + $0x90] sm:$0xf] %vm8493_vm0, %v9199_v33  ;;  %v9200_v21 = vpack.c.bf16 %v7638_v51, %v7638_v51  ;;  %v7883_v11 = vadd.f32 %v13003_v56, %v7882_v14  ;;  %v7884_v10 = vpop.f32.mrb[69].mxu1 }
 0x441   :  { %v7885_v44 = vpop.f32.mrb[70].mxu1 }
 0x442   :  { %8531 = vst.msk [vmem:[#allocation11 + $0x94] sm:$0xf] %vm8493_vm0, %v9200_v21  ;;  %v9261_v24 = vpack.c.bf16 %v7883_v11, %v7883_v11  ;;  %v7886_v25 = vadd.f32 %v13003_v56, %v7885_v44  ;;  %v7887_v6 = vpop.f32.mrb[71].mxu1 }
 0x443   :  { %v7642_v32 = vpop.f32.mrb[76].mxu0 }
 0x444   :  { %8592 = vst.msk [vmem:[#allocation11 + $0x188] sm:$0xf] %vm8493_vm0, %v9261_v24  ;;  %v9262_v23 = vpack.c.bf16 %v7886_v25, %v7886_v25  ;;  %v7643_v55 = vadd.f32 %v13003_v56, %v7642_v32  ;;  %v7644_v54 = vpop.f32.mrb[77].mxu0 }
 0x445   :  { %v7645_v2 = vpop.f32.mrb[78].mxu0 }
 0x446   :  { %8593 = vst.msk [vmem:[#allocation11 + $0x18c] sm:$0xf] %vm8493_vm0, %v9262_v23  ;;  %v9201_v42 = vpack.c.bf16 %v7643_v55, %v7643_v55  ;;  %v7646_v4 = vadd.f32 %v13003_v56, %v7645_v2  ;;  %v7647_v30 = vpop.f32.mrb[79].mxu0 }
 0x447   :  { %v7890_v3 = vpop.f32.mrb[72].mxu1 }
 0x448   :  { %8532 = vst.msk [vmem:[#allocation11 + $0x98] sm:$0xf] %vm8493_vm0, %v9201_v42  ;;  %v9202_v43 = vpack.c.bf16 %v7646_v4, %v7646_v4  ;;  %v7891_v18 = vadd.f32 %v13003_v56, %v7890_v3  ;;  %v7892_v40 = vpop.f32.mrb[73].mxu1 }
 0x449   :  { %v7893_v22 = vpop.f32.mrb[74].mxu1 }
 0x44a   :  { %8533 = vst.msk [vmem:[#allocation11 + $0x9c] sm:$0xf] %vm8493_vm0, %v9202_v43  ;;  %v9263_v59 = vpack.c.bf16 %v7891_v18, %v7891_v18  ;;  %v7894_v26 = vadd.f32 %v13003_v56, %v7893_v22  ;;  %v7895_v7 = vpop.f32.mrb[75].mxu1 }
 0x44b   :  { %v7650_v35 = vpop.f32.mrb[80].mxu0 }
 0x44c   :  { %8594 = vst.msk [vmem:[#allocation11 + $0x190] sm:$0xf] %vm8493_vm0, %v9263_v59  ;;  %v9264_v9 = vpack.c.bf16 %v7894_v26, %v7894_v26  ;;  %v7651_v5 = vadd.f32 %v13003_v56, %v7650_v35  ;;  %v7652_v63 = vpop.f32.mrb[81].mxu0 }
 0x44d   :  { %v7653_v39 = vpop.f32.mrb[82].mxu0 }
 0x44e   :  { %8595 = vst.msk [vmem:[#allocation11 + $0x194] sm:$0xf] %vm8493_vm0, %v9264_v9  ;;  %v9203_v29 = vpack.c.bf16 %v7651_v5, %v7651_v5  ;;  %v7654_v37 = vadd.f32 %v13003_v56, %v7653_v39  ;;  %v7655_v47 = vpop.f32.mrb[83].mxu0 }
 0x44f   :  { %v7898_v45 = vpop.f32.mrb[76].mxu1 }
 0x450   :  { %8534 = vst.msk [vmem:[#allocation11 + $0xa0] sm:$0xf] %vm8493_vm0, %v9203_v29  ;;  %v9204_v0 = vpack.c.bf16 %v7654_v37, %v7654_v37  ;;  %v7899_v20 = vadd.f32 %v13003_v56, %v7898_v45  ;;  %v7900_v57 = vpop.f32.mrb[77].mxu1 }
 0x451   :  { %v7901_v15 = vpop.f32.mrb[78].mxu1 }
 0x452   :  { %8535 = vst.msk [vmem:[#allocation11 + $0xa4] sm:$0xf] %vm8493_vm0, %v9204_v0  ;;  %v9265_v50 = vpack.c.bf16 %v7899_v20, %v7899_v20  ;;  %v7902_v16 = vadd.f32 %v13003_v56, %v7901_v15  ;;  %v7903_v1 = vpop.f32.mrb[79].mxu1 }
 0x453   :  { %v7658_v27 = vpop.f32.mrb[84].mxu0 }
 0x454   :  { %8596 = vst.msk [vmem:[#allocation11 + $0x198] sm:$0xf] %vm8493_vm0, %v9265_v50  ;;  %v9266_v53 = vpack.c.bf16 %v7902_v16, %v7902_v16  ;;  %v7659_v8 = vadd.f32 %v13003_v56, %v7658_v27  ;;  %v7660_v41 = vpop.f32.mrb[85].mxu0 }
 0x455   :  { %v7661_v34 = vpop.f32.mrb[86].mxu0 }
 0x456   :  { %8597 = vst.msk [vmem:[#allocation11 + $0x19c] sm:$0xf] %vm8493_vm0, %v9266_v53  ;;  %v9205_v52 = vpack.c.bf16 %v7659_v8, %v7659_v8  ;;  %v7662_v31 = vadd.f32 %v13003_v56, %v7661_v34  ;;  %v7663_v62 = vpop.f32.mrb[87].mxu0 }
 0x457   :  { %v7906_v58 = vpop.f32.mrb[80].mxu1 }
 0x458   :  { %8536 = vst.msk [vmem:[#allocation11 + $0xa8] sm:$0xf] %vm8493_vm0, %v9205_v52  ;;  %v9206_v28 = vpack.c.bf16 %v7662_v31, %v7662_v31  ;;  %v7907_v48 = vadd.f32 %v13003_v56, %v7906_v58  ;;  %v7908_v61 = vpop.f32.mrb[81].mxu1 }
 0x459   :  { %v7909_v60 = vpop.f32.mrb[82].mxu1 }
 0x45a   :  { %8537 = vst.msk [vmem:[#allocation11 + $0xac] sm:$0xf] %vm8493_vm0, %v9206_v28  ;;  %v9267_v19 = vpack.c.bf16 %v7907_v48, %v7907_v48  ;;  %v7910_v38 = vadd.f32 %v13003_v56, %v7909_v60  ;;  %v7911_v12 = vpop.f32.mrb[83].mxu1 }
 0x45b   :  { %v7666_v13 = vpop.f32.mrb[88].mxu0 }
 0x45c   :  { %8598 = vst.msk [vmem:[#allocation11 + $0x1a0] sm:$0xf] %vm8493_vm0, %v9267_v19  ;;  %v9268_v46 = vpack.c.bf16 %v7910_v38, %v7910_v38  ;;  %v7667_v36 = vadd.f32 %v13003_v56, %v7666_v13  ;;  %v7668_v49 = vpop.f32.mrb[89].mxu0 }
 0x45d   :  { %v7669_v33 = vpop.f32.mrb[90].mxu0 }
 0x45e   :  { %8599 = vst.msk [vmem:[#allocation11 + $0x1a4] sm:$0xf] %vm8493_vm0, %v9268_v46  ;;  %v9207_v51 = vpack.c.bf16 %v7667_v36, %v7667_v36  ;;  %v7670_v17 = vadd.f32 %v13003_v56, %v7669_v33  ;;  %v7671_v14 = vpop.f32.mrb[91].mxu0 }
 0x460   :  { %8538 = vst.msk [vmem:[#allocation11 + $0xb0] sm:$0xf] %vm8493_vm0, %v9207_v51  ;;  %v9208_v21 = vpack.c.bf16 %v7670_v17, %v7670_v17 }
 0x462   :  { %8539 = vst.msk [vmem:[#allocation11 + $0xb4] sm:$0xf] %vm8493_vm0, %v9208_v21 }
 0x464   :  { %v7914_v11 = vpop.f32.mrb[84].mxu1  ;;  %v7674_v10 = vpop.f32.mrb[92].mxu0 }
 0x465   :  { %v7915_v44 = vadd.f32 %v13003_v56, %v7914_v11  ;;  %v7675_v24 = vadd.f32 %v13003_v56, %v7674_v10  ;;  %v7916_v25 = vpop.f32.mrb[85].mxu1  ;;  %v7676_v6 = vpop.f32.mrb[93].mxu0 }
 0x466   :  { %v7917_v32 = vpop.f32.mrb[86].mxu1  ;;  %v7677_v23 = vpop.f32.mrb[94].mxu0 }
 0x467   :  { %v9269_v55 = vpack.c.bf16 %v7915_v44, %v7915_v44  ;;  %v9209_v54 = vpack.c.bf16 %v7675_v24, %v7675_v24  ;;  %v7918_v2 = vadd.f32 %v13003_v56, %v7917_v32  ;;  %v7678_v42 = vadd.f32 %v13003_v56, %v7677_v23  ;;  %v7919_v4 = vpop.f32.mrb[87].mxu1  ;;  %v7679_v30 = vpop.f32.mrb[95].mxu0 }
 0x469   :  { %8600 = vst.msk [vmem:[#allocation11 + $0x1a8] sm:$0xf] %vm8493_vm0, %v9269_v55  ;;  %8540 = vst.msk [vmem:[#allocation11 + $0xb8] sm:$0xf] %vm8493_vm0, %v9209_v54  ;;  %v9270_v3 = vpack.c.bf16 %v7918_v2, %v7918_v2  ;;  %v9210_v43 = vpack.c.bf16 %v7678_v42, %v7678_v42 }
 0x46b   :  { %8601 = vst.msk [vmem:[#allocation11 + $0x1ac] sm:$0xf] %vm8493_vm0, %v9270_v3  ;;  %8541 = vst.msk [vmem:[#allocation11 + $0xbc] sm:$0xf] %vm8493_vm0, %v9210_v43 }
 0x46c   :  { %v7922_v18 = vpop.f32.mrb[88].mxu1  ;;  %v7682_v40 = vpop.f32.mrb[96].mxu0 }
 0x46d   :  { %v7923_v22 = vadd.f32 %v13003_v56, %v7922_v18  ;;  %v7683_v59 = vadd.f32 %v13003_v56, %v7682_v40  ;;  %v7924_v26 = vpop.f32.mrb[89].mxu1  ;;  %v7684_v7 = vpop.f32.mrb[97].mxu0 }
 0x46e   :  { %v7925_v35 = vpop.f32.mrb[90].mxu1  ;;  %v7685_v9 = vpop.f32.mrb[98].mxu0 }
 0x46f   :  { %v9271_v5 = vpack.c.bf16 %v7923_v22, %v7923_v22  ;;  %v9211_v63 = vpack.c.bf16 %v7683_v59, %v7683_v59  ;;  %v7926_v39 = vadd.f32 %v13003_v56, %v7925_v35  ;;  %v7686_v29 = vadd.f32 %v13003_v56, %v7685_v9  ;;  %v7927_v37 = vpop.f32.mrb[91].mxu1  ;;  %v7687_v47 = vpop.f32.mrb[99].mxu0 }
 0x471   :  { %8602 = vst.msk [vmem:[#allocation11 + $0x1b0] sm:$0xf] %vm8493_vm0, %v9271_v5  ;;  %8542 = vst.msk [vmem:[#allocation11 + $0xc0] sm:$0xf] %vm8493_vm0, %v9211_v63  ;;  %v9272_v45 = vpack.c.bf16 %v7926_v39, %v7926_v39  ;;  %v9212_v0 = vpack.c.bf16 %v7686_v29, %v7686_v29 }
 0x473   :  { %8603 = vst.msk [vmem:[#allocation11 + $0x1b4] sm:$0xf] %vm8493_vm0, %v9272_v45  ;;  %8543 = vst.msk [vmem:[#allocation11 + $0xc4] sm:$0xf] %vm8493_vm0, %v9212_v0 }
 0x474   :  { %v7690_v57 = vpop.f32.mrb[100].mxu0 }
 0x475   :  { %v7930_v20 = vpop.f32.mrb[92].mxu1  ;;  %v7691_v50 = vadd.f32 %v13003_v56, %v7690_v57  ;;  %v7692_v1 = vpop.f32.mrb[101].mxu0 }
 0x476   :  { %v7931_v15 = vadd.f32 %v13003_v56, %v7930_v20  ;;  %v7932_v16 = vpop.f32.mrb[93].mxu1  ;;  %v7693_v53 = vpop.f32.mrb[102].mxu0 }
 0x477   :  { %v7933_v27 = vpop.f32.mrb[94].mxu1  ;;  %v9213_v41 = vpack.c.bf16 %v7691_v50, %v7691_v50  ;;  %v7694_v52 = vadd.f32 %v13003_v56, %v7693_v53  ;;  %v7695_v62 = vpop.f32.mrb[103].mxu0 }
 0x478   :  { %v9273_v8 = vpack.c.bf16 %v7931_v15, %v7931_v15  ;;  %v7934_v34 = vadd.f32 %v13003_v56, %v7933_v27  ;;  %v7935_v31 = vpop.f32.mrb[95].mxu1 }
 0x479   :  { %8544 = vst.msk [vmem:[#allocation11 + $0xc8] sm:$0xf] %vm8493_vm0, %v9213_v41  ;;  %v9214_v28 = vpack.c.bf16 %v7694_v52, %v7694_v52 }
 0x47a   :  { %8604 = vst.msk [vmem:[#allocation11 + $0x1b8] sm:$0xf] %vm8493_vm0, %v9273_v8  ;;  %v9274_v58 = vpack.c.bf16 %v7934_v34, %v7934_v34 }
 0x47b   :  { %8545 = vst.msk [vmem:[#allocation11 + $0xcc] sm:$0xf] %vm8493_vm0, %v9214_v28 }
 0x47c   :  { %8605 = vst.msk [vmem:[#allocation11 + $0x1bc] sm:$0xf] %vm8493_vm0, %v9274_v58 }
 0x47d   :  { %v7938_v48 = vpop.f32.mrb[96].mxu1 }
 0x47e   :  { %v7939_v61 = vadd.f32 %v13003_v56, %v7938_v48  ;;  %v7940_v60 = vpop.f32.mrb[97].mxu1 }
 0x47f   :  { %v7941_v19 = vpop.f32.mrb[98].mxu1  ;;  %v7698_v38 = vpop.f32.mrb[104].mxu0 }
 0x480   :  { %v9275_v12 = vpack.c.bf16 %v7939_v61, %v7939_v61  ;;  %v7942_v13 = vadd.f32 %v13003_v56, %v7941_v19  ;;  %v7943_v46 = vpop.f32.mrb[99].mxu1  ;;  %v7699_v36 = vadd.f32 %v13003_v56, %v7698_v38  ;;  %v7700_v49 = vpop.f32.mrb[105].mxu0 }
 0x481   :  { %v7701_v33 = vpop.f32.mrb[106].mxu0 }
 0x482   :  { %8606 = vst.msk [vmem:[#allocation11 + $0x1c0] sm:$0xf] %vm8493_vm0, %v9275_v12  ;;  %v9276_v51 = vpack.c.bf16 %v7942_v13, %v7942_v13  ;;  %v9215_v17 = vpack.c.bf16 %v7699_v36, %v7699_v36  ;;  %v7702_v14 = vadd.f32 %v13003_v56, %v7701_v33  ;;  %v7703_v21 = vpop.f32.mrb[107].mxu0 }
 0x484   :  { %8607 = vst.msk [vmem:[#allocation11 + $0x1c4] sm:$0xf] %vm8493_vm0, %v9276_v51  ;;  %8546 = vst.msk [vmem:[#allocation11 + $0xd0] sm:$0xf] %vm8493_vm0, %v9215_v17  ;;  %v9216_v11 = vpack.c.bf16 %v7702_v14, %v7702_v14 }
 0x485   :  { %v7946_v10 = vpop.f32.mrb[100].mxu1 }
 0x486   :  { %8547 = vst.msk [vmem:[#allocation11 + $0xd4] sm:$0xf] %vm8493_vm0, %v9216_v11  ;;  %v7947_v44 = vadd.f32 %v13003_v56, %v7946_v10  ;;  %v7948_v24 = vpop.f32.mrb[101].mxu1 }
 0x487   :  { %v7949_v25 = vpop.f32.mrb[102].mxu1 }
 0x488   :  { %v9277_v6 = vpack.c.bf16 %v7947_v44, %v7947_v44  ;;  %v7950_v32 = vadd.f32 %v13003_v56, %v7949_v25  ;;  %v7951_v23 = vpop.f32.mrb[103].mxu1 }
 0x48a   :  { %8608 = vst.msk [vmem:[#allocation11 + $0x1c8] sm:$0xf] %vm8493_vm0, %v9277_v6  ;;  %v9278_v55 = vpack.c.bf16 %v7950_v32, %v7950_v32 }
 0x48c   :  { %8609 = vst.msk [vmem:[#allocation11 + $0x1cc] sm:$0xf] %vm8493_vm0, %v9278_v55 }
 0x491   :  { %v7706_v54 = vpop.f32.mrb[108].mxu0 }
 0x492   :  { %v7707_v2 = vadd.f32 %v13003_v56, %v7706_v54  ;;  %v7708_v42 = vpop.f32.mrb[109].mxu0 }
 0x493   :  { %v7709_v4 = vpop.f32.mrb[110].mxu0 }
 0x494   :  { %v9217_v30 = vpack.c.bf16 %v7707_v2, %v7707_v2  ;;  %v7710_v3 = vadd.f32 %v13003_v56, %v7709_v4  ;;  %v7711_v43 = vpop.f32.mrb[111].mxu0  ;;  %v7954_v18 = vpop.f32.mrb[104].mxu1 }
 0x495   :  { %v7955_v40 = vadd.f32 %v13003_v56, %v7954_v18  ;;  %v7956_v22 = vpop.f32.mrb[105].mxu1 }
 0x496   :  { %8548 = vst.msk [vmem:[#allocation11 + $0xd8] sm:$0xf] %vm8493_vm0, %v9217_v30  ;;  %v9218_v59 = vpack.c.bf16 %v7710_v3, %v7710_v3  ;;  %v7957_v26 = vpop.f32.mrb[106].mxu1 }
 0x497   :  { %v9279_v7 = vpack.c.bf16 %v7955_v40, %v7955_v40  ;;  %v7958_v35 = vadd.f32 %v13003_v56, %v7957_v26  ;;  %v7959_v9 = vpop.f32.mrb[107].mxu1 }
 0x498   :  { %8549 = vst.msk [vmem:[#allocation11 + $0xdc] sm:$0xf] %vm8493_vm0, %v9218_v59 }
 0x499   :  { %8610 = vst.msk [vmem:[#allocation11 + $0x1d0] sm:$0xf] %vm8493_vm0, %v9279_v7  ;;  %v9280_v5 = vpack.c.bf16 %v7958_v35, %v7958_v35 }
 0x49b   :  { %8611 = vst.msk [vmem:[#allocation11 + $0x1d4] sm:$0xf] %vm8493_vm0, %v9280_v5 }
 0x4a3   :  { %v7714_v63 = vpop.f32.mrb[112].mxu0 }
 0x4a4   :  { %v7715_v39 = vadd.f32 %v13003_v56, %v7714_v63  ;;  %v7716_v29 = vpop.f32.mrb[113].mxu0 }
 0x4a5   :  { %v7717_v37 = vpop.f32.mrb[114].mxu0 }
 0x4a6   :  { %v9219_v47 = vpack.c.bf16 %v7715_v39, %v7715_v39  ;;  %v7718_v45 = vadd.f32 %v13003_v56, %v7717_v37  ;;  %v7719_v0 = vpop.f32.mrb[115].mxu0 }
 0x4a7   :  { %v7962_v57 = vpop.f32.mrb[108].mxu1 }
 0x4a8   :  { %8550 = vst.msk [vmem:[#allocation11 + $0xe0] sm:$0xf] %vm8493_vm0, %v9219_v47  ;;  %v9220_v20 = vpack.c.bf16 %v7718_v45, %v7718_v45  ;;  %v7963_v15 = vadd.f32 %v13003_v56, %v7962_v57  ;;  %v7964_v50 = vpop.f32.mrb[109].mxu1 }
 0x4a9   :  { %v7965_v16 = vpop.f32.mrb[110].mxu1 }
 0x4aa   :  { %8551 = vst.msk [vmem:[#allocation11 + $0xe4] sm:$0xf] %vm8493_vm0, %v9220_v20  ;;  %v9281_v1 = vpack.c.bf16 %v7963_v15, %v7963_v15  ;;  %v7966_v27 = vadd.f32 %v13003_v56, %v7965_v16  ;;  %v7967_v53 = vpop.f32.mrb[111].mxu1 }
 0x4ac   :  { %8612 = vst.msk [vmem:[#allocation11 + $0x1d8] sm:$0xf] %vm8493_vm0, %v9281_v1  ;;  %v9282_v8 = vpack.c.bf16 %v7966_v27, %v7966_v27 }
 0x4ae   :  { %8613 = vst.msk [vmem:[#allocation11 + $0x1dc] sm:$0xf] %vm8493_vm0, %v9282_v8 }
 0x4b5   :  { %v7722_v41 = vpop.f32.mrb[116].mxu0 }
 0x4b6   :  { %v7723_v34 = vadd.f32 %v13003_v56, %v7722_v41  ;;  %v7724_v52 = vpop.f32.mrb[117].mxu0 }
 0x4b7   :  { %v7725_v31 = vpop.f32.mrb[118].mxu0 }
 0x4b8   :  { %v9221_v62 = vpack.c.bf16 %v7723_v34, %v7723_v34  ;;  %v7726_v58 = vadd.f32 %v13003_v56, %v7725_v31  ;;  %v7727_v28 = vpop.f32.mrb[119].mxu0 }
 0x4ba   :  { %8552 = vst.msk [vmem:[#allocation11 + $0xe8] sm:$0xf] %vm8493_vm0, %v9221_v62  ;;  %v9222_v48 = vpack.c.bf16 %v7726_v58, %v7726_v58  ;;  %v7970_v61 = vpop.f32.mrb[112].mxu1 }
 0x4bb   :  { %v7971_v60 = vadd.f32 %v13003_v56, %v7970_v61  ;;  %v7972_v19 = vpop.f32.mrb[113].mxu1 }
 0x4bc   :  { %8553 = vst.msk [vmem:[#allocation11 + $0xec] sm:$0xf] %vm8493_vm0, %v9222_v48  ;;  %v7973_v38 = vpop.f32.mrb[114].mxu1 }
 0x4bd   :  { %v9283_v12 = vpack.c.bf16 %v7971_v60, %v7971_v60  ;;  %v7974_v13 = vadd.f32 %v13003_v56, %v7973_v38  ;;  %v7975_v46 = vpop.f32.mrb[115].mxu1 }
 0x4bf   :  { %8614 = vst.msk [vmem:[#allocation11 + $0x1e0] sm:$0xf] %vm8493_vm0, %v9283_v12  ;;  %v9284_v36 = vpack.c.bf16 %v7974_v13, %v7974_v13 }
 0x4c1   :  { %8615 = vst.msk [vmem:[#allocation11 + $0x1e4] sm:$0xf] %vm8493_vm0, %v9284_v36 }
 0x4c7   :  { %v7730_v49 = vpop.f32.mrb[120].mxu0 }
 0x4c8   :  { %v7731_v33 = vadd.f32 %v13003_v56, %v7730_v49  ;;  %v7732_v51 = vpop.f32.mrb[121].mxu0 }
 0x4c9   :  { %v7733_v17 = vpop.f32.mrb[122].mxu0 }
 0x4ca   :  { %v9223_v14 = vpack.c.bf16 %v7731_v33, %v7731_v33  ;;  %v7734_v21 = vadd.f32 %v13003_v56, %v7733_v17  ;;  %v7735_v11 = vpop.f32.mrb[123].mxu0 }
 0x4cc   :  { %8554 = vst.msk [vmem:[#allocation11 + $0xf0] sm:$0xf] %vm8493_vm0, %v9223_v14  ;;  %v9224_v10 = vpack.c.bf16 %v7734_v21, %v7734_v21 }
 0x4cd   :  { %v7978_v44 = vpop.f32.mrb[116].mxu1 }
 0x4ce   :  { %v7979_v24 = vadd.f32 %v13003_v56, %v7978_v44  ;;  %v7980_v25 = vpop.f32.mrb[117].mxu1  ;;  %8555 = vst.msk [vmem:[#allocation11 + $0xf4] sm:$0xf] %vm8493_vm0, %v9224_v10 }
 0x4cf   :  { %v7981_v6 = vpop.f32.mrb[118].mxu1 }
 0x4d0   :  { %v9285_v32 = vpack.c.bf16 %v7979_v24, %v7979_v24  ;;  %v7982_v23 = vadd.f32 %v13003_v56, %v7981_v6  ;;  %v7983_v55 = vpop.f32.mrb[119].mxu1 }
 0x4d2   :  { %8616 = vst.msk [vmem:[#allocation11 + $0x1e8] sm:$0xf] %vm8493_vm0, %v9285_v32  ;;  %v9286_v54 = vpack.c.bf16 %v7982_v23, %v7982_v23 }
 0x4d4   :  { %8617 = vst.msk [vmem:[#allocation11 + $0x1ec] sm:$0xf] %vm8493_vm0, %v9286_v54 }
 0x4d5   :  { %v7986_v2 = vpop.f32.mrb[120].mxu1  ;;  %v7738_v30 = vpop.f32.mrb[124].mxu0 }
 0x4d6   :  { %v7987_v42 = vadd.f32 %v13003_v56, %v7986_v2  ;;  %v7988_v4 = vpop.f32.mrb[121].mxu1  ;;  %v7739_v3 = vadd.f32 %v13003_v56, %v7738_v30  ;;  %v7740_v18 = vpop.f32.mrb[125].mxu0 }
 0x4d7   :  { %v7989_v43 = vpop.f32.mrb[122].mxu1  ;;  %v7741_v59 = vpop.f32.mrb[126].mxu0 }
 0x4d8   :  { %v9287_v40 = vpack.c.bf16 %v7987_v42, %v7987_v42  ;;  %v7990_v22 = vpop.f32.mrb[123].mxu1  ;;  %v9225_v26 = vpack.c.bf16 %v7739_v3, %v7739_v3  ;;  %v7742_v7 = vadd.f32 %v13003_v56, %v7741_v59  ;;  %v7743_v35 = vpop.f32.mrb[127].mxu0 }
 0x4da   :  { %8618 = vst.msk [vmem:[#allocation11 + $0x1f0] sm:$0xf] %vm8493_vm0, %v9287_v40  ;;  %8556 = vst.msk [vmem:[#allocation11 + $0xf8] sm:$0xf] %vm8493_vm0, %v9225_v26  ;;  %v9226_v9 = vpack.c.bf16 %v7742_v7, %v7742_v7 }
 0x4dc   :  { %8557 = vst.msk [vmem:[#allocation11 + $0xfc] sm:$0xf] %vm8493_vm0, %v9226_v9 }
 0x4dd   :  { %9614 = shalt.err (!%p9611_p2)
}
 0x4de   :  { %s9615_s6 = scalar_lea.hbm %s13194_s5, 8000 }
 0x4df   :  { %p9616_p3 = scmp.ne.s32.totalorder %s13194_s5, %s9615_s6  ;;  %p9619_p4 = scmp.lt.u32.totalorder %s9615_s6, %s13194_s5 }
 0x4e1   :  { %p9621_p5 = pnand %p9619_p4, %p9616_p3 }
 0x4e3   :  { %9624 = shalt.err (!%p9621_p5)
}
 0x4e4   :  { %8630 = dma.vmem_to_hbm [thread:$0]  %s8625_s3, 8000, %s13194_s5, [#allocation4], %s9636_s16, %s9636_s16, %s9637_s17  }
 0x4e5   :  { %9631 = dma.done.wait [#allocation4], 8000  }
 0x4e6   :  { %9632 = vsyncadd [#allocation4], 4294959296 }
 0x4e7   :  { %8634 = vsyncpa [#allocation3], 1 }
 0x4e8   :  { %8635 = vsyncpa [#allocation6], 1 }
 0x4e9   :  { %8636 = vsyncpa [#allocation9], 1 }
 0x4ea   :  { %8637 = vsyncpa [#allocation4], 1 }

</bundles_post_ra>
